<compile_context>
chip_gen: v7x
topology: tpu7x:2x2x1
jax: 0.10.0
libtpu: 0.0.40
codegen_flags: <defaults>
</compile_context>

<pallas_src>
import functools

import numpy as np

import jax
import jax.numpy as jnp
from jax.experimental import pallas as pl
from jax.experimental.pallas import tpu as pltpu

EPS = 1e-5  # nn.BatchNorm2d default eps


# ---------------------------------------------------------------------------
# In-kernel helpers (operate on traced values inside the single fused kernel).
# Activations use a flattened channels-last layout: (H * W_cur, C).
# ---------------------------------------------------------------------------
def _row_shift(x, delta, width):
    """x: (R*width, C) flattened rows.  y[r*width+u] = x[r*width+u+delta]
    when 0 <= u+delta < width, else 0 (per-row zero padding)."""
    m, c = x.shape
    r = m // width
    if width == 1:
        return jnp.zeros_like(x)
    zrow = jnp.zeros((1, c), x.dtype)
    pieces = []
    # TODO(synk): for very tall inputs (large H) switch to an iota-mask shift
    # to keep the concat operand count bounded.
    for i in range(r):
        row = x[i * width:(i + 1) * width, :]
        if delta == 1:
            pieces.append(row[1:, :])
            pieces.append(zrow)
        else:
            pieces.append(zrow)
            pieces.append(row[:-1, :])
    return jnp.concatenate(pieces, axis=0)


def _vshift(x, delta, width):
    """Shift by one whole row of `width` (vertical neighbour), zero fill."""
    m, c = x.shape
    if m <= width:
        return jnp.zeros_like(x)
    z = jnp.zeros((width, c), x.dtype)
    if delta == 1:                                   # y[j] = x[j + width]
        return jnp.concatenate([x[width:, :], z], axis=0)
    return jnp.concatenate([z, x[:m - width, :]], axis=0)   # y[j] = x[j - width]


def _conv1x3(x, w, shift, width, cin):
    """Conv2d(cin, cout, (1,3), padding=(0,1)) + folded BN + ReLU (MXU)."""
    xl = _row_shift(x, -1, width)
    xr = _row_shift(x, +1, width)
    acc = jnp.dot(xl, w[0 * cin:1 * cin, :], preferred_element_type=jnp.float32)
    acc = acc + jnp.dot(x, w[1 * cin:2 * cin, :], preferred_element_type=jnp.float32)
    acc = acc + jnp.dot(xr, w[2 * cin:3 * cin, :], preferred_element_type=jnp.float32)
    return jnp.maximum(acc + shift, 0.0)


def _conv1x3_cin1(x, w, shift, width):
    """conv1 (Cin == 1): pure VPU broadcast multiply-add, no MXU."""
    xl = _row_shift(x, -1, width)
    xr = _row_shift(x, +1, width)
    acc = xl * w[0:1, :] + x * w[1:2, :] + xr * w[2:3, :]
    return jnp.maximum(acc + shift, 0.0)


def _maxpool_w(x, pool, width, pbuf):
    """MaxPool2d((1, pool)), floor mode, fused via VMEM staging + strided reads."""
    m, c = x.shape
    r = m // width
    wo = width // pool
    wt = wo * pool
    if wt != width:
        # Drop the per-row floor remainder by repacking rows contiguously.
        for i in range(r):
            pbuf[pl.ds(i * wt, wt), pl.ds(0, c)] = x[i * width:i * width + wt, :]
    else:
        pbuf[pl.ds(0, m), pl.ds(0, c)] = x
    mo = r * wo
    y = pbuf[pl.ds(0, mo, pool), pl.ds(0, c)]
    for p in range(1, pool):
        y = jnp.maximum(y, pbuf[pl.ds(p, mo, pool), pl.ds(0, c)])
    return y, wo


def _deconv1x3_s2(x, w, sel, shift, width, cin):
    """ConvTranspose2d(cin, cout, (1,3), stride=(1,2), padding=(0,1)) + BN + ReLU.

    Even/odd output-phase decomposition (no zero-dilated input):
        out[2u]   = x[u]   @ W[:, :, 1]
        out[2u+1] = x[u]   @ W[:, :, 2] + x[u+1] @ W[:, :, 0]
    `sel` is a constant 0/1 matrix interleaving the two phases row-wise.
    """
    xn = _row_shift(x, +1, width)    # x[u+1]; the row-final odd entry is unused
    even = jnp.dot(x, w[1 * cin:2 * cin, :], preferred_element_type=jnp.float32)
    odd = (jnp.dot(x, w[2 * cin:3 * cin, :], preferred_element_type=jnp.float32)
           + jnp.dot(xn, w[0 * cin:1 * cin, :], preferred_element_type=jnp.float32))
    y = jnp.dot(sel, jnp.concatenate([even, odd], axis=0),
                preferred_element_type=jnp.float32)
    return jnp.maximum(y + shift, 0.0), 2 * width - 1


def _conv3x3_cout1(x, w9, bias, width):
    """conv5: Conv2d(4, 1, 3, padding=1) -- Cout == 1, so VPU + lane reduce."""
    vs = (_vshift(x, -1, width), x, _vshift(x, +1, width))
    acc = None
    for kh in range(3):
        base = vs[kh]
        hs = (_row_shift(base, -1, width), base, _row_shift(base, +1, width))
        for kw in range(3):
            term = hs[kw] * w9[3 * kh + kw:3 * kh + kw + 1, :]
            acc = term if acc is None else acc + term
    return jnp.sum(acc, axis=1, keepdims=True) + bias


# ---------------------------------------------------------------------------
# The fused kernel: one grid step == one batch sample, all layers in VMEM.
# ---------------------------------------------------------------------------
def _net_kernel(*refs, W):
    x_ref = refs[0]
    (w1, b1, w2, b2, w3, b3, w4, b4,
     dw1, sl1, c1, dw2, sl2, c2, dw3, sl3, c3,
     dw4, sl4, c4, dw5, sl5, c5, w9, b5) = refs[1:26]
    o_ref = refs[26]
    pbuf = refs[27]

    x = x_ref[0]                                        # (H*W, 1) f32
    h = _conv1x3_cin1(x, w1[...], b1[...], W)           # (H*W, 8)
    h, w_cur = _maxpool_w(h, 3, W, pbuf)
    h = _conv1x3(h, w2[...], b2[...], w_cur, 8)
    h, w_cur = _maxpool_w(h, 3, w_cur, pbuf)
    h = _conv1x3(h, w3[...], b3[...], w_cur, 32)
    h, w_cur = _maxpool_w(h, 5, w_cur, pbuf)
    h = _conv1x3(h, w4[...], b4[...], w_cur, 64)        # (H*W3, 128)
    h, w_cur = _deconv1x3_s2(h, dw1[...], sl1[...], c1[...], w_cur, 128)
    h, w_cur = _deconv1x3_s2(h, dw2[...], sl2[...], c2[...], w_cur, 64)
    h, w_cur = _deconv1x3_s2(h, dw3[...], sl3[...], c3[...], w_cur, 32)
    h, w_cur = _deconv1x3_s2(h, dw4[...], sl4[...], c4[...], w_cur, 16)
    h, w_cur = _deconv1x3_s2(h, dw5[...], sl5[...], c5[...], w_cur, 8)
    y = _conv3x3_cout1(h, w9[...], b5[...], w_cur)      # (H*Wf, 1)
    o_ref[0] = y


# ---------------------------------------------------------------------------
# Parameter folding / packing (tiny, one-time JAX glue in the wrapper).
# ---------------------------------------------------------------------------
def _fold_bn(bias, bn):
    gamma, beta, mean, var = bn
    scale = gamma * jax.lax.rsqrt(var + EPS)
    shift = beta + (bias - mean) * scale
    return scale, shift.reshape(1, -1).astype(jnp.float32)


def _pack_conv_w(w, scale):
    # torch (Cout, Cin, 1, 3) -> (3*Cin, Cout), tap-major rows, BN scale folded in.
    cout, cin = w.shape[0], w.shape[1]
    m = jnp.transpose(w[:, :, 0, :], (2, 1, 0)).reshape(3 * cin, cout)
    return (m * scale.reshape(1, cout)).astype(jnp.float32)


def _pack_deconv_w(w, scale):
    # torch (Cin, Cout, 1, 3) -> (3*Cin, Cout), tap-major rows, BN scale folded in.
    cin, cout = w.shape[0], w.shape[1]
    m = jnp.transpose(w[:, :, 0, :], (2, 0, 1)).reshape(3 * cin, cout)
    return (m * scale.reshape(1, cout)).astype(jnp.float32)


def _interleave_matrix(rows, win):
    # Constant 0/1 matrix interleaving even/odd deconv phases row-wise.
    m = rows * win
    wo = 2 * win - 1
    s = np.zeros((rows * wo, 2 * m), np.float32)
    for r in range(rows):
        for u in range(win):
            s[r * wo + 2 * u, r * win + u] = 1.0
        for u in range(win - 1):
            s[r * wo + 2 * u + 1, m + r * win + u] = 1.0
    return jnp.asarray(s)


# ---------------------------------------------------------------------------
# Forward pass wrapper.
# ---------------------------------------------------------------------------
def net_forward(params, x):
    """x: (N, H, W) float32 (the PyTorch forward does the unsqueeze(1) itself).
    Returns (N, 1, H, W_out) to match the PyTorch module (NCHW)."""
    N, H, W = x.shape
    w3p = ((W // 3) // 3) // 5
    assert w3p >= 1, "input width too small for the three pooling stages"
    wd = [w3p]
    for _ in range(5):
        wd.append(2 * wd[-1] - 1)
    wf = wd[-1]

    s1, t1 = _fold_bn(params["conv1_b"], params["bn1"])
    s2, t2 = _fold_bn(params["conv2_b"], params["bn2"])
    s3, t3 = _fold_bn(params["conv3_b"], params["bn3"])
    s4, t4 = _fold_bn(params["conv4_b"], params["bn4"])
    cs1, ct1 = _fold_bn(params["deconv1_b"], params["cbn1"])
    cs2, ct2 = _fold_bn(params["deconv2_b"], params["cbn2"])
    cs3, ct3 = _fold_bn(params["deconv3_b"], params["cbn3"])
    cs4, ct4 = _fold_bn(params["deconv4_b"], params["cbn4"])
    cs5, ct5 = _fold_bn(params["deconv5_b"], params["cbn5"])

    w9 = jnp.transpose(params["conv5_w"][0], (1, 2, 0)).reshape(9, 4).astype(jnp.float32)
    b5 = params["conv5_b"].reshape(1, 1).astype(jnp.float32)

    param_args = [
        _pack_conv_w(params["conv1_w"], s1), t1,
        _pack_conv_w(params["conv2_w"], s2), t2,
        _pack_conv_w(params["conv3_w"], s3), t3,
        _pack_conv_w(params["conv4_w"], s4), t4,
        _pack_deconv_w(params["deconv1_w"], cs1), _interleave_matrix(H, wd[0]), ct1,
        _pack_deconv_w(params["deconv2_w"], cs2), _interleave_matrix(H, wd[1]), ct2,
        _pack_deconv_w(params["deconv3_w"], cs3), _interleave_matrix(H, wd[2]), ct3,
        _pack_deconv_w(params["deconv4_w"], cs4), _interleave_matrix(H, wd[3]), ct4,
        _pack_deconv_w(params["deconv5_w"], cs5), _interleave_matrix(H, wd[4]), ct5,
        w9, b5,
    ]

    x2 = x.reshape(N, H * W, 1).astype(jnp.float32)

    in_specs = [pl.BlockSpec((1, H * W, 1), lambda n: (n, 0, 0))]
    in_specs += [pl.BlockSpec(a.shape, lambda n: (0, 0)) for a in param_args]

    out = pl.pallas_call(
        functools.partial(_net_kernel, W=W),
        out_shape=jax.ShapeDtypeStruct((N, H * wf, 1), jnp.float32),
        grid=(N,),
        in_specs=in_specs,
        out_specs=pl.BlockSpec((1, H * wf, 1), lambda n: (n, 0, 0)),
        scratch_shapes=[pltpu.VMEM((H * W, 64), jnp.float32)],
        compiler_params=pltpu.CompilerParams(
            dimension_semantics=("parallel",)),
    )(x2, *param_args)

    return out.reshape(N, H, wf)[:, None, :, :]          # NCHW: (N, 1, H, Wf)


# ---------------------------------------------------------------------------
# Deterministic synthetic parameters (same structure as the PyTorch module).
# ---------------------------------------------------------------------------
def init_params(key):
    keys = iter(jax.random.split(key, 64))

    def nrm(shape, s=0.1):
        return s * jax.random.normal(next(keys), shape, jnp.float32)

    p = {}

    def conv(name, cout, cin, kh, kw):
        p[name + "_w"] = nrm((cout, cin, kh, kw))
        p[name + "_b"] = nrm((cout,))

    def deconv(name, cin, cout, kh, kw):
        p[name + "_w"] = nrm((cin, cout, kh, kw))
        p[name + "_b"] = nrm((cout,))

    def bn(name, c):
        p[name] = (1.0 + nrm((c,)),                                   # gamma
                   nrm((c,)),                                          # beta
                   nrm((c,)),                                          # running mean
                   1.0 + 0.1 * jax.random.uniform(next(keys), (c,)))   # running var

    conv("conv1", 8, 1, 1, 3)
    conv("conv2", 32, 8, 1, 3)
    conv("conv3", 64, 32, 1, 3)
    conv("conv4", 128, 64, 1, 3)
    conv("conv5", 1, 4, 3, 3)
    bn("bn1", 8); bn("bn2", 32); bn("bn3", 64); bn("bn4", 128)
    bn("cbn1", 64); bn("cbn2", 32); bn("cbn3", 16); bn("cbn4", 8); bn("cbn5", 4)
    deconv("deconv1", 128, 64, 1, 3)
    deconv("deconv2", 64, 32, 1, 3)
    deconv("deconv3", 32, 16, 1, 3)
    deconv("deconv4", 16, 8, 1, 3)
    deconv("deconv5", 8, 4, 1, 3)
    return p


if __name__ == "__main__":
    key = jax.random.PRNGKey(0)
    kp, kx = jax.random.split(key)
    params = init_params(kp)
    # Small shapes consistent with the module: W must survive the /3, /3, /5 pools.
    x = jax.random.normal(kx, (2, 4, 90), jnp.float32)            # (N, H, W)
    out = jax.jit(net_forward)(params, x)
    out = jax.block_until_ready(out)
    assert out.shape == (2, 1, 4, 33), out.shape
    assert bool(jnp.all(jnp.isfinite(out)))
    print("KERNEL_OK")
</pallas_src>

<mosaic_0001>
module attributes {stable_mosaic.version = 11 : i64} {
  func.func @_net_kernel(%arg0: i32, %arg1: memref<1x360x1xf32, #tpu.memory_space<vmem>>, %arg2: memref<3x8xf32, #tpu.memory_space<vmem>>, %arg3: memref<1x8xf32, #tpu.memory_space<vmem>>, %arg4: memref<24x32xf32, #tpu.memory_space<vmem>>, %arg5: memref<1x32xf32, #tpu.memory_space<vmem>>, %arg6: memref<96x64xf32, #tpu.memory_space<vmem>>, %arg7: memref<1x64xf32, #tpu.memory_space<vmem>>, %arg8: memref<192x128xf32, #tpu.memory_space<vmem>>, %arg9: memref<1x128xf32, #tpu.memory_space<vmem>>, %arg10: memref<384x64xf32, #tpu.memory_space<vmem>>, %arg11: memref<12x16xf32, #tpu.memory_space<vmem>>, %arg12: memref<1x64xf32, #tpu.memory_space<vmem>>, %arg13: memref<192x32xf32, #tpu.memory_space<vmem>>, %arg14: memref<20x24xf32, #tpu.memory_space<vmem>>, %arg15: memref<1x32xf32, #tpu.memory_space<vmem>>, %arg16: memref<96x16xf32, #tpu.memory_space<vmem>>, %arg17: memref<36x40xf32, #tpu.memory_space<vmem>>, %arg18: memref<1x16xf32, #tpu.memory_space<vmem>>, %arg19: memref<48x8xf32, #tpu.memory_space<vmem>>, %arg20: memref<68x72xf32, #tpu.memory_space<vmem>>, %arg21: memref<1x8xf32, #tpu.memory_space<vmem>>, %arg22: memref<24x4xf32, #tpu.memory_space<vmem>>, %arg23: memref<132x136xf32, #tpu.memory_space<vmem>>, %arg24: memref<1x4xf32, #tpu.memory_space<vmem>>, %arg25: memref<9x4xf32, #tpu.memory_space<vmem>>, %arg26: memref<1x1xf32, #tpu.memory_space<vmem>>, %arg27: memref<1x132x1xf32, #tpu.memory_space<vmem>>, %arg28: memref<360x64xf32, #tpu.memory_space<vmem>>) attributes {dimension_semantics = [#tpu.dimension_semantics<parallel>], iteration_bounds = array<i64: 2>, scalar_prefetch = 0 : i64, scratch_operands = 1 : i64, tpu.core_type = #tpu.core_type<tc>, window_params = [{transform_indices = @transform_0, window_bounds = array<i64: 1, 360, 1>}, {pipeline_mode = #tpu.pipeline_mode<synchronous>, transform_indices = @transform_1, window_bounds = array<i64: 3, 8>}, {pipeline_mode = #tpu.pipeline_mode<synchronous>, transform_indices = @transform_2, window_bounds = array<i64: 1, 8>}, {pipeline_mode = #tpu.pipeline_mode<synchronous>, transform_indices = @transform_3, window_bounds = array<i64: 24, 32>}, {pipeline_mode = #tpu.pipeline_mode<synchronous>, transform_indices = @transform_4, window_bounds = array<i64: 1, 32>}, {pipeline_mode = #tpu.pipeline_mode<synchronous>, transform_indices = @transform_5, window_bounds = array<i64: 96, 64>}, {pipeline_mode = #tpu.pipeline_mode<synchronous>, transform_indices = @transform_6, window_bounds = array<i64: 1, 64>}, {pipeline_mode = #tpu.pipeline_mode<synchronous>, transform_indices = @transform_7, window_bounds = array<i64: 192, 128>}, {pipeline_mode = #tpu.pipeline_mode<synchronous>, transform_indices = @transform_8, window_bounds = array<i64: 1, 128>}, {pipeline_mode = #tpu.pipeline_mode<synchronous>, transform_indices = @transform_9, window_bounds = array<i64: 384, 64>}, {pipeline_mode = #tpu.pipeline_mode<synchronous>, transform_indices = @transform_10, window_bounds = array<i64: 12, 16>}, {pipeline_mode = #tpu.pipeline_mode<synchronous>, transform_indices = @transform_11, window_bounds = array<i64: 1, 64>}, {pipeline_mode = #tpu.pipeline_mode<synchronous>, transform_indices = @transform_12, window_bounds = array<i64: 192, 32>}, {pipeline_mode = #tpu.pipeline_mode<synchronous>, transform_indices = @transform_13, window_bounds = array<i64: 20, 24>}, {pipeline_mode = #tpu.pipeline_mode<synchronous>, transform_indices = @transform_14, window_bounds = array<i64: 1, 32>}, {pipeline_mode = #tpu.pipeline_mode<synchronous>, transform_indices = @transform_15, window_bounds = array<i64: 96, 16>}, {pipeline_mode = #tpu.pipeline_mode<synchronous>, transform_indices = @transform_16, window_bounds = array<i64: 36, 40>}, {pipeline_mode = #tpu.pipeline_mode<synchronous>, transform_indices = @transform_17, window_bounds = array<i64: 1, 16>}, {pipeline_mode = #tpu.pipeline_mode<synchronous>, transform_indices = @transform_18, window_bounds = array<i64: 48, 8>}, {pipeline_mode = #tpu.pipeline_mode<synchronous>, transform_indices = @transform_19, window_bounds = array<i64: 68, 72>}, {pipeline_mode = #tpu.pipeline_mode<synchronous>, transform_indices = @transform_20, window_bounds = array<i64: 1, 8>}, {pipeline_mode = #tpu.pipeline_mode<synchronous>, transform_indices = @transform_21, window_bounds = array<i64: 24, 4>}, {pipeline_mode = #tpu.pipeline_mode<synchronous>, transform_indices = @transform_22, window_bounds = array<i64: 132, 136>}, {pipeline_mode = #tpu.pipeline_mode<synchronous>, transform_indices = @transform_23, window_bounds = array<i64: 1, 4>}, {pipeline_mode = #tpu.pipeline_mode<synchronous>, transform_indices = @transform_24, window_bounds = array<i64: 9, 4>}, {pipeline_mode = #tpu.pipeline_mode<synchronous>, transform_indices = @transform_25, window_bounds = array<i64: 1, 1>}, {transform_indices = @transform_26, window_bounds = array<i64: 1, 132, 1>}]} {
    %c0 = arith.constant 0 : index
    %c0_0 = arith.constant 0 : index
    %c0_1 = arith.constant 0 : index
    %0 = vector.load %arg1[%c0, %c0_0, %c0_1] : memref<1x360x1xf32, #tpu.memory_space<vmem>>, vector<1x360x1xf32>
    %1 = vector.shape_cast %0 : vector<1x360x1xf32> to vector<360x1xf32>
    %c0_2 = arith.constant 0 : index
    %c0_3 = arith.constant 0 : index
    %2 = vector.load %arg2[%c0_2, %c0_3] : memref<3x8xf32, #tpu.memory_space<vmem>>, vector<3x8xf32>
    %c0_4 = arith.constant 0 : index
    %c0_5 = arith.constant 0 : index
    %3 = vector.load %arg3[%c0_4, %c0_5] : memref<1x8xf32, #tpu.memory_space<vmem>>, vector<1x8xf32>
    %cst = arith.constant 0.000000e+00 : f32
    %4 = vector.broadcast %cst : f32 to vector<1x1xf32>
    %5 = vector.extract_strided_slice %1 {offsets = [0, 0], sizes = [90, 1], strides = [1, 1]} : vector<360x1xf32> to vector<90x1xf32>
    %6 = vector.extract_strided_slice %5 {offsets = [0, 0], sizes = [89, 1], strides = [1, 1]} : vector<90x1xf32> to vector<89x1xf32>
    %7 = vector.extract_strided_slice %1 {offsets = [90, 0], sizes = [90, 1], strides = [1, 1]} : vector<360x1xf32> to vector<90x1xf32>
    %8 = vector.extract_strided_slice %7 {offsets = [0, 0], sizes = [89, 1], strides = [1, 1]} : vector<90x1xf32> to vector<89x1xf32>
    %9 = vector.extract_strided_slice %1 {offsets = [180, 0], sizes = [90, 1], strides = [1, 1]} : vector<360x1xf32> to vector<90x1xf32>
    %10 = vector.extract_strided_slice %9 {offsets = [0, 0], sizes = [89, 1], strides = [1, 1]} : vector<90x1xf32> to vector<89x1xf32>
    %11 = vector.extract_strided_slice %1 {offsets = [270, 0], sizes = [90, 1], strides = [1, 1]} : vector<360x1xf32> to vector<90x1xf32>
    %12 = vector.extract_strided_slice %11 {offsets = [0, 0], sizes = [89, 1], strides = [1, 1]} : vector<90x1xf32> to vector<89x1xf32>
    %13 = tpu.concatenate %4, %6, %4, %8, %4, %10, %4, %12 in 0 : vector<1x1xf32>, vector<89x1xf32>, vector<1x1xf32>, vector<89x1xf32>, vector<1x1xf32>, vector<89x1xf32>, vector<1x1xf32>, vector<89x1xf32> -> vector<360x1xf32>
    %cst_6 = arith.constant 0.000000e+00 : f32
    %14 = vector.broadcast %cst_6 : f32 to vector<1x1xf32>
    %15 = vector.extract_strided_slice %1 {offsets = [0, 0], sizes = [90, 1], strides = [1, 1]} : vector<360x1xf32> to vector<90x1xf32>
    %16 = vector.extract_strided_slice %15 {offsets = [1, 0], sizes = [89, 1], strides = [1, 1]} : vector<90x1xf32> to vector<89x1xf32>
    %17 = vector.extract_strided_slice %1 {offsets = [90, 0], sizes = [90, 1], strides = [1, 1]} : vector<360x1xf32> to vector<90x1xf32>
    %18 = vector.extract_strided_slice %17 {offsets = [1, 0], sizes = [89, 1], strides = [1, 1]} : vector<90x1xf32> to vector<89x1xf32>
    %19 = vector.extract_strided_slice %1 {offsets = [180, 0], sizes = [90, 1], strides = [1, 1]} : vector<360x1xf32> to vector<90x1xf32>
    %20 = vector.extract_strided_slice %19 {offsets = [1, 0], sizes = [89, 1], strides = [1, 1]} : vector<90x1xf32> to vector<89x1xf32>
    %21 = vector.extract_strided_slice %1 {offsets = [270, 0], sizes = [90, 1], strides = [1, 1]} : vector<360x1xf32> to vector<90x1xf32>
    %22 = vector.extract_strided_slice %21 {offsets = [1, 0], sizes = [89, 1], strides = [1, 1]} : vector<90x1xf32> to vector<89x1xf32>
    %23 = tpu.concatenate %16, %14, %18, %14, %20, %14, %22, %14 in 0 : vector<89x1xf32>, vector<1x1xf32>, vector<89x1xf32>, vector<1x1xf32>, vector<89x1xf32>, vector<1x1xf32>, vector<89x1xf32>, vector<1x1xf32> -> vector<360x1xf32>
    %24 = vector.extract_strided_slice %2 {offsets = [0, 0], sizes = [1, 8], strides = [1, 1]} : vector<3x8xf32> to vector<1x8xf32>
    %25 = vector.broadcast %13 : vector<360x1xf32> to vector<360x8xf32>
    %26 = vector.broadcast %24 : vector<1x8xf32> to vector<360x8xf32>
    %27 = arith.mulf %25, %26 : vector<360x8xf32>
    %28 = vector.extract_strided_slice %2 {offsets = [1, 0], sizes = [1, 8], strides = [1, 1]} : vector<3x8xf32> to vector<1x8xf32>
    %29 = vector.broadcast %1 : vector<360x1xf32> to vector<360x8xf32>
    %30 = vector.broadcast %28 : vector<1x8xf32> to vector<360x8xf32>
    %31 = arith.mulf %29, %30 : vector<360x8xf32>
    %32 = arith.addf %27, %31 : vector<360x8xf32>
    %33 = vector.extract_strided_slice %2 {offsets = [2, 0], sizes = [1, 8], strides = [1, 1]} : vector<3x8xf32> to vector<1x8xf32>
    %34 = vector.broadcast %23 : vector<360x1xf32> to vector<360x8xf32>
    %35 = vector.broadcast %33 : vector<1x8xf32> to vector<360x8xf32>
    %36 = arith.mulf %34, %35 : vector<360x8xf32>
    %37 = arith.addf %32, %36 : vector<360x8xf32>
    %38 = vector.broadcast %3 : vector<1x8xf32> to vector<360x8xf32>
    %39 = arith.addf %37, %38 : vector<360x8xf32>
    %cst_7 = arith.constant 0.000000e+00 : f32
    %40 = vector.broadcast %cst_7 : f32 to vector<360x8xf32>
    %41 = arith.maximumf %39, %40 : vector<360x8xf32>
    %c0_8 = arith.constant 0 : index
    %c0_9 = arith.constant 0 : index
    %42 = vector.load %arg28[%c0_8, %c0_9] : memref<360x64xf32, #tpu.memory_space<vmem>>, vector<360x8xf32>
    tpu.vector_store %arg28[%c0_8, %c0_9], %41 {strides = array<i32>} : memref<360x64xf32, #tpu.memory_space<vmem>>, vector<360x8xf32>,
    %c0_10 = arith.constant 0 : index
    %c0_11 = arith.constant 0 : index
    %43 = tpu.strided_load %arg28[%c0_10, %c0_11] {strides = array<i32: 3, 1>} : memref<360x64xf32, #tpu.memory_space<vmem>>, vector<120x8xf32>
    %c1 = arith.constant 1 : index
    %c0_12 = arith.constant 0 : index
    %44 = tpu.strided_load %arg28[%c1, %c0_12] {strides = array<i32: 3, 1>} : memref<360x64xf32, #tpu.memory_space<vmem>>, vector<120x8xf32>
    %45 = arith.maximumf %43, %44 : vector<120x8xf32>
    %c2 = arith.constant 2 : index
    %c0_13 = arith.constant 0 : index
    %46 = tpu.strided_load %arg28[%c2, %c0_13] {strides = array<i32: 3, 1>} : memref<360x64xf32, #tpu.memory_space<vmem>>, vector<120x8xf32>
    %47 = arith.maximumf %45, %46 : vector<120x8xf32>
    %c0_14 = arith.constant 0 : index
    %c0_15 = arith.constant 0 : index
    %48 = vector.load %arg4[%c0_14, %c0_15] : memref<24x32xf32, #tpu.memory_space<vmem>>, vector<24x32xf32>
    %c0_16 = arith.constant 0 : index
    %c0_17 = arith.constant 0 : index
    %49 = vector.load %arg5[%c0_16, %c0_17] : memref<1x32xf32, #tpu.memory_space<vmem>>, vector<1x32xf32>
    %cst_18 = arith.constant 0.000000e+00 : f32
    %50 = vector.broadcast %cst_18 : f32 to vector<1x8xf32>
    %51 = vector.extract_strided_slice %47 {offsets = [0, 0], sizes = [30, 8], strides = [1, 1]} : vector<120x8xf32> to vector<30x8xf32>
    %52 = vector.extract_strided_slice %51 {offsets = [0, 0], sizes = [29, 8], strides = [1, 1]} : vector<30x8xf32> to vector<29x8xf32>
    %53 = vector.extract_strided_slice %47 {offsets = [30, 0], sizes = [30, 8], strides = [1, 1]} : vector<120x8xf32> to vector<30x8xf32>
    %54 = vector.extract_strided_slice %53 {offsets = [0, 0], sizes = [29, 8], strides = [1, 1]} : vector<30x8xf32> to vector<29x8xf32>
    %55 = vector.extract_strided_slice %47 {offsets = [60, 0], sizes = [30, 8], strides = [1, 1]} : vector<120x8xf32> to vector<30x8xf32>
    %56 = vector.extract_strided_slice %55 {offsets = [0, 0], sizes = [29, 8], strides = [1, 1]} : vector<30x8xf32> to vector<29x8xf32>
    %57 = vector.extract_strided_slice %47 {offsets = [90, 0], sizes = [30, 8], strides = [1, 1]} : vector<120x8xf32> to vector<30x8xf32>
    %58 = vector.extract_strided_slice %57 {offsets = [0, 0], sizes = [29, 8], strides = [1, 1]} : vector<30x8xf32> to vector<29x8xf32>
    %59 = tpu.concatenate %50, %52, %50, %54, %50, %56, %50, %58 in 0 : vector<1x8xf32>, vector<29x8xf32>, vector<1x8xf32>, vector<29x8xf32>, vector<1x8xf32>, vector<29x8xf32>, vector<1x8xf32>, vector<29x8xf32> -> vector<120x8xf32>
    %cst_19 = arith.constant 0.000000e+00 : f32
    %60 = vector.broadcast %cst_19 : f32 to vector<1x8xf32>
    %61 = vector.extract_strided_slice %47 {offsets = [0, 0], sizes = [30, 8], strides = [1, 1]} : vector<120x8xf32> to vector<30x8xf32>
    %62 = vector.extract_strided_slice %61 {offsets = [1, 0], sizes = [29, 8], strides = [1, 1]} : vector<30x8xf32> to vector<29x8xf32>
    %63 = vector.extract_strided_slice %47 {offsets = [30, 0], sizes = [30, 8], strides = [1, 1]} : vector<120x8xf32> to vector<30x8xf32>
    %64 = vector.extract_strided_slice %63 {offsets = [1, 0], sizes = [29, 8], strides = [1, 1]} : vector<30x8xf32> to vector<29x8xf32>
    %65 = vector.extract_strided_slice %47 {offsets = [60, 0], sizes = [30, 8], strides = [1, 1]} : vector<120x8xf32> to vector<30x8xf32>
    %66 = vector.extract_strided_slice %65 {offsets = [1, 0], sizes = [29, 8], strides = [1, 1]} : vector<30x8xf32> to vector<29x8xf32>
    %67 = vector.extract_strided_slice %47 {offsets = [90, 0], sizes = [30, 8], strides = [1, 1]} : vector<120x8xf32> to vector<30x8xf32>
    %68 = vector.extract_strided_slice %67 {offsets = [1, 0], sizes = [29, 8], strides = [1, 1]} : vector<30x8xf32> to vector<29x8xf32>
    %69 = tpu.concatenate %62, %60, %64, %60, %66, %60, %68, %60 in 0 : vector<29x8xf32>, vector<1x8xf32>, vector<29x8xf32>, vector<1x8xf32>, vector<29x8xf32>, vector<1x8xf32>, vector<29x8xf32>, vector<1x8xf32> -> vector<120x8xf32>
    %70 = vector.extract_strided_slice %48 {offsets = [0, 0], sizes = [8, 32], strides = [1, 1]} : vector<24x32xf32> to vector<8x32xf32>
    %cst_20 = arith.constant dense<0.000000e+00> : vector<120x32xf32>
    %71 = tpu.matmul %59, %70, %cst_20 {dimension_numbers = #tpu.dot_dimension_numbers<[1], [0], [0], [1], [0, 0, 1, 1], [], []>} : vector<120x8xf32>, vector<8x32xf32>, vector<120x32xf32> -> vector<120x32xf32>
    %72 = vector.extract_strided_slice %48 {offsets = [8, 0], sizes = [8, 32], strides = [1, 1]} : vector<24x32xf32> to vector<8x32xf32>
    %cst_21 = arith.constant dense<0.000000e+00> : vector<120x32xf32>
    %73 = tpu.matmul %47, %72, %cst_21 {dimension_numbers = #tpu.dot_dimension_numbers<[1], [0], [0], [1], [0, 0, 1, 1], [], []>} : vector<120x8xf32>, vector<8x32xf32>, vector<120x32xf32> -> vector<120x32xf32>
    %74 = arith.addf %71, %73 : vector<120x32xf32>
    %75 = vector.extract_strided_slice %48 {offsets = [16, 0], sizes = [8, 32], strides = [1, 1]} : vector<24x32xf32> to vector<8x32xf32>
    %cst_22 = arith.constant dense<0.000000e+00> : vector<120x32xf32>
    %76 = tpu.matmul %69, %75, %cst_22 {dimension_numbers = #tpu.dot_dimension_numbers<[1], [0], [0], [1], [0, 0, 1, 1], [], []>} : vector<120x8xf32>, vector<8x32xf32>, vector<120x32xf32> -> vector<120x32xf32>
    %77 = arith.addf %74, %76 : vector<120x32xf32>
    %78 = vector.broadcast %49 : vector<1x32xf32> to vector<120x32xf32>
    %79 = arith.addf %77, %78 : vector<120x32xf32>
    %cst_23 = arith.constant 0.000000e+00 : f32
    %80 = vector.broadcast %cst_23 : f32 to vector<120x32xf32>
    %81 = arith.maximumf %79, %80 : vector<120x32xf32>
    %c0_24 = arith.constant 0 : index
    %c0_25 = arith.constant 0 : index
    %82 = vector.load %arg28[%c0_24, %c0_25] : memref<360x64xf32, #tpu.memory_space<vmem>>, vector<120x32xf32>
    tpu.vector_store %arg28[%c0_24, %c0_25], %81 {strides = array<i32>} : memref<360x64xf32, #tpu.memory_space<vmem>>, vector<120x32xf32>,
    %c0_26 = arith.constant 0 : index
    %c0_27 = arith.constant 0 : index
    %83 = tpu.strided_load %arg28[%c0_26, %c0_27] {strides = array<i32: 3, 1>} : memref<360x64xf32, #tpu.memory_space<vmem>>, vector<40x32xf32>
    %c1_28 = arith.constant 1 : index
    %c0_29 = arith.constant 0 : index
    %84 = tpu.strided_load %arg28[%c1_28, %c0_29] {strides = array<i32: 3, 1>} : memref<360x64xf32, #tpu.memory_space<vmem>>, vector<40x32xf32>
    %85 = arith.maximumf %83, %84 : vector<40x32xf32>
    %c2_30 = arith.constant 2 : index
    %c0_31 = arith.constant 0 : index
    %86 = tpu.strided_load %arg28[%c2_30, %c0_31] {strides = array<i32: 3, 1>} : memref<360x64xf32, #tpu.memory_space<vmem>>, vector<40x32xf32>
    %87 = arith.maximumf %85, %86 : vector<40x32xf32>
    %c0_32 = arith.constant 0 : index
    %c0_33 = arith.constant 0 : index
    %88 = vector.load %arg6[%c0_32, %c0_33] : memref<96x64xf32, #tpu.memory_space<vmem>>, vector<96x64xf32>
    %c0_34 = arith.constant 0 : index
    %c0_35 = arith.constant 0 : index
    %89 = vector.load %arg7[%c0_34, %c0_35] : memref<1x64xf32, #tpu.memory_space<vmem>>, vector<1x64xf32>
    %cst_36 = arith.constant 0.000000e+00 : f32
    %90 = vector.broadcast %cst_36 : f32 to vector<1x32xf32>
    %91 = vector.extract_strided_slice %87 {offsets = [0, 0], sizes = [10, 32], strides = [1, 1]} : vector<40x32xf32> to vector<10x32xf32>
    %92 = vector.extract_strided_slice %91 {offsets = [0, 0], sizes = [9, 32], strides = [1, 1]} : vector<10x32xf32> to vector<9x32xf32>
    %93 = vector.extract_strided_slice %87 {offsets = [10, 0], sizes = [10, 32], strides = [1, 1]} : vector<40x32xf32> to vector<10x32xf32>
    %94 = vector.extract_strided_slice %93 {offsets = [0, 0], sizes = [9, 32], strides = [1, 1]} : vector<10x32xf32> to vector<9x32xf32>
    %95 = vector.extract_strided_slice %87 {offsets = [20, 0], sizes = [10, 32], strides = [1, 1]} : vector<40x32xf32> to vector<10x32xf32>
    %96 = vector.extract_strided_slice %95 {offsets = [0, 0], sizes = [9, 32], strides = [1, 1]} : vector<10x32xf32> to vector<9x32xf32>
    %97 = vector.extract_strided_slice %87 {offsets = [30, 0], sizes = [10, 32], strides = [1, 1]} : vector<40x32xf32> to vector<10x32xf32>
    %98 = vector.extract_strided_slice %97 {offsets = [0, 0], sizes = [9, 32], strides = [1, 1]} : vector<10x32xf32> to vector<9x32xf32>
    %99 = tpu.concatenate %90, %92, %90, %94, %90, %96, %90, %98 in 0 : vector<1x32xf32>, vector<9x32xf32>, vector<1x32xf32>, vector<9x32xf32>, vector<1x32xf32>, vector<9x32xf32>, vector<1x32xf32>, vector<9x32xf32> -> vector<40x32xf32>
    %cst_37 = arith.constant 0.000000e+00 : f32
    %100 = vector.broadcast %cst_37 : f32 to vector<1x32xf32>
    %101 = vector.extract_strided_slice %87 {offsets = [0, 0], sizes = [10, 32], strides = [1, 1]} : vector<40x32xf32> to vector<10x32xf32>
    %102 = vector.extract_strided_slice %101 {offsets = [1, 0], sizes = [9, 32], strides = [1, 1]} : vector<10x32xf32> to vector<9x32xf32>
    %103 = vector.extract_strided_slice %87 {offsets = [10, 0], sizes = [10, 32], strides = [1, 1]} : vector<40x32xf32> to vector<10x32xf32>
    %104 = vector.extract_strided_slice %103 {offsets = [1, 0], sizes = [9, 32], strides = [1, 1]} : vector<10x32xf32> to vector<9x32xf32>
    %105 = vector.extract_strided_slice %87 {offsets = [20, 0], sizes = [10, 32], strides = [1, 1]} : vector<40x32xf32> to vector<10x32xf32>
    %106 = vector.extract_strided_slice %105 {offsets = [1, 0], sizes = [9, 32], strides = [1, 1]} : vector<10x32xf32> to vector<9x32xf32>
    %107 = vector.extract_strided_slice %87 {offsets = [30, 0], sizes = [10, 32], strides = [1, 1]} : vector<40x32xf32> to vector<10x32xf32>
    %108 = vector.extract_strided_slice %107 {offsets = [1, 0], sizes = [9, 32], strides = [1, 1]} : vector<10x32xf32> to vector<9x32xf32>
    %109 = tpu.concatenate %102, %100, %104, %100, %106, %100, %108, %100 in 0 : vector<9x32xf32>, vector<1x32xf32>, vector<9x32xf32>, vector<1x32xf32>, vector<9x32xf32>, vector<1x32xf32>, vector<9x32xf32>, vector<1x32xf32> -> vector<40x32xf32>
    %110 = vector.extract_strided_slice %88 {offsets = [0, 0], sizes = [32, 64], strides = [1, 1]} : vector<96x64xf32> to vector<32x64xf32>
    %cst_38 = arith.constant dense<0.000000e+00> : vector<40x64xf32>
    %111 = tpu.matmul %99, %110, %cst_38 {dimension_numbers = #tpu.dot_dimension_numbers<[1], [0], [0], [1], [0, 0, 1, 1], [], []>} : vector<40x32xf32>, vector<32x64xf32>, vector<40x64xf32> -> vector<40x64xf32>
    %112 = vector.extract_strided_slice %88 {offsets = [32, 0], sizes = [32, 64], strides = [1, 1]} : vector<96x64xf32> to vector<32x64xf32>
    %cst_39 = arith.constant dense<0.000000e+00> : vector<40x64xf32>
    %113 = tpu.matmul %87, %112, %cst_39 {dimension_numbers = #tpu.dot_dimension_numbers<[1], [0], [0], [1], [0, 0, 1, 1], [], []>} : vector<40x32xf32>, vector<32x64xf32>, vector<40x64xf32> -> vector<40x64xf32>
    %114 = arith.addf %111, %113 : vector<40x64xf32>
    %115 = vector.extract_strided_slice %88 {offsets = [64, 0], sizes = [32, 64], strides = [1, 1]} : vector<96x64xf32> to vector<32x64xf32>
    %cst_40 = arith.constant dense<0.000000e+00> : vector<40x64xf32>
    %116 = tpu.matmul %109, %115, %cst_40 {dimension_numbers = #tpu.dot_dimension_numbers<[1], [0], [0], [1], [0, 0, 1, 1], [], []>} : vector<40x32xf32>, vector<32x64xf32>, vector<40x64xf32> -> vector<40x64xf32>
    %117 = arith.addf %114, %116 : vector<40x64xf32>
    %118 = vector.broadcast %89 : vector<1x64xf32> to vector<40x64xf32>
    %119 = arith.addf %117, %118 : vector<40x64xf32>
    %cst_41 = arith.constant 0.000000e+00 : f32
    %120 = vector.broadcast %cst_41 : f32 to vector<40x64xf32>
    %121 = arith.maximumf %119, %120 : vector<40x64xf32>
    %c0_42 = arith.constant 0 : index
    %c0_43 = arith.constant 0 : index
    %122 = vector.load %arg28[%c0_42, %c0_43] : memref<360x64xf32, #tpu.memory_space<vmem>>, vector<40x64xf32>
    tpu.vector_store %arg28[%c0_42, %c0_43], %121 {strides = array<i32>} : memref<360x64xf32, #tpu.memory_space<vmem>>, vector<40x64xf32>,
    %c0_44 = arith.constant 0 : index
    %c0_45 = arith.constant 0 : index
    %123 = tpu.strided_load %arg28[%c0_44, %c0_45] {strides = array<i32: 5, 1>} : memref<360x64xf32, #tpu.memory_space<vmem>>, vector<8x64xf32>
    %c1_46 = arith.constant 1 : index
    %c0_47 = arith.constant 0 : index
    %124 = tpu.strided_load %arg28[%c1_46, %c0_47] {strides = array<i32: 5, 1>} : memref<360x64xf32, #tpu.memory_space<vmem>>, vector<8x64xf32>
    %125 = arith.maximumf %123, %124 : vector<8x64xf32>
    %c2_48 = arith.constant 2 : index
    %c0_49 = arith.constant 0 : index
    %126 = tpu.strided_load %arg28[%c2_48, %c0_49] {strides = array<i32: 5, 1>} : memref<360x64xf32, #tpu.memory_space<vmem>>, vector<8x64xf32>
    %127 = arith.maximumf %125, %126 : vector<8x64xf32>
    %c3 = arith.constant 3 : index
    %c0_50 = arith.constant 0 : index
    %128 = tpu.strided_load %arg28[%c3, %c0_50] {strides = array<i32: 5, 1>} : memref<360x64xf32, #tpu.memory_space<vmem>>, vector<8x64xf32>
    %129 = arith.maximumf %127, %128 : vector<8x64xf32>
    %c4 = arith.constant 4 : index
    %c0_51 = arith.constant 0 : index
    %130 = tpu.strided_load %arg28[%c4, %c0_51] {strides = array<i32: 5, 1>} : memref<360x64xf32, #tpu.memory_space<vmem>>, vector<8x64xf32>
    %131 = arith.maximumf %129, %130 : vector<8x64xf32>
    %c0_52 = arith.constant 0 : index
    %c0_53 = arith.constant 0 : index
    %132 = vector.load %arg8[%c0_52, %c0_53] : memref<192x128xf32, #tpu.memory_space<vmem>>, vector<192x128xf32>
    %c0_54 = arith.constant 0 : index
    %c0_55 = arith.constant 0 : index
    %133 = vector.load %arg9[%c0_54, %c0_55] : memref<1x128xf32, #tpu.memory_space<vmem>>, vector<1x128xf32>
    %cst_56 = arith.constant 0.000000e+00 : f32
    %134 = vector.broadcast %cst_56 : f32 to vector<1x64xf32>
    %135 = vector.extract_strided_slice %131 {offsets = [0, 0], sizes = [2, 64], strides = [1, 1]} : vector<8x64xf32> to vector<2x64xf32>
    %136 = vector.extract_strided_slice %135 {offsets = [0, 0], sizes = [1, 64], strides = [1, 1]} : vector<2x64xf32> to vector<1x64xf32>
    %137 = vector.extract_strided_slice %131 {offsets = [2, 0], sizes = [2, 64], strides = [1, 1]} : vector<8x64xf32> to vector<2x64xf32>
    %138 = vector.extract_strided_slice %137 {offsets = [0, 0], sizes = [1, 64], strides = [1, 1]} : vector<2x64xf32> to vector<1x64xf32>
    %139 = vector.extract_strided_slice %131 {offsets = [4, 0], sizes = [2, 64], strides = [1, 1]} : vector<8x64xf32> to vector<2x64xf32>
    %140 = vector.extract_strided_slice %139 {offsets = [0, 0], sizes = [1, 64], strides = [1, 1]} : vector<2x64xf32> to vector<1x64xf32>
    %141 = vector.extract_strided_slice %131 {offsets = [6, 0], sizes = [2, 64], strides = [1, 1]} : vector<8x64xf32> to vector<2x64xf32>
    %142 = vector.extract_strided_slice %141 {offsets = [0, 0], sizes = [1, 64], strides = [1, 1]} : vector<2x64xf32> to vector<1x64xf32>
    %143 = tpu.concatenate %134, %136, %134, %138, %134, %140, %134, %142 in 0 : vector<1x64xf32>, vector<1x64xf32>, vector<1x64xf32>, vector<1x64xf32>, vector<1x64xf32>, vector<1x64xf32>, vector<1x64xf32>, vector<1x64xf32> -> vector<8x64xf32>
    %cst_57 = arith.constant 0.000000e+00 : f32
    %144 = vector.broadcast %cst_57 : f32 to vector<1x64xf32>
    %145 = vector.extract_strided_slice %131 {offsets = [0, 0], sizes = [2, 64], strides = [1, 1]} : vector<8x64xf32> to vector<2x64xf32>
    %146 = vector.extract_strided_slice %145 {offsets = [1, 0], sizes = [1, 64], strides = [1, 1]} : vector<2x64xf32> to vector<1x64xf32>
    %147 = vector.extract_strided_slice %131 {offsets = [2, 0], sizes = [2, 64], strides = [1, 1]} : vector<8x64xf32> to vector<2x64xf32>
    %148 = vector.extract_strided_slice %147 {offsets = [1, 0], sizes = [1, 64], strides = [1, 1]} : vector<2x64xf32> to vector<1x64xf32>
    %149 = vector.extract_strided_slice %131 {offsets = [4, 0], sizes = [2, 64], strides = [1, 1]} : vector<8x64xf32> to vector<2x64xf32>
    %150 = vector.extract_strided_slice %149 {offsets = [1, 0], sizes = [1, 64], strides = [1, 1]} : vector<2x64xf32> to vector<1x64xf32>
    %151 = vector.extract_strided_slice %131 {offsets = [6, 0], sizes = [2, 64], strides = [1, 1]} : vector<8x64xf32> to vector<2x64xf32>
    %152 = vector.extract_strided_slice %151 {offsets = [1, 0], sizes = [1, 64], strides = [1, 1]} : vector<2x64xf32> to vector<1x64xf32>
    %153 = tpu.concatenate %146, %144, %148, %144, %150, %144, %152, %144 in 0 : vector<1x64xf32>, vector<1x64xf32>, vector<1x64xf32>, vector<1x64xf32>, vector<1x64xf32>, vector<1x64xf32>, vector<1x64xf32>, vector<1x64xf32> -> vector<8x64xf32>
    %154 = vector.extract_strided_slice %132 {offsets = [0, 0], sizes = [64, 128], strides = [1, 1]} : vector<192x128xf32> to vector<64x128xf32>
    %cst_58 = arith.constant dense<0.000000e+00> : vector<8x128xf32>
    %155 = tpu.matmul %143, %154, %cst_58 {dimension_numbers = #tpu.dot_dimension_numbers<[1], [0], [0], [1], [0, 0, 1, 1], [], []>} : vector<8x64xf32>, vector<64x128xf32>, vector<8x128xf32> -> vector<8x128xf32>
    %156 = vector.extract_strided_slice %132 {offsets = [64, 0], sizes = [64, 128], strides = [1, 1]} : vector<192x128xf32> to vector<64x128xf32>
    %cst_59 = arith.constant dense<0.000000e+00> : vector<8x128xf32>
    %157 = tpu.matmul %131, %156, %cst_59 {dimension_numbers = #tpu.dot_dimension_numbers<[1], [0], [0], [1], [0, 0, 1, 1], [], []>} : vector<8x64xf32>, vector<64x128xf32>, vector<8x128xf32> -> vector<8x128xf32>
    %158 = arith.addf %155, %157 : vector<8x128xf32>
    %159 = vector.extract_strided_slice %132 {offsets = [128, 0], sizes = [64, 128], strides = [1, 1]} : vector<192x128xf32> to vector<64x128xf32>
    %cst_60 = arith.constant dense<0.000000e+00> : vector<8x128xf32>
    %160 = tpu.matmul %153, %159, %cst_60 {dimension_numbers = #tpu.dot_dimension_numbers<[1], [0], [0], [1], [0, 0, 1, 1], [], []>} : vector<8x64xf32>, vector<64x128xf32>, vector<8x128xf32> -> vector<8x128xf32>
    %161 = arith.addf %158, %160 : vector<8x128xf32>
    %162 = vector.broadcast %133 : vector<1x128xf32> to vector<8x128xf32>
    %163 = arith.addf %161, %162 : vector<8x128xf32>
    %cst_61 = arith.constant 0.000000e+00 : f32
    %164 = vector.broadcast %cst_61 : f32 to vector<8x128xf32>
    %165 = arith.maximumf %163, %164 : vector<8x128xf32>
    %c0_62 = arith.constant 0 : index
    %c0_63 = arith.constant 0 : index
    %166 = vector.load %arg10[%c0_62, %c0_63] : memref<384x64xf32, #tpu.memory_space<vmem>>, vector<384x64xf32>
    %c0_64 = arith.constant 0 : index
    %c0_65 = arith.constant 0 : index
    %167 = vector.load %arg11[%c0_64, %c0_65] : memref<12x16xf32, #tpu.memory_space<vmem>>, vector<12x16xf32>
    %c0_66 = arith.constant 0 : index
    %c0_67 = arith.constant 0 : index
    %168 = vector.load %arg12[%c0_66, %c0_67] : memref<1x64xf32, #tpu.memory_space<vmem>>, vector<1x64xf32>
    %cst_68 = arith.constant 0.000000e+00 : f32
    %169 = vector.broadcast %cst_68 : f32 to vector<1x128xf32>
    %170 = vector.extract_strided_slice %165 {offsets = [0, 0], sizes = [2, 128], strides = [1, 1]} : vector<8x128xf32> to vector<2x128xf32>
    %171 = vector.extract_strided_slice %170 {offsets = [1, 0], sizes = [1, 128], strides = [1, 1]} : vector<2x128xf32> to vector<1x128xf32>
    %172 = vector.extract_strided_slice %165 {offsets = [2, 0], sizes = [2, 128], strides = [1, 1]} : vector<8x128xf32> to vector<2x128xf32>
    %173 = vector.extract_strided_slice %172 {offsets = [1, 0], sizes = [1, 128], strides = [1, 1]} : vector<2x128xf32> to vector<1x128xf32>
    %174 = vector.extract_strided_slice %165 {offsets = [4, 0], sizes = [2, 128], strides = [1, 1]} : vector<8x128xf32> to vector<2x128xf32>
    %175 = vector.extract_strided_slice %174 {offsets = [1, 0], sizes = [1, 128], strides = [1, 1]} : vector<2x128xf32> to vector<1x128xf32>
    %176 = vector.extract_strided_slice %165 {offsets = [6, 0], sizes = [2, 128], strides = [1, 1]} : vector<8x128xf32> to vector<2x128xf32>
    %177 = vector.extract_strided_slice %176 {offsets = [1, 0], sizes = [1, 128], strides = [1, 1]} : vector<2x128xf32> to vector<1x128xf32>
    %178 = tpu.concatenate %171, %169, %173, %169, %175, %169, %177, %169 in 0 : vector<1x128xf32>, vector<1x128xf32>, vector<1x128xf32>, vector<1x128xf32>, vector<1x128xf32>, vector<1x128xf32>, vector<1x128xf32>, vector<1x128xf32> -> vector<8x128xf32>
    %179 = vector.extract_strided_slice %166 {offsets = [128, 0], sizes = [128, 64], strides = [1, 1]} : vector<384x64xf32> to vector<128x64xf32>
    %cst_69 = arith.constant dense<0.000000e+00> : vector<8x64xf32>
    %180 = tpu.matmul %165, %179, %cst_69 {dimension_numbers = #tpu.dot_dimension_numbers<[1], [0], [0], [1], [0, 0, 1, 1], [], []>} : vector<8x128xf32>, vector<128x64xf32>, vector<8x64xf32> -> vector<8x64xf32>
    %181 = vector.extract_strided_slice %166 {offsets = [256, 0], sizes = [128, 64], strides = [1, 1]} : vector<384x64xf32> to vector<128x64xf32>
    %cst_70 = arith.constant dense<0.000000e+00> : vector<8x64xf32>
    %182 = tpu.matmul %165, %181, %cst_70 {dimension_numbers = #tpu.dot_dimension_numbers<[1], [0], [0], [1], [0, 0, 1, 1], [], []>} : vector<8x128xf32>, vector<128x64xf32>, vector<8x64xf32> -> vector<8x64xf32>
    %183 = vector.extract_strided_slice %166 {offsets = [0, 0], sizes = [128, 64], strides = [1, 1]} : vector<384x64xf32> to vector<128x64xf32>
    %cst_71 = arith.constant dense<0.000000e+00> : vector<8x64xf32>
    %184 = tpu.matmul %178, %183, %cst_71 {dimension_numbers = #tpu.dot_dimension_numbers<[1], [0], [0], [1], [0, 0, 1, 1], [], []>} : vector<8x128xf32>, vector<128x64xf32>, vector<8x64xf32> -> vector<8x64xf32>
    %185 = arith.addf %182, %184 : vector<8x64xf32>
    %186 = tpu.concatenate %180, %185 in 0 : vector<8x64xf32>, vector<8x64xf32> -> vector<16x64xf32>
    %cst_72 = arith.constant dense<0.000000e+00> : vector<12x64xf32>
    %187 = tpu.matmul %167, %186, %cst_72 {dimension_numbers = #tpu.dot_dimension_numbers<[1], [0], [0], [1], [0, 0, 1, 1], [], []>} : vector<12x16xf32>, vector<16x64xf32>, vector<12x64xf32> -> vector<12x64xf32>
    %188 = vector.broadcast %168 : vector<1x64xf32> to vector<12x64xf32>
    %189 = arith.addf %187, %188 : vector<12x64xf32>
    %cst_73 = arith.constant 0.000000e+00 : f32
    %190 = vector.broadcast %cst_73 : f32 to vector<12x64xf32>
    %191 = arith.maximumf %189, %190 : vector<12x64xf32>
    %c0_74 = arith.constant 0 : index
    %c0_75 = arith.constant 0 : index
    %192 = vector.load %arg13[%c0_74, %c0_75] : memref<192x32xf32, #tpu.memory_space<vmem>>, vector<192x32xf32>
    %c0_76 = arith.constant 0 : index
    %c0_77 = arith.constant 0 : index
    %193 = vector.load %arg14[%c0_76, %c0_77] : memref<20x24xf32, #tpu.memory_space<vmem>>, vector<20x24xf32>
    %c0_78 = arith.constant 0 : index
    %c0_79 = arith.constant 0 : index
    %194 = vector.load %arg15[%c0_78, %c0_79] : memref<1x32xf32, #tpu.memory_space<vmem>>, vector<1x32xf32>
    %cst_80 = arith.constant 0.000000e+00 : f32
    %195 = vector.broadcast %cst_80 : f32 to vector<1x64xf32>
    %196 = vector.extract_strided_slice %191 {offsets = [0, 0], sizes = [3, 64], strides = [1, 1]} : vector<12x64xf32> to vector<3x64xf32>
    %197 = vector.extract_strided_slice %196 {offsets = [1, 0], sizes = [2, 64], strides = [1, 1]} : vector<3x64xf32> to vector<2x64xf32>
    %198 = vector.extract_strided_slice %191 {offsets = [3, 0], sizes = [3, 64], strides = [1, 1]} : vector<12x64xf32> to vector<3x64xf32>
    %199 = vector.extract_strided_slice %198 {offsets = [1, 0], sizes = [2, 64], strides = [1, 1]} : vector<3x64xf32> to vector<2x64xf32>
    %200 = vector.extract_strided_slice %191 {offsets = [6, 0], sizes = [3, 64], strides = [1, 1]} : vector<12x64xf32> to vector<3x64xf32>
    %201 = vector.extract_strided_slice %200 {offsets = [1, 0], sizes = [2, 64], strides = [1, 1]} : vector<3x64xf32> to vector<2x64xf32>
    %202 = vector.extract_strided_slice %191 {offsets = [9, 0], sizes = [3, 64], strides = [1, 1]} : vector<12x64xf32> to vector<3x64xf32>
    %203 = vector.extract_strided_slice %202 {offsets = [1, 0], sizes = [2, 64], strides = [1, 1]} : vector<3x64xf32> to vector<2x64xf32>
    %204 = tpu.concatenate %197, %195, %199, %195, %201, %195, %203, %195 in 0 : vector<2x64xf32>, vector<1x64xf32>, vector<2x64xf32>, vector<1x64xf32>, vector<2x64xf32>, vector<1x64xf32>, vector<2x64xf32>, vector<1x64xf32> -> vector<12x64xf32>
    %205 = vector.extract_strided_slice %192 {offsets = [64, 0], sizes = [64, 32], strides = [1, 1]} : vector<192x32xf32> to vector<64x32xf32>
    %cst_81 = arith.constant dense<0.000000e+00> : vector<12x32xf32>
    %206 = tpu.matmul %191, %205, %cst_81 {dimension_numbers = #tpu.dot_dimension_numbers<[1], [0], [0], [1], [0, 0, 1, 1], [], []>} : vector<12x64xf32>, vector<64x32xf32>, vector<12x32xf32> -> vector<12x32xf32>
    %207 = vector.extract_strided_slice %192 {offsets = [128, 0], sizes = [64, 32], strides = [1, 1]} : vector<192x32xf32> to vector<64x32xf32>
    %cst_82 = arith.constant dense<0.000000e+00> : vector<12x32xf32>
    %208 = tpu.matmul %191, %207, %cst_82 {dimension_numbers = #tpu.dot_dimension_numbers<[1], [0], [0], [1], [0, 0, 1, 1], [], []>} : vector<12x64xf32>, vector<64x32xf32>, vector<12x32xf32> -> vector<12x32xf32>
    %209 = vector.extract_strided_slice %192 {offsets = [0, 0], sizes = [64, 32], strides = [1, 1]} : vector<192x32xf32> to vector<64x32xf32>
    %cst_83 = arith.constant dense<0.000000e+00> : vector<12x32xf32>
    %210 = tpu.matmul %204, %209, %cst_83 {dimension_numbers = #tpu.dot_dimension_numbers<[1], [0], [0], [1], [0, 0, 1, 1], [], []>} : vector<12x64xf32>, vector<64x32xf32>, vector<12x32xf32> -> vector<12x32xf32>
    %211 = arith.addf %208, %210 : vector<12x32xf32>
    %212 = tpu.concatenate %206, %211 in 0 : vector<12x32xf32>, vector<12x32xf32> -> vector<24x32xf32>
    %cst_84 = arith.constant dense<0.000000e+00> : vector<20x32xf32>
    %213 = tpu.matmul %193, %212, %cst_84 {dimension_numbers = #tpu.dot_dimension_numbers<[1], [0], [0], [1], [0, 0, 1, 1], [], []>} : vector<20x24xf32>, vector<24x32xf32>, vector<20x32xf32> -> vector<20x32xf32>
    %214 = vector.broadcast %194 : vector<1x32xf32> to vector<20x32xf32>
    %215 = arith.addf %213, %214 : vector<20x32xf32>
    %cst_85 = arith.constant 0.000000e+00 : f32
    %216 = vector.broadcast %cst_85 : f32 to vector<20x32xf32>
    %217 = arith.maximumf %215, %216 : vector<20x32xf32>
    %c0_86 = arith.constant 0 : index
    %c0_87 = arith.constant 0 : index
    %218 = vector.load %arg16[%c0_86, %c0_87] : memref<96x16xf32, #tpu.memory_space<vmem>>, vector<96x16xf32>
    %c0_88 = arith.constant 0 : index
    %c0_89 = arith.constant 0 : index
    %219 = vector.load %arg17[%c0_88, %c0_89] : memref<36x40xf32, #tpu.memory_space<vmem>>, vector<36x40xf32>
    %c0_90 = arith.constant 0 : index
    %c0_91 = arith.constant 0 : index
    %220 = vector.load %arg18[%c0_90, %c0_91] : memref<1x16xf32, #tpu.memory_space<vmem>>, vector<1x16xf32>
    %cst_92 = arith.constant 0.000000e+00 : f32
    %221 = vector.broadcast %cst_92 : f32 to vector<1x32xf32>
    %222 = vector.extract_strided_slice %217 {offsets = [0, 0], sizes = [5, 32], strides = [1, 1]} : vector<20x32xf32> to vector<5x32xf32>
    %223 = vector.extract_strided_slice %222 {offsets = [1, 0], sizes = [4, 32], strides = [1, 1]} : vector<5x32xf32> to vector<4x32xf32>
    %224 = vector.extract_strided_slice %217 {offsets = [5, 0], sizes = [5, 32], strides = [1, 1]} : vector<20x32xf32> to vector<5x32xf32>
    %225 = vector.extract_strided_slice %224 {offsets = [1, 0], sizes = [4, 32], strides = [1, 1]} : vector<5x32xf32> to vector<4x32xf32>
    %226 = vector.extract_strided_slice %217 {offsets = [10, 0], sizes = [5, 32], strides = [1, 1]} : vector<20x32xf32> to vector<5x32xf32>
    %227 = vector.extract_strided_slice %226 {offsets = [1, 0], sizes = [4, 32], strides = [1, 1]} : vector<5x32xf32> to vector<4x32xf32>
    %228 = vector.extract_strided_slice %217 {offsets = [15, 0], sizes = [5, 32], strides = [1, 1]} : vector<20x32xf32> to vector<5x32xf32>
    %229 = vector.extract_strided_slice %228 {offsets = [1, 0], sizes = [4, 32], strides = [1, 1]} : vector<5x32xf32> to vector<4x32xf32>
    %230 = tpu.concatenate %223, %221, %225, %221, %227, %221, %229, %221 in 0 : vector<4x32xf32>, vector<1x32xf32>, vector<4x32xf32>, vector<1x32xf32>, vector<4x32xf32>, vector<1x32xf32>, vector<4x32xf32>, vector<1x32xf32> -> vector<20x32xf32>
    %231 = vector.extract_strided_slice %218 {offsets = [32, 0], sizes = [32, 16], strides = [1, 1]} : vector<96x16xf32> to vector<32x16xf32>
    %cst_93 = arith.constant dense<0.000000e+00> : vector<20x16xf32>
    %232 = tpu.matmul %217, %231, %cst_93 {dimension_numbers = #tpu.dot_dimension_numbers<[1], [0], [0], [1], [0, 0, 1, 1], [], []>} : vector<20x32xf32>, vector<32x16xf32>, vector<20x16xf32> -> vector<20x16xf32>
    %233 = vector.extract_strided_slice %218 {offsets = [64, 0], sizes = [32, 16], strides = [1, 1]} : vector<96x16xf32> to vector<32x16xf32>
    %cst_94 = arith.constant dense<0.000000e+00> : vector<20x16xf32>
    %234 = tpu.matmul %217, %233, %cst_94 {dimension_numbers = #tpu.dot_dimension_numbers<[1], [0], [0], [1], [0, 0, 1, 1], [], []>} : vector<20x32xf32>, vector<32x16xf32>, vector<20x16xf32> -> vector<20x16xf32>
    %235 = vector.extract_strided_slice %218 {offsets = [0, 0], sizes = [32, 16], strides = [1, 1]} : vector<96x16xf32> to vector<32x16xf32>
    %cst_95 = arith.constant dense<0.000000e+00> : vector<20x16xf32>
    %236 = tpu.matmul %230, %235, %cst_95 {dimension_numbers = #tpu.dot_dimension_numbers<[1], [0], [0], [1], [0, 0, 1, 1], [], []>} : vector<20x32xf32>, vector<32x16xf32>, vector<20x16xf32> -> vector<20x16xf32>
    %237 = arith.addf %234, %236 : vector<20x16xf32>
    %238 = tpu.concatenate %232, %237 in 0 : vector<20x16xf32>, vector<20x16xf32> -> vector<40x16xf32>
    %cst_96 = arith.constant dense<0.000000e+00> : vector<36x16xf32>
    %239 = tpu.matmul %219, %238, %cst_96 {dimension_numbers = #tpu.dot_dimension_numbers<[1], [0], [0], [1], [0, 0, 1, 1], [], []>} : vector<36x40xf32>, vector<40x16xf32>, vector<36x16xf32> -> vector<36x16xf32>
    %240 = vector.broadcast %220 : vector<1x16xf32> to vector<36x16xf32>
    %241 = arith.addf %239, %240 : vector<36x16xf32>
    %cst_97 = arith.constant 0.000000e+00 : f32
    %242 = vector.broadcast %cst_97 : f32 to vector<36x16xf32>
    %243 = arith.maximumf %241, %242 : vector<36x16xf32>
    %c0_98 = arith.constant 0 : index
    %c0_99 = arith.constant 0 : index
    %244 = vector.load %arg19[%c0_98, %c0_99] : memref<48x8xf32, #tpu.memory_space<vmem>>, vector<48x8xf32>
    %c0_100 = arith.constant 0 : index
    %c0_101 = arith.constant 0 : index
    %245 = vector.load %arg20[%c0_100, %c0_101] : memref<68x72xf32, #tpu.memory_space<vmem>>, vector<68x72xf32>
    %c0_102 = arith.constant 0 : index
    %c0_103 = arith.constant 0 : index
    %246 = vector.load %arg21[%c0_102, %c0_103] : memref<1x8xf32, #tpu.memory_space<vmem>>, vector<1x8xf32>
    %cst_104 = arith.constant 0.000000e+00 : f32
    %247 = vector.broadcast %cst_104 : f32 to vector<1x16xf32>
    %248 = vector.extract_strided_slice %243 {offsets = [0, 0], sizes = [9, 16], strides = [1, 1]} : vector<36x16xf32> to vector<9x16xf32>
    %249 = vector.extract_strided_slice %248 {offsets = [1, 0], sizes = [8, 16], strides = [1, 1]} : vector<9x16xf32> to vector<8x16xf32>
    %250 = vector.extract_strided_slice %243 {offsets = [9, 0], sizes = [9, 16], strides = [1, 1]} : vector<36x16xf32> to vector<9x16xf32>
    %251 = vector.extract_strided_slice %250 {offsets = [1, 0], sizes = [8, 16], strides = [1, 1]} : vector<9x16xf32> to vector<8x16xf32>
    %252 = vector.extract_strided_slice %243 {offsets = [18, 0], sizes = [9, 16], strides = [1, 1]} : vector<36x16xf32> to vector<9x16xf32>
    %253 = vector.extract_strided_slice %252 {offsets = [1, 0], sizes = [8, 16], strides = [1, 1]} : vector<9x16xf32> to vector<8x16xf32>
    %254 = vector.extract_strided_slice %243 {offsets = [27, 0], sizes = [9, 16], strides = [1, 1]} : vector<36x16xf32> to vector<9x16xf32>
    %255 = vector.extract_strided_slice %254 {offsets = [1, 0], sizes = [8, 16], strides = [1, 1]} : vector<9x16xf32> to vector<8x16xf32>
    %256 = tpu.concatenate %249, %247, %251, %247, %253, %247, %255, %247 in 0 : vector<8x16xf32>, vector<1x16xf32>, vector<8x16xf32>, vector<1x16xf32>, vector<8x16xf32>, vector<1x16xf32>, vector<8x16xf32>, vector<1x16xf32> -> vector<36x16xf32>
    %257 = vector.extract_strided_slice %244 {offsets = [16, 0], sizes = [16, 8], strides = [1, 1]} : vector<48x8xf32> to vector<16x8xf32>
    %cst_105 = arith.constant dense<0.000000e+00> : vector<36x8xf32>
    %258 = tpu.matmul %243, %257, %cst_105 {dimension_numbers = #tpu.dot_dimension_numbers<[1], [0], [0], [1], [0, 0, 1, 1], [], []>} : vector<36x16xf32>, vector<16x8xf32>, vector<36x8xf32> -> vector<36x8xf32>
    %259 = vector.extract_strided_slice %244 {offsets = [32, 0], sizes = [16, 8], strides = [1, 1]} : vector<48x8xf32> to vector<16x8xf32>
    %cst_106 = arith.constant dense<0.000000e+00> : vector<36x8xf32>
    %260 = tpu.matmul %243, %259, %cst_106 {dimension_numbers = #tpu.dot_dimension_numbers<[1], [0], [0], [1], [0, 0, 1, 1], [], []>} : vector<36x16xf32>, vector<16x8xf32>, vector<36x8xf32> -> vector<36x8xf32>
    %261 = vector.extract_strided_slice %244 {offsets = [0, 0], sizes = [16, 8], strides = [1, 1]} : vector<48x8xf32> to vector<16x8xf32>
    %cst_107 = arith.constant dense<0.000000e+00> : vector<36x8xf32>
    %262 = tpu.matmul %256, %261, %cst_107 {dimension_numbers = #tpu.dot_dimension_numbers<[1], [0], [0], [1], [0, 0, 1, 1], [], []>} : vector<36x16xf32>, vector<16x8xf32>, vector<36x8xf32> -> vector<36x8xf32>
    %263 = arith.addf %260, %262 : vector<36x8xf32>
    %264 = tpu.concatenate %258, %263 in 0 : vector<36x8xf32>, vector<36x8xf32> -> vector<72x8xf32>
    %cst_108 = arith.constant dense<0.000000e+00> : vector<68x8xf32>
    %265 = tpu.matmul %245, %264, %cst_108 {dimension_numbers = #tpu.dot_dimension_numbers<[1], [0], [0], [1], [0, 0, 1, 1], [], []>} : vector<68x72xf32>, vector<72x8xf32>, vector<68x8xf32> -> vector<68x8xf32>
    %266 = vector.broadcast %246 : vector<1x8xf32> to vector<68x8xf32>
    %267 = arith.addf %265, %266 : vector<68x8xf32>
    %cst_109 = arith.constant 0.000000e+00 : f32
    %268 = vector.broadcast %cst_109 : f32 to vector<68x8xf32>
    %269 = arith.maximumf %267, %268 : vector<68x8xf32>
    %c0_110 = arith.constant 0 : index
    %c0_111 = arith.constant 0 : index
    %270 = vector.load %arg22[%c0_110, %c0_111] : memref<24x4xf32, #tpu.memory_space<vmem>>, vector<24x4xf32>
    %c0_112 = arith.constant 0 : index
    %c0_113 = arith.constant 0 : index
    %271 = vector.load %arg23[%c0_112, %c0_113] : memref<132x136xf32, #tpu.memory_space<vmem>>, vector<132x136xf32>
    %c0_114 = arith.constant 0 : index
    %c0_115 = arith.constant 0 : index
    %272 = vector.load %arg24[%c0_114, %c0_115] : memref<1x4xf32, #tpu.memory_space<vmem>>, vector<1x4xf32>
    %cst_116 = arith.constant 0.000000e+00 : f32
    %273 = vector.broadcast %cst_116 : f32 to vector<1x8xf32>
    %274 = vector.extract_strided_slice %269 {offsets = [0, 0], sizes = [17, 8], strides = [1, 1]} : vector<68x8xf32> to vector<17x8xf32>
    %275 = vector.extract_strided_slice %274 {offsets = [1, 0], sizes = [16, 8], strides = [1, 1]} : vector<17x8xf32> to vector<16x8xf32>
    %276 = vector.extract_strided_slice %269 {offsets = [17, 0], sizes = [17, 8], strides = [1, 1]} : vector<68x8xf32> to vector<17x8xf32>
    %277 = vector.extract_strided_slice %276 {offsets = [1, 0], sizes = [16, 8], strides = [1, 1]} : vector<17x8xf32> to vector<16x8xf32>
    %278 = vector.extract_strided_slice %269 {offsets = [34, 0], sizes = [17, 8], strides = [1, 1]} : vector<68x8xf32> to vector<17x8xf32>
    %279 = vector.extract_strided_slice %278 {offsets = [1, 0], sizes = [16, 8], strides = [1, 1]} : vector<17x8xf32> to vector<16x8xf32>
    %280 = vector.extract_strided_slice %269 {offsets = [51, 0], sizes = [17, 8], strides = [1, 1]} : vector<68x8xf32> to vector<17x8xf32>
    %281 = vector.extract_strided_slice %280 {offsets = [1, 0], sizes = [16, 8], strides = [1, 1]} : vector<17x8xf32> to vector<16x8xf32>
    %282 = tpu.concatenate %275, %273, %277, %273, %279, %273, %281, %273 in 0 : vector<16x8xf32>, vector<1x8xf32>, vector<16x8xf32>, vector<1x8xf32>, vector<16x8xf32>, vector<1x8xf32>, vector<16x8xf32>, vector<1x8xf32> -> vector<68x8xf32>
    %283 = vector.extract_strided_slice %270 {offsets = [8, 0], sizes = [8, 4], strides = [1, 1]} : vector<24x4xf32> to vector<8x4xf32>
    %cst_117 = arith.constant dense<0.000000e+00> : vector<68x4xf32>
    %284 = tpu.matmul %269, %283, %cst_117 {dimension_numbers = #tpu.dot_dimension_numbers<[1], [0], [0], [1], [0, 0, 1, 1], [], []>} : vector<68x8xf32>, vector<8x4xf32>, vector<68x4xf32> -> vector<68x4xf32>
    %285 = vector.extract_strided_slice %270 {offsets = [16, 0], sizes = [8, 4], strides = [1, 1]} : vector<24x4xf32> to vector<8x4xf32>
    %cst_118 = arith.constant dense<0.000000e+00> : vector<68x4xf32>
    %286 = tpu.matmul %269, %285, %cst_118 {dimension_numbers = #tpu.dot_dimension_numbers<[1], [0], [0], [1], [0, 0, 1, 1], [], []>} : vector<68x8xf32>, vector<8x4xf32>, vector<68x4xf32> -> vector<68x4xf32>
    %287 = vector.extract_strided_slice %270 {offsets = [0, 0], sizes = [8, 4], strides = [1, 1]} : vector<24x4xf32> to vector<8x4xf32>
    %cst_119 = arith.constant dense<0.000000e+00> : vector<68x4xf32>
    %288 = tpu.matmul %282, %287, %cst_119 {dimension_numbers = #tpu.dot_dimension_numbers<[1], [0], [0], [1], [0, 0, 1, 1], [], []>} : vector<68x8xf32>, vector<8x4xf32>, vector<68x4xf32> -> vector<68x4xf32>
    %289 = arith.addf %286, %288 : vector<68x4xf32>
    %290 = tpu.concatenate %284, %289 in 0 : vector<68x4xf32>, vector<68x4xf32> -> vector<136x4xf32>
    %cst_120 = arith.constant dense<0.000000e+00> : vector<132x4xf32>
    %291 = tpu.matmul %271, %290, %cst_120 {dimension_numbers = #tpu.dot_dimension_numbers<[1], [0], [0], [1], [0, 0, 1, 1], [], []>} : vector<132x136xf32>, vector<136x4xf32>, vector<132x4xf32> -> vector<132x4xf32>
    %292 = vector.broadcast %272 : vector<1x4xf32> to vector<132x4xf32>
    %293 = arith.addf %291, %292 : vector<132x4xf32>
    %cst_121 = arith.constant 0.000000e+00 : f32
    %294 = vector.broadcast %cst_121 : f32 to vector<132x4xf32>
    %295 = arith.maximumf %293, %294 : vector<132x4xf32>
    %c0_122 = arith.constant 0 : index
    %c0_123 = arith.constant 0 : index
    %296 = vector.load %arg25[%c0_122, %c0_123] : memref<9x4xf32, #tpu.memory_space<vmem>>, vector<9x4xf32>
    %c0_124 = arith.constant 0 : index
    %c0_125 = arith.constant 0 : index
    %297 = vector.load %arg26[%c0_124, %c0_125] : memref<1x1xf32, #tpu.memory_space<vmem>>, vector<1x1xf32>
    %cst_126 = arith.constant 0.000000e+00 : f32
    %298 = vector.broadcast %cst_126 : f32 to vector<33x4xf32>
    %299 = vector.extract_strided_slice %295 {offsets = [0, 0], sizes = [99, 4], strides = [1, 1]} : vector<132x4xf32> to vector<99x4xf32>
    %300 = tpu.concatenate %298, %299 in 0 : vector<33x4xf32>, vector<99x4xf32> -> vector<132x4xf32>
    %cst_127 = arith.constant 0.000000e+00 : f32
    %301 = vector.broadcast %cst_127 : f32 to vector<33x4xf32>
    %302 = vector.extract_strided_slice %295 {offsets = [33, 0], sizes = [99, 4], strides = [1, 1]} : vector<132x4xf32> to vector<99x4xf32>
    %303 = tpu.concatenate %302, %301 in 0 : vector<99x4xf32>, vector<33x4xf32> -> vector<132x4xf32>
    %cst_128 = arith.constant 0.000000e+00 : f32
    %304 = vector.broadcast %cst_128 : f32 to vector<1x4xf32>
    %305 = vector.extract_strided_slice %300 {offsets = [0, 0], sizes = [33, 4], strides = [1, 1]} : vector<132x4xf32> to vector<33x4xf32>
    %306 = vector.extract_strided_slice %305 {offsets = [0, 0], sizes = [32, 4], strides = [1, 1]} : vector<33x4xf32> to vector<32x4xf32>
    %307 = vector.extract_strided_slice %300 {offsets = [33, 0], sizes = [33, 4], strides = [1, 1]} : vector<132x4xf32> to vector<33x4xf32>
    %308 = vector.extract_strided_slice %307 {offsets = [0, 0], sizes = [32, 4], strides = [1, 1]} : vector<33x4xf32> to vector<32x4xf32>
    %309 = vector.extract_strided_slice %300 {offsets = [66, 0], sizes = [33, 4], strides = [1, 1]} : vector<132x4xf32> to vector<33x4xf32>
    %310 = vector.extract_strided_slice %309 {offsets = [0, 0], sizes = [32, 4], strides = [1, 1]} : vector<33x4xf32> to vector<32x4xf32>
    %311 = vector.extract_strided_slice %300 {offsets = [99, 0], sizes = [33, 4], strides = [1, 1]} : vector<132x4xf32> to vector<33x4xf32>
    %312 = vector.extract_strided_slice %311 {offsets = [0, 0], sizes = [32, 4], strides = [1, 1]} : vector<33x4xf32> to vector<32x4xf32>
    %313 = tpu.concatenate %304, %306, %304, %308, %304, %310, %304, %312 in 0 : vector<1x4xf32>, vector<32x4xf32>, vector<1x4xf32>, vector<32x4xf32>, vector<1x4xf32>, vector<32x4xf32>, vector<1x4xf32>, vector<32x4xf32> -> vector<132x4xf32>
    %cst_129 = arith.constant 0.000000e+00 : f32
    %314 = vector.broadcast %cst_129 : f32 to vector<1x4xf32>
    %315 = vector.extract_strided_slice %300 {offsets = [0, 0], sizes = [33, 4], strides = [1, 1]} : vector<132x4xf32> to vector<33x4xf32>
    %316 = vector.extract_strided_slice %315 {offsets = [1, 0], sizes = [32, 4], strides = [1, 1]} : vector<33x4xf32> to vector<32x4xf32>
    %317 = vector.extract_strided_slice %300 {offsets = [33, 0], sizes = [33, 4], strides = [1, 1]} : vector<132x4xf32> to vector<33x4xf32>
    %318 = vector.extract_strided_slice %317 {offsets = [1, 0], sizes = [32, 4], strides = [1, 1]} : vector<33x4xf32> to vector<32x4xf32>
    %319 = vector.extract_strided_slice %300 {offsets = [66, 0], sizes = [33, 4], strides = [1, 1]} : vector<132x4xf32> to vector<33x4xf32>
    %320 = vector.extract_strided_slice %319 {offsets = [1, 0], sizes = [32, 4], strides = [1, 1]} : vector<33x4xf32> to vector<32x4xf32>
    %321 = vector.extract_strided_slice %300 {offsets = [99, 0], sizes = [33, 4], strides = [1, 1]} : vector<132x4xf32> to vector<33x4xf32>
    %322 = vector.extract_strided_slice %321 {offsets = [1, 0], sizes = [32, 4], strides = [1, 1]} : vector<33x4xf32> to vector<32x4xf32>
    %323 = tpu.concatenate %316, %314, %318, %314, %320, %314, %322, %314 in 0 : vector<32x4xf32>, vector<1x4xf32>, vector<32x4xf32>, vector<1x4xf32>, vector<32x4xf32>, vector<1x4xf32>, vector<32x4xf32>, vector<1x4xf32> -> vector<132x4xf32>
    %324 = vector.extract_strided_slice %296 {offsets = [0, 0], sizes = [1, 4], strides = [1, 1]} : vector<9x4xf32> to vector<1x4xf32>
    %325 = vector.broadcast %324 : vector<1x4xf32> to vector<132x4xf32>
    %326 = arith.mulf %313, %325 : vector<132x4xf32>
    %327 = vector.extract_strided_slice %296 {offsets = [1, 0], sizes = [1, 4], strides = [1, 1]} : vector<9x4xf32> to vector<1x4xf32>
    %328 = vector.broadcast %327 : vector<1x4xf32> to vector<132x4xf32>
    %329 = arith.mulf %300, %328 : vector<132x4xf32>
    %330 = arith.addf %326, %329 : vector<132x4xf32>
    %331 = vector.extract_strided_slice %296 {offsets = [2, 0], sizes = [1, 4], strides = [1, 1]} : vector<9x4xf32> to vector<1x4xf32>
    %332 = vector.broadcast %331 : vector<1x4xf32> to vector<132x4xf32>
    %333 = arith.mulf %323, %332 : vector<132x4xf32>
    %334 = arith.addf %330, %333 : vector<132x4xf32>
    %cst_130 = arith.constant 0.000000e+00 : f32
    %335 = vector.broadcast %cst_130 : f32 to vector<1x4xf32>
    %336 = vector.extract_strided_slice %295 {offsets = [0, 0], sizes = [33, 4], strides = [1, 1]} : vector<132x4xf32> to vector<33x4xf32>
    %337 = vector.extract_strided_slice %336 {offsets = [0, 0], sizes = [32, 4], strides = [1, 1]} : vector<33x4xf32> to vector<32x4xf32>
    %338 = vector.extract_strided_slice %295 {offsets = [33, 0], sizes = [33, 4], strides = [1, 1]} : vector<132x4xf32> to vector<33x4xf32>
    %339 = vector.extract_strided_slice %338 {offsets = [0, 0], sizes = [32, 4], strides = [1, 1]} : vector<33x4xf32> to vector<32x4xf32>
    %340 = vector.extract_strided_slice %295 {offsets = [66, 0], sizes = [33, 4], strides = [1, 1]} : vector<132x4xf32> to vector<33x4xf32>
    %341 = vector.extract_strided_slice %340 {offsets = [0, 0], sizes = [32, 4], strides = [1, 1]} : vector<33x4xf32> to vector<32x4xf32>
    %342 = vector.extract_strided_slice %295 {offsets = [99, 0], sizes = [33, 4], strides = [1, 1]} : vector<132x4xf32> to vector<33x4xf32>
    %343 = vector.extract_strided_slice %342 {offsets = [0, 0], sizes = [32, 4], strides = [1, 1]} : vector<33x4xf32> to vector<32x4xf32>
    %344 = tpu.concatenate %335, %337, %335, %339, %335, %341, %335, %343 in 0 : vector<1x4xf32>, vector<32x4xf32>, vector<1x4xf32>, vector<32x4xf32>, vector<1x4xf32>, vector<32x4xf32>, vector<1x4xf32>, vector<32x4xf32> -> vector<132x4xf32>
    %cst_131 = arith.constant 0.000000e+00 : f32
    %345 = vector.broadcast %cst_131 : f32 to vector<1x4xf32>
    %346 = vector.extract_strided_slice %295 {offsets = [0, 0], sizes = [33, 4], strides = [1, 1]} : vector<132x4xf32> to vector<33x4xf32>
    %347 = vector.extract_strided_slice %346 {offsets = [1, 0], sizes = [32, 4], strides = [1, 1]} : vector<33x4xf32> to vector<32x4xf32>
    %348 = vector.extract_strided_slice %295 {offsets = [33, 0], sizes = [33, 4], strides = [1, 1]} : vector<132x4xf32> to vector<33x4xf32>
    %349 = vector.extract_strided_slice %348 {offsets = [1, 0], sizes = [32, 4], strides = [1, 1]} : vector<33x4xf32> to vector<32x4xf32>
    %350 = vector.extract_strided_slice %295 {offsets = [66, 0], sizes = [33, 4], strides = [1, 1]} : vector<132x4xf32> to vector<33x4xf32>
    %351 = vector.extract_strided_slice %350 {offsets = [1, 0], sizes = [32, 4], strides = [1, 1]} : vector<33x4xf32> to vector<32x4xf32>
    %352 = vector.extract_strided_slice %295 {offsets = [99, 0], sizes = [33, 4], strides = [1, 1]} : vector<132x4xf32> to vector<33x4xf32>
    %353 = vector.extract_strided_slice %352 {offsets = [1, 0], sizes = [32, 4], strides = [1, 1]} : vector<33x4xf32> to vector<32x4xf32>
    %354 = tpu.concatenate %347, %345, %349, %345, %351, %345, %353, %345 in 0 : vector<32x4xf32>, vector<1x4xf32>, vector<32x4xf32>, vector<1x4xf32>, vector<32x4xf32>, vector<1x4xf32>, vector<32x4xf32>, vector<1x4xf32> -> vector<132x4xf32>
    %355 = vector.extract_strided_slice %296 {offsets = [3, 0], sizes = [1, 4], strides = [1, 1]} : vector<9x4xf32> to vector<1x4xf32>
    %356 = vector.broadcast %355 : vector<1x4xf32> to vector<132x4xf32>
    %357 = arith.mulf %344, %356 : vector<132x4xf32>
    %358 = arith.addf %334, %357 : vector<132x4xf32>
    %359 = vector.extract_strided_slice %296 {offsets = [4, 0], sizes = [1, 4], strides = [1, 1]} : vector<9x4xf32> to vector<1x4xf32>
    %360 = vector.broadcast %359 : vector<1x4xf32> to vector<132x4xf32>
    %361 = arith.mulf %295, %360 : vector<132x4xf32>
    %362 = arith.addf %358, %361 : vector<132x4xf32>
    %363 = vector.extract_strided_slice %296 {offsets = [5, 0], sizes = [1, 4], strides = [1, 1]} : vector<9x4xf32> to vector<1x4xf32>
    %364 = vector.broadcast %363 : vector<1x4xf32> to vector<132x4xf32>
    %365 = arith.mulf %354, %364 : vector<132x4xf32>
    %366 = arith.addf %362, %365 : vector<132x4xf32>
    %cst_132 = arith.constant 0.000000e+00 : f32
    %367 = vector.broadcast %cst_132 : f32 to vector<1x4xf32>
    %368 = vector.extract_strided_slice %303 {offsets = [0, 0], sizes = [33, 4], strides = [1, 1]} : vector<132x4xf32> to vector<33x4xf32>
    %369 = vector.extract_strided_slice %368 {offsets = [0, 0], sizes = [32, 4], strides = [1, 1]} : vector<33x4xf32> to vector<32x4xf32>
    %370 = vector.extract_strided_slice %303 {offsets = [33, 0], sizes = [33, 4], strides = [1, 1]} : vector<132x4xf32> to vector<33x4xf32>
    %371 = vector.extract_strided_slice %370 {offsets = [0, 0], sizes = [32, 4], strides = [1, 1]} : vector<33x4xf32> to vector<32x4xf32>
    %372 = vector.extract_strided_slice %303 {offsets = [66, 0], sizes = [33, 4], strides = [1, 1]} : vector<132x4xf32> to vector<33x4xf32>
    %373 = vector.extract_strided_slice %372 {offsets = [0, 0], sizes = [32, 4], strides = [1, 1]} : vector<33x4xf32> to vector<32x4xf32>
    %374 = vector.extract_strided_slice %303 {offsets = [99, 0], sizes = [33, 4], strides = [1, 1]} : vector<132x4xf32> to vector<33x4xf32>
    %375 = vector.extract_strided_slice %374 {offsets = [0, 0], sizes = [32, 4], strides = [1, 1]} : vector<33x4xf32> to vector<32x4xf32>
    %376 = tpu.concatenate %367, %369, %367, %371, %367, %373, %367, %375 in 0 : vector<1x4xf32>, vector<32x4xf32>, vector<1x4xf32>, vector<32x4xf32>, vector<1x4xf32>, vector<32x4xf32>, vector<1x4xf32>, vector<32x4xf32> -> vector<132x4xf32>
    %cst_133 = arith.constant 0.000000e+00 : f32
    %377 = vector.broadcast %cst_133 : f32 to vector<1x4xf32>
    %378 = vector.extract_strided_slice %303 {offsets = [0, 0], sizes = [33, 4], strides = [1, 1]} : vector<132x4xf32> to vector<33x4xf32>
    %379 = vector.extract_strided_slice %378 {offsets = [1, 0], sizes = [32, 4], strides = [1, 1]} : vector<33x4xf32> to vector<32x4xf32>
    %380 = vector.extract_strided_slice %303 {offsets = [33, 0], sizes = [33, 4], strides = [1, 1]} : vector<132x4xf32> to vector<33x4xf32>
    %381 = vector.extract_strided_slice %380 {offsets = [1, 0], sizes = [32, 4], strides = [1, 1]} : vector<33x4xf32> to vector<32x4xf32>
    %382 = vector.extract_strided_slice %303 {offsets = [66, 0], sizes = [33, 4], strides = [1, 1]} : vector<132x4xf32> to vector<33x4xf32>
    %383 = vector.extract_strided_slice %382 {offsets = [1, 0], sizes = [32, 4], strides = [1, 1]} : vector<33x4xf32> to vector<32x4xf32>
    %384 = vector.extract_strided_slice %303 {offsets = [99, 0], sizes = [33, 4], strides = [1, 1]} : vector<132x4xf32> to vector<33x4xf32>
    %385 = vector.extract_strided_slice %384 {offsets = [1, 0], sizes = [32, 4], strides = [1, 1]} : vector<33x4xf32> to vector<32x4xf32>
    %386 = tpu.concatenate %379, %377, %381, %377, %383, %377, %385, %377 in 0 : vector<32x4xf32>, vector<1x4xf32>, vector<32x4xf32>, vector<1x4xf32>, vector<32x4xf32>, vector<1x4xf32>, vector<32x4xf32>, vector<1x4xf32> -> vector<132x4xf32>
    %387 = vector.extract_strided_slice %296 {offsets = [6, 0], sizes = [1, 4], strides = [1, 1]} : vector<9x4xf32> to vector<1x4xf32>
    %388 = vector.broadcast %387 : vector<1x4xf32> to vector<132x4xf32>
    %389 = arith.mulf %376, %388 : vector<132x4xf32>
    %390 = arith.addf %366, %389 : vector<132x4xf32>
    %391 = vector.extract_strided_slice %296 {offsets = [7, 0], sizes = [1, 4], strides = [1, 1]} : vector<9x4xf32> to vector<1x4xf32>
    %392 = vector.broadcast %391 : vector<1x4xf32> to vector<132x4xf32>
    %393 = arith.mulf %303, %392 : vector<132x4xf32>
    %394 = arith.addf %390, %393 : vector<132x4xf32>
    %395 = vector.extract_strided_slice %296 {offsets = [8, 0], sizes = [1, 4], strides = [1, 1]} : vector<9x4xf32> to vector<1x4xf32>
    %396 = vector.broadcast %395 : vector<1x4xf32> to vector<132x4xf32>
    %397 = arith.mulf %386, %396 : vector<132x4xf32>
    %398 = arith.addf %394, %397 : vector<132x4xf32>
    %cst_134 = arith.constant dense<0.000000e+00> : vector<132xf32>
    %399 = vector.multi_reduction <add>, %398, %cst_134 [1] : vector<132x4xf32> to vector<132xf32>
    %400 = vector.shape_cast %399 : vector<132xf32> to vector<132x1xf32>
    %401 = vector.broadcast %297 : vector<1x1xf32> to vector<132x1xf32>
    %402 = arith.addf %400, %401 : vector<132x1xf32>
    %c0_135 = arith.constant 0 : index
    %c0_136 = arith.constant 0 : index
    %c0_137 = arith.constant 0 : index
    %403 = vector.load %arg27[%c0_135, %c0_136, %c0_137] : memref<1x132x1xf32, #tpu.memory_space<vmem>>, vector<1x132x1xf32>
    %404 = vector.shape_cast %403 : vector<1x132x1xf32> to vector<132x1xf32>
    %405 = vector.shape_cast %402 : vector<132x1xf32> to vector<1x132x1xf32>
    tpu.vector_store %arg27[%c0_135, %c0_136, %c0_137], %405 {strides = array<i32>} : memref<1x132x1xf32, #tpu.memory_space<vmem>>, vector<1x132x1xf32>,
    return
  }
  func.func @transform_0(%arg0: i32) -> (i32, i32, i32) {
    %c0_i32 = arith.constant 0 : i32
    %c0_i32_0 = arith.constant 0 : i32
    %c0_i32_1 = arith.constant 0 : i32
    return %arg0, %c0_i32, %c0_i32_0 : i32, i32, i32
  }
  func.func @transform_1(%arg0: i32) -> (i32, i32) {
    %c0_i32 = arith.constant 0 : i32
    %c0_i32_0 = arith.constant 0 : i32
    %c0_i32_1 = arith.constant 0 : i32
    return %c0_i32, %c0_i32_0 : i32, i32
  }
  func.func @transform_2(%arg0: i32) -> (i32, i32) {
    %c0_i32 = arith.constant 0 : i32
    %c0_i32_0 = arith.constant 0 : i32
    %c0_i32_1 = arith.constant 0 : i32
    return %c0_i32, %c0_i32_0 : i32, i32
  }
  func.func @transform_3(%arg0: i32) -> (i32, i32) {
    %c0_i32 = arith.constant 0 : i32
    %c0_i32_0 = arith.constant 0 : i32
    %c0_i32_1 = arith.constant 0 : i32
    return %c0_i32, %c0_i32_0 : i32, i32
  }
  func.func @transform_4(%arg0: i32) -> (i32, i32) {
    %c0_i32 = arith.constant 0 : i32
    %c0_i32_0 = arith.constant 0 : i32
    %c0_i32_1 = arith.constant 0 : i32
    return %c0_i32, %c0_i32_0 : i32, i32
  }
  func.func @transform_5(%arg0: i32) -> (i32, i32) {
    %c0_i32 = arith.constant 0 : i32
    %c0_i32_0 = arith.constant 0 : i32
    %c0_i32_1 = arith.constant 0 : i32
    return %c0_i32, %c0_i32_0 : i32, i32
  }
  func.func @transform_6(%arg0: i32) -> (i32, i32) {
    %c0_i32 = arith.constant 0 : i32
    %c0_i32_0 = arith.constant 0 : i32
    %c0_i32_1 = arith.constant 0 : i32
    return %c0_i32, %c0_i32_0 : i32, i32
  }
  func.func @transform_7(%arg0: i32) -> (i32, i32) {
    %c0_i32 = arith.constant 0 : i32
    %c0_i32_0 = arith.constant 0 : i32
    %c0_i32_1 = arith.constant 0 : i32
    return %c0_i32, %c0_i32_0 : i32, i32
  }
  func.func @transform_8(%arg0: i32) -> (i32, i32) {
    %c0_i32 = arith.constant 0 : i32
    %c0_i32_0 = arith.constant 0 : i32
    %c0_i32_1 = arith.constant 0 : i32
    return %c0_i32, %c0_i32_0 : i32, i32
  }
  func.func @transform_9(%arg0: i32) -> (i32, i32) {
    %c0_i32 = arith.constant 0 : i32
    %c0_i32_0 = arith.constant 0 : i32
    %c0_i32_1 = arith.constant 0 : i32
    return %c0_i32, %c0_i32_0 : i32, i32
  }
  func.func @transform_10(%arg0: i32) -> (i32, i32) {
    %c0_i32 = arith.constant 0 : i32
    %c0_i32_0 = arith.constant 0 : i32
    %c0_i32_1 = arith.constant 0 : i32
    return %c0_i32, %c0_i32_0 : i32, i32
  }
  func.func @transform_11(%arg0: i32) -> (i32, i32) {
    %c0_i32 = arith.constant 0 : i32
    %c0_i32_0 = arith.constant 0 : i32
    %c0_i32_1 = arith.constant 0 : i32
    return %c0_i32, %c0_i32_0 : i32, i32
  }
  func.func @transform_12(%arg0: i32) -> (i32, i32) {
    %c0_i32 = arith.constant 0 : i32
    %c0_i32_0 = arith.constant 0 : i32
    %c0_i32_1 = arith.constant 0 : i32
    return %c0_i32, %c0_i32_0 : i32, i32
  }
  func.func @transform_13(%arg0: i32) -> (i32, i32) {
    %c0_i32 = arith.constant 0 : i32
    %c0_i32_0 = arith.constant 0 : i32
    %c0_i32_1 = arith.constant 0 : i32
    return %c0_i32, %c0_i32_0 : i32, i32
  }
  func.func @transform_14(%arg0: i32) -> (i32, i32) {
    %c0_i32 = arith.constant 0 : i32
    %c0_i32_0 = arith.constant 0 : i32
    %c0_i32_1 = arith.constant 0 : i32
    return %c0_i32, %c0_i32_0 : i32, i32
  }
  func.func @transform_15(%arg0: i32) -> (i32, i32) {
    %c0_i32 = arith.constant 0 : i32
    %c0_i32_0 = arith.constant 0 : i32
    %c0_i32_1 = arith.constant 0 : i32
    return %c0_i32, %c0_i32_0 : i32, i32
  }
  func.func @transform_16(%arg0: i32) -> (i32, i32) {
    %c0_i32 = arith.constant 0 : i32
    %c0_i32_0 = arith.constant 0 : i32
    %c0_i32_1 = arith.constant 0 : i32
    return %c0_i32, %c0_i32_0 : i32, i32
  }
  func.func @transform_17(%arg0: i32) -> (i32, i32) {
    %c0_i32 = arith.constant 0 : i32
    %c0_i32_0 = arith.constant 0 : i32
    %c0_i32_1 = arith.constant 0 : i32
    return %c0_i32, %c0_i32_0 : i32, i32
  }
  func.func @transform_18(%arg0: i32) -> (i32, i32) {
    %c0_i32 = arith.constant 0 : i32
    %c0_i32_0 = arith.constant 0 : i32
    %c0_i32_1 = arith.constant 0 : i32
    return %c0_i32, %c0_i32_0 : i32, i32
  }
  func.func @transform_19(%arg0: i32) -> (i32, i32) {
    %c0_i32 = arith.constant 0 : i32
    %c0_i32_0 = arith.constant 0 : i32
    %c0_i32_1 = arith.constant 0 : i32
    return %c0_i32, %c0_i32_0 : i32, i32
  }
  func.func @transform_20(%arg0: i32) -> (i32, i32) {
    %c0_i32 = arith.constant 0 : i32
    %c0_i32_0 = arith.constant 0 : i32
    %c0_i32_1 = arith.constant 0 : i32
    return %c0_i32, %c0_i32_0 : i32, i32
  }
  func.func @transform_21(%arg0: i32) -> (i32, i32) {
    %c0_i32 = arith.constant 0 : i32
    %c0_i32_0 = arith.constant 0 : i32
    %c0_i32_1 = arith.constant 0 : i32
    return %c0_i32, %c0_i32_0 : i32, i32
  }
  func.func @transform_22(%arg0: i32) -> (i32, i32) {
    %c0_i32 = arith.constant 0 : i32
    %c0_i32_0 = arith.constant 0 : i32
    %c0_i32_1 = arith.constant 0 : i32
    return %c0_i32, %c0_i32_0 : i32, i32
  }
  func.func @transform_23(%arg0: i32) -> (i32, i32) {
    %c0_i32 = arith.constant 0 : i32
    %c0_i32_0 = arith.constant 0 : i32
    %c0_i32_1 = arith.constant 0 : i32
    return %c0_i32, %c0_i32_0 : i32, i32
  }
  func.func @transform_24(%arg0: i32) -> (i32, i32) {
    %c0_i32 = arith.constant 0 : i32
    %c0_i32_0 = arith.constant 0 : i32
    %c0_i32_1 = arith.constant 0 : i32
    return %c0_i32, %c0_i32_0 : i32, i32
  }
  func.func @transform_25(%arg0: i32) -> (i32, i32) {
    %c0_i32 = arith.constant 0 : i32
    %c0_i32_0 = arith.constant 0 : i32
    %c0_i32_1 = arith.constant 0 : i32
    return %c0_i32, %c0_i32_0 : i32, i32
  }
  func.func @transform_26(%arg0: i32) -> (i32, i32, i32) {
    %c0_i32 = arith.constant 0 : i32
    %c0_i32_0 = arith.constant 0 : i32
    %c0_i32_1 = arith.constant 0 : i32
    return %arg0, %c0_i32, %c0_i32_0 : i32, i32, i32
  }
}

</mosaic_0001>

<bundles_post_ra>
// kernel: net_forward.1
= control target key start
LH: loop header
LB: loop body
LE: loop exit
PB: predicated region body
PF: predicated region fallthrough
CT: control target
= control target key end

     0   :  { %s11230_s0 = inlined_call_operand.vmem [shape: f32[2,360,1], index: 0, kind: input, shape index: {}]   ;;  %s11231_s1 = inlined_call_operand.vmem [shape: f32[3,8], index: 1, kind: input, shape index: {}]   ;;  %s11232_s2 = inlined_call_operand.vmem [shape: f32[1,8], index: 2, kind: input, shape index: {}]   ;;  %s11233_s3 = inlined_call_operand.vmem [shape: f32[24,32], index: 3, kind: input, shape index: {}]   ;;  %s11234_s4 = inlined_call_operand.vmem [shape: f32[1,32], index: 4, kind: input, shape index: {}]   ;;  %s11235_s5 = inlined_call_operand.vmem [shape: f32[96,64], index: 5, kind: input, shape index: {}]   ;;  %s11236_s6 = inlined_call_operand.vmem [shape: f32[1,64], index: 6, kind: input, shape index: {}]   ;;  %s11237_s7 = inlined_call_operand.vmem [shape: f32[192,128], index: 7, kind: input, shape index: {}]   ;;  %s11238_s8 = inlined_call_operand.vmem [shape: f32[1,128], index: 8, kind: input, shape index: {}]   ;;  %s11239_s9 = inlined_call_operand.vmem [shape: f32[384,64], index: 9, kind: input, shape index: {}]   ;;  %s11240_s10 = inlined_call_operand.vmem [shape: f32[12,16], index: 10, kind: input, shape index: {}]   ;;  %s11241_s11 = inlined_call_operand.vmem [shape: f32[1,64], index: 11, kind: input, shape index: {}]   ;;  %s11242_s12 = inlined_call_operand.vmem [shape: f32[192,32], index: 12, kind: input, shape index: {}]   ;;  %s11243_s13 = inlined_call_operand.vmem [shape: f32[20,24], index: 13, kind: input, shape index: {}]   ;;  %s11244_s14 = inlined_call_operand.vmem [shape: f32[1,32], index: 14, kind: input, shape index: {}]   ;;  %s11245_s15 = inlined_call_operand.vmem [shape: f32[96,16], index: 15, kind: input, shape index: {}]   ;;  %s11246_s16 = inlined_call_operand.vmem [shape: f32[36,40], index: 16, kind: input, shape index: {}]   ;;  %s11247_s17 = inlined_call_operand.vmem [shape: f32[1,16], index: 17, kind: input, shape index: {}]   ;;  %s11248_s18 = inlined_call_operand.vmem [shape: f32[48,8], index: 18, kind: input, shape index: {}]   ;;  %s11249_s19 = inlined_call_operand.vmem [shape: f32[68,72], index: 19, kind: input, shape index: {}]   ;;  %s11250_s20 = inlined_call_operand.vmem [shape: f32[1,8], index: 20, kind: input, shape index: {}]   ;;  %s11251_s21 = inlined_call_operand.vmem [shape: f32[24,4], index: 21, kind: input, shape index: {}]   ;;  %s11252_s22 = inlined_call_operand.vmem [shape: f32[132,136], index: 22, kind: input, shape index: {}]   ;;  %s11253_s23 = inlined_call_operand.vmem [shape: f32[1,4], index: 23, kind: input, shape index: {}]   ;;  %s11254_s24 = inlined_call_operand.vmem [shape: f32[9,4], index: 24, kind: input, shape index: {}]   ;;  %s11255_s25 = inlined_call_operand.<no memory space> [shape: f32[1,1], index: 25, kind: input, shape index: {}]   ;;  %s11256_s26 = inlined_call_operand.vmem [shape: f32[2,132,1], index: 26, kind: output, shape index: {}]  }
   0x1   :  { %11274 = sst [smem:[#allocation12_spill]] %s11230_s0  ;;  %v31_v0 = vstv %s11255_s25 }
   0x2   :  { %11275 = sst [smem:[#allocation13_spill]] %s11231_s1  ;;  %32 = vst [vmem:[#allocation3] sm:$0x1] %v31_v0 }
   0x3   :  { %11276 = sst [smem:[#allocation14_spill]] %s11232_s2 }
   0x4   :  { %11277 = sst [smem:[#allocation15_spill]] %s11233_s3 }
   0x5   :  { %11278 = sst [smem:[#allocation16_spill]] %s11234_s4 }
   0x6   :  { %11279 = sst [smem:[#allocation17_spill]] %s11235_s5 }
   0x7   :  { %11280 = sst [smem:[#allocation18_spill]] %s11236_s6 }
   0x8   :  { %11281 = sst [smem:[#allocation19_spill]] %s11237_s7  ;;  %s8364_s7 = smov 0  }
   0x9   :  { %11282 = sst [smem:[#allocation20_spill]] %s11238_s8 }
   0xa   :  { %11283 = sst [smem:[#allocation21_spill]] %s11239_s9 }
   0xb   :  { %11284 = sst [smem:[#allocation22_spill]] %s11240_s10 }
   0xc LB: > { %s6720_s28 = sadd.s32 4294967295, %s8220_s7   ;;  %p6724_p0 = scmp.ge.s32.totalorder %s8220_s7, 1  ;;  %s8220_s7 = sphi %s8364_s7, %s38_s7  }
   0xd   : > { %p714_p1 = scmp.lt.s32.totalorder %s8220_s7, 3 }
   0xf   : > { %p715_p2 = pnand %p6724_p0, %p714_p1 }
  0x11   : > { %718 = sbr.rel (%p715_p2) target bundleno = 3939 (0xf63), region = 124 }
  0x18   : > { %p784_p3 = scmp.lt.s32.totalorder %s6720_s28, 1  ;;  %v8222_v1 = vmov 0   ;;  %s11285_s29 = sld [smem:[#allocation12_spill]]  ;;  %vm853_vm0 = vcmask 1040384   ;;  %vm994_vm1 = vcmask 1046528   ;;  %v8223_v41 = vmov 0.0  }
  0x19   : > { %8211 = vset.pattern.permute.xlu0 %v8222_v1  ;;  %8210 = vset.pattern.permute.xlu1 %v8222_v1  ;;  %s11286_s2 = sld [smem:[#allocation15_spill]]  ;;  %vm8224_vm2 = vmmov 0   ;;  %vm984_vm3 = vcmask 1041408   ;;  %vm986_vm4 = vcmask 1042432   ;;  %vm988_vm5 = vcmask 1043456   ;;  %s11287_s27 = sld [smem:[#allocation13_spill]] }
  0x1a   : > { %s11344_s28 = smov (!%p784_p3, %s6720_s28), 1  ;;  %7190 = vmatprep.subr.mxu0 %v8223_v41  ;;  %8156 = vmatprep.subr.mxu1 %v8223_v41  ;;  %vm990_vm6 = vcmask 1044480   ;;  %s11288_s8 = sld [smem:[#allocation14_spill]]  ;;  %vm1980_vm7 = vcmask 64512   ;;  %vm992_vm8 = vcmask 1045504   ;;  %vm2819_vm9 = vcmask 261120  }
  0x1b   : > { %s8196_s25 = smul.u32 360, %s11344_s28  ;;  %7192 = vmatprep.mubr.msk.f32.mxu0 %vm8224_vm2, %v8223_v41  ;;  %7245 = vmatprep.mubr.msk.f32.mxu1 %vm8224_vm2, %v8223_v41  ;;  %s11289_s10 = sld [smem:[#allocation17_spill]]  ;;  %vm3253_vm10 = vcmask 523264   ;;  %vm3818_vm11 = vcmask 130048   ;;  %vm4193_vm12 = vcmask 195584   ;;  %vm4595_vm13 = vcmask 326656  }
  0x1c   : > { %s11290_s9 = sld [smem:[#allocation16_spill]]  ;;  %s11291_s4 = sld [smem:[#allocation19_spill]]  ;;  %vm5068_vm14 = vcmask 588800   ;;  %vm6570_vm15 = vcmask 31744  }
  0x1d   : > { %s11293_s5 = sld [smem:[#allocation21_spill]]  ;;  %s11294_s3 = sld [smem:[#allocation20_spill]] }
  0x1e   : > { %s8378_s0 = scalar_lea.vmem %s11285_s29, %s8196_s25  ;;  %s11292_s29 = sld [smem:[#allocation18_spill]] }
  0x1f   : > { %v795_v2 = vld [vmem:[%s8378_s0 + $0x8] sm:$0xff]  ;;  %v794_v3 = vld [vmem:[%s8378_s0] sm:$0xff]  ;;  %v796_v4 = vld [vmem:[%s8378_s0 + $0x10] sm:$0xff] }
  0x20   : > { %1337 = vperm.xlu0 %8211, %v795_v2   ;;  %1333 = vperm.xlu1 %8210, %v794_v3   ;;  %v855_v5 = vrot.slane %v795_v2, 7  ;;  %v857_v6 = vrot.slane %v796_v4, 7  ;;  %v854_v7 = vrot.slane %v794_v3, 7  ;;  %v997_v9 = vrot.slane %v795_v2, 1  ;;  %v797_v14 = vld [vmem:[%s8378_s0 + $0x18] sm:$0xff]  ;;  %v798_v19 = vld [vmem:[%s8378_s0 + $0x20] sm:$0xff] }
  0x21   : > { %v996_v10 = vrot.slane %v794_v3, 1  ;;  %v999_v11 = vrot.slane %v796_v4, 1  ;;  %v859_v17 = vrot.slane %v797_v14, 7  ;;  %v1001_v18 = vrot.slane %v797_v14, 1  ;;  %v799_v20 = vld [vmem:[%s8378_s0 + $0x28] sm:$0xff]  ;;  %v800_v28 = vld [vmem:[%s8378_s0 + $0x30] sm:$0xff] }
  0x22   : > { %v983_v8 = vsel %vm853_vm0, 0.0, %v854_v7  ;;  %v858_v12 = vsel %vm853_vm0, %v855_v5, %v857_v6  ;;  %v856_v13 = vsel %vm853_vm0, %v854_v7, %v855_v5  ;;  %v861_v23 = vrot.slane %v798_v19, 7  ;;  %v801_v32 = vld [vmem:[%s8378_s0 + $0x38] sm:$0xff]  ;;  %v802_v37 = vld [vmem:[%s8378_s0 + $0x40] sm:$0xff]  ;;  %v2146_v42 = vld [vmem:[%s11286_s2 + $0x8] sm:$0xff] }
  0x23   : > { %v1000_v15 = vsel %vm994_vm1, %v997_v9, %v999_v11  ;;  %v998_v16 = vsel %vm994_vm1, %v996_v10, %v997_v9  ;;  %v860_v21 = vsel %vm853_vm0, %v857_v6, %v859_v17  ;;  %v1002_v22 = vsel %vm994_vm1, %v999_v11, %v1001_v18  ;;  %7191 = vmatpush3.msra.mxu0 %v2146_v42  ;;  %v804_v44 = vld [vmem:[%s8378_s0 + $0x50] sm:$0xff]  ;;  %v805_v45 = vld [vmem:[%s8378_s0 + $0x58] sm:$0xff]  ;;  %v803_v48 = vld [vmem:[%s8378_s0 + $0x48] sm:$0xff] }
  0x24   : > { %1341 = vperm.xlu1 %8210, %v796_v4   ;;  %1101 = vperm.xlu0 %8211, %v983_v8   ;;  %v863_v24 = vrot.slane %v799_v20, 7  ;;  %v862_v26 = vsel %vm853_vm0, %v859_v17, %v861_v23  ;;  %v1003_v27 = vrot.slane %v798_v19, 1  ;;  %v1005_v30 = vrot.slane %v799_v20, 1  ;;  %v806_v61 = vld [vmem:[%s8378_s0 + $0x60] sm:$0xff]  ;;  %v807_v4 = vld [vmem:[%s8378_s0 + $0x68] sm:$0xff]  ;;  %v808_v9 = vld [vmem:[%s8378_s0 + $0x70] sm:$0xff] }
  0x25   : > { %v1007_v31 = vrot.slane %v800_v28, 1  ;;  %v865_v35 = vrot.slane %v800_v28, 7  ;;  %v867_v36 = vrot.slane %v801_v32, 7  ;;  %v869_v40 = vrot.slane %v802_v37, 7  ;;  %7237 = vmatprep.subr.mxu0 %v8223_v41  ;;  %v809_v17 = vld [vmem:[%s8378_s0 + $0x78] sm:$0xff] }
  0x26   : > { %v864_v25 = vsel %vm853_vm0, %v861_v23, %v863_v24  ;;  %v1004_v29 = vsel %vm994_vm1, %v1001_v18, %v1003_v27  ;;  %v1006_v34 = vsel %vm994_vm1, %v1003_v27, %v1005_v30  ;;  %v1009_v46 = vrot.slane %v801_v32, 1  ;;  %v811_v23 = vld [vmem:[%s8378_s0 + $0x88] sm:$0xff] }
  0x27   : > { %v1008_v33 = vsel %vm994_vm1, %v1005_v30, %v1007_v31  ;;  %v868_v38 = vsel %vm853_vm0, %v865_v35, %v867_v36  ;;  %v866_v39 = vsel %vm853_vm0, %v863_v24, %v865_v35  ;;  %v870_v43 = vsel %vm853_vm0, %v867_v36, %v869_v40  ;;  %v813_v35 = vld [vmem:[%s8378_s0 + $0x98] sm:$0xff] }
  0x28   : > { %1109 = vperm.xlu1 %8210, %v858_v12   ;;  %1105 = vperm.xlu0 %8211, %v856_v13   ;;  %v1011_v47 = vrot.slane %v802_v37, 1  ;;  %v873_v49 = vrot.slane %v804_v44, 7  ;;  %v875_v50 = vrot.slane %v805_v45, 7  ;;  %v1010_v52 = vsel %vm994_vm1, %v1007_v31, %v1009_v46  ;;  %v812_v31 = vld [vmem:[%s8378_s0 + $0x90] sm:$0xff] }
  0x29   : > { %v871_v53 = vrot.slane %v803_v48, 7  ;;  %v1013_v54 = vrot.slane %v803_v48, 1  ;;  %v1015_v62 = vrot.slane %v804_v44, 1  ;;  %v1017_v63 = vrot.slane %v805_v45, 1 }
  0x2a   : > { %v1012_v51 = vsel %vm994_vm1, %v1009_v46, %v1011_v47  ;;  %v876_v55 = vsel %vm853_vm0, %v873_v49, %v875_v50  ;;  %v1020_v0 = vrot.slane %v806_v61, 1  ;;  %v890_v7 = vrot.slane %v806_v61, 7  ;;  %v816_v46 = vld [vmem:[%s8378_s0 + $0xb0] sm:$0xff] }
  0x2b   : > { %v872_v56 = vsel %vm853_vm0, %v869_v40, %v871_v53  ;;  %v1014_v57 = vsel %vm994_vm1, %v1011_v47, %v1013_v54  ;;  %v985_v58 = vsel %vm984_vm3, %v876_v55, 0.0  ;;  %v874_v60 = vsel %vm853_vm0, %v871_v53, %v873_v49  ;;  %v814_v40 = vld [vmem:[%s8378_s0 + $0xa0] sm:$0xff]  ;;  %v815_v49 = vld [vmem:[%s8378_s0 + $0xa8] sm:$0xff]  ;;  %v8465_v55 = vld [vmem:[%s8378_s0 + $0xb8] sm:$0xff] }
  0x2c   : > { %1611 = vperm.xlu1 %8210, %v1000_v15   ;;  %1607 = vperm.xlu0 %8211, %v998_v16   ;;  %v987_v59 = vsel %vm986_vm4, %v985_v58, %v875_v50  ;;  %v1016_v1 = vsel %vm994_vm1, %v1013_v54, %v1015_v62  ;;  %v1021_v2 = vsel %vm994_vm1, %v1017_v63, %v1020_v0  ;;  %v1092_v3 = vsel %vm853_vm0, %v1017_v63, 0.0 }
  0x2d   : > { %v1093_v5 = vsel %vm984_vm3, %v1092_v3, %v1021_v2  ;;  %v1018_v6 = vsel %vm994_vm1, %v1015_v62, %v1017_v63  ;;  %v892_v8 = vrot.slane %v807_v4, 7  ;;  %v891_v11 = vsel %vm853_vm0, %v875_v50, %v890_v7 }
  0x2e   : > { %v894_v12 = vrot.slane %v808_v9, 7  ;;  %v1022_v15 = vrot.slane %v807_v4, 1  ;;  %v1024_v16 = vrot.slane %v808_v9, 1  ;;  %v900_v27 = vrot.slane %v811_v23, 7 }
  0x2f   : > { %v893_v10 = vsel %vm853_vm0, %v890_v7, %v892_v8  ;;  %v1034_v47 = vrot.slane %v813_v35, 1  ;;  %v910_v50 = vrot.slane %v816_v46, 7  ;;  %v908_v53 = vrot.slane %v815_v49, 7  ;;  %v8482_v7 = vld [vmem:[%s8378_s0 + $0xc0] sm:$0xff] }
  0x30   : > { %1113 = vperm.xlu1 %8210, %v860_v21   ;;  %1615 = vperm.xlu0 %8211, %v1002_v22   ;;  %v895_v13 = vsel %vm853_vm0, %v892_v8, %v894_v12  ;;  %v1025_v18 = vsel %vm994_vm1, %v1022_v15, %v1024_v16  ;;  %v1026_v21 = vrot.slane %v809_v17, 1  ;;  %v810_v22 = vld [vmem:[%s8378_s0 + $0x80] sm:$0xff]  ;;  %v1038_v54 = vrot.slane %v815_v49, 1 }
  0x31   : > { %v1028_v30 = vrot.slane %v810_v22, 1  ;;  %v1044_v8 = vrot.slane %v8465_v55, 1 }
  0x34   : > { %1121 = vperm.xlu1 %8210, %v864_v25   ;;  %1117 = vperm.xlu0 %8211, %v862_v26   ;;  %v1027_v25 = vsel %vm994_vm1, %v1024_v16, %v1026_v21  ;;  %v898_v26 = vrot.slane %v810_v22, 7  ;;  %v1046_v16 = vrot.slane %v8482_v7, 1 }
  0x38   : > { %1349 = vperm.xlu1 %8210, %v798_v19   ;;  %1345 = vperm.xlu0 %8211, %v797_v14   ;;  %v8439_v14 = vld [vmem:[%s11286_s2] sm:$0xff]  ;;  %v1023_v19 = vsel %vm994_vm1, %v1020_v0, %v1022_v15 }
  0x39   : > { %8157 = vmatpush3.msra.mxu1 %v8439_v14 }
  0x3c   : > { %1619 = vperm.xlu1 %8210, %v1004_v29   ;;  %1353 = vperm.xlu0 %8211, %v799_v20   ;;  %v896_v20 = vrot.slane %v809_v17, 7 }
  0x3e   : > { %v897_v24 = vsel %vm853_vm0, %v894_v12, %v896_v20  ;;  %v899_v29 = vsel %vm853_vm0, %v896_v20, %v898_v26 }
  0x40   : > { %1627 = vperm.xlu1 %8210, %v1008_v33   ;;  %1623 = vperm.xlu0 %8211, %v1006_v34   ;;  %v1030_v33 = vrot.slane %v811_v23, 1  ;;  %v1032_v34 = vrot.slane %v812_v31, 1 }
  0x42   : > { %v1033_v36 = vsel %vm994_vm1, %v1030_v33, %v1032_v34 }
  0x44   : > { %1129 = vperm.xlu1 %8210, %v868_v38   ;;  %1125 = vperm.xlu0 %8211, %v866_v39   ;;  %v902_v38 = vrot.slane %v812_v31, 7  ;;  %v904_v39 = vrot.slane %v813_v35, 7 }
  0x46   : > { %v905_v42 = vsel %vm853_vm0, %v902_v38, %v904_v39 }
  0x48   : > { %1357 = vperm.xlu1 %8210, %v800_v28   ;;  %1133 = vperm.xlu0 %8211, %v870_v43   ;;  %v901_v28 = vsel %vm853_vm0, %v898_v26, %v900_v27  ;;  %v903_v43 = vsel %vm853_vm0, %v900_v27, %v902_v38  ;;  %v1047_v26 = vsel %vm994_vm1, %v1044_v8, %v1046_v16 }
  0x4c   : > { %1365 = vperm.xlu1 %8210, %v802_v37   ;;  %1361 = vperm.xlu0 %8211, %v801_v32   ;;  %v1029_v32 = vsel %vm994_vm1, %v1026_v21, %v1028_v30  ;;  %v1031_v37 = vsel %vm994_vm1, %v1028_v30, %v1030_v33 }
  0x50   : > { %1635 = vperm.xlu1 %8210, %v1012_v51   ;;  %1631 = vperm.xlu0 %8211, %v1010_v52   ;;  %v1035_v52 = vsel %vm994_vm1, %v1032_v34, %v1034_v47 }
  0x54   : > { %1137 = vperm.xlu1 %8210, %v872_v56   ;;  %1639 = vperm.xlu0 %8211, %v1014_v57   ;;  %v911_v56 = vsel %vm853_vm0, %v908_v53, %v910_v50 }
  0x58   : > { %1146 = vperm.xlu1 %8210, %v987_v59   ;;  %1141 = vperm.xlu0 %8211, %v874_v60   ;;  %v1283_v59 = vlaneseq  ;;  %v925_v60 = vrot.slane %v8465_v55, 7 }
  0x5a   : > { %v8472_v62 = vshrl.u32 %v1283_v59, 7  ;;  %v926_v63 = vsel %vm853_vm0, %v910_v50, %v925_v60 }
  0x5c   : > { %1373 = vperm.xlu1 %8210, %v804_v44   ;;  %1369 = vperm.xlu0 %8211, %v803_v48   ;;  %v906_v44 = vrot.slane %v814_v40, 7  ;;  %v1036_v48 = vrot.slane %v814_v40, 1  ;;  %v1285_v3 = vsub.s32 0, %v8472_v62  ;;  %v1792_v12 = vsub.s32 2, %v8472_v62 }
  0x5e   : > { %v1037_v51 = vsel %vm994_vm1, %v1034_v47, %v1036_v48  ;;  %v909_v57 = vsel %vm853_vm0, %v906_v44, %v908_v53  ;;  %v1039_v58 = vsel %vm994_vm1, %v1036_v48, %v1038_v54 }
  0x60   : > { %1643 = vperm.xlu1 %8210, %v1016_v1   ;;  %1377 = vperm.xlu0 %8211, %v805_v45   ;;  %v907_v45 = vsel %vm853_vm0, %v904_v39, %v906_v44  ;;  %v8525_v39 = vld [vmem:[%s11288_s8] ss:$0 sm:$0xff] }
  0x64   : > { %1652 = vperm.xlu1 %8210, %v1093_v5   ;;  %1647 = vperm.xlu0 %8211, %v1018_v6   ;;  %v1040_v5 = vrot.slane %v816_v46, 1  ;;  %v839_v6 = vld [vmem:[%s11287_s27] sm:$0x7] }
  0x66   : > { %v1041_v15 = vsel %vm994_vm1, %v1038_v54, %v1040_v5 }
  0x68   : > { %1154 = vperm.xlu1 %8210, %v893_v10   ;;  %1150 = vperm.xlu0 %8211, %v891_v11   ;;  %v8487_v10 = vrot.slane %v839_v6, %v1285_v3 }
  0x6c   : > { %1381 = vperm.xlu1 %8210, %v806_v61   ;;  %1158 = vperm.xlu0 %8211, %v895_v13   ;;  %v989_v61 = vsel %vm988_vm5, %v911_v56, 0.0 }
  0x6d   : > { %v991_v0 = vsel %vm990_vm6, %v989_v61, %v910_v50 }
  0x70   : > { %1389 = vperm.xlu1 %8210, %v808_v9   ;;  %1385 = vperm.xlu0 %8211, %v807_v4   ;;  %v1514_v4 = vsub.s32 1, %v8472_v62 }
  0x72   : > { %v8492_v13 = vrot.slane %v839_v6, %v1514_v4 }
  0x74   : > { %1660 = vperm.xlu1 %8210, %v1025_v18   ;;  %1656 = vperm.xlu0 %8211, %v1023_v19   ;;  %v1094_v18 = vsel %vm986_vm4, %v1040_v5, 0.0  ;;  %v8499_v19 = vld [vmem:[%s8378_s0 + $0xc8] sm:$0xff] }
  0x78   : > { %1162 = vperm.xlu1 %8210, %v897_v24   ;;  %1664 = vperm.xlu0 %8211, %v1027_v25   ;;  %v8507_v25 = vrot.slane %v839_v6, %v1792_v12 }
  0x7c   : > { %1170 = vperm.xlu1 %8210, %v901_v28   ;;  %1166 = vperm.xlu0 %8211, %v899_v29   ;;  %v927_v28 = vrot.slane %v8482_v7, 7  ;;  %v929_v29 = vrot.slane %v8499_v19, 7 }
  0x80   : > { %1397 = vperm.xlu1 %8210, %v810_v22   ;;  %1393 = vperm.xlu0 %8211, %v809_v17   ;;  %v1045_v17 = vsel %vm994_vm1, %v1040_v5, %v1044_v8 }
  0x81   : > { %v1095_v27 = vsel %vm988_vm5, %v1094_v18, %v1045_v17  ;;  %v8556_v17 = vld [vmem:[%s8378_s0 + $0xe0] sm:$0xff]  ;;  %v8559_v18 = vld [vmem:[%s8378_s0 + $0xe8] sm:$0xff] }
  0x84   : > { %1668 = vperm.xlu1 %8210, %v1029_v32   ;;  %1401 = vperm.xlu0 %8211, %v811_v23  }
  0x88   : > { %1676 = vperm.xlu1 %8210, %v1033_v36   ;;  %1672 = vperm.xlu0 %8211, %v1031_v37  }
  0x8c   : > { %1178 = vperm.xlu1 %8210, %v905_v42   ;;  %1174 = vperm.xlu0 %8211, %v903_v43  }
  0x90   : > { %1405 = vperm.xlu1 %8210, %v812_v31   ;;  %1182 = vperm.xlu0 %8211, %v907_v45   ;;  %v8517_v31 = vld [vmem:[%s8378_s0 + $0xd0] sm:$0xff] }
  0x91   : > { %v931_v42 = vrot.slane %v8517_v31, 7  ;;  %v1050_v61 = vrot.slane %v8517_v31, 1 }
  0x93   : > { %v932_v56 = vsel %vm853_vm0, %v929_v29, %v931_v42 }
  0x94   : > { %1413 = vperm.xlu1 %8210, %v814_v40   ;;  %1409 = vperm.xlu0 %8211, %v813_v35   ;;  %v930_v40 = vsel %vm853_vm0, %v927_v28, %v929_v29 }
  0x98   : > { %1684 = vperm.xlu1 %8210, %v1037_v51   ;;  %1680 = vperm.xlu0 %8211, %v1035_v52  }
  0x9c   : > { %1186 = vperm.xlu1 %8210, %v909_v57   ;;  %1688 = vperm.xlu0 %8211, %v1039_v58  }
  0x9f   : > { %v1338_v1 = vpop.permute.xlu0 %1337  ;;  %v1334_v2 = vpop.permute.xlu1 %1333 }
  0xa0   : > { %1195 = vperm.xlu1 %8210, %v926_v63   ;;  %1191 = vperm.xlu0 %8211, %v991_v0   ;;  %v1516_v20 = vmul.f32 %v8492_v13, %v1334_v2  ;;  %v1517_v30 = vmul.f32 %v8492_v13, %v1338_v1  ;;  %v8542_v63 = vld [vmem:[%s8378_s0 + $0xd8] sm:$0xff] }
  0xa1   : > { %v933_v6 = vrot.slane %v8542_v63, 7 }
  0xa3   : > { %v1342_v9 = vpop.permute.xlu1 %1341  ;;  %v1102_v11 = vpop.permute.xlu0 %1101 }
  0xa4   : > { %1421 = vperm.xlu1 %8210, %v816_v46   ;;  %1417 = vperm.xlu0 %8211, %v815_v49   ;;  %v1287_v21 = vmul.f32 %v8487_v10, %v1102_v11  ;;  %v1518_v43 = vmul.f32 %v8492_v13, %v1342_v9  ;;  %v928_v46 = vsel %vm853_vm0, %v925_v60, %v927_v28  ;;  %v1048_v60 = vrot.slane %v8499_v19, 1 }
  0xa5   : > { %v937_v28 = vrot.slane %v8559_v18, 7 }
  0xa6   : > { %v1561_v32 = vadd.f32 %v1516_v20, %v1287_v21  ;;  %v1051_v8 = vsel %vm994_vm1, %v1048_v60, %v1050_v61  ;;  %v1049_v11 = vsel %vm994_vm1, %v1046_v16, %v1048_v60 }
  0xa7   : > { %v1110_v22 = vpop.permute.xlu1 %1109  ;;  %v1106_v23 = vpop.permute.xlu0 %1105 }
  0xa8   : > { %v1288_v24 = vmul.f32 %v8487_v10, %v1106_v23  ;;  %1692 = vperm.xlu1 %8210, %v1041_v15   ;;  %1425 = vperm.xlu0 %8211, %v8465_v55   ;;  %v1289_v33 = vmul.f32 %v8487_v10, %v1110_v22  ;;  %v1052_v15 = vrot.slane %v8542_v63, 1 }
  0xaa   : > { %v1562_v36 = vadd.f32 %v1517_v30, %v1288_v24  ;;  %v1563_v49 = vadd.f32 %v1518_v43, %v1289_v33  ;;  %v1053_v30 = vsel %vm994_vm1, %v1050_v61, %v1052_v15  ;;  %v1056_v61 = vrot.slane %v8559_v18, 1 }
  0xab   : > { %v1612_v34 = vpop.permute.xlu1 %1611  ;;  %v1608_v35 = vpop.permute.xlu0 %1607 }
  0xac   : > { %v1795_v37 = vmul.f32 %v8507_v25, %v1612_v34  ;;  %v1794_v38 = vmul.f32 %v8507_v25, %v1608_v35  ;;  %1701 = vperm.xlu1 %8210, %v1047_v26   ;;  %1697 = vperm.xlu0 %8211, %v1095_v27   ;;  %v935_v27 = vrot.slane %v8556_v17, 7 }
  0xae   : > { %v1840_v44 = vadd.f32 %v1795_v37, %v1562_v36  ;;  %v1839_v45 = vadd.f32 %v1794_v38, %v1561_v32  ;;  %v938_v43 = vsel %vm853_vm0, %v935_v27, %v937_v28 }
  0xaf   : > { %v1114_v47 = vpop.permute.xlu1 %1113  ;;  %v1616_v48 = vpop.permute.xlu0 %1615 }
  0xb0   : > { %v1891_v50 = vadd.f32 %v8525_v39, %v1840_v44  ;;  %v1890_v51 = vadd.f32 %v8525_v39, %v1839_v45  ;;  %v1796_v52 = vmul.f32 %v8507_v25, %v1616_v48  ;;  %1203 = vperm.xlu1 %8210, %v930_v40   ;;  %1199 = vperm.xlu0 %8211, %v928_v46  }
  0xb1   : > { %v1290_v9 = vmul.f32 %v8487_v10, %v1114_v47  ;;  %v936_v44 = vsel %vm853_vm0, %v933_v6, %v935_v27 }
  0xb2   : > { %v1936_v53 = vmax.f32 %v1891_v50, 0.0  ;;  %v1935_v54 = vmax.f32 %v1890_v51, 0.0  ;;  %v1841_v55 = vadd.f32 %v1796_v52, %v1563_v49 }
  0xb3   : > { %v1122_v57 = vpop.permute.xlu1 %1121  ;;  %v1118_v58 = vpop.permute.xlu0 %1117 }
  0xb4   : > { %1982 = vst.msk [vmem:[#allocation2 + $0x8] sm:$0xff] %vm1980_vm7, %v1936_v53  ;;  %1981 = vst.msk [vmem:[#allocation2] sm:$0xff] %vm1980_vm7, %v1935_v54  ;;  %v1892_v59 = vadd.f32 %v8525_v39, %v1841_v55  ;;  %1429 = vperm.xlu1 %8210, %v8482_v7   ;;  %1207 = vperm.xlu0 %8211, %v932_v56   ;;  %v934_v7 = vsel %vm853_vm0, %v931_v42, %v933_v6  ;;  %v1054_v54 = vrot.slane %v8556_v17, 1 }
  0xb5   : > { %v1292_v16 = vmul.f32 %v8487_v10, %v1122_v57  ;;  %v1291_v26 = vmul.f32 %v8487_v10, %v1118_v58  ;;  %v8586_v57 = vld [vmem:[%s8378_s0 + $0xf0] sm:$0xff] }
  0xb6   : > { %v1937_v0 = vmax.f32 %v1892_v59, 0.0  ;;  %v1055_v60 = vsel %vm994_vm1, %v1052_v15, %v1054_v54 }
  0xb7   : > { %v1350_v1 = vpop.permute.xlu1 %1349  ;;  %v1346_v2 = vpop.permute.xlu0 %1345 }
  0xb8   : > { %1983 = vst.msk [vmem:[#allocation2 + $0x10] sm:$0xff] %vm1980_vm7, %v1937_v0  ;;  %v1519_v5 = vmul.f32 %v8492_v13, %v1346_v2  ;;  %1437 = vperm.xlu1 %8210, %v8517_v31   ;;  %1433 = vperm.xlu0 %8211, %v8499_v19   ;;  %v1520_v20 = vmul.f32 %v8492_v13, %v1350_v1  ;;  %v1058_v0 = vrot.slane %v8586_v57, 1 }
  0xba   : > { %v1564_v23 = vadd.f32 %v1519_v5, %v1290_v9  ;;  %v1565_v31 = vadd.f32 %v1520_v20, %v1291_v26  ;;  %v1057_v20 = vsel %vm994_vm1, %v1054_v54, %v1056_v61 }
  0xbb   : > { %v1620_v21 = vpop.permute.xlu1 %1619  ;;  %v1354_v22 = vpop.permute.xlu0 %1353 }
  0xbc   : > { %v1797_v19 = vmul.f32 %v8507_v25, %v1620_v21  ;;  %v1521_v24 = vmul.f32 %v8492_v13, %v1354_v22  ;;  %1709 = vperm.xlu1 %8210, %v1051_v8   ;;  %1705 = vperm.xlu0 %8211, %v1049_v11   ;;  %v8605_v8 = vld [vmem:[%s8378_s0 + $0x100] sm:$0xff]  ;;  %v939_v11 = vrot.slane %v8586_v57, 7 }
  0xbe   : > { %v1842_v29 = vadd.f32 %v1797_v19, %v1564_v23  ;;  %v1566_v32 = vadd.f32 %v1521_v24, %v1292_v16  ;;  %v943_v16 = vrot.slane %v8605_v8, 7 }
  0xbf   : > { %v1628_v33 = vpop.permute.xlu1 %1627  ;;  %v1624_v34 = vpop.permute.xlu0 %1623  ;;  %v2026_v35 = vld [vmem:[#allocation2] ss:$3 sm:$0xff]  ;;  %v2056_v36 = vld [vmem:[#allocation2 + $0x1] ss:$3 sm:$0xff]  ;;  %v2101_v45 = vld [vmem:[#allocation2 + $0x2] ss:$3 sm:$0xff] }
  0xc0   : > { %v1893_v37 = vadd.f32 %v8525_v39, %v1842_v29  ;;  %v1799_v38 = vmul.f32 %v8507_v25, %v1628_v33  ;;  %v1798_v40 = vmul.f32 %v8507_v25, %v1624_v34  ;;  %1211 = vperm.xlu1 %8210, %v934_v7   ;;  %v2085_v42 = vmax.f32 %v2026_v35, %v2056_v36 }
  0xc1   : > { %1713 = vperm.xlu0 %8211, %v1053_v30  }
  0xc2   : > { %v1938_v46 = vmax.f32 %v1893_v37, 0.0  ;;  %v1844_v47 = vadd.f32 %v1799_v38, %v1566_v32  ;;  %v1843_v48 = vadd.f32 %v1798_v40, %v1565_v31  ;;  %v8577_v49 = vmax.f32 %v2085_v42, %v2101_v45 }
  0xc3   : > { %v1130_v50 = vpop.permute.xlu1 %1129  ;;  %v1126_v51 = vpop.permute.xlu0 %1125  ;;  %v940_v32 = vsel %vm853_vm0, %v937_v28, %v939_v11 }
  0xc4   : > { %1984 = vst.msk [vmem:[#allocation2 + $0x18] sm:$0xff] %vm1980_vm7, %v1938_v46  ;;  %v1895_v52 = vadd.f32 %v8525_v39, %v1844_v47  ;;  %v1894_v53 = vadd.f32 %v8525_v39, %v1843_v48  ;;  %1219 = vperm.xlu1 %8210, %v938_v43   ;;  %7193 = vmatmul.mubr.msk.f32.vlgmr.msra.gmra.mrb[0].mxu0 %vm1980_vm7, %v8577_v49  ;;  %v8629_v43 = vld [vmem:[%s8378_s0 + $0x108] sm:$0xff]  ;;  %v2207_v46 = vrot.slane %v8577_v49, 1 }
  0xc5   : > { %1215 = vperm.xlu0 %8211, %v936_v44   ;;  %7195 = vmatprep.mubr.msk.f32.mxu0 %vm8224_vm2, %v8223_v41  ;;  %v1293_v9 = vmul.f32 %v8487_v10, %v1126_v51  ;;  %v945_v54 = vrot.slane %v8629_v43, 7 }
  0xc6   : > { %v1940_v55 = vmax.f32 %v1895_v52, 0.0  ;;  %v1939_v56 = vmax.f32 %v1894_v53, 0.0  ;;  %7238 = vmatpush3.msra.mxu0 %v8439_v14  ;;  %v8600_v14 = vld [vmem:[%s8378_s0 + $0xf8] sm:$0xff] }
  0xc7   : > { %v1358_v58 = vpop.permute.xlu1 %1357  ;;  %v1134_v59 = vpop.permute.xlu0 %1133  ;;  %7284 = vmatprep.subr.mxu0 %v8223_v41  ;;  %v941_v15 = vrot.slane %v8600_v14, 7 }
  0xc8   : > { %1986 = vst.msk [vmem:[#allocation2 + $0x28] sm:$0xff] %vm1980_vm7, %v1940_v55  ;;  %1985 = vst.msk [vmem:[#allocation2 + $0x20] sm:$0xff] %vm1980_vm7, %v1939_v56  ;;  %1445 = vperm.xlu1 %8210, %v8556_v17   ;;  %v1522_v1 = vmul.f32 %v8492_v13, %v1358_v58  ;;  %v1294_v17 = vmul.f32 %v8487_v10, %v1130_v50  ;;  %v1295_v34 = vmul.f32 %v8487_v10, %v1134_v59 }
  0xc9   : > { %1441 = vperm.xlu0 %8211, %v8542_v63   ;;  %v1059_v63 = vsel %vm994_vm1, %v1056_v61, %v1058_v0  ;;  %v942_v31 = vsel %vm853_vm0, %v939_v11, %v941_v15  ;;  %v944_v42 = vsel %vm853_vm0, %v941_v15, %v943_v16  ;;  %v2153_v50 = vrot.slane %v8577_v49, 7 }
  0xca   : > { %v1567_v21 = vadd.f32 %v1522_v1, %v1293_v9  ;;  %v1060_v61 = vrot.slane %v8600_v14, 1  ;;  %v1062_v1 = vrot.slane %v8605_v8, 1 }
  0xcb   : > { %v1366_v2 = vpop.permute.xlu1 %1365  ;;  %v1362_v5 = vpop.permute.xlu0 %1361 }
  0xcc   : > { %v1523_v6 = vmul.f32 %v8492_v13, %v1362_v5  ;;  %1717 = vperm.xlu1 %8210, %v1055_v60   ;;  %v1524_v22 = vmul.f32 %v8492_v13, %v1366_v2  ;;  %v946_v5 = vsel %vm853_vm0, %v943_v16, %v945_v54  ;;  %v1063_v11 = vsel %vm994_vm1, %v1060_v61, %v1062_v1 }
  0xcd   : > { %1449 = vperm.xlu0 %8211, %v8559_v18   ;;  %v993_v15 = vsel %vm992_vm8, %v946_v5, 0.0 }
  0xce   : > { %v1568_v26 = vadd.f32 %v1523_v6, %v1294_v17  ;;  %v1569_v44 = vadd.f32 %v1524_v22, %v1295_v34  ;;  %v8674_v22 = vld [vmem:[%s8378_s0 + $0x110] sm:$0xff] }
  0xcf   : > { %v1636_v23 = vpop.permute.xlu1 %1635  ;;  %v1632_v19 = vpop.permute.xlu0 %1631  ;;  %v2028_v24 = vld [vmem:[#allocation2 + $0x18] ss:$3 sm:$0xff]  ;;  %v2058_v7 = vld [vmem:[#allocation2 + $0x19] ss:$3 sm:$0xff]  ;;  %v2103_v33 = vld [vmem:[#allocation2 + $0x1a] ss:$3 sm:$0xff] }
  0xd0   : > { %v1801_v27 = vmul.f32 %v8507_v25, %v1636_v23  ;;  %v1800_v29 = vmul.f32 %v8507_v25, %v1632_v19  ;;  %1725 = vperm.xlu1 %8210, %v1059_v63   ;;  %v2086_v30 = vmax.f32 %v2028_v24, %v2058_v7  ;;  %v8677_v23 = vld [vmem:[%s8378_s0 + $0x118] sm:$0xff] }
  0xd1   : > { %1721 = vperm.xlu0 %8211, %v1057_v20   ;;  %v1061_v20 = vsel %vm994_vm1, %v1058_v0, %v1060_v61 }
  0xd2   : > { %v1846_v35 = vadd.f32 %v1801_v27, %v1568_v26  ;;  %v1845_v36 = vadd.f32 %v1800_v29, %v1567_v21  ;;  %v8625_v37 = vmax.f32 %v2086_v30, %v2103_v33  ;;  %v1064_v21 = vrot.slane %v8629_v43, 1 }
  0xd3   : > { %v1138_v38 = vpop.permute.xlu1 %1137  ;;  %v1640_v40 = vpop.permute.xlu0 %1639  ;;  %v960_v27 = vrot.slane %v8674_v22, 7  ;;  %v962_v29 = vrot.slane %v8677_v23, 7 }
  0xd4   : > { %v1897_v45 = vadd.f32 %v8525_v39, %v1846_v35  ;;  %v1896_v18 = vadd.f32 %v8525_v39, %v1845_v36  ;;  %v1802_v28 = vmul.f32 %v8507_v25, %v1640_v40  ;;  %1227 = vperm.xlu1 %8210, %v942_v31   ;;  %v2208_v47 = vrot.slane %v8625_v37, 1  ;;  %7196 = vmatmul.mubr.msk.f32.gmra.mrb[2].mxu0 %vm1980_vm7, %v8625_v37 }
  0xd5   : > { %1223 = vperm.xlu0 %8211, %v940_v32   ;;  %v2154_v48 = vrot.slane %v8625_v37, 7  ;;  %7198 = vmatprep.mubr.msk.f32.mxu0 %vm8224_vm2, %v8223_v41  ;;  %v1296_v17 = vmul.f32 %v8487_v10, %v1138_v38  ;;  %v1065_v31 = vsel %vm994_vm1, %v1062_v1, %v1064_v21 }
  0xd6   : > { %v1942_v51 = vmax.f32 %v1897_v45, 0.0  ;;  %v1941_v52 = vmax.f32 %v1896_v18, 0.0  ;;  %v1847_v53 = vadd.f32 %v1802_v28, %v1569_v44  ;;  %v8653_v59 = vsel %vm994_vm1, %v2207_v46, %v2208_v47 }
  0xd7   : > { %v1147_v55 = vpop.permute.xlu1 %1146  ;;  %v1142_v56 = vpop.permute.xlu0 %1141  ;;  %v8648_v58 = vsel %vm853_vm0, %v2153_v50, %v2154_v48  ;;  %v963_v18 = vsel %vm853_vm0, %v960_v27, %v962_v29  ;;  %v961_v28 = vsel %vm853_vm0, %v945_v54, %v960_v27 }
  0xd8   : > { %1988 = vst.msk [vmem:[#allocation2 + $0x38] sm:$0xff] %vm1980_vm7, %v1942_v51  ;;  %1987 = vst.msk [vmem:[#allocation2 + $0x30] sm:$0xff] %vm1980_vm7, %v1941_v52  ;;  %v1898_v60 = vadd.f32 %v8525_v39, %v1847_v53  ;;  %1453 = vperm.xlu1 %8210, %v8586_v57   ;;  %v995_v57 = vsel %vm994_vm1, %v993_v15, %v945_v54  ;;  %v1298_v0 = vmul.f32 %v8487_v10, %v1147_v55  ;;  %v8708_v15 = vld [vmem:[%s8378_s0 + $0x120] sm:$0xff] }
  0xd9   : > { %1231 = vperm.xlu0 %8211, %v944_v42   ;;  %v1297_v26 = vmul.f32 %v8487_v10, %v1142_v56  ;;  %v1068_v51 = vrot.slane %v8674_v22, 1  ;;  %v1072_v37 = vrot.slane %v8708_v15, 1 }
  0xda   : > { %v1943_v2 = vmax.f32 %v1898_v60, 0.0 }
  0xdb   : > { %v1374_v6 = vpop.permute.xlu1 %1373  ;;  %v1370_v9 = vpop.permute.xlu0 %1369 }
  0xdc   : > { %1989 = vst.msk [vmem:[#allocation2 + $0x40] sm:$0xff] %vm1980_vm7, %v1943_v2  ;;  %v1525_v63 = vmul.f32 %v8492_v13, %v1370_v9  ;;  %1461 = vperm.xlu1 %8210, %v8605_v8   ;;  %v1526_v8 = vmul.f32 %v8492_v13, %v1374_v6 }
  0xdd   : > { %1457 = vperm.xlu0 %8211, %v8600_v14  }
  0xde   : > { %v1570_v24 = vadd.f32 %v1525_v63, %v1296_v17  ;;  %v1571_v32 = vadd.f32 %v1526_v8, %v1297_v26  ;;  %v1069_v63 = vsel %vm994_vm1, %v1064_v21, %v1068_v51 }
  0xdf   : > { %v1644_v19 = vpop.permute.xlu1 %1643  ;;  %v1378_v14 = vpop.permute.xlu0 %1377 }
  0xe0   : > { %v1803_v7 = vmul.f32 %v8507_v25, %v1644_v19  ;;  %v1527_v16 = vmul.f32 %v8492_v13, %v1378_v14  ;;  %1733 = vperm.xlu1 %8210, %v1063_v11   ;;  %v1096_v11 = vsel %vm990_vm6, %v1064_v21, 0.0  ;;  %v1070_v19 = vrot.slane %v8677_v23, 1 }
  0xe1   : > { %1729 = vperm.xlu0 %8211, %v1061_v20  }
  0xe2   : > { %v1848_v30 = vadd.f32 %v1803_v7, %v1570_v24  ;;  %v1572_v33 = vadd.f32 %v1527_v16, %v1298_v0  ;;  %v1073_v16 = vsel %vm994_vm1, %v1070_v19, %v1072_v37  ;;  %v1071_v27 = vsel %vm994_vm1, %v1068_v51, %v1070_v19 }
  0xe3   : > { %v1653_v34 = vpop.permute.xlu1 %1652  ;;  %v1648_v35 = vpop.permute.xlu0 %1647  ;;  %v2030_v36 = vld [vmem:[#allocation2 + $0x30] ss:$3 sm:$0xff]  ;;  %v2060_v38 = vld [vmem:[#allocation2 + $0x31] ss:$3 sm:$0xff]  ;;  %v2105_v46 = vld [vmem:[#allocation2 + $0x32] ss:$3 sm:$0xff] }
  0xe4   : > { %v1899_v40 = vadd.f32 %v8525_v39, %v1848_v30  ;;  %v1805_v42 = vmul.f32 %v8507_v25, %v1653_v34  ;;  %v1804_v44 = vmul.f32 %v8507_v25, %v1648_v35  ;;  %1236 = vperm.xlu1 %8210, %v995_v57   ;;  %v2087_v45 = vmax.f32 %v2030_v36, %v2060_v38  ;;  %v8749_v30 = vld [vmem:[%s8378_s0 + $0x130] sm:$0xff] }
  0xe5   : > { %1737 = vperm.xlu0 %8211, %v1065_v31   ;;  %v964_v57 = vrot.slane %v8708_v15, 7 }
  0xe6   : > { %v1944_v52 = vmax.f32 %v1899_v40, 0.0  ;;  %v1850_v53 = vadd.f32 %v1805_v42, %v1572_v33  ;;  %v1849_v55 = vadd.f32 %v1804_v44, %v1571_v32  ;;  %v8696_v56 = vmax.f32 %v2087_v45, %v2105_v46 }
  0xe7   : > { %v1155_v60 = vpop.permute.xlu1 %1154  ;;  %v1151_v61 = vpop.permute.xlu0 %1150  ;;  %v968_v46 = vrot.slane %v8749_v30, 7 }
  0xe8   : > { %1990 = vst.msk [vmem:[#allocation2 + $0x48] sm:$0xff] %vm1980_vm7, %v1944_v52  ;;  %v1901_v1 = vadd.f32 %v8525_v39, %v1850_v53  ;;  %v1900_v2 = vadd.f32 %v8525_v39, %v1849_v55  ;;  %1244 = vperm.xlu1 %8210, %v963_v18   ;;  %7199 = vmatmul.mubr.msk.f32.gmra.mrb[4].mxu0 %vm1980_vm7, %v8696_v56  ;;  %v2156_v54 = vrot.slane %v8696_v56, 7  ;;  %v2210_v5 = vrot.slane %v8696_v56, 1 }
  0xe9   : > { %1240 = vperm.xlu0 %8211, %v961_v28   ;;  %7201 = vmatprep.mubr.msk.f32.mxu0 %vm8224_vm2, %v8223_v41  ;;  %v1300_v26 = vmul.f32 %v8487_v10, %v1155_v60  ;;  %v965_v18 = vsel %vm853_vm0, %v962_v29, %v964_v57  ;;  %v1076_v56 = vrot.slane %v8749_v30, 1 }
  0xea   : > { %v1946_v6 = vmax.f32 %v1901_v1, 0.0  ;;  %v1945_v9 = vmax.f32 %v1900_v2, 0.0  ;;  %v2157_v20 = vsel %vm853_vm0, %v2154_v48, %v2156_v54  ;;  %v8722_v21 = vsel %vm994_vm1, %v2208_v47, %v2210_v5  ;;  %v8735_v47 = vld [vmem:[%s8378_s0 + $0x128] sm:$0xff] }
  0xeb   : > { %v1382_v17 = vpop.permute.xlu1 %1381  ;;  %v1159_v8 = vpop.permute.xlu0 %1158  ;;  %7246 = vmatmul.mubr.msk.f32.vlgmr.msra.gmra.mrb[0].mxu1 %vm1980_vm7, %v2157_v20  ;;  %v1097_v48 = vsel %vm992_vm8, %v1096_v11, %v1069_v63  ;;  %v966_v0 = vrot.slane %v8735_v47, 7 }
  0xec   : > { %1992 = vst.msk [vmem:[#allocation2 + $0x58] sm:$0xff] %vm1980_vm7, %v1946_v6  ;;  %1991 = vst.msk [vmem:[#allocation2 + $0x50] sm:$0xff] %vm1980_vm7, %v1945_v9  ;;  %1469 = vperm.xlu1 %8210, %v8674_v22   ;;  %7248 = vmatprep.mubr.msk.f32.mxu1 %vm8224_vm2, %v8223_v41  ;;  %v1528_v14 = vmul.f32 %v8492_v13, %v1382_v17  ;;  %v1301_v51 = vmul.f32 %v8487_v10, %v1159_v8 }
  0xed   : > { %1465 = vperm.xlu0 %8211, %v8629_v43   ;;  %v1299_v43 = vmul.f32 %v8487_v10, %v1151_v61  ;;  %v967_v45 = vsel %vm853_vm0, %v964_v57, %v966_v0  ;;  %v969_v20 = vsel %vm853_vm0, %v966_v0, %v968_v46 }
  0xef   : > { %v1390_v24 = vpop.permute.xlu1 %1389  ;;  %v1386_v7 = vpop.permute.xlu0 %1385  ;;  %v1573_v31 = vadd.f32 %v1528_v14, %v1299_v43 }
  0xf0   : > { %v1529_v22 = vmul.f32 %v8492_v13, %v1386_v7  ;;  %1742 = vperm.xlu1 %8210, %v1097_v48   ;;  %v1530_v32 = vmul.f32 %v8492_v13, %v1390_v24 }
  0xf1   : > { %1473 = vperm.xlu0 %8211, %v8677_v23  }
  0xf2   : > { %v1574_v38 = vadd.f32 %v1529_v22, %v1300_v26  ;;  %v1575_v1 = vadd.f32 %v1530_v32, %v1301_v51  ;;  %v1074_v22 = vrot.slane %v8735_v47, 1 }
  0xf3   : > { %v1661_v33 = vpop.permute.xlu1 %1660  ;;  %v1657_v34 = vpop.permute.xlu0 %1656  ;;  %v2032_v35 = vld [vmem:[#allocation2 + $0x48] ss:$3 sm:$0xff]  ;;  %v2062_v36 = vld [vmem:[#allocation2 + $0x49] ss:$3 sm:$0xff]  ;;  %v2107_v28 = vld [vmem:[#allocation2 + $0x4a] ss:$3 sm:$0xff] }
  0xf4   : > { %v1807_v40 = vmul.f32 %v8507_v25, %v1661_v33  ;;  %v1806_v42 = vmul.f32 %v8507_v25, %v1657_v34  ;;  %1750 = vperm.xlu1 %8210, %v1073_v16   ;;  %v2088_v44 = vmax.f32 %v2032_v35, %v2062_v36  ;;  %v1075_v32 = vsel %vm994_vm1, %v1072_v37, %v1074_v22  ;;  %v8808_v34 = vld [vmem:[%s8378_s0 + $0x140] sm:$0xff]  ;;  %v8811_v35 = vld [vmem:[%s8378_s0 + $0x148] sm:$0xff] }
  0xf5   : > { %1746 = vperm.xlu0 %8211, %v1071_v27   ;;  %v1077_v27 = vsel %vm994_vm1, %v1074_v22, %v1076_v56 }
  0xf6   : > { %v1852_v52 = vadd.f32 %v1807_v40, %v1574_v38  ;;  %v1851_v53 = vadd.f32 %v1806_v42, %v1573_v31  ;;  %v2133_v55 = vmax.f32 %v2088_v44, %v2107_v28 }
  0xf7   : > { %v1163_v60 = vpop.permute.xlu1 %1162  ;;  %v1665_v61 = vpop.permute.xlu0 %1664 }
  0xf8   : > { %v1903_v2 = vadd.f32 %v8525_v39, %v1852_v52  ;;  %v1902_v6 = vadd.f32 %v8525_v39, %v1851_v53  ;;  %v1808_v9 = vmul.f32 %v8507_v25, %v1665_v61  ;;  %1252 = vperm.xlu1 %8210, %v967_v45   ;;  %7202 = vmatmul.mubr.msk.f32.gmra.mrb[6].mxu0 %vm1980_vm7, %v2133_v55  ;;  %v8764_v23 = vrot.slane %v2133_v55, 7 }
  0xf9   : > { %1248 = vperm.xlu0 %8211, %v965_v18   ;;  %v8766_v29 = vrot.slane %v2133_v55, 1  ;;  %7204 = vmatprep.mubr.msk.f32.mxu0 %vm8224_vm2, %v8223_v41  ;;  %v1302_v31 = vmul.f32 %v8487_v10, %v1163_v60  ;;  %v972_v45 = vrot.slane %v8808_v34, 7  ;;  %v974_v18 = vrot.slane %v8811_v35, 7 }
  0xfa   : > { %v1948_v63 = vmax.f32 %v1903_v2, 0.0  ;;  %v1947_v11 = vmax.f32 %v1902_v6, 0.0  ;;  %v1853_v17 = vadd.f32 %v1808_v9, %v1575_v1  ;;  %v2159_v19 = vsel %vm853_vm0, %v2156_v54, %v8764_v23 }
  0xfb   : > { %v1171_v8 = vpop.permute.xlu1 %1170  ;;  %v1167_v48 = vpop.permute.xlu0 %1166  ;;  %v8779_v14 = vsel %vm994_vm1, %v2210_v5, %v8766_v29  ;;  %v2201_v7 = vsel %vm992_vm8, %v2159_v19, 0.0  ;;  %v8791_v5 = vld [vmem:[%s8378_s0 + $0x138] sm:$0xff] }
  0xfc   : > { %1994 = vst.msk [vmem:[#allocation2 + $0x68] sm:$0xff] %vm1980_vm7, %v1948_v63  ;;  %1993 = vst.msk [vmem:[#allocation2 + $0x60] sm:$0xff] %vm1980_vm7, %v1947_v11  ;;  %v1904_v24 = vadd.f32 %v8525_v39, %v1853_v17  ;;  %1477 = vperm.xlu1 %8210, %v8708_v15   ;;  %v2202_v54 = vsel %vm994_vm1, %v2201_v7, %v8764_v23  ;;  %v970_v26 = vrot.slane %v8791_v5, 7  ;;  %v1078_v33 = vrot.slane %v8791_v5, 1 }
  0xfd   : > { %1256 = vperm.xlu0 %8211, %v969_v20   ;;  %7249 = vmatmul.mubr.msk.f32.gmra.mrb[2].mxu1 %vm1980_vm7, %v2202_v54  ;;  %v1304_v37 = vmul.f32 %v8487_v10, %v1171_v8  ;;  %v1303_v44 = vmul.f32 %v8487_v10, %v1167_v48  ;;  %v975_v63 = vsel %vm853_vm0, %v972_v45, %v974_v18 }
  0xfe   : > { %v1949_v43 = vmax.f32 %v1904_v24, 0.0  ;;  %7251 = vmatprep.mubr.msk.f32.mxu1 %vm8224_vm2, %v8223_v41  ;;  %v971_v15 = vsel %vm853_vm0, %v968_v46, %v970_v26  ;;  %v1079_v51 = vsel %vm994_vm1, %v1076_v56, %v1078_v33  ;;  %v973_v11 = vsel %vm853_vm0, %v970_v26, %v972_v45  ;;  %v8842_v26 = vld [vmem:[%s8378_s0 + $0x150] sm:$0xff] }
  0xff   : > { %v1398_v16 = vpop.permute.xlu1 %1397  ;;  %v1394_v57 = vpop.permute.xlu0 %1393 }
 0x100   : > { %1995 = vst.msk [vmem:[#allocation2 + $0x70] sm:$0xff] %vm1980_vm7, %v1949_v43  ;;  %v1531_v0 = vmul.f32 %v8492_v13, %v1394_v57  ;;  %1485 = vperm.xlu1 %8210, %v8749_v30   ;;  %v1532_v30 = vmul.f32 %v8492_v13, %v1398_v16  ;;  %v1080_v43 = vrot.slane %v8808_v34, 1 }
 0x101   : > { %1481 = vperm.xlu0 %8211, %v8735_v47  }
 0x102   : > { %v1576_v40 = vadd.f32 %v1531_v0, %v1302_v31  ;;  %v1577_v52 = vadd.f32 %v1532_v30, %v1303_v44  ;;  %v976_v44 = vrot.slane %v8842_v26, 7 }
 0x103   : > { %v1669_v36 = vpop.permute.xlu1 %1668  ;;  %v1402_v38 = vpop.permute.xlu0 %1401 }
 0x104   : > { %v1809_v47 = vmul.f32 %v8507_v25, %v1669_v36  ;;  %v1533_v42 = vmul.f32 %v8492_v13, %v1402_v38  ;;  %1758 = vperm.xlu1 %8210, %v1077_v27   ;;  %v2243_v36 = vsel %vm990_vm6, %v8766_v29, 0.0 }
 0x105   : > { %1754 = vperm.xlu0 %8211, %v1075_v32  }
 0x106   : > { %v1854_v28 = vadd.f32 %v1809_v47, %v1576_v40  ;;  %v1578_v53 = vadd.f32 %v1533_v42, %v1304_v37  ;;  %v1082_v40 = vrot.slane %v8811_v35, 1  ;;  %v8872_v47 = vld [vmem:[%s8378_s0 + $0x158] sm:$0xff] }
 0x107   : > { %v1677_v55 = vpop.permute.xlu1 %1676  ;;  %v1673_v60 = vpop.permute.xlu0 %1672  ;;  %v2034_v61 = vld [vmem:[#allocation2 + $0x60] ss:$3 sm:$0xff]  ;;  %v2064_v46 = vld [vmem:[#allocation2 + $0x61] ss:$3 sm:$0xff]  ;;  %v2109_v17 = vld [vmem:[#allocation2 + $0x62] ss:$3 sm:$0xff] }
 0x108   : > { %v1905_v1 = vadd.f32 %v8525_v39, %v1854_v28  ;;  %v1811_v2 = vmul.f32 %v8507_v25, %v1677_v55  ;;  %v1810_v6 = vmul.f32 %v8507_v25, %v1673_v60  ;;  %1260 = vperm.xlu1 %8210, %v971_v15   ;;  %v2089_v9 = vmax.f32 %v2034_v61, %v2064_v46 }
 0x109   : > { %1762 = vperm.xlu0 %8211, %v1079_v51   ;;  %v978_v45 = vrot.slane %v8872_v47, 7  ;;  %v1083_v51 = vsel %vm994_vm1, %v1080_v43, %v1082_v40 }
 0x10a   : > { %v1950_v20 = vmax.f32 %v1905_v1, 0.0  ;;  %v1856_v8 = vadd.f32 %v1811_v2, %v1578_v53  ;;  %v1855_v48 = vadd.f32 %v1810_v6, %v1577_v52  ;;  %v8831_v19 = vmax.f32 %v2089_v9, %v2109_v17  ;;  %v8886_v52 = vld [vmem:[%s8378_s0 + $0x160] sm:$0xff] }
 0x10b   : > { %v1179_v24 = vpop.permute.xlu1 %1178  ;;  %v1175_v7 = vpop.permute.xlu0 %1174  ;;  %v977_v17 = vsel %vm853_vm0, %v974_v18, %v976_v44 }
 0x10c   : > { %1996 = vst.msk [vmem:[#allocation2 + $0x78] sm:$0xff] %vm1980_vm7, %v1950_v20  ;;  %v1907_v54 = vadd.f32 %v8525_v39, %v1856_v8  ;;  %v1906_v22 = vadd.f32 %v8525_v39, %v1855_v48  ;;  %1268 = vperm.xlu1 %8210, %v975_v63   ;;  %7205 = vmatmul.mubr.msk.f32.gmra.mrb[8].mxu0 %vm1980_vm7, %v8831_v19  ;;  %v2166_v56 = vrot.slane %v8831_v19, 7  ;;  %v2215_v16 = vrot.slane %v8831_v19, 1 }
 0x10d   : > { %1264 = vperm.xlu0 %8211, %v973_v11   ;;  %7207 = vmatprep.mubr.msk.f32.mxu0 %vm8224_vm2, %v8223_v41  ;;  %v1306_v28 = vmul.f32 %v8487_v10, %v1179_v24  ;;  %v979_v11 = vsel %vm853_vm0, %v976_v44, %v978_v45  ;;  %v980_v8 = vrot.slane %v8886_v52, 7 }
 0x10e   : > { %v1952_v57 = vmax.f32 %v1907_v54, 0.0  ;;  %v1951_v0 = vmax.f32 %v1906_v22, 0.0  ;;  %v2167_v31 = vsel %vm853_vm0, %v8764_v23, %v2166_v56  ;;  %v2216_v30 = vsel %vm994_vm1, %v8766_v29, %v2215_v16 }
 0x10f   : > { %v1406_v27 = vpop.permute.xlu1 %1405  ;;  %v1183_v32 = vpop.permute.xlu0 %1182  ;;  %7252 = vmatmul.mubr.msk.f32.gmra.mrb[4].mxu1 %vm1980_vm7, %v2167_v31  ;;  %v8861_v38 = vsel %vm992_vm8, %v2243_v36, %v2216_v30  ;;  %v1081_v23 = vsel %vm994_vm1, %v1078_v33, %v1080_v43  ;;  %v1084_v29 = vrot.slane %v8842_v26, 1 }
 0x110   : > { %1998 = vst.msk [vmem:[#allocation2 + $0x88] sm:$0xff] %vm1980_vm7, %v1952_v57  ;;  %1997 = vst.msk [vmem:[#allocation2 + $0x80] sm:$0xff] %vm1980_vm7, %v1951_v0  ;;  %1493 = vperm.xlu1 %8210, %v8808_v34   ;;  %7254 = vmatprep.mubr.msk.f32.mxu1 %vm8224_vm2, %v8223_v41  ;;  %v1534_v34 = vmul.f32 %v8492_v13, %v1406_v27  ;;  %v1307_v48 = vmul.f32 %v8487_v10, %v1183_v32 }
 0x111   : > { %1489 = vperm.xlu0 %8211, %v8791_v5   ;;  %v1305_v5 = vmul.f32 %v8487_v10, %v1175_v7  ;;  %v1085_v33 = vsel %vm994_vm1, %v1082_v40, %v1084_v29 }
 0x113   : > { %v1414_v42 = vpop.permute.xlu1 %1413  ;;  %v1410_v15 = vpop.permute.xlu0 %1409  ;;  %v1579_v53 = vadd.f32 %v1534_v34, %v1305_v5  ;;  %v1088_v5 = vrot.slane %v8886_v52, 1 }
 0x114   : > { %v1535_v37 = vmul.f32 %v8492_v13, %v1410_v15  ;;  %1766 = vperm.xlu1 %8210, %v1081_v23   ;;  %v1536_v55 = vmul.f32 %v8492_v13, %v1414_v42  ;;  %v981_v23 = vsel %vm853_vm0, %v978_v45, %v980_v8 }
 0x115   : > { %1497 = vperm.xlu0 %8211, %v8811_v35  }
 0x116   : > { %v1580_v2 = vadd.f32 %v1535_v37, %v1306_v28  ;;  %v1581_v57 = vadd.f32 %v1536_v55, %v1307_v48 }
 0x117   : > { %v1685_v60 = vpop.permute.xlu1 %1684  ;;  %v1681_v61 = vpop.permute.xlu0 %1680  ;;  %v2036_v46 = vld [vmem:[#allocation2 + $0x78] ss:$3 sm:$0xff]  ;;  %v2066_v1 = vld [vmem:[#allocation2 + $0x79] ss:$3 sm:$0xff]  ;;  %v2111_v20 = vld [vmem:[#allocation2 + $0x7a] ss:$3 sm:$0xff] }
 0x118   : > { %v1813_v6 = vmul.f32 %v8507_v25, %v1685_v60  ;;  %v1812_v9 = vmul.f32 %v8507_v25, %v1681_v61  ;;  %1774 = vperm.xlu1 %8210, %v1085_v33   ;;  %v2090_v63 = vmax.f32 %v2036_v46, %v2066_v1 }
 0x119   : > { %1770 = vperm.xlu0 %8211, %v1083_v51  }
 0x11a   : > { %v1858_v24 = vadd.f32 %v1813_v6, %v1580_v2  ;;  %v1857_v7 = vadd.f32 %v1812_v9, %v1579_v53  ;;  %v8897_v54 = vmax.f32 %v2090_v63, %v2111_v20 }
 0x11b   : > { %v1187_v22 = vpop.permute.xlu1 %1186  ;;  %v1689_v43 = vpop.permute.xlu0 %1688 }
 0x11c   : > { %v1909_v0 = vadd.f32 %v8525_v39, %v1858_v24  ;;  %v1908_v27 = vadd.f32 %v8525_v39, %v1857_v7  ;;  %v1814_v35 = vmul.f32 %v8507_v25, %v1689_v43  ;;  %1276 = vperm.xlu1 %8210, %v979_v11   ;;  %7208 = vmatmul.mubr.msk.f32.gmra.mrb[10].mxu0 %vm1980_vm7, %v8897_v54  ;;  %v2168_v18 = vrot.slane %v8897_v54, 7 }
 0x11d   : > { %1272 = vperm.xlu0 %8211, %v977_v17   ;;  %v2217_v31 = vrot.slane %v8897_v54, 1  ;;  %7210 = vmatprep.mubr.msk.f32.mxu0 %vm8224_vm2, %v8223_v41  ;;  %v1308_v28 = vmul.f32 %v8487_v10, %v1187_v22 }
 0x11e   : > { %v1954_v32 = vmax.f32 %v1909_v0, 0.0  ;;  %v1953_v30 = vmax.f32 %v1908_v27, 0.0  ;;  %v1859_v36 = vadd.f32 %v1814_v35, %v1581_v57  ;;  %v2169_v34 = vsel %vm853_vm0, %v2166_v56, %v2168_v18 }
 0x11f   : > { %v1196_v40 = vpop.permute.xlu1 %1195  ;;  %v1192_v42 = vpop.permute.xlu0 %1191  ;;  %v8919_v15 = vsel %vm994_vm1, %v2215_v16, %v2217_v31  ;;  %7255 = vmatmul.mubr.msk.f32.gmra.mrb[6].mxu1 %vm1980_vm7, %v2169_v34  ;;  %v1086_v56 = vrot.slane %v8872_v47, 1 }
 0x120   : > { %2000 = vst.msk [vmem:[#allocation2 + $0x98] sm:$0xff] %vm1980_vm7, %v1954_v32  ;;  %1999 = vst.msk [vmem:[#allocation2 + $0x90] sm:$0xff] %vm1980_vm7, %v1953_v30  ;;  %v1910_v37 = vadd.f32 %v8525_v39, %v1859_v36  ;;  %1501 = vperm.xlu1 %8210, %v8842_v26   ;;  %7257 = vmatprep.mubr.msk.f32.mxu1 %vm8224_vm2, %v8223_v41  ;;  %v1098_v26 = vsel %vm994_vm1, %v1088_v5, 0.0 }
 0x121   : > { %1280 = vperm.xlu0 %8211, %v981_v23   ;;  %v1089_v45 = vsel %vm994_vm1, %v1086_v56, %v1088_v5  ;;  %v1087_v51 = vsel %vm994_vm1, %v1084_v29, %v1086_v56 }
 0x122   : > { %v1955_v19 = vmax.f32 %v1910_v37, 0.0 }
 0x123   : > { %v1422_v16 = vpop.permute.xlu1 %1421  ;;  %v1418_v33 = vpop.permute.xlu0 %1417 }
 0x124   : > { %2001 = vst.msk [vmem:[#allocation2 + $0xa0] sm:$0xff] %vm1980_vm7, %v1955_v19  ;;  %v1537_v44 = vmul.f32 %v8492_v13, %v1418_v33  ;;  %1509 = vperm.xlu1 %8210, %v8886_v52   ;;  %v1538_v53 = vmul.f32 %v8492_v13, %v1422_v16  ;;  %v1309_v52 = vmul.f32 %v8487_v10, %v1192_v42 }
 0x125   : > { %1505 = vperm.xlu0 %8211, %v8872_v47   ;;  %v1310_v47 = vmul.f32 %v8487_v10, %v1196_v40 }
 0x126   : > { %v1582_v61 = vadd.f32 %v1537_v44, %v1308_v28  ;;  %v1583_v6 = vadd.f32 %v1538_v53, %v1309_v52 }
 0x127   : > { %v1693_v55 = vpop.permute.xlu1 %1692  ;;  %v1426_v60 = vpop.permute.xlu0 %1425 }
 0x128   : > { %v1815_v46 = vmul.f32 %v8507_v25, %v1693_v55  ;;  %v1539_v1 = vmul.f32 %v8492_v13, %v1426_v60  ;;  %1782 = vperm.xlu1 %8210, %v1089_v45  }
 0x129   : > { %1778 = vperm.xlu0 %8211, %v1087_v51  }
 0x12a   : > { %v1860_v2 = vadd.f32 %v1815_v46, %v1582_v61  ;;  %v1584_v29 = vadd.f32 %v1539_v1, %v1310_v47 }
 0x12b   : > { %v1702_v9 = vpop.permute.xlu1 %1701  ;;  %v1698_v63 = vpop.permute.xlu0 %1697  ;;  %v2038_v11 = vld [vmem:[#allocation2 + $0x90] ss:$3 sm:$0xff]  ;;  %v2068_v17 = vld [vmem:[#allocation2 + $0x91] ss:$3 sm:$0xff]  ;;  %v2113_v7 = vld [vmem:[#allocation2 + $0x92] ss:$3 sm:$0xff] }
 0x12c   : > { %v1911_v20 = vadd.f32 %v8525_v39, %v1860_v2  ;;  %v1817_v8 = vmul.f32 %v8507_v25, %v1702_v9  ;;  %v1816_v48 = vmul.f32 %v8507_v25, %v1698_v63  ;;  %v2091_v24 = vmax.f32 %v2038_v11, %v2068_v17 }
 0x12d   : > { %1787 = vperm.xlu0 %8211, %v1098_v26  }
 0x12e   : > { %v1956_v22 = vmax.f32 %v1911_v20, 0.0  ;;  %v1862_v43 = vadd.f32 %v1817_v8, %v1584_v29  ;;  %v1861_v57 = vadd.f32 %v1816_v48, %v1583_v6  ;;  %v2136_v0 = vmax.f32 %v2091_v24, %v2113_v7  ;;  %v8978_v29 = vld [vmem:[%s11288_s8] ss:$0 sm:$0xff] }
 0x12f   : > { %v1204_v27 = vpop.permute.xlu1 %1203  ;;  %v1200_v30 = vpop.permute.xlu0 %1199 }
 0x130   : > { %2002 = vst.msk [vmem:[#allocation2 + $0xa8] sm:$0xff] %vm1980_vm7, %v1956_v22  ;;  %v1913_v35 = vadd.f32 %v8525_v39, %v1862_v43  ;;  %v1912_v32 = vadd.f32 %v8525_v39, %v1861_v57  ;;  %7211 = vmatmul.mubr.msk.f32.gmra.mrb[12].mxu0 %vm1980_vm7, %v2136_v0  ;;  %v2170_v36 = vrot.slane %v2136_v0, 7  ;;  %v2219_v23 = vrot.slane %v2136_v0, 1 }
 0x131   : > { %7213 = vmatprep.mubr.msk.f32.mxu0 %vm8224_vm2, %v8223_v41  ;;  %v1312_v33 = vmul.f32 %v8487_v10, %v1204_v27  ;;  %v1311_v54 = vmul.f32 %v8487_v10, %v1200_v30 }
 0x132   : > { %v1958_v40 = vmax.f32 %v1913_v35, 0.0  ;;  %v1957_v34 = vmax.f32 %v1912_v32, 0.0  ;;  %v2171_v42 = vsel %vm853_vm0, %v2168_v18, %v2170_v36  ;;  %v8961_v39 = vsel %vm994_vm1, %v2217_v31, %v2219_v23 }
 0x133   : > { %v1430_v37 = vpop.permute.xlu1 %1429  ;;  %7258 = vmatmul.mubr.msk.f32.gmra.mrb[8].mxu1 %vm1980_vm7, %v2171_v42  ;;  %v1208_v56 = vpop.permute.xlu0 %1207 }
 0x134   : > { %2004 = vst.msk [vmem:[#allocation2 + $0xb8] sm:$0xff] %vm1980_vm7, %v1958_v40  ;;  %2003 = vst.msk [vmem:[#allocation2 + $0xb0] sm:$0xff] %vm1980_vm7, %v1957_v34  ;;  %7260 = vmatprep.mubr.msk.f32.mxu1 %vm8224_vm2, %v8223_v41  ;;  %v1540_v18 = vmul.f32 %v8492_v13, %v1430_v37  ;;  %v1313_v2 = vmul.f32 %v8487_v10, %v1208_v56 }
 0x136   : > { %v1585_v60 = vadd.f32 %v1540_v18, %v1311_v54 }
 0x137   : > { %v1438_v5 = vpop.permute.xlu1 %1437  ;;  %v1434_v19 = vpop.permute.xlu0 %1433 }
 0x138   : > { %v1541_v16 = vmul.f32 %v8492_v13, %v1434_v19  ;;  %v1542_v61 = vmul.f32 %v8492_v13, %v1438_v5 }
 0x13a   : > { %v1586_v28 = vadd.f32 %v1541_v16, %v1312_v33  ;;  %v1587_v20 = vadd.f32 %v1542_v61, %v1313_v2 }
 0x13b   : > { %v1710_v31 = vpop.permute.xlu1 %1709  ;;  %v2040_v44 = vld [vmem:[#allocation2 + $0xa8] ss:$3 sm:$0xff]  ;;  %v2070_v45 = vld [vmem:[#allocation2 + $0xa9] ss:$3 sm:$0xff]  ;;  %v1706_v53 = vpop.permute.xlu0 %1705  ;;  %v2115_v1 = vld [vmem:[#allocation2 + $0xaa] ss:$3 sm:$0xff] }
 0x13c   : > { %v1819_v51 = vmul.f32 %v8507_v25, %v1710_v31  ;;  %v2092_v55 = vmax.f32 %v2040_v44, %v2070_v45  ;;  %v1818_v46 = vmul.f32 %v8507_v25, %v1706_v53 }
 0x13e   : > { %v1864_v47 = vadd.f32 %v1819_v51, %v1586_v28  ;;  %v2137_v52 = vmax.f32 %v2092_v55, %v2115_v1  ;;  %v1863_v26 = vadd.f32 %v1818_v46, %v1585_v60 }
 0x13f   : > { %v1212_v6 = vpop.permute.xlu1 %1211 }
 0x140   : > { %v1915_v9 = vadd.f32 %v8978_v29, %v1864_v47  ;;  %v1714_v63 = vpop.permute.xlu0 %1713  ;;  %7214 = vmatmul.mubr.msk.f32.gmra.mrb[14].mxu0 %vm1980_vm7, %v2137_v52  ;;  %v8982_v11 = vrot.slane %v2137_v52, 7  ;;  %v8984_v17 = vrot.slane %v2137_v52, 1  ;;  %v1914_v8 = vadd.f32 %v8978_v29, %v1863_v26 }
 0x141   : > { %v1820_v48 = vmul.f32 %v8507_v25, %v1714_v63  ;;  %7216 = vmatprep.mubr.msk.f32.mxu0 %vm8224_vm2, %v8223_v41  ;;  %v1314_v42 = vmul.f32 %v8487_v10, %v1212_v6 }
 0x142   : > { %v1960_v24 = vmax.f32 %v1915_v9, 0.0  ;;  %v2173_v7 = vsel %vm853_vm0, %v2170_v36, %v8982_v11  ;;  %v8994_v22 = vsel %vm994_vm1, %v2219_v23, %v8984_v17  ;;  %v1959_v43 = vmax.f32 %v1914_v8, 0.0 }
 0x143   : > { %v1865_v57 = vadd.f32 %v1820_v48, %v1587_v20  ;;  %v1220_v0 = vpop.permute.xlu1 %1219  ;;  %v2203_v27 = vsel %vm988_vm5, %v2173_v7, 0.0 }
 0x144   : > { %2006 = vst.msk [vmem:[#allocation2 + $0xc8] sm:$0xff] %vm1980_vm7, %v1960_v24  ;;  %v1216_v35 = vpop.permute.xlu0 %1215  ;;  %v2204_v32 = vsel %vm990_vm6, %v2203_v27, %v8982_v11  ;;  %2005 = vst.msk [vmem:[#allocation2 + $0xc0] sm:$0xff] %vm1980_vm7, %v1959_v43  ;;  %v1316_v33 = vmul.f32 %v8487_v10, %v1220_v0 }
 0x145   : > { %v1916_v30 = vadd.f32 %v8978_v29, %v1865_v57  ;;  %7261 = vmatmul.mubr.msk.f32.gmra.mrb[10].mxu1 %vm1980_vm7, %v2204_v32  ;;  %v1315_v31 = vmul.f32 %v8487_v10, %v1216_v35  ;;  %v2245_v35 = vsel %vm986_vm4, %v8984_v17, 0.0 }
 0x146   : > { %7263 = vmatprep.mubr.msk.f32.mxu1 %vm8224_vm2, %v8223_v41 }
 0x147   : > { %v1961_v36 = vmax.f32 %v1916_v30, 0.0  ;;  %v1446_v23 = vpop.permute.xlu1 %1445 }
 0x148   : > { %v1442_v40 = vpop.permute.xlu0 %1441  ;;  %v1544_v18 = vmul.f32 %v8492_v13, %v1446_v23 }
 0x149   : > { %2007 = vst.msk [vmem:[#allocation2 + $0xd0] sm:$0xff] %vm1980_vm7, %v1961_v36  ;;  %v1543_v34 = vmul.f32 %v8492_v13, %v1442_v40 }
 0x14a   : > { %v1589_v61 = vadd.f32 %v1544_v18, %v1315_v31 }
 0x14b   : > { %v1718_v37 = vpop.permute.xlu1 %1717  ;;  %v1588_v56 = vadd.f32 %v1543_v34, %v1314_v42 }
 0x14c   : > { %v1821_v5 = vmul.f32 %v8507_v25, %v1718_v37  ;;  %v1450_v19 = vpop.permute.xlu0 %1449 }
 0x14d   : > { %v1545_v16 = vmul.f32 %v8492_v13, %v1450_v19 }
 0x14e   : > { %v1866_v54 = vadd.f32 %v1821_v5, %v1588_v56 }
 0x14f   : > { %v1726_v44 = vpop.permute.xlu1 %1725  ;;  %v1590_v28 = vadd.f32 %v1545_v16, %v1316_v33 }
 0x150   : > { %v1917_v45 = vadd.f32 %v8978_v29, %v1866_v54  ;;  %v1823_v51 = vmul.f32 %v8507_v25, %v1726_v44  ;;  %v1722_v53 = vpop.permute.xlu0 %1721  ;;  %v2042_v55 = vld [vmem:[#allocation2 + $0xc0] ss:$3 sm:$0xff]  ;;  %v2072_v60 = vld [vmem:[#allocation2 + $0xc1] ss:$3 sm:$0xff]  ;;  %v2117_v2 = vld [vmem:[#allocation2 + $0xc2] ss:$3 sm:$0xff] }
 0x151   : > { %v1822_v46 = vmul.f32 %v8507_v25, %v1722_v53  ;;  %v2093_v1 = vmax.f32 %v2042_v55, %v2072_v60 }
 0x152   : > { %v1962_v47 = vmax.f32 %v1917_v45, 0.0  ;;  %v1868_v52 = vadd.f32 %v1823_v51, %v1590_v28 }
 0x153   : > { %v1867_v26 = vadd.f32 %v1822_v46, %v1589_v61  ;;  %v1228_v6 = vpop.permute.xlu1 %1227  ;;  %v2138_v9 = vmax.f32 %v2093_v1, %v2117_v2 }
 0x154   : > { %2008 = vst.msk [vmem:[#allocation2 + $0xd8] sm:$0xff] %vm1980_vm7, %v1962_v47  ;;  %v1919_v63 = vadd.f32 %v8978_v29, %v1868_v52  ;;  %v1224_v20 = vpop.permute.xlu0 %1223 }
 0x155   : > { %v1918_v8 = vadd.f32 %v8978_v29, %v1867_v26  ;;  %7217 = vmatmul.mubr.msk.f32.gmra.mrb[16].mxu0 %vm1980_vm7, %v2138_v9  ;;  %v2180_v48 = vrot.slane %v2138_v9, 7  ;;  %v2225_v24 = vrot.slane %v2138_v9, 1  ;;  %v1317_v34 = vmul.f32 %v8487_v10, %v1224_v20 }
 0x156   : > { %v1964_v7 = vmax.f32 %v1919_v63, 0.0  ;;  %7219 = vmatprep.mubr.msk.f32.mxu0 %vm8224_vm2, %v8223_v41 }
 0x157   : > { %v1963_v43 = vmax.f32 %v1918_v8, 0.0  ;;  %v1454_v57 = vpop.permute.xlu1 %1453  ;;  %v2181_v0 = vsel %vm853_vm0, %v8982_v11, %v2180_v48  ;;  %v2226_v27 = vsel %vm994_vm1, %v8984_v17, %v2225_v24  ;;  %v1318_v17 = vmul.f32 %v8487_v10, %v1228_v6 }
 0x158   : > { %2010 = vst.msk [vmem:[#allocation2 + $0xe8] sm:$0xff] %vm1980_vm7, %v1964_v7  ;;  %7264 = vmatmul.mubr.msk.f32.gmra.mrb[12].mxu1 %vm1980_vm7, %v2181_v0  ;;  %v1232_v32 = vpop.permute.xlu0 %1231  ;;  %v9031_v30 = vsel %vm988_vm5, %v2245_v35, %v2226_v27  ;;  %v1546_v23 = vmul.f32 %v8492_v13, %v1454_v57 }
 0x159   : > { %2009 = vst.msk [vmem:[#allocation2 + $0xe0] sm:$0xff] %vm1980_vm7, %v1963_v43  ;;  %7266 = vmatprep.mubr.msk.f32.mxu1 %vm8224_vm2, %v8223_v41  ;;  %v1319_v44 = vmul.f32 %v8487_v10, %v1232_v32 }
 0x15a   : > { %v1591_v33 = vadd.f32 %v1546_v23, %v1317_v34 }
 0x15b   : > { %v1462_v11 = vpop.permute.xlu1 %1461 }
 0x15c   : > { %v1458_v36 = vpop.permute.xlu0 %1457  ;;  %v1548_v37 = vmul.f32 %v8492_v13, %v1462_v11 }
 0x15d   : > { %v1547_v40 = vmul.f32 %v8492_v13, %v1458_v36 }
 0x15e   : > { %v1593_v60 = vadd.f32 %v1548_v37, %v1319_v44 }
 0x15f   : > { %v1734_v42 = vpop.permute.xlu1 %1733  ;;  %v1592_v56 = vadd.f32 %v1547_v40, %v1318_v17 }
 0x160   : > { %v1825_v5 = vmul.f32 %v8507_v25, %v1734_v42  ;;  %v1730_v19 = vpop.permute.xlu0 %1729  ;;  %v2044_v18 = vld [vmem:[#allocation2 + $0xd8] ss:$3 sm:$0xff]  ;;  %v2074_v16 = vld [vmem:[#allocation2 + $0xd9] ss:$3 sm:$0xff]  ;;  %v2119_v28 = vld [vmem:[#allocation2 + $0xda] ss:$3 sm:$0xff] }
 0x161   : > { %v1824_v54 = vmul.f32 %v8507_v25, %v1730_v19  ;;  %v2094_v31 = vmax.f32 %v2044_v18, %v2074_v16 }
 0x162   : > { %v1870_v45 = vadd.f32 %v1825_v5, %v1592_v56 }
 0x163   : > { %v1869_v51 = vadd.f32 %v1824_v54, %v1591_v33  ;;  %v1237_v53 = vpop.permute.xlu1 %1236  ;;  %v9044_v55 = vmax.f32 %v2094_v31, %v2119_v28 }
 0x164   : > { %v1921_v61 = vadd.f32 %v8978_v29, %v1870_v45  ;;  %v1738_v46 = vpop.permute.xlu0 %1737 }
 0x165   : > { %v1920_v1 = vadd.f32 %v8978_v29, %v1869_v51  ;;  %v1826_v47 = vmul.f32 %v8507_v25, %v1738_v46  ;;  %7220 = vmatmul.mubr.msk.f32.gmra.mrb[18].mxu0 %vm1980_vm7, %v9044_v55  ;;  %v2182_v52 = vrot.slane %v9044_v55, 7  ;;  %v2227_v2 = vrot.slane %v9044_v55, 1 }
 0x166   : > { %v1966_v26 = vmax.f32 %v1921_v61, 0.0  ;;  %7222 = vmatprep.mubr.msk.f32.mxu0 %vm8224_vm2, %v8223_v41 }
 0x167   : > { %v1965_v6 = vmax.f32 %v1920_v1, 0.0  ;;  %v1871_v9 = vadd.f32 %v1826_v47, %v1593_v60  ;;  %v1245_v63 = vpop.permute.xlu1 %1244  ;;  %v2183_v20 = vsel %vm853_vm0, %v2180_v48, %v2182_v52  ;;  %v9057_v8 = vsel %vm994_vm1, %v2225_v24, %v2227_v2 }
 0x168   : > { %2012 = vst.msk [vmem:[#allocation2 + $0xf8] sm:$0xff] %vm1980_vm7, %v1966_v26  ;;  %7267 = vmatmul.mubr.msk.f32.gmra.mrb[14].mxu1 %vm1980_vm7, %v2183_v20  ;;  %v1241_v7 = vpop.permute.xlu0 %1240  ;;  %v1320_v24 = vmul.f32 %v8487_v10, %v1237_v53  ;;  %v1322_v17 = vmul.f32 %v8487_v10, %v1245_v63 }
 0x169   : > { %2011 = vst.msk [vmem:[#allocation2 + $0xf0] sm:$0xff] %vm1980_vm7, %v1965_v6  ;;  %v1922_v43 = vadd.f32 %v8978_v29, %v1871_v9  ;;  %7269 = vmatprep.mubr.msk.f32.mxu1 %vm8224_vm2, %v8223_v41  ;;  %v1321_v42 = vmul.f32 %v8487_v10, %v1241_v7 }
 0x16b   : > { %v1967_v57 = vmax.f32 %v1922_v43, 0.0  ;;  %v1470_v0 = vpop.permute.xlu1 %1469 }
 0x16c   : > { %v1466_v27 = vpop.permute.xlu0 %1465  ;;  %v1550_v23 = vmul.f32 %v8492_v13, %v1470_v0 }
 0x16d   : > { %2013 = vst.msk [vmem:[#allocation2 + $0x100] sm:$0xff] %vm1980_vm7, %v1967_v57  ;;  %v1549_v48 = vmul.f32 %v8492_v13, %v1466_v27 }
 0x16e   : > { %v1595_v54 = vadd.f32 %v1550_v23, %v1321_v42 }
 0x16f   : > { %v1743_v35 = vpop.permute.xlu1 %1742  ;;  %v1594_v32 = vadd.f32 %v1549_v48, %v1320_v24 }
 0x170   : > { %v1827_v11 = vmul.f32 %v8507_v25, %v1743_v35  ;;  %v1474_v36 = vpop.permute.xlu0 %1473 }
 0x171   : > { %v1551_v40 = vmul.f32 %v8492_v13, %v1474_v36 }
 0x172   : > { %v1872_v34 = vadd.f32 %v1827_v11, %v1594_v32 }
 0x173   : > { %v1751_v37 = vpop.permute.xlu1 %1750  ;;  %v1596_v5 = vadd.f32 %v1551_v40, %v1322_v17 }
 0x174   : > { %v1923_v56 = vadd.f32 %v8978_v29, %v1872_v34  ;;  %v1829_v19 = vmul.f32 %v8507_v25, %v1751_v37  ;;  %v1747_v18 = vpop.permute.xlu0 %1746  ;;  %v2046_v16 = vld [vmem:[#allocation2 + $0xf0] ss:$3 sm:$0xff]  ;;  %v2076_v33 = vld [vmem:[#allocation2 + $0xf1] ss:$3 sm:$0xff]  ;;  %v2121_v51 = vld [vmem:[#allocation2 + $0xf2] ss:$3 sm:$0xff] }
 0x175   : > { %v1828_v31 = vmul.f32 %v8507_v25, %v1747_v18  ;;  %v2095_v44 = vmax.f32 %v2046_v16, %v2076_v33 }
 0x176   : > { %v1968_v45 = vmax.f32 %v1923_v56, 0.0  ;;  %v1874_v28 = vadd.f32 %v1829_v19, %v1596_v5 }
 0x177   : > { %v1873_v53 = vadd.f32 %v1828_v31, %v1595_v54  ;;  %v1253_v55 = vpop.permute.xlu1 %1252  ;;  %v2140_v60 = vmax.f32 %v2095_v44, %v2121_v51 }
 0x178   : > { %2014 = vst.msk [vmem:[#allocation2 + $0x108] sm:$0xff] %vm1980_vm7, %v1968_v45  ;;  %v1925_v61 = vadd.f32 %v8978_v29, %v1874_v28  ;;  %v1249_v46 = vpop.permute.xlu0 %1248 }
 0x179   : > { %v1924_v1 = vadd.f32 %v8978_v29, %v1873_v53  ;;  %7223 = vmatmul.mubr.msk.f32.gmra.mrb[20].mxu0 %vm1980_vm7, %v2140_v60  ;;  %v2184_v47 = vrot.slane %v2140_v60, 7  ;;  %v2229_v26 = vrot.slane %v2140_v60, 1 }
 0x17a   : > { %v1970_v6 = vmax.f32 %v1925_v61, 0.0  ;;  %7225 = vmatprep.mubr.msk.f32.mxu0 %vm8224_vm2, %v8223_v41 }
 0x17b   : > { %v1969_v9 = vmax.f32 %v1924_v1, 0.0  ;;  %v1478_v63 = vpop.permute.xlu1 %1477  ;;  %v2185_v20 = vsel %vm853_vm0, %v2182_v52, %v2184_v47  ;;  %v9084_v7 = vsel %vm994_vm1, %v2227_v2, %v2229_v26  ;;  %v1324_v52 = vmul.f32 %v8487_v10, %v1253_v55 }
 0x17c   : > { %2016 = vst.msk [vmem:[#allocation2 + $0x118] sm:$0xff] %vm1980_vm7, %v1970_v6  ;;  %7270 = vmatmul.mubr.msk.f32.gmra.mrb[16].mxu1 %vm1980_vm7, %v2185_v20  ;;  %v1257_v43 = vpop.permute.xlu0 %1256  ;;  %v1552_v27 = vmul.f32 %v8492_v13, %v1478_v63  ;;  %v1323_v2 = vmul.f32 %v8487_v10, %v1249_v46 }
 0x17d   : > { %2015 = vst.msk [vmem:[#allocation2 + $0x110] sm:$0xff] %vm1980_vm7, %v1969_v9  ;;  %7272 = vmatprep.mubr.msk.f32.mxu1 %vm8224_vm2, %v8223_v41  ;;  %v1325_v37 = vmul.f32 %v8487_v10, %v1257_v43 }
 0x17e   : > { %v1597_v17 = vadd.f32 %v1552_v27, %v1323_v2 }
 0x17f   : > { %v1486_v57 = vpop.permute.xlu1 %1485 }
 0x180   : > { %v1482_v0 = vpop.permute.xlu0 %1481  ;;  %v1554_v35 = vmul.f32 %v8492_v13, %v1486_v57 }
 0x181   : > { %v1553_v48 = vmul.f32 %v8492_v13, %v1482_v0 }
 0x182   : > { %v1599_v33 = vadd.f32 %v1554_v35, %v1325_v37 }
 0x183   : > { %v1759_v24 = vpop.permute.xlu1 %1758  ;;  %v1598_v32 = vadd.f32 %v1553_v48, %v1324_v52 }
 0x184   : > { %v1831_v11 = vmul.f32 %v8507_v25, %v1759_v24  ;;  %v1755_v36 = vpop.permute.xlu0 %1754  ;;  %v2048_v23 = vld [vmem:[#allocation2 + $0x108] ss:$3 sm:$0xff]  ;;  %v2078_v40 = vld [vmem:[#allocation2 + $0x109] ss:$3 sm:$0xff]  ;;  %v2123_v5 = vld [vmem:[#allocation2 + $0x10a] ss:$3 sm:$0xff] }
 0x185   : > { %v1830_v34 = vmul.f32 %v8507_v25, %v1755_v36  ;;  %v2096_v42 = vmax.f32 %v2048_v23, %v2078_v40 }
 0x186   : > { %v1876_v56 = vadd.f32 %v1831_v11, %v1598_v32 }
 0x187   : > { %v1875_v19 = vadd.f32 %v1830_v34, %v1597_v17  ;;  %v1261_v18 = vpop.permute.xlu1 %1260  ;;  %v2141_v16 = vmax.f32 %v2096_v42, %v2123_v5 }
 0x188   : > { %v1927_v54 = vadd.f32 %v8978_v29, %v1876_v56  ;;  %v1763_v31 = vpop.permute.xlu0 %1762  ;;  %v1326_v0 = vmul.f32 %v8487_v10, %v1261_v18 }
 0x189   : > { %v1926_v44 = vadd.f32 %v8978_v29, %v1875_v19  ;;  %v1832_v45 = vmul.f32 %v8507_v25, %v1763_v31  ;;  %7226 = vmatmul.mubr.msk.f32.gmra.mrb[22].mxu0 %vm1980_vm7, %v2141_v16  ;;  %v2186_v28 = vrot.slane %v2141_v16, 7  ;;  %v2231_v51 = vrot.slane %v2141_v16, 1 }
 0x18a   : > { %v1972_v53 = vmax.f32 %v1927_v54, 0.0  ;;  %7228 = vmatprep.mubr.msk.f32.mxu0 %vm8224_vm2, %v8223_v41 }
 0x18b   : > { %v1971_v55 = vmax.f32 %v1926_v44, 0.0  ;;  %v1877_v60 = vadd.f32 %v1832_v45, %v1599_v33  ;;  %v1269_v61 = vpop.permute.xlu1 %1268  ;;  %v2187_v46 = vsel %vm853_vm0, %v2184_v47, %v2186_v28  ;;  %v9107_v1 = vsel %vm994_vm1, %v2229_v26, %v2231_v51 }
 0x18c   : > { %2018 = vst.msk [vmem:[#allocation2 + $0x128] sm:$0xff] %vm1980_vm7, %v1972_v53  ;;  %v1265_v6 = vpop.permute.xlu0 %1264  ;;  %v2205_v9 = vsel %vm984_vm3, %v2187_v46, 0.0  ;;  %v1328_v32 = vmul.f32 %v8487_v10, %v1269_v61 }
 0x18d   : > { %2017 = vst.msk [vmem:[#allocation2 + $0x120] sm:$0xff] %vm1980_vm7, %v1971_v55  ;;  %v1928_v63 = vadd.f32 %v8978_v29, %v1877_v60  ;;  %v2206_v20 = vsel %vm986_vm4, %v2205_v9, %v2186_v28  ;;  %v1327_v36 = vmul.f32 %v8487_v10, %v1265_v6 }
 0x18e   : > { %7273 = vmatmul.mubr.msk.f32.gmra.mrb[18].mxu1 %vm1980_vm7, %v2206_v20 }
 0x18f   : > { %v1973_v43 = vmax.f32 %v1928_v63, 0.0  ;;  %v1494_v57 = vpop.permute.xlu1 %1493  ;;  %7275 = vmatprep.mubr.msk.f32.mxu1 %vm8224_vm2, %v8223_v41 }
 0x190   : > { %v1490_v47 = vpop.permute.xlu0 %1489  ;;  %v1556_v24 = vmul.f32 %v8492_v13, %v1494_v57 }
 0x191   : > { %2019 = vst.msk [vmem:[#allocation2 + $0x130] sm:$0xff] %vm1980_vm7, %v1973_v43  ;;  %v1555_v26 = vmul.f32 %v8492_v13, %v1490_v47 }
 0x192   : > { %v1601_v19 = vadd.f32 %v1556_v24, %v1327_v36 }
 0x193   : > { %v1767_v27 = vpop.permute.xlu1 %1766  ;;  %v1600_v48 = vadd.f32 %v1555_v26, %v1326_v0  ;;  %v2247_v26 = vsel %vm853_vm0, %v2231_v51, 0.0 }
 0x194   : > { %v1833_v52 = vmul.f32 %v8507_v25, %v1767_v27  ;;  %v1498_v2 = vpop.permute.xlu0 %1497 }
 0x195   : > { %v1557_v35 = vmul.f32 %v8492_v13, %v1498_v2 }
 0x196   : > { %v1878_v11 = vadd.f32 %v1833_v52, %v1600_v48 }
 0x197   : > { %v1775_v23 = vpop.permute.xlu1 %1774  ;;  %v1602_v17 = vadd.f32 %v1557_v35, %v1328_v32  ;;  %v9127_v42 = vpop.f32.mrb[0].mxu0 }
 0x198   : > { %v1929_v40 = vadd.f32 %v8978_v29, %v1878_v11  ;;  %v1835_v34 = vmul.f32 %v8507_v25, %v1775_v23  ;;  %v1771_v37 = vpop.permute.xlu0 %1770  ;;  %v2050_v56 = vld [vmem:[#allocation2 + $0x120] ss:$3 sm:$0xff]  ;;  %v2080_v5 = vld [vmem:[#allocation2 + $0x121] ss:$3 sm:$0xff]  ;;  %v7194_v16 = vpop.f32.mrb[1].mxu0 }
 0x199   : > { %v1834_v18 = vmul.f32 %v8507_v25, %v1771_v37  ;;  %v2097_v33 = vmax.f32 %v2050_v56, %v2080_v5  ;;  %v2125_v44 = vld [vmem:[#allocation2 + $0x122] ss:$3 sm:$0xff] }
 0x19a   : > { %v1974_v54 = vmax.f32 %v1929_v40, 0.0  ;;  %v1880_v31 = vadd.f32 %v1835_v34, %v1602_v17 }
 0x19b   : > { %v1879_v45 = vadd.f32 %v1834_v18, %v1601_v19  ;;  %v1277_v53 = vpop.permute.xlu1 %1276  ;;  %v2142_v55 = vmax.f32 %v2097_v33, %v2125_v44 }
 0x19c   : > { %2020 = vst.msk [vmem:[#allocation2 + $0x138] sm:$0xff] %vm1980_vm7, %v1974_v54  ;;  %v1931_v60 = vadd.f32 %v8978_v29, %v1880_v31  ;;  %v1273_v61 = vpop.permute.xlu0 %1272 }
 0x19d   : > { %v1930_v46 = vadd.f32 %v8978_v29, %v1879_v45  ;;  %7229 = vmatmul.mubr.msk.f32.gmra.mrb[24].mxu0 %vm1980_vm7, %v2142_v55  ;;  %v2193_v6 = vrot.slane %v2142_v55, 7  ;;  %v2235_v9 = vrot.slane %v2142_v55, 1  ;;  %v1329_v24 = vmul.f32 %v8487_v10, %v1273_v61 }
 0x19e   : > { %v1976_v63 = vmax.f32 %v1931_v60, 0.0  ;;  %7231 = vmatprep.mubr.msk.f32.mxu0 %vm8224_vm2, %v8223_v41 }
 0x19f   : > { %v1975_v20 = vmax.f32 %v1930_v46, 0.0  ;;  %v1502_v43 = vpop.permute.xlu1 %1501  ;;  %v2194_v57 = vsel %vm853_vm0, %v2186_v28, %v2193_v6  ;;  %v2236_v47 = vsel %vm994_vm1, %v2231_v51, %v2235_v9  ;;  %v1330_v51 = vmul.f32 %v8487_v10, %v1277_v53 }
 0x1a0   : > { %2022 = vst.msk [vmem:[#allocation2 + $0x148] sm:$0xff] %vm1980_vm7, %v1976_v63  ;;  %7276 = vmatmul.mubr.msk.f32.gmra.mrb[20].mxu1 %vm1980_vm7, %v2194_v57  ;;  %v1281_v0 = vpop.permute.xlu0 %1280  ;;  %v9142_v27 = vsel %vm984_vm3, %v2247_v26, %v2236_v47  ;;  %v1558_v28 = vmul.f32 %v8492_v13, %v1502_v43 }
 0x1a1   : > { %2021 = vst.msk [vmem:[#allocation2 + $0x140] sm:$0xff] %vm1980_vm7, %v1975_v20  ;;  %7278 = vmatprep.mubr.msk.f32.mxu1 %vm8224_vm2, %v8223_v41  ;;  %v1331_v18 = vmul.f32 %v8487_v10, %v1281_v0 }
 0x1a2   : > { %v1603_v37 = vadd.f32 %v1558_v28, %v1329_v24 }
 0x1a3   : > { %v1510_v48 = vpop.permute.xlu1 %1509 }
 0x1a4   : > { %v1506_v52 = vpop.permute.xlu0 %1505  ;;  %v1560_v32 = vmul.f32 %v8492_v13, %v1510_v48 }
 0x1a5   : > { %v1559_v2 = vmul.f32 %v8492_v13, %v1506_v52 }
 0x1a6   : > { %v1605_v13 = vadd.f32 %v1560_v32, %v1331_v18  ;;  %v2200_v32 = vsel %vm853_vm0, 0.0, %v2153_v50 }
 0x1a7   : > { %v1783_v35 = vpop.permute.xlu1 %1782  ;;  %v1604_v11 = vadd.f32 %v1559_v2, %v1330_v51  ;;  %v9153_v23 = vpop.f32.mrb[2].mxu0 }
 0x1a8   : > { %v1837_v36 = vmul.f32 %v8507_v25, %v1783_v35  ;;  %v1779_v40 = vpop.permute.xlu0 %1778  ;;  %v2052_v17 = vld [vmem:[#allocation2 + $0x138] ss:$3 sm:$0xff]  ;;  %v2082_v34 = vld [vmem:[#allocation2 + $0x139] ss:$3 sm:$0xff]  ;;  %v7197_v5 = vpop.f32.mrb[3].mxu0  ;;  %v2147_v35 = vld [vmem:[%s11286_s2 + $0x10] sm:$0xff] }
 0x1a9   : > { %v1836_v56 = vmul.f32 %v8507_v25, %v1779_v40  ;;  %v2098_v19 = vmax.f32 %v2052_v17, %v2082_v34  ;;  %v2127_v33 = vld [vmem:[#allocation2 + $0x13a] ss:$3 sm:$0xff] }
 0x1aa   : > { %v1882_v16 = vadd.f32 %v1837_v36, %v1604_v11 }
 0x1ab   : > { %v1881_v54 = vadd.f32 %v1836_v56, %v1603_v37  ;;  %v9157_v31 = vmax.f32 %v2098_v19, %v2127_v33 }
 0x1ac   : > { %v1933_v44 = vadd.f32 %v8978_v29, %v1882_v16  ;;  %v1788_v45 = vpop.permute.xlu0 %1787 }
 0x1ad   : > { %v1932_v53 = vadd.f32 %v8978_v29, %v1881_v54  ;;  %v1838_v55 = vmul.f32 %v8507_v25, %v1788_v45  ;;  %7232 = vmatmul.mubr.msk.f32.gmra.mrb[26].mxu0 %vm1980_vm7, %v9157_v31  ;;  %v2195_v60 = vrot.slane %v9157_v31, 7  ;;  %v2237_v10 = vrot.slane %v9157_v31, 1 }
 0x1ae   : > { %v1978_v61 = vmax.f32 %v1933_v44, 0.0  ;;  %7234 = vmatprep.mubr.msk.f32.mxu0 %vm8224_vm2, %v8223_v41 }
 0x1af   : > { %v1977_v46 = vmax.f32 %v1932_v53, 0.0  ;;  %v1883_v63 = vadd.f32 %v1838_v55, %v1605_v13  ;;  %v2196_v20 = vsel %vm853_vm0, %v2193_v6, %v2195_v60  ;;  %v9172_v43 = vsel %vm994_vm1, %v2235_v9, %v2237_v10  ;;  %v2864_v55 = vld [vmem:[%s11289_s10 + $0x20] sm:$0xff] }
 0x1b0   : > { %2024 = vst.msk [vmem:[#allocation2 + $0x158] sm:$0xff] %vm1980_vm7, %v1978_v61  ;;  %7279 = vmatmul.mubr.msk.f32.gmra.mrb[22].mxu1 %vm1980_vm7, %v2196_v20 }
 0x1b1   : > { %2023 = vst.msk [vmem:[#allocation2 + $0x150] sm:$0xff] %vm1980_vm7, %v1977_v46  ;;  %v1934_v25 = vadd.f32 %v8978_v29, %v1883_v63  ;;  %7281 = vmatprep.mubr.msk.f32.mxu1 %vm8224_vm2, %v8223_v41  ;;  %v2866_v46 = vld [vmem:[%s11289_s10 + $0x30] sm:$0xff]  ;;  %v2867_v63 = vld [vmem:[%s11289_s10 + $0x38] sm:$0xff] }
 0x1b2   : > { %v7910_v20 = vpack.c.bf16 %v2867_v63, %v2866_v46 }
 0x1b3   : > { %v1979_v57 = vmax.f32 %v1934_v25, 0.0 }
 0x1b5   : > { %2025 = vst.msk [vmem:[#allocation2 + $0x160] sm:$0xff] %vm1980_vm7, %v1979_v57 }
 0x1bb   : > { %v2356_v6 = vpop.f32.mrb[4].mxu0 }
 0x1bc   : > { %v2054_v47 = vld [vmem:[#allocation2 + $0x150] ss:$3 sm:$0xff]  ;;  %v2084_v26 = vld [vmem:[#allocation2 + $0x151] ss:$3 sm:$0xff]  ;;  %v7200_v0 = vpop.f32.mrb[5].mxu0 }
 0x1bd   : > { %v2099_v9 = vmax.f32 %v2054_v47, %v2084_v26  ;;  %v2129_v48 = vld [vmem:[#allocation2 + $0x152] ss:$3 sm:$0xff] }
 0x1be   : > { %v2530_v52 = vpop.f32.mrb[0].mxu1 }
 0x1bf   : > { %v9181_v28 = vmax.f32 %v2099_v9, %v2129_v48  ;;  %v9183_v2 = vadd.f32 %v2530_v52, %v2356_v6  ;;  %v7247_v51 = vpop.f32.mrb[1].mxu1 }
 0x1c1   : > { %7235 = vmatmul.mubr.msk.f32.gmra.mrb[28].mxu0 %vm1980_vm7, %v9181_v28  ;;  %v2197_v29 = vrot.slane %v9181_v28, 7 }
 0x1c2   : > { %7239 = vmatprep.mubr.msk.f32.mxu0 %vm8224_vm2, %v8223_v41 }
 0x1c3   : > { %v2198_v24 = vsel %vm853_vm0, %v2195_v60, %v2197_v29  ;;  %v2865_v60 = vld [vmem:[%s11289_s10 + $0x28] sm:$0xff] }
 0x1c4   : > { %7282 = vmatmul.mubr.msk.f32.gmra.mrb[24].mxu1 %vm1980_vm7, %v2198_v24  ;;  %v7907_v61 = vpack.c.bf16 %v2865_v60, %v2864_v55 }
 0x1c5   : > { %7240 = vmatmul.mubr.msk.f32.vlgmr.msra.gmra.mrb[30].mxu0 %vm1980_vm7, %v2200_v32  ;;  %7339 = vmatprep.mubr.msk.f32.mxu1 %vm8224_vm2, %v8223_v41 }
 0x1c6   : > { %7242 = vmatprep.mubr.msk.f32.mxu0 %vm8224_vm2, %v8223_v41  ;;  %7285 = vmatpush3.msra.mxu0 %v2147_v35 }
 0x1c9   : > { %7243 = vmatmul.mubr.msk.f32.gmra.mrb[32].mxu0 %vm1980_vm7, %v8648_v58 }
 0x1ca   : > { %7286 = vmatprep.mubr.msk.f32.mxu0 %vm8224_vm2, %v8223_v41 }
 0x1cb   : > { %v2361_v11 = vpop.f32.mrb[6].mxu0 }
 0x1cc   : > { %v7203_v36 = vpop.f32.mrb[7].mxu0 }
 0x1cd   : > { %7287 = vmatmul.mubr.msk.f32.vlgmr.msra.gmra.mrb[34].mxu0 %vm1980_vm7, %v8653_v59 }
 0x1ce   : > { %7289 = vmatprep.mubr.msk.f32.mxu0 %vm8224_vm2, %v8223_v41 }
 0x1d0   : > { %v2535_v49 = vpop.f32.mrb[2].mxu1 }
 0x1d1   : > { %7290 = vmatmul.mubr.msk.f32.gmra.mrb[36].mxu0 %vm1980_vm7, %v8722_v21  ;;  %v9213_v50 = vadd.f32 %v2535_v49, %v2361_v11  ;;  %v7250_v40 = vpop.f32.mrb[3].mxu1 }
 0x1d2   : > { %7292 = vmatprep.mubr.msk.f32.mxu0 %vm8224_vm2, %v8223_v41 }
 0x1d5   : > { %7293 = vmatmul.mubr.msk.f32.gmra.mrb[38].mxu0 %vm1980_vm7, %v8779_v14 }
 0x1d6   : > { %7295 = vmatprep.mubr.msk.f32.mxu0 %vm8224_vm2, %v8223_v41 }
 0x1d9   : > { %7296 = vmatmul.mubr.msk.f32.gmra.mrb[40].mxu0 %vm1980_vm7, %v8861_v38 }
 0x1da   : > { %7298 = vmatprep.mubr.msk.f32.mxu0 %vm8224_vm2, %v8223_v41 }
 0x1dd   : > { %7299 = vmatmul.mubr.msk.f32.gmra.mrb[42].mxu0 %vm1980_vm7, %v8919_v15 }
 0x1de   : > { %7301 = vmatprep.mubr.msk.f32.mxu0 %vm8224_vm2, %v8223_v41 }
 0x1df   : > { %v2366_v58 = vpop.f32.mrb[8].mxu0 }
 0x1e0   : > { %v7206_v59 = vpop.f32.mrb[9].mxu0 }
 0x1e1   : > { %7302 = vmatmul.mubr.msk.f32.gmra.mrb[44].mxu0 %vm1980_vm7, %v8961_v39 }
 0x1e2   : > { %7304 = vmatprep.mubr.msk.f32.mxu0 %vm8224_vm2, %v8223_v41  ;;  %v2540_v21 = vpop.f32.mrb[4].mxu1 }
 0x1e3   : > { %v9233_v14 = vadd.f32 %v2540_v21, %v2366_v58  ;;  %v7253_v38 = vpop.f32.mrb[5].mxu1 }
 0x1e5   : > { %7305 = vmatmul.mubr.msk.f32.gmra.mrb[46].mxu0 %vm1980_vm7, %v8994_v22 }
 0x1e6   : > { %7307 = vmatprep.mubr.msk.f32.mxu0 %vm8224_vm2, %v8223_v41 }
 0x1e9   : > { %7308 = vmatmul.mubr.msk.f32.gmra.mrb[48].mxu0 %vm1980_vm7, %v9031_v30 }
 0x1ea   : > { %7310 = vmatprep.mubr.msk.f32.mxu0 %vm8224_vm2, %v8223_v41 }
 0x1ed   : > { %7311 = vmatmul.mubr.msk.f32.gmra.mrb[50].mxu0 %vm1980_vm7, %v9057_v8  ;;  %v2239_v8 = vrot.slane %v9181_v28, 1 }
 0x1ee   : > { %7313 = vmatprep.mubr.msk.f32.mxu0 %vm8224_vm2, %v8223_v41 }
 0x1ef   : > { %v2371_v15 = vpop.f32.mrb[10].mxu0  ;;  %v2249_v34 = vsel %vm994_vm1, %v2239_v8, 0.0 }
 0x1f0   : > { %v7209_v39 = vpop.f32.mrb[11].mxu0 }
 0x1f1   : > { %7314 = vmatmul.mubr.msk.f32.gmra.mrb[52].mxu0 %vm1980_vm7, %v9084_v7  ;;  %v2240_v7 = vsel %vm994_vm1, %v2237_v10, %v2239_v8  ;;  %v8225_v10 = vmov 0.0|0.0  }
 0x1f2   : > { %7316 = vmatprep.mubr.msk.f32.mxu0 %vm8224_vm2, %v8223_v41  ;;  %v2545_v22 = vpop.f32.mrb[6].mxu1  ;;  %7906 = vmatprep.subr.bf16.mxu1 %v8225_v10 }
 0x1f3   : > { %v9251_v17 = vadd.f32 %v2545_v22, %v2371_v15  ;;  %v7256_v30 = vpop.f32.mrb[7].mxu1  ;;  %7924 = vmatprep.subr.bf16.mxu0 %v8225_v10  ;;  %7908 = vmatpush3.bf16.msra.mxu1 %v7907_v61 }
 0x1f4   : > { %7909 = vmatprep.subr.bf16.mxu1 %v8225_v10 }
 0x1f5   : > { %7317 = vmatmul.mubr.msk.f32.gmra.mrb[54].mxu0 %vm1980_vm7, %v9107_v1 }
 0x1f6   : > { %7319 = vmatprep.mubr.msk.f32.mxu0 %vm8224_vm2, %v8223_v41 }
 0x1f7   : > { %7911 = vmatpush3.bf16.msra.mxu1 %v7910_v20 }
 0x1f8   : > { %7912 = vmatprep.subr.bf16.mxu1 %v8225_v10 }
 0x1f9   : > { %7320 = vmatmul.mubr.msk.f32.gmra.mrb[56].mxu0 %vm1980_vm7, %v9142_v27 }
 0x1fa   : > { %7322 = vmatprep.mubr.msk.f32.mxu0 %vm8224_vm2, %v8223_v41 }
 0x1fd   : > { %7323 = vmatmul.mubr.msk.f32.gmra.mrb[58].mxu0 %vm1980_vm7, %v9172_v43 }
 0x1fe   : > { %7325 = vmatprep.mubr.msk.f32.mxu0 %vm8224_vm2, %v8223_v41 }
 0x201   : > { %7326 = vmatmul.mubr.msk.f32.gmra.mrb[60].mxu0 %vm1980_vm7, %v2240_v7 }
 0x202   : > { %7328 = vmatprep.mubr.msk.f32.mxu0 %vm8224_vm2, %v8223_v41 }
 0x203   : > { %v2376_v1 = vpop.f32.mrb[12].mxu0 }
 0x204   : > { %v7212_v27 = vpop.f32.mrb[13].mxu0 }
 0x205   : > { %7329 = vmatmul.mubr.msk.f32.gmra.mrb[62].mxu0 %vm1980_vm7, %v2249_v34 }
 0x206   : > { %v2550_v37 = vpop.f32.mrb[8].mxu1  ;;  %7416 = vmatprep.mubr.msk.f32.mxu0 %vm8224_vm2, %v8223_v41 }
 0x207   : > { %v9276_v56 = vadd.f32 %v2550_v37, %v2376_v1  ;;  %v7259_v5 = vpop.f32.mrb[9].mxu1 }
 0x213   : > { %v2381_v19 = vpop.f32.mrb[14].mxu0 }
 0x214   : > { %v7215_v18 = vpop.f32.mrb[15].mxu0 }
 0x215   : > { %v9315_v18 = vld [vmem:[%s11290_s9] ss:$0 sm:$0xff] }
 0x218   : > { %v2555_v16 = vpop.f32.mrb[10].mxu1 }
 0x219   : > { %v9278_v33 = vadd.f32 %v2555_v16, %v2381_v19  ;;  %v7262_v54 = vpop.f32.mrb[11].mxu1 }
 0x228   : > { %v2386_v31 = vpop.f32.mrb[16].mxu0 }
 0x229   : > { %v7218_v13 = vpop.f32.mrb[17].mxu0 }
 0x22b   : > { %v2560_v44 = vpop.f32.mrb[12].mxu1 }
 0x22c   : > { %v9280_v45 = vadd.f32 %v2560_v44, %v2386_v31  ;;  %v7265_v53 = vpop.f32.mrb[13].mxu1 }
 0x238   : > { %v2391_v43 = vpop.f32.mrb[18].mxu0 }
 0x239   : > { %v7221_v25 = vpop.f32.mrb[19].mxu0 }
 0x23b   : > { %v2565_v57 = vpop.f32.mrb[14].mxu1 }
 0x23c   : > { %v9298_v6 = vadd.f32 %v2565_v57, %v2391_v43  ;;  %v7268_v47 = vpop.f32.mrb[15].mxu1 }
 0x24c   : > { %v2396_v26 = vpop.f32.mrb[20].mxu0 }
 0x24d   : > { %v7224_v0 = vpop.f32.mrb[21].mxu0 }
 0x24f   : > { %v2570_v9 = vpop.f32.mrb[16].mxu1 }
 0x250   : > { %v9300_v48 = vadd.f32 %v2570_v9, %v2396_v26  ;;  %v7271_v52 = vpop.f32.mrb[17].mxu1 }
 0x25c   : > { %v2401_v28 = vpop.f32.mrb[22].mxu0 }
 0x25d   : > { %v7227_v51 = vpop.f32.mrb[23].mxu0 }
 0x261   : > { %v2575_v29 = vpop.f32.mrb[18].mxu1 }
 0x262   : > { %v9302_v24 = vadd.f32 %v2575_v29, %v2401_v28  ;;  %v7274_v35 = vpop.f32.mrb[19].mxu1 }
 0x270   : > { %v2406_v32 = vpop.f32.mrb[24].mxu0 }
 0x271   : > { %v7230_v11 = vpop.f32.mrb[25].mxu0 }
 0x272   : > { %v2861_v11 = vld [vmem:[%s11289_s10 + $0x8] sm:$0xff] }
 0x273   : > { %v2580_v36 = vpop.f32.mrb[20].mxu1 }
 0x274   : > { %v9304_v49 = vadd.f32 %v2580_v36, %v2406_v32  ;;  %v7277_v40 = vpop.f32.mrb[21].mxu1 }
 0x280   : > { %v2411_v58 = vpop.f32.mrb[26].mxu0 }
 0x281   : > { %v7233_v59 = vpop.f32.mrb[27].mxu0 }
 0x283   : > { %v2585_v21 = vpop.f32.mrb[22].mxu1 }
 0x284   : > { %v9306_v38 = vadd.f32 %v2585_v21, %v2411_v58  ;;  %v7280_v15 = vpop.f32.mrb[23].mxu1 }
 0x294   : > { %v2416_v39 = vpop.f32.mrb[28].mxu0 }
 0x295   : > { %v7236_v22 = vpop.f32.mrb[29].mxu0 }
 0x297   : > { %v2590_v30 = vpop.f32.mrb[24].mxu1 }
 0x298   : > { %v9308_v8 = vadd.f32 %v2590_v30, %v2416_v39  ;;  %v2520_v7 = vpop.f32.mrb[30].mxu0  ;;  %v7283_v1 = vpop.f32.mrb[25].mxu1 }
 0x299   : > { %v2521_v27 = vadd.f32 %v2520_v7, %v9127_v42  ;;  %v7241_v34 = vpop.f32.mrb[31].mxu0  ;;  %v2862_v7 = vld [vmem:[%s11289_s10 + $0x10] sm:$0xff]  ;;  %v2863_v1 = vld [vmem:[%s11289_s10 + $0x18] sm:$0xff] }
 0x29c   : > { %v2525_v37 = vpop.f32.mrb[32].mxu0 }
 0x29d   : > { %v2526_v5 = vadd.f32 %v2525_v37, %v9153_v23  ;;  %v7244_v19 = vpop.f32.mrb[33].mxu0 }
 0x2a0   : > { %v2694_v16 = vpop.f32.mrb[34].mxu0 }
 0x2a1   : > { %v2768_v54 = vadd.f32 %v2694_v16, %v2521_v27  ;;  %v7288_v31 = vpop.f32.mrb[35].mxu0 }
 0x2a3   : > { %v2789_v13 = vadd.f32 %v9315_v18, %v2768_v54 }
 0x2a4   : > { %v2699_v44 = vpop.f32.mrb[36].mxu0 }
 0x2a5   : > { %v2804_v53 = vmax.f32 %v2789_v13, 0.0  ;;  %v2769_v55 = vadd.f32 %v2699_v44, %v2526_v5  ;;  %v7291_v42 = vpop.f32.mrb[37].mxu0 }
 0x2a7   : > { %2820 = vst.msk [vmem:[#allocation2] sm:$0xff] %vm2819_vm9, %v2804_v53  ;;  %v2790_v23 = vadd.f32 %v9315_v18, %v2769_v55 }
 0x2a8   : > { %v2704_v60 = vpop.f32.mrb[38].mxu0 }
 0x2a9   : > { %v2805_v61 = vmax.f32 %v2790_v23, 0.0  ;;  %v2770_v46 = vadd.f32 %v2704_v60, %v9183_v2  ;;  %v7294_v63 = vpop.f32.mrb[39].mxu0 }
 0x2ab   : > { %2821 = vst.msk [vmem:[#allocation2 + $0x8] sm:$0xff] %vm2819_vm9, %v2805_v61  ;;  %v2791_v20 = vadd.f32 %v9315_v18, %v2770_v46 }
 0x2ac   : > { %v2709_v43 = vpop.f32.mrb[40].mxu0 }
 0x2ad   : > { %v2806_v25 = vmax.f32 %v2791_v20, 0.0  ;;  %v2771_v57 = vadd.f32 %v2709_v43, %v9213_v50  ;;  %v7297_v47 = vpop.f32.mrb[41].mxu0  ;;  %v2860_v50 = vld [vmem:[%s11289_s10] sm:$0xff] }
 0x2ae   : > { %v7913_v15 = vpack.c.bf16 %v2861_v11, %v2860_v50 }
 0x2af   : > { %2822 = vst.msk [vmem:[#allocation2 + $0x10] sm:$0xff] %vm2819_vm9, %v2806_v25  ;;  %v2792_v26 = vadd.f32 %v9315_v18, %v2771_v57 }
 0x2b0   : > { %v2714_v0 = vpop.f32.mrb[42].mxu0 }
 0x2b1   : > { %v2807_v9 = vmax.f32 %v2792_v26, 0.0  ;;  %v2772_v52 = vadd.f32 %v2714_v0, %v9233_v14  ;;  %v7300_v28 = vpop.f32.mrb[43].mxu0 }
 0x2b3   : > { %2823 = vst.msk [vmem:[#allocation2 + $0x18] sm:$0xff] %vm2819_vm9, %v2807_v9  ;;  %v2793_v2 = vadd.f32 %v9315_v18, %v2772_v52 }
 0x2b4   : > { %v2719_v51 = vpop.f32.mrb[44].mxu0 }
 0x2b5   : > { %v2808_v29 = vmax.f32 %v2793_v2, 0.0  ;;  %v2773_v35 = vadd.f32 %v2719_v51, %v9251_v17  ;;  %v7303_v32 = vpop.f32.mrb[45].mxu0 }
 0x2b6   : > { %v2835_v36 = vld [vmem:[#allocation2] ss:$3 sm:$0xff]  ;;  %v2840_v14 = vld [vmem:[#allocation2 + $0x1] ss:$3 sm:$0xff]  ;;  %v2850_v21 = vld [vmem:[#allocation2 + $0x2] ss:$3 sm:$0xff] }
 0x2b7   : > { %2824 = vst.msk [vmem:[#allocation2 + $0x20] sm:$0xff] %vm2819_vm9, %v2808_v29  ;;  %v2794_v40 = vadd.f32 %v9315_v18, %v2773_v35  ;;  %v2845_v58 = vmax.f32 %v2835_v36, %v2840_v14 }
 0x2b8   : > { %v2724_v59 = vpop.f32.mrb[46].mxu0 }
 0x2b9   : > { %v2809_v17 = vmax.f32 %v2794_v40, 0.0  ;;  %v2774_v39 = vadd.f32 %v2724_v59, %v9276_v56  ;;  %v7306_v22 = vpop.f32.mrb[47].mxu0  ;;  %v9339_v30 = vmax.f32 %v2845_v58, %v2850_v21  ;;  %v7916_v56 = vpack.c.bf16 %v2863_v1, %v2862_v7 }
 0x2bb   : > { %2825 = vst.msk [vmem:[#allocation2 + $0x28] sm:$0xff] %vm2819_vm9, %v2809_v17  ;;  %v2795_v27 = vadd.f32 %v9315_v18, %v2774_v39  ;;  %7340 = vmatmul.mubr.msk.f32.vlgmr.msra.gmra.mrb[26].mxu1 %vm2819_vm9, %v9339_v30 }
 0x2bc   : > { %v2729_v34 = vpop.f32.mrb[48].mxu0  ;;  %7342 = vmatprep.mubr.msk.f32.mxu1 %vm8224_vm2, %v8223_v41  ;;  %7914 = vmatpush3.bf16.msra.mxu1 %v7913_v15 }
 0x2bd   : > { %v2810_v37 = vmax.f32 %v2795_v27, 0.0  ;;  %v2775_v5 = vadd.f32 %v2729_v34, %v9278_v33  ;;  %v7309_v19 = vpop.f32.mrb[49].mxu0  ;;  %7915 = vmatprep.subr.bf16.mxu1 %v8225_v10 }
 0x2bf   : > { %2826 = vst.msk [vmem:[#allocation2 + $0x30] sm:$0xff] %vm2819_vm9, %v2810_v37  ;;  %v2796_v16 = vadd.f32 %v9315_v18, %v2775_v5 }
 0x2c0   : > { %v2734_v54 = vpop.f32.mrb[50].mxu0  ;;  %7917 = vmatpush3.bf16.msra.mxu1 %v7916_v56 }
 0x2c1   : > { %v2811_v31 = vmax.f32 %v2796_v16, 0.0  ;;  %v2776_v13 = vadd.f32 %v2734_v54, %v9280_v45  ;;  %v7312_v44 = vpop.f32.mrb[51].mxu0  ;;  %7918 = vmatprep.subr.bf16.mxu1 %v8225_v10 }
 0x2c2   : > { %v2836_v53 = vld [vmem:[#allocation2 + $0x18] ss:$3 sm:$0xff]  ;;  %v2841_v55 = vld [vmem:[#allocation2 + $0x19] ss:$3 sm:$0xff]  ;;  %v2851_v60 = vld [vmem:[#allocation2 + $0x1a] ss:$3 sm:$0xff] }
 0x2c3   : > { %2827 = vst.msk [vmem:[#allocation2 + $0x38] sm:$0xff] %vm2819_vm9, %v2811_v31  ;;  %v2797_v33 = vadd.f32 %v9315_v18, %v2776_v13  ;;  %v2846_v42 = vmax.f32 %v2836_v53, %v2841_v55  ;;  %v2869_v31 = vld [vmem:[%s11289_s10 + $0x48] sm:$0xff]  ;;  %v2875_v13 = vrot.slane %v9339_v30, 7 }
 0x2c4   : > { %v2739_v23 = vpop.f32.mrb[52].mxu0 }
 0x2c5   : > { %v2812_v61 = vmax.f32 %v2797_v33, 0.0  ;;  %v2777_v46 = vadd.f32 %v2739_v23, %v9298_v6  ;;  %v7315_v63 = vpop.f32.mrb[53].mxu0  ;;  %v9362_v20 = vmax.f32 %v2846_v42, %v2851_v60  ;;  %v2870_v33 = vld [vmem:[%s11289_s10 + $0x50] sm:$0xff]  ;;  %v2871_v42 = vld [vmem:[%s11289_s10 + $0x58] sm:$0xff]  ;;  %v2894_v23 = vsel %vm853_vm0, 0.0, %v2875_v13 }
 0x2c6   : > { %v7922_v63 = vpack.c.bf16 %v2871_v42, %v2870_v33 }
 0x2c7   : > { %2828 = vst.msk [vmem:[#allocation2 + $0x40] sm:$0xff] %vm2819_vm9, %v2812_v61  ;;  %v2798_v45 = vadd.f32 %v9315_v18, %v2777_v46  ;;  %7343 = vmatmul.mubr.msk.f32.gmra.mrb[28].mxu1 %vm2819_vm9, %v9362_v20  ;;  %v2876_v16 = vrot.slane %v9362_v20, 7 }
 0x2c8   : > { %v2744_v43 = vpop.f32.mrb[54].mxu0  ;;  %7345 = vmatprep.mubr.msk.f32.mxu1 %vm8224_vm2, %v8223_v41 }
 0x2c9   : > { %v2813_v25 = vmax.f32 %v2798_v45, 0.0  ;;  %v2778_v57 = vadd.f32 %v2744_v43, %v9300_v48  ;;  %v7318_v47 = vpop.f32.mrb[55].mxu0  ;;  %v2877_v53 = vsel %vm853_vm0, %v2875_v13, %v2876_v16 }
 0x2ca   : > { %v2895_v60 = vsel %vm984_vm3, %v2877_v53, 0.0 }
 0x2cb   : > { %2829 = vst.msk [vmem:[#allocation2 + $0x48] sm:$0xff] %vm2819_vm9, %v2813_v25  ;;  %v2799_v6 = vadd.f32 %v9315_v18, %v2778_v57  ;;  %v2896_v45 = vsel %vm986_vm4, %v2895_v60, %v2876_v16 }
 0x2cc   : > { %v2749_v26 = vpop.f32.mrb[56].mxu0 }
 0x2cd   : > { %v2814_v0 = vmax.f32 %v2799_v6, 0.0  ;;  %v2779_v9 = vadd.f32 %v2749_v26, %v9302_v24  ;;  %v7321_v52 = vpop.f32.mrb[57].mxu0 }
 0x2ce   : > { %v2837_v28 = vld [vmem:[#allocation2 + $0x30] ss:$3 sm:$0xff]  ;;  %v2842_v2 = vld [vmem:[#allocation2 + $0x31] ss:$3 sm:$0xff]  ;;  %v2852_v32 = vld [vmem:[#allocation2 + $0x32] ss:$3 sm:$0xff] }
 0x2cf   : > { %2830 = vst.msk [vmem:[#allocation2 + $0x50] sm:$0xff] %vm2819_vm9, %v2814_v0  ;;  %v2800_v51 = vadd.f32 %v9315_v18, %v2779_v9  ;;  %v2847_v29 = vmax.f32 %v2837_v28, %v2842_v2  ;;  %v2902_v0 = vrot.slane %v9362_v20, 1  ;;  %v2901_v28 = vrot.slane %v9339_v30, 1 }
 0x2d0   : > { %v2754_v35 = vpop.f32.mrb[58].mxu0 }
 0x2d1   : > { %v2815_v48 = vmax.f32 %v2800_v51, 0.0  ;;  %v2780_v50 = vadd.f32 %v2754_v35, %v9304_v49  ;;  %v7324_v11 = vpop.f32.mrb[59].mxu0  ;;  %v9377_v36 = vmax.f32 %v2847_v29, %v2852_v32  ;;  %v2903_v2 = vsel %vm994_vm1, %v2901_v28, %v2902_v0 }
 0x2d2   : > { %v2917_v20 = vsel %vm853_vm0, %v2902_v0, 0.0 }
 0x2d3   : > { %2831 = vst.msk [vmem:[#allocation2 + $0x58] sm:$0xff] %vm2819_vm9, %v2815_v48  ;;  %v2801_v24 = vadd.f32 %v9315_v18, %v2780_v50  ;;  %7346 = vmatmul.mubr.msk.f32.gmra.mrb[30].mxu1 %vm2819_vm9, %v9377_v36  ;;  %v2881_v55 = vrot.slane %v9377_v36, 7  ;;  %v2905_v52 = vrot.slane %v9377_v36, 1 }
 0x2d4   : > { %v2759_v14 = vpop.f32.mrb[60].mxu0  ;;  %7348 = vmatprep.mubr.msk.f32.mxu1 %vm8224_vm2, %v8223_v41 }
 0x2d5   : > { %v2816_v40 = vmax.f32 %v2801_v24, 0.0  ;;  %v2781_v58 = vadd.f32 %v2759_v14, %v9306_v38  ;;  %v7327_v59 = vpop.f32.mrb[61].mxu0  ;;  %v2882_v61 = vsel %vm853_vm0, %v2876_v16, %v2881_v55  ;;  %v2906_v51 = vsel %vm994_vm1, %v2902_v0, %v2905_v52  ;;  %v3275_v16 = vld [vmem:[%s11291_s4 + $0x28] sm:$0xff] }
 0x2d6   : > { %v2897_v43 = vsel %vm988_vm5, %v2882_v61, 0.0  ;;  %v2918_v35 = vsel %vm984_vm3, %v2917_v20, %v2906_v51  ;;  %v2919_v30 = vsel %vm986_vm4, %v2905_v52, 0.0 }
 0x2d7   : > { %2832 = vst.msk [vmem:[#allocation2 + $0x60] sm:$0xff] %vm2819_vm9, %v2816_v40  ;;  %v2802_v49 = vadd.f32 %v9315_v18, %v2781_v58  ;;  %v2898_v57 = vsel %vm990_vm6, %v2897_v43, %v2881_v55  ;;  %v3278_v40 = vld [vmem:[%s11291_s4 + $0x40] sm:$0xff]  ;;  %v3279_v58 = vld [vmem:[%s11291_s4 + $0x48] sm:$0xff] }
 0x2d8   : > { %v2764_v21 = vpop.f32.mrb[62].mxu0  ;;  %v7925_v59 = vpack.c.bf16 %v3279_v58, %v3278_v40 }
 0x2d9   : > { %v2817_v15 = vmax.f32 %v2802_v49, 0.0  ;;  %v2782_v17 = vadd.f32 %v2764_v21, %v9308_v8  ;;  %v7330_v39 = vpop.f32.mrb[63].mxu0  ;;  %v3280_v49 = vld [vmem:[%s11291_s4 + $0x50] sm:$0xff]  ;;  %v3281_v21 = vld [vmem:[%s11291_s4 + $0x58] sm:$0xff] }
 0x2da   : > { %v2838_v22 = vld [vmem:[#allocation2 + $0x48] ss:$3 sm:$0xff]  ;;  %v2843_v7 = vld [vmem:[#allocation2 + $0x49] ss:$3 sm:$0xff]  ;;  %v2853_v34 = vld [vmem:[#allocation2 + $0x4a] ss:$3 sm:$0xff]  ;;  %7926 = vmatpush3.bf16.msra.mxu0 %v7925_v59 }
 0x2db   : > { %2833 = vst.msk [vmem:[#allocation2 + $0x68] sm:$0xff] %vm2819_vm9, %v2817_v15  ;;  %v2803_v1 = vadd.f32 %v9315_v18, %v2782_v17  ;;  %v2848_v27 = vmax.f32 %v2838_v22, %v2843_v7  ;;  %v2868_v18 = vld [vmem:[%s11289_s10 + $0x40] sm:$0xff]  ;;  %7927 = vmatprep.subr.bf16.mxu0 %v8225_v10  ;;  %v7928_v15 = vpack.c.bf16 %v3281_v21, %v3280_v49  ;;  %v3283_v39 = vld [vmem:[%s11291_s4 + $0x68] sm:$0xff]  ;;  %v3284_v7 = vld [vmem:[%s11291_s4 + $0x70] sm:$0xff] }
 0x2dc   : > { %v7919_v44 = vpack.c.bf16 %v2869_v31, %v2868_v18  ;;  %v3282_v17 = vld [vmem:[%s11291_s4 + $0x60] sm:$0xff]  ;;  %v3276_v18 = vld [vmem:[%s11291_s4 + $0x30] sm:$0xff]  ;;  %v3277_v31 = vld [vmem:[%s11291_s4 + $0x38] sm:$0xff] }
 0x2dd   : > { %v2818_v56 = vmax.f32 %v2803_v1, 0.0  ;;  %v2858_v38 = vmax.f32 %v2848_v27, %v2853_v34  ;;  %v7931_v22 = vpack.c.bf16 %v3283_v39, %v3282_v17  ;;  %v3285_v1 = vld [vmem:[%s11291_s4 + $0x78] sm:$0xff]  ;;  %v3270_v27 = vld [vmem:[%s11291_s4] sm:$0xff]  ;;  %v7946_v13 = vpack.c.bf16 %v3277_v31, %v3276_v18 }
 0x2de   : > { %7929 = vmatpush3.bf16.msra.mxu0 %v7928_v15  ;;  %v7934_v34 = vpack.c.bf16 %v3285_v1, %v3284_v7  ;;  %v3286_v31 = vld [vmem:[%s11291_s4 + $0x80] sm:$0xff] }
 0x2df   : > { %2834 = vst.msk [vmem:[#allocation2 + $0x70] sm:$0xff] %vm2819_vm9, %v2818_v56  ;;  %7349 = vmatmul.mubr.msk.f32.gmra.mrb[32].mxu1 %vm2819_vm9, %v2858_v38  ;;  %v2886_v46 = vrot.slane %v2858_v38, 7  ;;  %v2909_v29 = vrot.slane %v2858_v38, 1  ;;  %7930 = vmatprep.subr.bf16.mxu0 %v8225_v10  ;;  %v3271_v56 = vld [vmem:[%s11291_s4 + $0x8] sm:$0xff]  ;;  %v3272_v38 = vld [vmem:[%s11291_s4 + $0x10] sm:$0xff] }
 0x2e0   : > { %7351 = vmatprep.mubr.msk.f32.mxu1 %vm8224_vm2, %v8223_v41 }
 0x2e1   : > { %v2887_v25 = vsel %vm853_vm0, %v2881_v55, %v2886_v46  ;;  %v2910_v32 = vsel %vm994_vm1, %v2905_v52, %v2909_v29  ;;  %v2921_v36 = vsel %vm990_vm6, %v2909_v29, 0.0 }
 0x2e2   : > { %v2899_v47 = vsel %vm992_vm8, %v2887_v25, 0.0  ;;  %v2920_v50 = vsel %vm988_vm5, %v2919_v30, %v2910_v32  ;;  %7932 = vmatpush3.bf16.msra.mxu0 %v7931_v22 }
 0x2e3   : > { %v2900_v6 = vsel %vm994_vm1, %v2899_v47, %v2886_v46  ;;  %7933 = vmatprep.subr.bf16.mxu0 %v8225_v10 }
 0x2e6   : > { %v2839_v37 = vld [vmem:[#allocation2 + $0x60] ss:$3 sm:$0xff]  ;;  %v2844_v8 = vld [vmem:[#allocation2 + $0x61] ss:$3 sm:$0xff]  ;;  %v2854_v19 = vld [vmem:[#allocation2 + $0x62] ss:$3 sm:$0xff]  ;;  %7935 = vmatpush3.bf16.msra.mxu0 %v7934_v34 }
 0x2e7   : > { %v2849_v5 = vmax.f32 %v2839_v37, %v2844_v8  ;;  %v3273_v37 = vld [vmem:[%s11291_s4 + $0x18] sm:$0xff]  ;;  %v7937_v8 = vpack.c.bf16 %v3271_v56, %v3270_v27  ;;  %7948 = vmatprep.subr.bf16.mxu0 %v8225_v10 }
 0x2e9   : > { %v2859_v54 = vmax.f32 %v2849_v5, %v2854_v19  ;;  %v7940_v5 = vpack.c.bf16 %v3273_v37, %v3272_v38  ;;  %v3274_v19 = vld [vmem:[%s11291_s4 + $0x20] sm:$0xff] }
 0x2eb   : > { %7352 = vmatmul.mubr.msk.f32.gmra.mrb[34].mxu1 %vm2819_vm9, %v2859_v54  ;;  %v2891_v26 = vrot.slane %v2859_v54, 7  ;;  %v2913_v48 = vrot.slane %v2859_v54, 1  ;;  %v7943_v54 = vpack.c.bf16 %v3275_v16, %v3274_v19 }
 0x2ec   : > { %7362 = vmatprep.mubr.msk.f32.mxu1 %vm8224_vm2, %v8223_v41 }
 0x2ed   : > { %v2892_v9 = vsel %vm853_vm0, %v2886_v46, %v2891_v26  ;;  %v2914_v11 = vsel %vm994_vm1, %v2909_v29, %v2913_v48  ;;  %v2923_v14 = vsel %vm994_vm1, %v2913_v48, 0.0 }
 0x2ee   : > { %v2922_v24 = vsel %vm992_vm8, %v2921_v36, %v2914_v11 }
 0x2ef   : > { %7363 = vmatmul.mubr.msk.f32.vlgmr.msra.gmra.mrb[36].mxu1 %vm2819_vm9, %v2894_v23 }
 0x2f0   : > { %7365 = vmatprep.mubr.msk.f32.mxu1 %vm8224_vm2, %v8223_v41  ;;  %7920 = vmatpush3.bf16.msra.mxu1 %v7919_v44 }
 0x2f1   : > { %7921 = vmatprep.subr.bf16.mxu1 %v8225_v10 }
 0x2f3   : > { %7366 = vmatmul.mubr.msk.f32.gmra.mrb[38].mxu1 %vm2819_vm9, %v2896_v45 }
 0x2f4   : > { %7368 = vmatprep.mubr.msk.f32.mxu1 %vm8224_vm2, %v8223_v41  ;;  %7923 = vmatpush3.bf16.msra.mxu1 %v7922_v63 }
 0x2f5   : > { %7936 = vmatprep.subr.bf16.mxu1 %v8225_v10 }
 0x2f7   : > { %7369 = vmatmul.mubr.msk.f32.gmra.mrb[40].mxu1 %vm2819_vm9, %v2898_v57 }
 0x2f8   : > { %7371 = vmatprep.mubr.msk.f32.mxu1 %vm8224_vm2, %v8223_v41 }
 0x2fb   : > { %7372 = vmatmul.mubr.msk.f32.gmra.mrb[42].mxu1 %vm2819_vm9, %v2900_v6 }
 0x2fc   : > { %7374 = vmatprep.mubr.msk.f32.mxu1 %vm8224_vm2, %v8223_v41 }
 0x2ff   : > { %7375 = vmatmul.mubr.msk.f32.gmra.mrb[44].mxu1 %vm2819_vm9, %v2892_v9 }
 0x300   : > { %7385 = vmatprep.mubr.msk.f32.mxu1 %vm8224_vm2, %v8223_v41 }
 0x303   : > { %7386 = vmatmul.mubr.msk.f32.vlgmr.msra.gmra.mrb[46].mxu1 %vm2819_vm9, %v2903_v2 }
 0x304   : > { %7388 = vmatprep.mubr.msk.f32.mxu1 %vm8224_vm2, %v8223_v41  ;;  %7938 = vmatpush3.bf16.msra.mxu1 %v7937_v8 }
 0x305   : > { %7939 = vmatprep.subr.bf16.mxu1 %v8225_v10 }
 0x307   : > { %7389 = vmatmul.mubr.msk.f32.gmra.mrb[48].mxu1 %vm2819_vm9, %v2918_v35  ;;  %v6789_v35 = vld [vmem:[%s11292_s29] ss:$0 sm:$0xff]  ;;  %s11295_s29 = sld [smem:[#allocation22_spill]] }
 0x308   : > { %7391 = vmatprep.mubr.msk.f32.mxu1 %vm8224_vm2, %v8223_v41  ;;  %7941 = vmatpush3.bf16.msra.mxu1 %v7940_v5 }
 0x309   : > { %7942 = vmatprep.subr.bf16.mxu1 %v8225_v10 }
 0x30b   : > { %7392 = vmatmul.mubr.msk.f32.gmra.mrb[50].mxu1 %vm2819_vm9, %v2920_v50 }
 0x30c   : > { %7394 = vmatprep.mubr.msk.f32.mxu1 %vm8224_vm2, %v8223_v41  ;;  %7944 = vmatpush3.bf16.msra.mxu1 %v7943_v54 }
 0x30d   : > { %7945 = vmatprep.subr.bf16.mxu1 %v8225_v10 }
 0x30f   : > { %7395 = vmatmul.mubr.msk.f32.gmra.mrb[52].mxu1 %vm2819_vm9, %v2922_v24 }
 0x310   : > { %7397 = vmatprep.mubr.msk.f32.mxu1 %vm8224_vm2, %v8223_v41  ;;  %7947 = vmatpush3.bf16.msra.mxu1 %v7946_v13  ;;  %v3287_v13 = vld [vmem:[%s11291_s4 + $0x88] sm:$0xff] }
 0x311   : > { %7960 = vmatprep.subr.bf16.mxu1 %v8225_v10 }
 0x313   : > { %7398 = vmatmul.mubr.msk.f32.gmra.mrb[54].mxu1 %vm2819_vm9, %v2923_v14 }
 0x314   : > { %7435 = vmatprep.mubr.msk.f32.mxu1 %vm8224_vm2, %v8223_v41 }
 0x38e   : > { %v3000_v44 = vpop.f32.mrb[26].mxu1 }
 0x38f   : > { %v7341_v53 = vpop.f32.mrb[27].mxu1 }
 0x39a   : > { %v3005_v55 = vpop.f32.mrb[28].mxu1 }
 0x39b   : > { %v7344_v33 = vpop.f32.mrb[29].mxu1 }
 0x39c   : > { %v7949_v33 = vpack.c.bf16 %v3287_v13, %v3286_v31  ;;  %v3567_v13 = vld [vmem:[%s11293_s5 + $0xd0] sm:$0xff] }
 0x3a6   : > { %v3010_v42 = vpop.f32.mrb[30].mxu1 }
 0x3a7   : > { %v7347_v23 = vpop.f32.mrb[31].mxu1 }
 0x3a8   : > { %v3288_v23 = vld [vmem:[%s11291_s4 + $0x90] sm:$0xff] }
 0x3b2   : > { %v3015_v60 = vpop.f32.mrb[32].mxu1 }
 0x3b3   : > { %v7350_v61 = vpop.f32.mrb[33].mxu1 }
 0x3be   : > { %v3020_v46 = vpop.f32.mrb[34].mxu1 }
 0x3bf   : > { %v7353_v63 = vpop.f32.mrb[35].mxu1 }
 0x3c2   : > { %v3104_v45 = vpop.f32.mrb[36].mxu1 }
 0x3c3   : > { %v3105_v43 = vadd.f32 %v3104_v45, %v3000_v44  ;;  %v7364_v25 = vpop.f32.mrb[37].mxu1  ;;  %v3290_v45 = vld [vmem:[%s11291_s4 + $0xa0] sm:$0xff] }
 0x3c6   : > { %v3109_v57 = vpop.f32.mrb[38].mxu1 }
 0x3c7   : > { %v3110_v47 = vadd.f32 %v3109_v57, %v3005_v55  ;;  %v7367_v6 = vpop.f32.mrb[39].mxu1 }
 0x3ca   : > { %v3114_v26 = vpop.f32.mrb[40].mxu1 }
 0x3cb   : > { %v3115_v0 = vadd.f32 %v3114_v26, %v3010_v42  ;;  %v7370_v9 = vpop.f32.mrb[41].mxu1  ;;  %v3557_v26 = vld [vmem:[%s11293_s5 + $0x80] sm:$0xff] }
 0x3ce   : > { %v3119_v52 = vpop.f32.mrb[42].mxu1 }
 0x3cf   : > { %v3120_v28 = vadd.f32 %v3119_v52, %v3015_v60  ;;  %v7373_v2 = vpop.f32.mrb[43].mxu1  ;;  %v3289_v60 = vld [vmem:[%s11291_s4 + $0x98] sm:$0xff] }
 0x3d0   : > { %v7952_v63 = vpack.c.bf16 %v3289_v60, %v3288_v23  ;;  %v3569_v23 = vld [vmem:[%s11293_s5 + $0xe0] sm:$0xff]  ;;  %v3570_v60 = vld [vmem:[%s11293_s5 + $0xe8] sm:$0xff] }
 0x3d2   : > { %v3124_v51 = vpop.f32.mrb[44].mxu1 }
 0x3d3   : > { %v3125_v29 = vadd.f32 %v3124_v51, %v3020_v46  ;;  %v7376_v20 = vpop.f32.mrb[45].mxu1 }
 0x3d4   : > { %v3293_v20 = vld [vmem:[%s11291_s4 + $0xb8] sm:$0xff] }
 0x3d6   : > { %v3208_v32 = vpop.f32.mrb[46].mxu1 }
 0x3d7   : > { %v3232_v48 = vadd.f32 %v3208_v32, %v3105_v43  ;;  %v7387_v30 = vpop.f32.mrb[47].mxu1  ;;  %v3291_v43 = vld [vmem:[%s11291_s4 + $0xa8] sm:$0xff] }
 0x3d8   : > { %v3559_v30 = vld [vmem:[%s11293_s5 + $0x90] sm:$0xff] }
 0x3d9   : > { %v3243_v50 = vadd.f32 %v6789_v35, %v3232_v48 }
 0x3da   : > { %v3213_v11 = vpop.f32.mrb[48].mxu1 }
 0x3db   : > { %v3248_v36 = vmax.f32 %v3243_v50, 0.0  ;;  %v3233_v24 = vadd.f32 %v3213_v11, %v3110_v47  ;;  %v7390_v14 = vpop.f32.mrb[49].mxu1  ;;  %v3560_v50 = vld [vmem:[%s11293_s5 + $0x98] sm:$0xff] }
 0x3dc   : > { %v7964_v14 = vpack.c.bf16 %v3560_v50, %v3559_v30 }
 0x3dd   : > { %3254 = vst.msk [vmem:[#allocation2] sm:$0xff] %vm3253_vm10, %v3248_v36  ;;  %v3244_v40 = vadd.f32 %v6789_v35, %v3233_v24 }
 0x3de   : > { %v3218_v58 = vpop.f32.mrb[50].mxu1 }
 0x3df   : > { %v3249_v59 = vmax.f32 %v3244_v40, 0.0  ;;  %v3234_v49 = vadd.f32 %v3218_v58, %v3115_v0  ;;  %v7393_v21 = vpop.f32.mrb[51].mxu1  ;;  %v3558_v0 = vld [vmem:[%s11293_s5 + $0x88] sm:$0xff]  ;;  %v3541_v40 = vld [vmem:[%s11293_s5] sm:$0xff] }
 0x3e0   : > { %v7961_v32 = vpack.c.bf16 %v3558_v0, %v3557_v26  ;;  %v3542_v58 = vld [vmem:[%s11293_s5 + $0x8] sm:$0xff]  ;;  %v3555_v0 = vld [vmem:[%s11293_s5 + $0x70] sm:$0xff] }
 0x3e1   : > { %3255 = vst.msk [vmem:[#allocation2 + $0x8] sm:$0xff] %vm3253_vm10, %v3249_v59  ;;  %v3245_v15 = vadd.f32 %v6789_v35, %v3234_v49  ;;  %v3561_v59 = vld [vmem:[%s11293_s5 + $0xa0] sm:$0xff]  ;;  %v3562_v49 = vld [vmem:[%s11293_s5 + $0xa8] sm:$0xff] }
 0x3e2   : > { %v3223_v17 = vpop.f32.mrb[52].mxu1 }
 0x3e3   : > { %v3250_v39 = vmax.f32 %v3245_v15, 0.0  ;;  %v3235_v22 = vadd.f32 %v3223_v17, %v3120_v28  ;;  %v7396_v7 = vpop.f32.mrb[53].mxu1  ;;  %v7955_v28 = vpack.c.bf16 %v3291_v43, %v3290_v45  ;;  %v7985_v15 = vpack.c.bf16 %v3542_v58, %v3541_v40  ;;  %v3571_v43 = vld [vmem:[%s11293_s5 + $0xf0] sm:$0xff]  ;;  %v3574_v40 = vld [vmem:[%s11293_s5 + $0x108] sm:$0xff] }
 0x3e4   : > { %v7967_v17 = vpack.c.bf16 %v3562_v49, %v3561_v59  ;;  %v3544_v7 = vld [vmem:[%s11293_s5 + $0x18] sm:$0xff] }
 0x3e5   : > { %3256 = vst.msk [vmem:[#allocation2 + $0x10] sm:$0xff] %vm3253_vm10, %v3250_v39  ;;  %v3246_v1 = vadd.f32 %v6789_v35, %v3235_v22  ;;  %v3543_v22 = vld [vmem:[%s11293_s5 + $0x10] sm:$0xff] }
 0x3e6   : > { %v3228_v27 = vpop.f32.mrb[54].mxu1 }
 0x3e7   : > { %v3251_v34 = vmax.f32 %v3246_v1, 0.0  ;;  %v3236_v56 = vadd.f32 %v3228_v27, %v3125_v29  ;;  %v7399_v38 = vpop.f32.mrb[55].mxu1  ;;  %v3292_v29 = vld [vmem:[%s11291_s4 + $0xb0] sm:$0xff]  ;;  %v7988_v1 = vpack.c.bf16 %v3544_v7, %v3543_v22  ;;  %s8197_s4 = smul.u32 136, %s11344_s28 }
 0x3e8   : > { %v7958_v36 = vpack.c.bf16 %v3293_v20, %v3292_v29  ;;  %v3563_v27 = vld [vmem:[%s11293_s5 + $0xb0] sm:$0xff] }
 0x3e9   : > { %3257 = vst.msk [vmem:[#allocation2 + $0x18] sm:$0xff] %vm3253_vm10, %v3251_v34  ;;  %v3247_v37 = vadd.f32 %v6789_v35, %v3236_v56  ;;  %v3564_v34 = vld [vmem:[%s11293_s5 + $0xb8] sm:$0xff]  ;;  %v3545_v56 = vld [vmem:[%s11293_s5 + $0x20] sm:$0xff]  ;;  %s11192_s30 = scalar_lea.vmem %s11256_s26, %s8197_s4 }
 0x3ea   : > { %v7970_v38 = vpack.c.bf16 %v3564_v34, %v3563_v27  ;;  %v3578_v27 = vld [vmem:[%s11293_s5 + $0x128] sm:$0xff] }
 0x3eb   : > { %v3252_v8 = vmax.f32 %v3247_v37, 0.0  ;;  %v3546_v37 = vld [vmem:[%s11293_s5 + $0x28] sm:$0xff] }
 0x3ed   : > { %3258 = vst.msk [vmem:[#allocation2 + $0x20] sm:$0xff] %vm3253_vm10, %v3252_v8  ;;  %v3565_v8 = vld [vmem:[%s11293_s5 + $0xc0] sm:$0xff] }
 0x3f4   : > { %v3259_v5 = vld [vmem:[#allocation2] ss:$5 sm:$0xff]  ;;  %v3260_v19 = vld [vmem:[#allocation2 + $0x1] ss:$5 sm:$0xff] }
 0x3f5   : > { %v3261_v16 = vmax.f32 %v3259_v5, %v3260_v19  ;;  %v3262_v54 = vld [vmem:[#allocation2 + $0x2] ss:$5 sm:$0xff]  ;;  %v3265_v44 = vld [vmem:[#allocation2 + $0x3] ss:$5 sm:$0xff]  ;;  %v7991_v19 = vpack.c.bf16 %v3546_v37, %v3545_v56 }
 0x3f6   : > { %v3268_v55 = vld [vmem:[#allocation2 + $0x4] ss:$5 sm:$0xff] }
 0x3f7   : > { %v3263_v18 = vmax.f32 %v3261_v16, %v3262_v54  ;;  %v3566_v5 = vld [vmem:[%s11293_s5 + $0xc8] sm:$0xff]  ;;  %v3547_v54 = vld [vmem:[%s11293_s5 + $0x30] sm:$0xff] }
 0x3f8   : > { %v7973_v16 = vpack.c.bf16 %v3566_v5, %v3565_v8  ;;  %v3579_v56 = vld [vmem:[%s11293_s5 + $0x130] sm:$0xff]  ;;  %v3581_v8 = vld [vmem:[%s11293_s5 + $0x140] sm:$0xff]  ;;  %v3582_v5 = vld [vmem:[%s11293_s5 + $0x148] sm:$0xff] }
 0x3f9   : > { %v3266_v53 = vmax.f32 %v3263_v18, %v3265_v44  ;;  %v3548_v18 = vld [vmem:[%s11293_s5 + $0x38] sm:$0xff] }
 0x3fa   : > { %v7994_v31 = vpack.c.bf16 %v3548_v18, %v3547_v54  ;;  %v3568_v44 = vld [vmem:[%s11293_s5 + $0xd8] sm:$0xff] }
 0x3fb   : > { %v3269_v42 = vmax.f32 %v3266_v53, %v3268_v55  ;;  %v7976_v53 = vpack.c.bf16 %v3568_v44, %v3567_v13  ;;  %v3549_v55 = vld [vmem:[%s11293_s5 + $0x40] sm:$0xff]  ;;  %v3584_v54 = vld [vmem:[%s11293_s5 + $0x158] sm:$0xff]  ;;  %v3586_v13 = vld [vmem:[%s11293_s5 + $0x168] sm:$0xff] }
 0x3fd   : > { %7417 = vmatmul.mubr.msk.f32.vlgmr.msra.gmra.mrb[64].mxu0 %vm3253_vm10, %v3269_v42  ;;  %v3296_v61 = vrot.slane %v3269_v42, 7  ;;  %v3305_v46 = vrot.slane %v3269_v42, 1 }
 0x3fe   : > { %7950 = vmatpush3.bf16.msra.mxu0 %v7949_v33  ;;  %7454 = vmatprep.mubr.msk.f32.mxu0 %vm8224_vm2, %v8223_v41  ;;  %v3550_v33 = vld [vmem:[%s11293_s5 + $0x48] sm:$0xff] }
 0x3ff   : > { %7951 = vmatprep.subr.bf16.mxu0 %v8225_v10  ;;  %v3298_v25 = vsel %vm853_vm0, 0.0, %v3296_v61  ;;  %v3307_v57 = vsel %vm853_vm0, %v3305_v46, 0.0  ;;  %v7997_v42 = vpack.c.bf16 %v3550_v33, %v3549_v55  ;;  %v3588_v55 = vld [vmem:[%s11293_s5 + $0x178] sm:$0xff] }
 0x400   : > { %v3299_v47 = vsel %vm984_vm3, %v3298_v25, 0.0  ;;  %v3308_v6 = vsel %vm984_vm3, %v3307_v57, %v3305_v46  ;;  %v3572_v25 = vld [vmem:[%s11293_s5 + $0xf8] sm:$0xff] }
 0x401   : > { %v3300_v9 = vsel %vm986_vm4, %v3299_v47, %v3296_v61  ;;  %v3309_v52 = vsel %vm986_vm4, %v3308_v6, 0.0  ;;  %v7982_v57 = vpack.c.bf16 %v3572_v25, %v3571_v43  ;;  %v3553_v47 = vld [vmem:[%s11293_s5 + $0x60] sm:$0xff]  ;;  %v3554_v6 = vld [vmem:[%s11293_s5 + $0x68] sm:$0xff] }
 0x402   : > { %7953 = vmatpush3.bf16.msra.mxu0 %v7952_v63  ;;  %v3301_v2 = vsel %vm988_vm5, %v3300_v9, 0.0  ;;  %v3310_v35 = vsel %vm988_vm5, %v3309_v52, %v3305_v46  ;;  %v3552_v63 = vld [vmem:[%s11293_s5 + $0x58] sm:$0xff]  ;;  %v8003_v26 = vpack.c.bf16 %v3554_v6, %v3553_v47  ;;  %v3590_v6 = vld [vmem:[%s11295_s29 + $0x8] sm:$0xf] }
 0x403   : > { %7954 = vmatprep.subr.bf16.mxu0 %v8225_v10  ;;  %v3302_v51 = vsel %vm990_vm6, %v3301_v2, %v3296_v61  ;;  %v3311_v24 = vsel %vm990_vm6, %v3310_v35, 0.0  ;;  %v3556_v9 = vld [vmem:[%s11293_s5 + $0x78] sm:$0xff]  ;;  %v6793_v35 = vld [vmem:[%s11294_s3] ss:$0 sm:$0xff] }
 0x404   : > { %v3303_v48 = vsel %vm992_vm8, %v3302_v51, 0.0  ;;  %v3312_v21 = vsel %vm992_vm8, %v3311_v24, %v3305_v46  ;;  %v3551_v46 = vld [vmem:[%s11293_s5 + $0x50] sm:$0xff]  ;;  %v8006_v52 = vpack.c.bf16 %v3556_v9, %v3555_v0  ;;  %v3913_v47 = vld [vmem:[%s11242_s12 + $0x58] sm:$0xff]  ;;  %v3914_v0 = vld [vmem:[%s11242_s12 + $0x60] sm:$0xff] }
 0x405   : > { %v3304_v11 = vsel %vm994_vm1, %v3303_v48, %v3296_v61  ;;  %v3313_v39 = vsel %vm994_vm1, %v3312_v21, 0.0  ;;  %v7979_v61 = vpack.c.bf16 %v3570_v60, %v3569_v23  ;;  %v8000_v45 = vpack.c.bf16 %v3552_v63, %v3551_v46  ;;  %v3911_v46 = vld [vmem:[%s11242_s12 + $0x48] sm:$0xff] }
 0x406   : > { %7956 = vmatpush3.bf16.msra.mxu0 %v7955_v28  ;;  %7436 = vmatmul.mubr.msk.f32.vlgmr.msra.gmra.mrb[56].mxu1 %vm3253_vm10, %v3304_v11  ;;  %v3915_v9 = vld [vmem:[%s11242_s12 + $0x68] sm:$0xff] }
 0x407   : > { %7957 = vmatprep.subr.bf16.mxu0 %v8225_v10  ;;  %7962 = vmatpush3.bf16.msra.mxu1 %v7961_v32 }
 0x408   : > { %7963 = vmatprep.subr.bf16.mxu1 %v8225_v10  ;;  %7489 = vmatprep.mubr.msk.f32.mxu1 %vm8224_vm2, %v8223_v41 }
 0x40a   : > { %7959 = vmatpush3.bf16.msra.mxu0 %v7958_v36 }
 0x40b   : > { %7965 = vmatpush3.bf16.msra.mxu1 %v7964_v14  ;;  %7984 = vmatprep.subr.bf16.mxu0 %v8225_v10  ;;  %v3573_v14 = vld [vmem:[%s11293_s5 + $0x100] sm:$0xff] }
 0x40c   : > { %7966 = vmatprep.subr.bf16.mxu1 %v8225_v10  ;;  %v8009_v21 = vpack.c.bf16 %v3574_v40, %v3573_v14 }
 0x40d   : > { %7455 = vmatmul.mubr.msk.f32.vlgmr.msra.gmra.mrb[66].mxu0 %vm3253_vm10, %v3313_v39  ;;  %v3576_v39 = vld [vmem:[%s11293_s5 + $0x118] sm:$0xff] }
 0x40e   : > { %7986 = vmatpush3.bf16.msra.mxu0 %v7985_v15  ;;  %7524 = vmatprep.mubr.msk.f32.mxu0 %vm8224_vm2, %v8223_v41 }
 0x40f   : > { %7968 = vmatpush3.bf16.msra.mxu1 %v7967_v17  ;;  %7987 = vmatprep.subr.bf16.mxu0 %v8225_v10  ;;  %v3575_v17 = vld [vmem:[%s11293_s5 + $0x110] sm:$0xff] }
 0x410   : > { %7969 = vmatprep.subr.bf16.mxu1 %v8225_v10  ;;  %v8012_v7 = vpack.c.bf16 %v3576_v39, %v3575_v17 }
 0x412   : > { %7989 = vmatpush3.bf16.msra.mxu0 %v7988_v1  ;;  %v3577_v1 = vld [vmem:[%s11293_s5 + $0x120] sm:$0xff] }
 0x413   : > { %7971 = vmatpush3.bf16.msra.mxu1 %v7970_v38  ;;  %7990 = vmatprep.subr.bf16.mxu0 %v8225_v10  ;;  %v8015_v34 = vpack.c.bf16 %v3578_v27, %v3577_v1  ;;  %v3580_v38 = vld [vmem:[%s11293_s5 + $0x138] sm:$0xff]  ;;  %v3908_v27 = vld [vmem:[%s11242_s12 + $0x30] sm:$0xff] }
 0x414   : > { %7972 = vmatprep.subr.bf16.mxu1 %v8225_v10  ;;  %v8018_v37 = vpack.c.bf16 %v3580_v38, %v3579_v56 }
 0x416   : > { %7992 = vmatpush3.bf16.msra.mxu0 %v7991_v19  ;;  %v8021_v19 = vpack.c.bf16 %v3582_v5, %v3581_v8  ;;  %v3919_v8 = vld [vmem:[%s11242_s12 + $0x88] sm:$0xff] }
 0x417   : > { %7974 = vmatpush3.bf16.msra.mxu1 %v7973_v16  ;;  %7993 = vmatprep.subr.bf16.mxu0 %v8225_v10  ;;  %v3583_v16 = vld [vmem:[%s11293_s5 + $0x150] sm:$0xff] }
 0x418   : > { %7975 = vmatprep.subr.bf16.mxu1 %v8225_v10  ;;  %v8024_v18 = vpack.c.bf16 %v3584_v54, %v3583_v16  ;;  %v3921_v16 = vld [vmem:[%s11242_s12 + $0x98] sm:$0xff] }
 0x41a   : > { %7995 = vmatpush3.bf16.msra.mxu0 %v7994_v31  ;;  %v3585_v31 = vld [vmem:[%s11293_s5 + $0x160] sm:$0xff] }
 0x41b   : > { %7977 = vmatpush3.bf16.msra.mxu1 %v7976_v53  ;;  %7996 = vmatprep.subr.bf16.mxu0 %v8225_v10  ;;  %v8027_v44 = vpack.c.bf16 %v3586_v13, %v3585_v31  ;;  %v3587_v53 = vld [vmem:[%s11293_s5 + $0x170] sm:$0xff]  ;;  %v3922_v13 = vld [vmem:[%s11242_s12 + $0xa0] sm:$0xff] }
 0x41c   : > { %7978 = vmatprep.subr.bf16.mxu1 %v8225_v10  ;;  %v8030_v33 = vpack.c.bf16 %v3588_v55, %v3587_v53  ;;  %v3924_v55 = vld [vmem:[%s11242_s12 + $0xb0] sm:$0xff] }
 0x41e   : > { %7998 = vmatpush3.bf16.msra.mxu0 %v7997_v42  ;;  %v3589_v42 = vld [vmem:[%s11295_s29] sm:$0xff] }
 0x41f   : > { %7980 = vmatpush3.bf16.msra.mxu1 %v7979_v61  ;;  %7999 = vmatprep.subr.bf16.mxu0 %v8225_v10  ;;  %v3910_v61 = vld [vmem:[%s11242_s12 + $0x40] sm:$0xff] }
 0x420   : > { %7981 = vmatprep.subr.bf16.mxu1 %v8225_v10  ;;  %v8036_v25 = vpack.c.bf16 %v3911_v46, %v3910_v61 }
 0x422   : > { %8001 = vmatpush3.bf16.msra.mxu0 %v8000_v45 }
 0x423   : > { %7983 = vmatpush3.bf16.msra.mxu1 %v7982_v57  ;;  %8002 = vmatprep.subr.bf16.mxu0 %v8225_v10  ;;  %v3912_v57 = vld [vmem:[%s11242_s12 + $0x50] sm:$0xff] }
 0x426   : > { %8004 = vmatpush3.bf16.msra.mxu0 %v8003_v26  ;;  %v8040_v26 = vpack.c.bf16 %v3913_v47, %v3912_v57 }
 0x427   : > { %8005 = vmatprep.subr.bf16.mxu0 %v8225_v10 }
 0x42a   : > { %8007 = vmatpush3.bf16.msra.mxu0 %v8006_v52  ;;  %v8044_v52 = vpack.c.bf16 %v3915_v9, %v3914_v0  ;;  %v3926_v0 = vld [vmem:[%s11243_s13] sm:$0xff]  ;;  %v3927_v9 = vld [vmem:[%s11243_s13 + $0x8] sm:$0xff] }
 0x42b   : > { %8008 = vmatprep.subr.bf16.mxu0 %v8225_v10 }
 0x4d0   : > { %v3382_v28 = vpop.f32.mrb[64].mxu0 }
 0x4d1   : > { %v7418_v2 = vpop.f32.mrb[65].mxu0 }
 0x4d2   : > { %v3917_v2 = vld [vmem:[%s11242_s12 + $0x78] sm:$0xff] }
 0x4d9   : > { %v3455_v51 = vpop.f32.mrb[56].mxu1 }
 0x4da   : > { %v3456_v29 = vadd.f32 %v3455_v51, %v3382_v28  ;;  %v7437_v20 = vpop.f32.mrb[57].mxu1  ;;  %v3916_v28 = vld [vmem:[%s11242_s12 + $0x70] sm:$0xff] }
 0x4db   : > { %v8048_v51 = vpack.c.bf16 %v3917_v2, %v3916_v28  ;;  %v3903_v20 = vld [vmem:[%s11242_s12 + $0x8] sm:$0xff]  ;;  %v4292_v28 = vld [vmem:[%s11245_s15 + $0x30] sm:$0xff]  ;;  %v4293_v2 = vld [vmem:[%s11245_s15 + $0x38] sm:$0xff] }
 0x4e0   : > { %v3528_v32 = vpop.f32.mrb[66].mxu0 }
 0x4e1   : > { %v3532_v48 = vadd.f32 %v3528_v32, %v3456_v29  ;;  %v7456_v30 = vpop.f32.mrb[67].mxu0  ;;  %v3902_v29 = vld [vmem:[%s11242_s12] sm:$0xff] }
 0x4e2   : > { %v6795_v32 = vld [vmem:[%s11241_s11] ss:$0 sm:$0xff] }
 0x4e3   : > { %v3539_v50 = vadd.f32 %v6793_v35, %v3532_v48  ;;  %v8052_v35 = vpack.c.bf16 %v3903_v20, %v3902_v29  ;;  %v4286_v29 = vld [vmem:[%s11245_s15] sm:$0xff]  ;;  %v4287_v20 = vld [vmem:[%s11245_s15 + $0x8] sm:$0xff] }
 0x4e5   : > { %v3540_v11 = vmax.f32 %v3539_v50, 0.0 }
 0x4e7   : > { %v3593_v36 = vrot.slane %v3540_v11, 1  ;;  %7490 = vmatmul.mubr.f32.vlgmr.msra.gmra.mrb[58].mxu1 %v3540_v11 }
 0x4e8   : > { %7566 = vmatprep.mubr.msk.f32.mxu1 %vm3818_vm11, %v3589_v42 }
 0x4e9   : > { %v3595_v24 = vsel %vm853_vm0, %v3593_v36, 0.0 }
 0x4ea   : > { %v3596_v58 = vsel %vm984_vm3, %v3595_v24, %v3593_v36  ;;  %v3905_v24 = vld [vmem:[%s11242_s12 + $0x18] sm:$0xff] }
 0x4eb   : > { %v3597_v59 = vsel %vm986_vm4, %v3596_v58, 0.0 }
 0x4ec   : > { %v3598_v49 = vsel %vm988_vm5, %v3597_v59, %v3593_v36 }
 0x4ed   : > { %v3599_v15 = vsel %vm990_vm6, %v3598_v49, 0.0 }
 0x4ee   : > { %v3600_v22 = vsel %vm992_vm8, %v3599_v15, %v3593_v36  ;;  %v3904_v36 = vld [vmem:[%s11242_s12 + $0x10] sm:$0xff]  ;;  %v3907_v15 = vld [vmem:[%s11242_s12 + $0x28] sm:$0xff] }
 0x4ef   : > { %7525 = vmatmul.mubr.msk.f32.vlgmr.msra.gmra.mrb[68].mxu0 %vm994_vm1, %v3600_v22  ;;  %v8056_v59 = vpack.c.bf16 %v3905_v24, %v3904_v36 }
 0x4f0   : > { %8010 = vmatpush3.bf16.msra.mxu0 %v8009_v21  ;;  %7559 = vmatprep.mubr.msk.f32.mxu0 %vm8224_vm2, %v8223_v41  ;;  %v3906_v21 = vld [vmem:[%s11242_s12 + $0x20] sm:$0xff] }
 0x4f1   : > { %8011 = vmatprep.subr.bf16.mxu0 %v8225_v10 }
 0x4f4   : > { %8013 = vmatpush3.bf16.msra.mxu0 %v8012_v7  ;;  %v8060_v7 = vpack.c.bf16 %v3907_v15, %v3906_v21  ;;  %v4294_v15 = vld [vmem:[%s11245_s15 + $0x40] sm:$0xff] }
 0x4f5   : > { %8014 = vmatprep.subr.bf16.mxu0 %v8225_v10 }
 0x4f8   : > { %8016 = vmatpush3.bf16.msra.mxu0 %v8015_v34  ;;  %v3909_v34 = vld [vmem:[%s11242_s12 + $0x38] sm:$0xff] }
 0x4f9   : > { %8017 = vmatprep.subr.bf16.mxu0 %v8225_v10  ;;  %v8064_v38 = vpack.c.bf16 %v3909_v34, %v3908_v27 }
 0x4fc   : > { %8019 = vmatpush3.bf16.msra.mxu0 %v8018_v37  ;;  %v3918_v37 = vld [vmem:[%s11242_s12 + $0x80] sm:$0xff] }
 0x4fd   : > { %8020 = vmatprep.subr.bf16.mxu0 %v8225_v10  ;;  %v8068_v5 = vpack.c.bf16 %v3919_v8, %v3918_v37  ;;  %v4296_v8 = vld [vmem:[%s11245_s15 + $0x50] sm:$0xff] }
 0x500   : > { %8022 = vmatpush3.bf16.msra.mxu0 %v8021_v19  ;;  %v3920_v19 = vld [vmem:[%s11242_s12 + $0x90] sm:$0xff] }
 0x501   : > { %8023 = vmatprep.subr.bf16.mxu0 %v8225_v10 }
 0x504   : > { %8025 = vmatpush3.bf16.msra.mxu0 %v8024_v18  ;;  %v8072_v18 = vpack.c.bf16 %v3921_v16, %v3920_v19 }
 0x505   : > { %8026 = vmatprep.subr.bf16.mxu0 %v8225_v10 }
 0x508   : > { %8028 = vmatpush3.bf16.msra.mxu0 %v8027_v44  ;;  %v3923_v44 = vld [vmem:[%s11242_s12 + $0xa8] sm:$0xff] }
 0x509   : > { %8029 = vmatprep.subr.bf16.mxu0 %v8225_v10  ;;  %v8076_v53 = vpack.c.bf16 %v3923_v44, %v3922_v13 }
 0x50c   : > { %8031 = vmatpush3.bf16.msra.mxu0 %v8030_v33  ;;  %v3925_v33 = vld [vmem:[%s11242_s12 + $0xb8] sm:$0xff] }
 0x50d   : > { %8084 = vmatprep.subr.bf16.mxu0 %v8225_v10  ;;  %v8080_v42 = vpack.c.bf16 %v3925_v33, %v3924_v55 }
 0x50f   : > { %7560 = vmatmul.mubr.f32.vlgmr.msra.gmra.mrb[68].mxu0 %v3540_v11 }
 0x510   : > { %7632 = vmatprep.mubr.msk.f32.mxu0 %vm8224_vm2, %v8223_v41 }
 0x5ba   : > { %v3668_v23 = vpop.f32.mrb[58].mxu1 }
 0x5bb   : > { %v7491_v60 = vpop.f32.mrb[59].mxu1 }
 0x5bc   : > { %v4291_v60 = vld [vmem:[%s11245_s15 + $0x28] sm:$0xff] }
 0x5e2   : > { %v3808_v63 = vpop.f32.mrb[68].mxu0 }
 0x5e3   : > { %v8032_v45 = vpack.c.bf16 %v3808_v63, %v3668_v23  ;;  %v7561_v43 = vpop.f32.mrb[69].mxu0  ;;  %v4290_v23 = vld [vmem:[%s11245_s15 + $0x20] sm:$0xff] }
 0x5e4   : > { %v8088_v61 = vpack.c.bf16 %v4291_v60, %v4290_v23 }
 0x5e5   : > { %8033 = vmatprep.subr.bf16.mxu1 %v8032_v45 }
 0x5e6   : > { %8035 = vmatpush3.bf16.msra.mxu1 %v8032_v45 }
 0x5e7   : > { %8037 = vmatprep.subr.bf16.mxu1 %v8036_v25 }
 0x5e9   : > { %7567 = vmatmul.mubr.msk.f32.vlgmr.msra.gmra.mrb[60].mxu1 %vm3818_vm11, %v3590_v6 }
 0x5ea   : > { %8039 = vmatpush3.bf16.msra.mxu1 %v8036_v25 }
 0x5eb   : > { %8041 = vmatprep.subr.bf16.mxu1 %v8040_v26 }
 0x5ee   : > { %8043 = vmatpush3.bf16.msra.mxu1 %v8040_v26 }
 0x5ef   : > { %8045 = vmatprep.subr.bf16.mxu1 %v8044_v52 }
 0x5f2   : > { %8047 = vmatpush3.bf16.msra.mxu1 %v8044_v52  ;;  %v3928_v52 = vld [vmem:[%s11243_s13 + $0x10] sm:$0xf] }
 0x5f3   : > { %8049 = vmatprep.subr.bf16.mxu1 %v8048_v51 }
 0x5f6   : > { %8051 = vmatpush3.bf16.msra.mxu1 %v8048_v51  ;;  %v8091_v51 = vpack.c.bf16 %v4293_v2, %v4292_v28  ;;  %v4706_v28 = vld [vmem:[%s11248_s18] sm:$0xff]  ;;  %v4707_v2 = vld [vmem:[%s11248_s18 + $0x8] sm:$0xff] }
 0x5f7   : > { %8053 = vmatprep.subr.bf16.mxu1 %v8052_v35 }
 0x6bc   : > { %v7568_v48 = vpop.f32.mrb[60].mxu1 }
 0x6bd   : > { %v3897_v30 = vadd.f32 %v7568_v48, %v6795_v32  ;;  %v3891_v50 = vpop.f32.mrb[61].mxu1  ;;  %v4289_v48 = vld [vmem:[%s11245_s15 + $0x18] sm:$0xff] }
 0x6be   : > { %v3892_v11 = vadd.f32 %v6795_v32, %v3891_v50  ;;  %v4288_v32 = vld [vmem:[%s11245_s15 + $0x10] sm:$0xff]  ;;  %v6804_v50 = vld [vmem:[%s11244_s14] ss:$0 sm:$0xff] }
 0x6bf   : > { %v3901_v14 = vmax.f32 %v3897_v30, 0.0  ;;  %v8097_v30 = vpack.c.bf16 %v4289_v48, %v4288_v32  ;;  %v4300_v32 = vld [vmem:[%s11246_s16 + $0x10] sm:$0xff]  ;;  %v4301_v48 = vld [vmem:[%s11246_s16 + $0x18] sm:$0xff] }
 0x6c0   : > { %v3900_v40 = vmax.f32 %v3892_v11, 0.0 }
 0x6c1   : > { %v3934_v58 = vrot.slane %v3901_v14, 1 }
 0x6c2   : > { %v3931_v49 = vrot.slane %v3900_v40, 1  ;;  %7585 = vmatprep.mubr.msk.f32.mxu1 %vm3253_vm10, %v3900_v40 }
 0x6c3   : > { %7586 = vmatmul.mubr.msk.f32.vlgmr.msra.gmra.mrb[62].mxu1 %vm3253_vm10, %v3901_v14  ;;  %v3942_v54 = vsel %vm853_vm0, 0.0, %v3934_v58 }
 0x6c4   : > { %8055 = vmatpush3.bf16.msra.mxu1 %v8052_v35  ;;  %v3935_v17 = vsel %vm994_vm1, %v3931_v49, %v3934_v58  ;;  %v3938_v39 = vsel %vm984_vm3, %v3931_v49, 0.0  ;;  %v3943_v31 = vsel %vm986_vm4, %v3942_v54, 0.0  ;;  %v8094_v35 = vpack.c.bf16 %v4287_v20, %v4286_v29  ;;  %v4298_v29 = vld [vmem:[%s11246_s16] sm:$0xff] }
 0x6c5   : > { %8057 = vmatprep.subr.bf16.mxu1 %v8056_v59  ;;  %v3939_v22 = vsel %vm986_vm4, %v3938_v39, %v3931_v49  ;;  %v8115_v20 = vpack.c.bf16 %v4707_v2, %v4706_v28 }
 0x6c6   : > { %v3940_v1 = vsel %vm990_vm6, %v3939_v22, 0.0 }
 0x6c7   : > { %v3941_v56 = vsel %vm992_vm8, %v3940_v1, %v3935_v17  ;;  %v4295_v17 = vld [vmem:[%s11245_s15 + $0x48] sm:$0xff] }
 0x6c8   : > { %8059 = vmatpush3.bf16.msra.mxu1 %v8056_v59  ;;  %7604 = vmatprep.mubr.msk.f32.mxu1 %vm3253_vm10, %v3941_v56  ;;  %v8100_v27 = vpack.c.bf16 %v4295_v17, %v4294_v15 }
 0x6c9   : > { %8061 = vmatprep.subr.bf16.mxu1 %v8060_v7 }
 0x6cc   : > { %8063 = vmatpush3.bf16.msra.mxu1 %v8060_v7 }
 0x6cd   : > { %8065 = vmatprep.subr.bf16.mxu1 %v8064_v38 }
 0x6d0   : > { %8067 = vmatpush3.bf16.msra.mxu1 %v8064_v38 }
 0x6d1   : > { %8069 = vmatprep.subr.bf16.mxu1 %v8068_v5 }
 0x6d3   : > { %7605 = vmatmul.mubr.msk.f32.vlgmr.msra.gmra.mrb[64].mxu1 %vm3253_vm10, %v3943_v31 }
 0x6d4   : > { %8071 = vmatpush3.bf16.msra.mxu1 %v8068_v5  ;;  %7623 = vmatprep.mubr.msk.f32.mxu1 %vm3253_vm10, %v3900_v40  ;;  %v4297_v5 = vld [vmem:[%s11245_s15 + $0x58] sm:$0xff] }
 0x6d5   : > { %8073 = vmatprep.subr.bf16.mxu1 %v8072_v18  ;;  %v8103_v31 = vpack.c.bf16 %v4297_v5, %v4296_v8 }
 0x6d8   : > { %8075 = vmatpush3.bf16.msra.mxu1 %v8072_v18 }
 0x6d9   : > { %8077 = vmatprep.subr.bf16.mxu1 %v8076_v53 }
 0x6dc   : > { %8079 = vmatpush3.bf16.msra.mxu1 %v8076_v53 }
 0x6dd   : > { %8081 = vmatprep.subr.bf16.mxu1 %v8080_v42 }
 0x6e0   : > { %8083 = vmatpush3.bf16.msra.mxu1 %v8080_v42 }
 0x6e1   : > { %8087 = vmatprep.subr.bf16.mxu1 %v8225_v10 }
 0x6e3   : > { %7624 = vmatmul.mubr.msk.f32.vlgmr.msra.gmra.mrb[64].mxu1 %vm3253_vm10, %v3901_v14 }
 0x6e4   : > { %7649 = vmatprep.mubr.msk.f32.mxu1 %vm8224_vm2, %v8223_v41  ;;  %8089 = vmatpush3.bf16.msra.mxu1 %v8088_v61 }
 0x6e5   : > { %8090 = vmatprep.subr.bf16.mxu1 %v8225_v10 }
 0x6e8   : > { %8092 = vmatpush3.bf16.msra.mxu1 %v8091_v51 }
 0x6e9   : > { %8105 = vmatprep.subr.bf16.mxu1 %v8225_v10 }
 0x796   : > { %v7587_v46 = vpop.f32.mrb[62].mxu1 }
 0x797   : > { %v4014_v63 = vpop.f32.mrb[63].mxu1 }
 0x7b6   : > { %v7625_v45 = vpop.f32.mrb[64].mxu1 }
 0x7b7   : > { %v4182_v43 = vrot.slane %v7625_v45, 4  ;;  %v4170_v25 = vpop.f32.mrb[65].mxu1 }
 0x7b8   : > { %v4181_v57 = vrot.slane %v4170_v25, 4 }
 0x7ba   : > { %v4186_v47 = vsel %vm988_vm5, %v7587_v46, %v4181_v57  ;;  %v4183_v6 = vsel %vm988_vm5, %v4181_v57, %v4182_v43 }
 0x7bb   : > { %v8085_v26 = vpack.c.bf16 %v4186_v47, %v4014_v63 }
 0x7bd   : > { %8086 = vmatpush3.bf16.msra.mxu0 %v8085_v26 }
 0x7be   : > { %7630 = vmatprep.subr.mxu0 %v8223_v41 }
 0x7c1   : > { %7631 = vmatpush3.msra.mxu0 %v4183_v6 }
 0x7c2   : > { %7633 = vmatmul.mubr.msk.f32.vlgmr.msra.gmra.mrb[70].mxu0 %vm4193_vm12, %v3926_v0  ;;  %8093 = vmatprep.subr.bf16.mxu0 %v8225_v10 }
 0x7c3   : > { %7635 = vmatprep.mubr.msk.f32.mxu0 %vm8224_vm2, %v8223_v41  ;;  %8095 = vmatpush3.bf16.msra.mxu0 %v8094_v35  ;;  %v4299_v35 = vld [vmem:[%s11246_s16 + $0x8] sm:$0xff] }
 0x7c4   : > { %8096 = vmatprep.subr.bf16.mxu0 %v8225_v10 }
 0x7c6   : > { %7636 = vmatmul.mubr.msk.f32.gmra.mrb[72].mxu0 %vm4193_vm12, %v3927_v9 }
 0x7c7   : > { %7638 = vmatprep.mubr.msk.f32.mxu0 %vm8224_vm2, %v8223_v41  ;;  %8098 = vmatpush3.bf16.msra.mxu0 %v8097_v30  ;;  %v4302_v30 = vld [vmem:[%s11246_s16 + $0x20] sm:$0xf] }
 0x7c8   : > { %8099 = vmatprep.subr.bf16.mxu0 %v8225_v10 }
 0x7ca   : > { %7639 = vmatmul.mubr.msk.f32.gmra.mrb[74].mxu0 %vm4193_vm12, %v3928_v52 }
 0x7cb   : > { %7666 = vmatprep.mubr.msk.f32.mxu0 %vm8224_vm2, %v8223_v41 }
 0x895   : > { %v4269_v11 = vpop.f32.mrb[70].mxu0 }
 0x896   : > { %v4270_v36 = vadd.f32 %v6804_v50, %v4269_v11  ;;  %v7634_v24 = vpop.f32.mrb[71].mxu0  ;;  %v4709_v11 = vld [vmem:[%s11248_s18 + $0x18] sm:$0xff] }
 0x897   : > { %v6817_v24 = vld [vmem:[%s11247_s17] ss:$0 sm:$0xff] }
 0x898   : > { %v4283_v14 = vmax.f32 %v4270_v36, 0.0 }
 0x899   : > { %v4274_v40 = vpop.f32.mrb[72].mxu0 }
 0x89a   : > { %v4275_v58 = vadd.f32 %v6804_v50, %v4274_v40  ;;  %v7637_v59 = vpop.f32.mrb[73].mxu0  ;;  %7650 = vmatmul.mubr.msk.f32.vlgmr.msra.gmra.mrb[66].mxu1 %vm2819_vm9, %v4283_v14  ;;  %v4305_v49 = vrot.slane %v4283_v14, 1 }
 0x89b   : > { %7652 = vmatprep.mubr.msk.f32.mxu1 %vm8224_vm2, %v8223_v41 }
 0x89c   : > { %v4284_v21 = vmax.f32 %v4275_v58, 0.0  ;;  %v4315_v34 = vsel %vm988_vm5, %v4305_v49, 0.0 }
 0x89d   : > { %v4279_v39 = vpop.f32.mrb[74].mxu0 }
 0x89e   : > { %v4308_v22 = vrot.slane %v4284_v21, 1  ;;  %v4280_v7 = vadd.f32 %v6804_v50, %v4279_v39  ;;  %v7640_v1 = vpop.f32.mrb[75].mxu0  ;;  %7653 = vmatmul.mubr.msk.f32.gmra.mrb[68].mxu1 %vm2819_vm9, %v4284_v21  ;;  %v4708_v50 = vld [vmem:[%s11248_s18 + $0x10] sm:$0xff]  ;;  %v4710_v39 = vld [vmem:[%s11248_s18 + $0x20] sm:$0xff] }
 0x89f   : > { %7655 = vmatprep.mubr.msk.f32.mxu1 %vm8224_vm2, %v8223_v41  ;;  %v8112_v36 = vpack.c.bf16 %v4709_v11, %v4708_v50 }
 0x8a0   : > { %v4309_v56 = vsel %vm994_vm1, %v4305_v49, %v4308_v22  ;;  %v4285_v38 = vmax.f32 %v4280_v7, 0.0  ;;  %v4317_v37 = vsel %vm853_vm0, %v4308_v22, 0.0 }
 0x8a1   : > { %v4316_v19 = vsel %vm990_vm6, %v4315_v34, %v4309_v56  ;;  %v4318_v16 = vsel %vm984_vm3, %v4317_v37, %v4308_v22  ;;  %v4711_v22 = vld [vmem:[%s11248_s18 + $0x28] sm:$0xff] }
 0x8a2   : > { %v4313_v54 = vrot.slane %v4285_v38, 1  ;;  %7656 = vmatmul.mubr.msk.f32.gmra.mrb[70].mxu1 %vm2819_vm9, %v4285_v38  ;;  %7667 = vmatmul.mubr.msk.f32.vlgmr.msra.gmra.mrb[76].mxu0 %vm2819_vm9, %v4316_v19  ;;  %v4319_v18 = vsel %vm992_vm8, %v4318_v16, 0.0 }
 0x8a3   : > { %7669 = vmatprep.mubr.msk.f32.mxu0 %vm8224_vm2, %v8223_v41  ;;  %8101 = vmatpush3.bf16.msra.mxu0 %v8100_v27 }
 0x8a4   : > { %v4320_v13 = vsel %vm994_vm1, %v4319_v18, %v4313_v54  ;;  %8102 = vmatprep.subr.bf16.mxu0 %v8225_v10  ;;  %7702 = vmatprep.mubr.msk.f32.mxu1 %vm8224_vm2, %v8223_v41  ;;  %v4321_v44 = vsel %vm986_vm4, %v4313_v54, 0.0 }
 0x8a6   : > { %7670 = vmatmul.mubr.msk.f32.gmra.mrb[78].mxu0 %vm2819_vm9, %v4320_v13 }
 0x8a7   : > { %7672 = vmatprep.mubr.msk.f32.mxu0 %vm8224_vm2, %v8223_v41  ;;  %8104 = vmatpush3.bf16.msra.mxu0 %v8103_v31 }
 0x8a8   : > { %8111 = vmatprep.subr.bf16.mxu0 %v8225_v10 }
 0x8aa   : > { %7673 = vmatmul.mubr.msk.f32.gmra.mrb[80].mxu0 %vm2819_vm9, %v4321_v44 }
 0x8ab   : > { %7683 = vmatprep.mubr.msk.f32.mxu0 %vm8224_vm2, %v8223_v41 }
 0x8ae   : > { %7684 = vmatmul.mubr.msk.f32.vlgmr.msra.gmra.mrb[76].mxu0 %vm2819_vm9, %v4283_v14 }
 0x8af   : > { %7686 = vmatprep.mubr.msk.f32.mxu0 %vm8224_vm2, %v8223_v41  ;;  %8113 = vmatpush3.bf16.msra.mxu0 %v8112_v36 }
 0x8b0   : > { %8120 = vmatprep.subr.bf16.mxu0 %v8225_v10 }
 0x8b2   : > { %7687 = vmatmul.mubr.msk.f32.gmra.mrb[78].mxu0 %vm2819_vm9, %v4284_v21 }
 0x8b3   : > { %7689 = vmatprep.mubr.msk.f32.mxu0 %vm8224_vm2, %v8223_v41 }
 0x8b6   : > { %7690 = vmatmul.mubr.msk.f32.gmra.mrb[80].mxu0 %vm2819_vm9, %v4285_v38  ;;  %v8118_v38 = vpack.c.bf16 %v4711_v22, %v4710_v39 }
 0x8b7   : > { %7721 = vmatprep.mubr.msk.f32.mxu0 %vm8224_vm2, %v8223_v41 }
 0x96d   : > { %v4394_v53 = vpop.f32.mrb[66].mxu1 }
 0x96e   : > { %v7651_v55 = vpop.f32.mrb[67].mxu1 }
 0x971   : > { %v4399_v33 = vpop.f32.mrb[68].mxu1 }
 0x972   : > { %v8106_v42 = vpack.c.bf16 %v4399_v33, %v4394_v53  ;;  %v7654_v23 = vpop.f32.mrb[69].mxu1 }
 0x974   : > { %8107 = vmatpush3.bf16.msra.mxu1 %v8106_v42 }
 0x975   : > { %v4404_v60 = vpop.f32.mrb[70].mxu1  ;;  %8108 = vmatprep.subr.bf16.mxu1 %v8225_v10 }
 0x976   : > { %v7657_v61 = vpop.f32.mrb[71].mxu1 }
 0x981   : > { %v4563_v46 = vpop.f32.mrb[76].mxu0 }
 0x982   : > { %v4580_v63 = vrot.slane %v4563_v46, 4  ;;  %v7685_v45 = vpop.f32.mrb[77].mxu0 }
 0x984   : > { %v4588_v43 = vsel %vm988_vm5, %v4404_v60, %v4580_v63 }
 0x985   : > { %v4568_v25 = vpop.f32.mrb[78].mxu0 }
 0x986   : > { %v4581_v57 = vrot.slane %v4568_v25, 4  ;;  %v7688_v47 = vpop.f32.mrb[79].mxu0 }
 0x988   : > { %v4582_v6 = vsel %vm988_vm5, %v4580_v63, %v4581_v57 }
 0x989   : > { %v8109_v26 = vpack.c.bf16 %v4582_v6, %v4588_v43  ;;  %v4573_v0 = vpop.f32.mrb[80].mxu0 }
 0x98a   : > { %v4583_v9 = vrot.slane %v4573_v0, 4  ;;  %v7691_v52 = vpop.f32.mrb[81].mxu0 }
 0x98b   : > { %8110 = vmatpush3.bf16.msra.mxu1 %v8109_v26 }
 0x98c   : > { %7700 = vmatprep.subr.mxu1 %v8223_v41  ;;  %v4584_v51 = vsel %vm988_vm5, %v4581_v57, %v4583_v9 }
 0x98f   : > { %7701 = vmatpush3.msra.mxu1 %v4584_v51 }
 0x990   : > { %7703 = vmatmul.mubr.msk.f32.vlgmr.msra.gmra.mrb[72].mxu1 %vm4595_vm13, %v4298_v29  ;;  %8114 = vmatprep.subr.bf16.mxu1 %v8225_v10 }
 0x991   : > { %7705 = vmatprep.mubr.msk.f32.mxu1 %vm8224_vm2, %v8223_v41  ;;  %8116 = vmatpush3.bf16.msra.mxu1 %v8115_v20 }
 0x992   : > { %8117 = vmatprep.subr.bf16.mxu1 %v8225_v10 }
 0x994   : > { %7706 = vmatmul.mubr.msk.f32.gmra.mrb[74].mxu1 %vm4595_vm13, %v4299_v35 }
 0x995   : > { %7708 = vmatprep.mubr.msk.f32.mxu1 %vm8224_vm2, %v8223_v41 }
 0x998   : > { %7709 = vmatmul.mubr.msk.f32.gmra.mrb[76].mxu1 %vm4595_vm13, %v4300_v32 }
 0x999   : > { %7711 = vmatprep.mubr.msk.f32.mxu1 %vm8224_vm2, %v8223_v41 }
 0x99c   : > { %7712 = vmatmul.mubr.msk.f32.gmra.mrb[78].mxu1 %vm4595_vm13, %v4301_v48 }
 0x99d   : > { %7714 = vmatprep.mubr.msk.f32.mxu1 %vm8224_vm2, %v8223_v41 }
 0x9a0   : > { %7715 = vmatmul.mubr.msk.f32.gmra.mrb[80].mxu1 %vm4595_vm13, %v4302_v30 }
 0x9a1   : > { %7740 = vmatprep.mubr.msk.f32.mxu1 %vm8224_vm2, %v8223_v41 }
 0xa63   : > { %v4677_v14 = vpop.f32.mrb[72].mxu1 }
 0xa64   : > { %v4678_v40 = vadd.f32 %v6817_v24, %v4677_v14  ;;  %v7704_v58 = vpop.f32.mrb[73].mxu1 }
 0xa66   : > { %v4701_v59 = vmax.f32 %v4678_v40, 0.0 }
 0xa67   : > { %v4682_v49 = vpop.f32.mrb[74].mxu1 }
 0xa68   : > { %v4683_v21 = vadd.f32 %v6817_v24, %v4682_v49  ;;  %v7707_v15 = vpop.f32.mrb[75].mxu1  ;;  %7722 = vmatmul.mubr.msk.f32.vlgmr.msra.gmra.mrb[82].mxu0 %vm3818_vm11, %v4701_v59  ;;  %v4724_v1 = vrot.slane %v4701_v59, 1 }
 0xa69   : > { %7724 = vmatprep.mubr.msk.f32.mxu0 %vm8224_vm2, %v8223_v41 }
 0xa6a   : > { %v4702_v17 = vmax.f32 %v4683_v21, 0.0 }
 0xa6b   : > { %v4687_v7 = vpop.f32.mrb[76].mxu1 }
 0xa6c   : > { %v4725_v27 = vrot.slane %v4702_v17, 1  ;;  %v4688_v34 = vadd.f32 %v6817_v24, %v4687_v7  ;;  %v7710_v56 = vpop.f32.mrb[77].mxu1  ;;  %7725 = vmatmul.mubr.msk.f32.gmra.mrb[84].mxu0 %vm3818_vm11, %v4702_v17 }
 0xa6d   : > { %7727 = vmatprep.mubr.msk.f32.mxu0 %vm8224_vm2, %v8223_v41  ;;  %v4712_v56 = vld [vmem:[%s11249_s19] sm:$0xff] }
 0xa6e   : > { %v4703_v37 = vmax.f32 %v4688_v34, 0.0  ;;  %v4726_v8 = vsel %vm994_vm1, %v4724_v1, %v4725_v27 }
 0xa6f   : > { %v4692_v5 = vpop.f32.mrb[78].mxu1  ;;  %7741 = vmatmul.mubr.msk.f32.vlgmr.msra.gmra.mrb[82].mxu1 %vm3818_vm11, %v4726_v8  ;;  %v4714_v8 = vld [vmem:[%s11249_s19 + $0x10] sm:$0xff] }
 0xa70   : > { %v4728_v19 = vrot.slane %v4703_v37, 1  ;;  %v4693_v16 = vadd.f32 %v6817_v24, %v4692_v5  ;;  %v7713_v54 = vpop.f32.mrb[79].mxu1  ;;  %7728 = vmatmul.mubr.msk.f32.gmra.mrb[86].mxu0 %vm3818_vm11, %v4703_v37  ;;  %7743 = vmatprep.mubr.msk.f32.mxu1 %vm8224_vm2, %v8223_v41  ;;  %v4715_v5 = vld [vmem:[%s11249_s19 + $0x18] sm:$0xff] }
 0xa71   : > { %7730 = vmatprep.mubr.msk.f32.mxu0 %vm8224_vm2, %v8223_v41  ;;  %8119 = vmatpush3.bf16.msra.mxu1 %v8118_v38  ;;  %v5215_v38 = vld [vmem:[%s11251_s21] sm:$0xff]  ;;  %v4718_v54 = vld [vmem:[%s11249_s19 + $0x30] sm:$0xff] }
 0xa72   : > { %v4704_v18 = vmax.f32 %v4693_v16, 0.0  ;;  %v4729_v31 = vsel %vm994_vm1, %v4725_v27, %v4728_v19  ;;  %7819 = vmatprep.subr.mxu1 %v8223_v41  ;;  %v4743_v60 = vsel %vm853_vm0, %v4728_v19, 0.0  ;;  %v4717_v16 = vld [vmem:[%s11249_s19 + $0x28] sm:$0xff] }
 0xa73   : > { %v4697_v13 = vpop.f32.mrb[80].mxu1  ;;  %v4742_v44 = vsel %vm853_vm0, 0.0, %v4729_v31  ;;  %v4720_v31 = vld [vmem:[%s11249_s19 + $0x40] sm:$0xf] }
 0xa74   : > { %v4733_v53 = vrot.slane %v4704_v18, 1  ;;  %v4698_v55 = vadd.f32 %v6817_v24, %v4697_v13  ;;  %v7716_v33 = vpop.f32.mrb[81].mxu1  ;;  %7731 = vmatmul.mubr.msk.f32.gmra.mrb[88].mxu0 %vm3818_vm11, %v4704_v18  ;;  %7744 = vmatmul.mubr.msk.f32.gmra.mrb[84].mxu1 %vm3818_vm11, %v4742_v44  ;;  %v5216_v13 = vld [vmem:[%s11251_s21 + $0x8] sm:$0xff]  ;;  %v10154_v44 = vld [vmem:[%s11250_s20] ss:$0 sm:$0xff] }
 0xa75   : > { %7733 = vmatprep.mubr.msk.f32.mxu0 %vm8224_vm2, %v8223_v41  ;;  %7746 = vmatprep.mubr.msk.f32.mxu1 %vm8224_vm2, %v8223_v41 }
 0xa76   : > { %v4705_v42 = vmax.f32 %v4698_v55, 0.0  ;;  %v4734_v23 = vsel %vm994_vm1, %v4728_v19, %v4733_v53  ;;  %v4745_v45 = vsel %vm984_vm3, %v4733_v53, 0.0  ;;  %v4716_v19 = vld [vmem:[%s11249_s19 + $0x20] sm:$0xff] }
 0xa77   : > { %v4744_v61 = vsel %vm984_vm3, %v4743_v60, %v4734_v23 }
 0xa78   : > { %v4738_v46 = vrot.slane %v4705_v42, 1  ;;  %7734 = vmatmul.mubr.msk.f32.gmra.mrb[90].mxu0 %vm3818_vm11, %v4705_v42  ;;  %7747 = vmatmul.mubr.msk.f32.gmra.mrb[86].mxu1 %vm3818_vm11, %v4744_v61 }
 0xa79   : > { %7749 = vmatprep.mubr.msk.f32.mxu1 %vm8224_vm2, %v8223_v41  ;;  %7792 = vmatprep.mubr.msk.f32.mxu0 %vm8224_vm2, %v8223_v41 }
 0xa7a   : > { %v4739_v63 = vsel %vm994_vm1, %v4733_v53, %v4738_v46  ;;  %v4747_v25 = vsel %vm986_vm4, %v4738_v46, 0.0 }
 0xa7b   : > { %v4746_v43 = vsel %vm986_vm4, %v4745_v45, %v4739_v63 }
 0xa7c   : > { %7750 = vmatmul.mubr.msk.f32.gmra.mrb[88].mxu1 %vm3818_vm11, %v4746_v43 }
 0xa7d   : > { %7752 = vmatprep.mubr.msk.f32.mxu1 %vm8224_vm2, %v8223_v41 }
 0xa80   : > { %7753 = vmatmul.mubr.msk.f32.gmra.mrb[90].mxu1 %vm3818_vm11, %v4747_v25 }
 0xa81   : > { %7759 = vmatprep.mubr.msk.f32.mxu1 %vm8224_vm2, %v8223_v41 }
 0xa84   : > { %7760 = vmatmul.mubr.msk.f32.vlgmr.msra.gmra.mrb[82].mxu1 %vm3818_vm11, %v4701_v59 }
 0xa85   : > { %7762 = vmatprep.mubr.msk.f32.mxu1 %vm8224_vm2, %v8223_v41  ;;  %7820 = vmatpush3.msra.mxu1 %v5216_v13 }
 0xa86   : > { %8132 = vmatprep.subr.bf16.mxu1 %v8225_v10 }
 0xa88   : > { %7763 = vmatmul.mubr.msk.f32.gmra.mrb[84].mxu1 %vm3818_vm11, %v4702_v17 }
 0xa89   : > { %7765 = vmatprep.mubr.msk.f32.mxu1 %vm8224_vm2, %v8223_v41 }
 0xa8c   : > { %7766 = vmatmul.mubr.msk.f32.gmra.mrb[86].mxu1 %vm3818_vm11, %v4703_v37  ;;  %v4713_v37 = vld [vmem:[%s11249_s19 + $0x8] sm:$0xff] }
 0xa8d   : > { %7768 = vmatprep.mubr.msk.f32.mxu1 %vm8224_vm2, %v8223_v41 }
 0xa90   : > { %7769 = vmatmul.mubr.msk.f32.gmra.mrb[88].mxu1 %vm3818_vm11, %v4704_v18  ;;  %v4719_v18 = vld [vmem:[%s11249_s19 + $0x38] sm:$0xff] }
 0xa91   : > { %7771 = vmatprep.mubr.msk.f32.mxu1 %vm8224_vm2, %v8223_v41 }
 0xa94   : > { %7772 = vmatmul.mubr.msk.f32.gmra.mrb[90].mxu1 %vm3818_vm11, %v4705_v42 }
 0xa95   : > { %7821 = vmatprep.mubr.msk.f32.mxu1 %vm8224_vm2, %v8223_v41 }
 0xb3b   : > { %v4824_v57 = vpop.f32.mrb[82].mxu0 }
 0xb3c   : > { %v7723_v47 = vpop.f32.mrb[83].mxu0 }
 0xb3f   : > { %v4829_v6 = vpop.f32.mrb[84].mxu0 }
 0xb40   : > { %v8121_v26 = vpack.c.bf16 %v4829_v6, %v4824_v57  ;;  %v7726_v0 = vpop.f32.mrb[85].mxu0 }
 0xb42   : > { %8122 = vmatpush3.bf16.msra.mxu0 %v8121_v26  ;;  %v5217_v26 = vld [vmem:[%s11251_s21 + $0x10] sm:$0xff] }
 0xb43   : > { %v4834_v9 = vpop.f32.mrb[86].mxu0  ;;  %8123 = vmatprep.subr.bf16.mxu0 %v8225_v10 }
 0xb44   : > { %v7729_v52 = vpop.f32.mrb[87].mxu0 }
 0xb47   : > { %v4839_v28 = vpop.f32.mrb[88].mxu0 }
 0xb48   : > { %v8124_v2 = vpack.c.bf16 %v4839_v28, %v4834_v9  ;;  %v7732_v51 = vpop.f32.mrb[89].mxu0 }
 0xb4a   : > { %8125 = vmatpush3.bf16.msra.mxu0 %v8124_v2 }
 0xb4b   : > { %v4844_v29 = vpop.f32.mrb[90].mxu0  ;;  %8126 = vmatprep.subr.bf16.mxu0 %v8225_v10 }
 0xb4c   : > { %v7735_v20 = vpop.f32.mrb[91].mxu0 }
 0xb57   : > { %v5018_v35 = vpop.f32.mrb[82].mxu1 }
 0xb58   : > { %v5047_v32 = vrot.slane %v5018_v35, 4  ;;  %v7761_v48 = vpop.f32.mrb[83].mxu1 }
 0xb5a   : > { %v5061_v30 = vsel %vm988_vm5, %v4844_v29, %v5047_v32 }
 0xb5b   : > { %v5023_v50 = vpop.f32.mrb[84].mxu1 }
 0xb5c   : > { %v5048_v11 = vrot.slane %v5023_v50, 4  ;;  %v7764_v36 = vpop.f32.mrb[85].mxu1 }
 0xb5e   : > { %v5049_v24 = vsel %vm988_vm5, %v5047_v32, %v5048_v11 }
 0xb5f   : > { %v8127_v14 = vpack.c.bf16 %v5049_v24, %v5061_v30  ;;  %v5028_v40 = vpop.f32.mrb[86].mxu1 }
 0xb60   : > { %v5050_v58 = vrot.slane %v5028_v40, 4  ;;  %v7767_v59 = vpop.f32.mrb[87].mxu1 }
 0xb61   : > { %8128 = vmatpush3.bf16.msra.mxu0 %v8127_v14 }
 0xb62   : > { %v5051_v49 = vsel %vm988_vm5, %v5048_v11, %v5050_v58  ;;  %8129 = vmatprep.subr.bf16.mxu0 %v8225_v10 }
 0xb63   : > { %v5033_v21 = vpop.f32.mrb[88].mxu1 }
 0xb64   : > { %v5052_v15 = vrot.slane %v5033_v21, 4  ;;  %v7770_v17 = vpop.f32.mrb[89].mxu1 }
 0xb66   : > { %v5053_v39 = vsel %vm988_vm5, %v5050_v58, %v5052_v15 }
 0xb67   : > { %v8130_v22 = vpack.c.bf16 %v5053_v39, %v5051_v49  ;;  %v5038_v7 = vpop.f32.mrb[90].mxu1 }
 0xb68   : > { %v5054_v1 = vrot.slane %v5038_v7, 4  ;;  %v7773_v27 = vpop.f32.mrb[91].mxu1 }
 0xb69   : > { %8131 = vmatpush3.bf16.msra.mxu0 %v8130_v22 }
 0xb6a   : > { %7790 = vmatprep.subr.mxu0 %v8223_v41  ;;  %v5055_v34 = vsel %vm988_vm5, %v5052_v15, %v5054_v1 }
 0xb6d   : > { %7791 = vmatpush3.msra.mxu0 %v5055_v34 }
 0xb6e   : > { %7793 = vmatmul.mubr.msk.f32.vlgmr.msra.gmra.mrb[92].mxu0 %vm5068_vm14, %v4712_v56  ;;  %7848 = vmatprep.subr.mxu0 %v8223_v41 }
 0xb6f   : > { %7795 = vmatprep.mubr.msk.f32.mxu0 %vm8224_vm2, %v8223_v41  ;;  %7849 = vmatpush3.msra.mxu0 %v5215_v38 }
 0xb70   : > { %7877 = vmatprep.subr.mxu0 %v8223_v41 }
 0xb72   : > { %7796 = vmatmul.mubr.msk.f32.gmra.mrb[94].mxu0 %vm5068_vm14, %v4713_v37 }
 0xb73   : > { %7798 = vmatprep.mubr.msk.f32.mxu0 %vm8224_vm2, %v8223_v41 }
 0xb76   : > { %7799 = vmatmul.mubr.msk.f32.gmra.mrb[96].mxu0 %vm5068_vm14, %v4714_v8 }
 0xb77   : > { %7801 = vmatprep.mubr.msk.f32.mxu0 %vm8224_vm2, %v8223_v41 }
 0xb7a   : > { %7802 = vmatmul.mubr.msk.f32.gmra.mrb[98].mxu0 %vm5068_vm14, %v4715_v5 }
 0xb7b   : > { %7804 = vmatprep.mubr.msk.f32.mxu0 %vm8224_vm2, %v8223_v41 }
 0xb7e   : > { %7805 = vmatmul.mubr.msk.f32.gmra.mrb[100].mxu0 %vm5068_vm14, %v4716_v19 }
 0xb7f   : > { %7807 = vmatprep.mubr.msk.f32.mxu0 %vm8224_vm2, %v8223_v41 }
 0xb82   : > { %7808 = vmatmul.mubr.msk.f32.gmra.mrb[102].mxu0 %vm5068_vm14, %v4717_v16 }
 0xb83   : > { %7810 = vmatprep.mubr.msk.f32.mxu0 %vm8224_vm2, %v8223_v41 }
 0xb86   : > { %7811 = vmatmul.mubr.msk.f32.gmra.mrb[104].mxu0 %vm5068_vm14, %v4718_v54 }
 0xb87   : > { %7813 = vmatprep.mubr.msk.f32.mxu0 %vm8224_vm2, %v8223_v41 }
 0xb8a   : > { %7814 = vmatmul.mubr.msk.f32.gmra.mrb[106].mxu0 %vm5068_vm14, %v4719_v18 }
 0xb8b   : > { %7816 = vmatprep.mubr.msk.f32.mxu0 %vm8224_vm2, %v8223_v41 }
 0xb8e   : > { %7817 = vmatmul.mubr.msk.f32.gmra.mrb[108].mxu0 %vm5068_vm14, %v4720_v31 }
 0xb8f   : > { %7850 = vmatprep.mubr.msk.f32.mxu0 %vm8224_vm2, %v8223_v41 }
 0xc41   : > { %v5162_v53 = vpop.f32.mrb[92].mxu0 }
 0xc42   : > { %v5163_v55 = vadd.f32 %v10154_v44, %v5162_v53  ;;  %v7794_v33 = vpop.f32.mrb[93].mxu0 }
 0xc43   : > { %v5219_v33 = vld [vmem:[%s11252_s22 + $0x8] sm:$0xff] }
 0xc44   : > { %v10157_v42 = vmax.f32 %v5163_v55, 0.0 }
 0xc45   : > { %v5167_v23 = vpop.f32.mrb[94].mxu0 }
 0xc46   : > { %v5168_v60 = vadd.f32 %v10154_v44, %v5167_v23  ;;  %v7797_v61 = vpop.f32.mrb[95].mxu0  ;;  %7822 = vmatmul.mubr.msk.f32.vlgmr.msra.gmra.mrb[92].mxu1 %vm1980_vm7, %v10157_v42  ;;  %v5256_v45 = vrot.slane %v10157_v42, 1 }
 0xc47   : > { %7824 = vmatprep.mubr.msk.f32.mxu1 %vm8224_vm2, %v8223_v41 }
 0xc48   : > { %v10164_v46 = vmax.f32 %v5168_v60, 0.0 }
 0xc49   : > { %v5172_v63 = vpop.f32.mrb[96].mxu0 }
 0xc4a   : > { %v5257_v43 = vrot.slane %v10164_v46, 1  ;;  %v5173_v25 = vadd.f32 %v10154_v44, %v5172_v63  ;;  %v7800_v57 = vpop.f32.mrb[97].mxu0  ;;  %7825 = vmatmul.mubr.msk.f32.gmra.mrb[94].mxu1 %vm1980_vm7, %v10164_v46 }
 0xc4b   : > { %7827 = vmatprep.mubr.msk.f32.mxu1 %vm8224_vm2, %v8223_v41 }
 0xc4c   : > { %v10173_v47 = vmax.f32 %v5173_v25, 0.0  ;;  %v5258_v6 = vsel %vm994_vm1, %v5256_v45, %v5257_v43 }
 0xc4d   : > { %v5177_v0 = vpop.f32.mrb[98].mxu0  ;;  %7851 = vmatmul.mubr.msk.f32.vlgmr.msra.gmra.mrb[110].mxu0 %vm1980_vm7, %v5258_v6 }
 0xc4e   : > { %v5259_v9 = vrot.slane %v10173_v47, 1  ;;  %v5178_v52 = vadd.f32 %v10154_v44, %v5177_v0  ;;  %v7803_v28 = vpop.f32.mrb[99].mxu0  ;;  %7828 = vmatmul.mubr.msk.f32.gmra.mrb[96].mxu1 %vm1980_vm7, %v10173_v47  ;;  %7853 = vmatprep.mubr.msk.f32.mxu0 %vm8224_vm2, %v8223_v41 }
 0xc4f   : > { %7830 = vmatprep.mubr.msk.f32.mxu1 %vm8224_vm2, %v8223_v41  ;;  %7878 = vmatpush3.msra.mxu0 %v5217_v26 }
 0xc50   : > { %v10188_v2 = vmax.f32 %v5178_v52, 0.0  ;;  %v5260_v51 = vsel %vm994_vm1, %v5257_v43, %v5259_v9 }
 0xc51   : > { %v5182_v29 = vpop.f32.mrb[100].mxu0  ;;  %7854 = vmatmul.mubr.msk.f32.gmra.mrb[112].mxu0 %vm1980_vm7, %v5260_v51 }
 0xc52   : > { %v5263_v20 = vrot.slane %v10188_v2, 1  ;;  %v5183_v35 = vadd.f32 %v10154_v44, %v5182_v29  ;;  %v7806_v32 = vpop.f32.mrb[101].mxu0  ;;  %7831 = vmatmul.mubr.msk.f32.gmra.mrb[98].mxu1 %vm1980_vm7, %v10188_v2  ;;  %7856 = vmatprep.mubr.msk.f32.mxu0 %vm8224_vm2, %v8223_v41 }
 0xc53   : > { %7833 = vmatprep.mubr.msk.f32.mxu1 %vm8224_vm2, %v8223_v41 }
 0xc54   : > { %v10200_v48 = vmax.f32 %v5183_v35, 0.0  ;;  %v5264_v30 = vsel %vm994_vm1, %v5259_v9, %v5263_v20 }
 0xc55   : > { %v5187_v50 = vpop.f32.mrb[102].mxu0  ;;  %v5285_v11 = vsel %vm853_vm0, 0.0, %v5264_v30 }
 0xc56   : > { %v5265_v36 = vrot.slane %v10200_v48, 1  ;;  %v5188_v24 = vadd.f32 %v10154_v44, %v5187_v50  ;;  %v7809_v14 = vpop.f32.mrb[103].mxu0  ;;  %7834 = vmatmul.mubr.msk.f32.gmra.mrb[100].mxu1 %vm1980_vm7, %v10200_v48  ;;  %7857 = vmatmul.mubr.msk.f32.gmra.mrb[114].mxu0 %vm1980_vm7, %v5285_v11 }
 0xc57   : > { %7836 = vmatprep.mubr.msk.f32.mxu1 %vm8224_vm2, %v8223_v41  ;;  %7859 = vmatprep.mubr.msk.f32.mxu0 %vm8224_vm2, %v8223_v41 }
 0xc58   : > { %v5211_v40 = vmax.f32 %v5188_v24, 0.0  ;;  %v5266_v58 = vsel %vm994_vm1, %v5263_v20, %v5265_v36  ;;  %v5286_v22 = vsel %vm853_vm0, %v5265_v36, 0.0 }
 0xc59   : > { %v5192_v59 = vpop.f32.mrb[104].mxu0 }
 0xc5a   : > { %v5271_v49 = vrot.slane %v5211_v40, 1  ;;  %v5193_v21 = vadd.f32 %v10154_v44, %v5192_v59  ;;  %v7812_v15 = vpop.f32.mrb[105].mxu0  ;;  %7837 = vmatmul.mubr.msk.f32.gmra.mrb[102].mxu1 %vm1980_vm7, %v5211_v40  ;;  %7860 = vmatmul.mubr.msk.f32.gmra.mrb[116].mxu0 %vm1980_vm7, %v5266_v58 }
 0xc5b   : > { %7839 = vmatprep.mubr.msk.f32.mxu1 %vm8224_vm2, %v8223_v41  ;;  %7862 = vmatprep.mubr.msk.f32.mxu0 %vm8224_vm2, %v8223_v41 }
 0xc5c   : > { %v5212_v17 = vmax.f32 %v5193_v21, 0.0  ;;  %v5272_v39 = vsel %vm994_vm1, %v5265_v36, %v5271_v49 }
 0xc5d   : > { %v5197_v7 = vpop.f32.mrb[106].mxu0  ;;  %v5287_v1 = vsel %vm984_vm3, %v5286_v22, %v5272_v39 }
 0xc5e   : > { %v5273_v27 = vrot.slane %v5212_v17, 1  ;;  %v5198_v34 = vadd.f32 %v10154_v44, %v5197_v7  ;;  %v7815_v56 = vpop.f32.mrb[107].mxu0  ;;  %7840 = vmatmul.mubr.msk.f32.gmra.mrb[104].mxu1 %vm1980_vm7, %v5212_v17  ;;  %7863 = vmatmul.mubr.msk.f32.gmra.mrb[118].mxu0 %vm1980_vm7, %v5287_v1 }
 0xc5f   : > { %7842 = vmatprep.mubr.msk.f32.mxu1 %vm8224_vm2, %v8223_v41  ;;  %7865 = vmatprep.mubr.msk.f32.mxu0 %vm8224_vm2, %v8223_v41 }
 0xc60   : > { %v5213_v38 = vmax.f32 %v5198_v34, 0.0  ;;  %v5274_v37 = vsel %vm994_vm1, %v5271_v49, %v5273_v27  ;;  %v5288_v31 = vsel %vm984_vm3, %v5273_v27, 0.0 }
 0xc61   : > { %v5202_v8 = vpop.f32.mrb[108].mxu0 }
 0xc62   : > { %v5279_v5 = vrot.slane %v5213_v38, 1  ;;  %v5203_v19 = vadd.f32 %v10154_v44, %v5202_v8  ;;  %v7818_v16 = vpop.f32.mrb[109].mxu0  ;;  %7843 = vmatmul.mubr.msk.f32.gmra.mrb[106].mxu1 %vm1980_vm7, %v5213_v38  ;;  %7866 = vmatmul.mubr.msk.f32.gmra.mrb[120].mxu0 %vm1980_vm7, %v5274_v37 }
 0xc63   : > { %7845 = vmatprep.mubr.msk.f32.mxu1 %vm8224_vm2, %v8223_v41  ;;  %7868 = vmatprep.mubr.msk.f32.mxu0 %vm8224_vm2, %v8223_v41 }
 0xc64   : > { %v5214_v54 = vmax.f32 %v5203_v19, 0.0  ;;  %v5280_v18 = vsel %vm994_vm1, %v5273_v27, %v5279_v5 }
 0xc65   : > { %v5289_v13 = vsel %vm986_vm4, %v5288_v31, %v5280_v18 }
 0xc66   : > { %v5281_v53 = vrot.slane %v5214_v54, 1  ;;  %7846 = vmatmul.mubr.msk.f32.gmra.mrb[108].mxu1 %vm1980_vm7, %v5214_v54  ;;  %7869 = vmatmul.mubr.msk.f32.gmra.mrb[122].mxu0 %vm1980_vm7, %v5289_v13 }
 0xc67   : > { %7871 = vmatprep.mubr.msk.f32.mxu0 %vm8224_vm2, %v8223_v41  ;;  %6876 = vmatprep.mubr.msk.f32.mxu1 %vm1980_vm7, %v5219_v33 }
 0xc68   : > { %v5282_v44 = vsel %vm994_vm1, %v5279_v5, %v5281_v53  ;;  %v5290_v55 = vsel %vm986_vm4, %v5281_v53, 0.0 }
 0xc6a   : > { %7872 = vmatmul.mubr.msk.f32.gmra.mrb[124].mxu0 %vm1980_vm7, %v5282_v44 }
 0xc6b   : > { %7874 = vmatprep.mubr.msk.f32.mxu0 %vm8224_vm2, %v8223_v41 }
 0xc6e   : > { %7875 = vmatmul.mubr.msk.f32.gmra.mrb[126].mxu0 %vm1980_vm7, %v5290_v55 }
 0xc6f   : > { %7879 = vmatprep.mubr.msk.f32.mxu0 %vm8224_vm2, %v8223_v41 }
 0xc72   : > { %7880 = vmatmul.mubr.msk.f32.vlgmr.msra.gmra.mrb[110].mxu0 %vm1980_vm7, %v10157_v42 }
 0xc73   : > { %7882 = vmatprep.mubr.msk.f32.mxu0 %vm8224_vm2, %v8223_v41 }
 0xc76   : > { %7883 = vmatmul.mubr.msk.f32.gmra.mrb[112].mxu0 %vm1980_vm7, %v10164_v46 }
 0xc77   : > { %7885 = vmatprep.mubr.msk.f32.mxu0 %vm8224_vm2, %v8223_v41 }
 0xc7a   : > { %7886 = vmatmul.mubr.msk.f32.gmra.mrb[114].mxu0 %vm1980_vm7, %v10173_v47 }
 0xc7b   : > { %7888 = vmatprep.mubr.msk.f32.mxu0 %vm8224_vm2, %v8223_v41 }
 0xc7e   : > { %7889 = vmatmul.mubr.msk.f32.gmra.mrb[116].mxu0 %vm1980_vm7, %v10188_v2 }
 0xc7f   : > { %7891 = vmatprep.mubr.msk.f32.mxu0 %vm8224_vm2, %v8223_v41 }
 0xc82   : > { %7892 = vmatmul.mubr.msk.f32.gmra.mrb[118].mxu0 %vm1980_vm7, %v10200_v48 }
 0xc83   : > { %7894 = vmatprep.mubr.msk.f32.mxu0 %vm8224_vm2, %v8223_v41 }
 0xc86   : > { %7895 = vmatmul.mubr.msk.f32.gmra.mrb[120].mxu0 %vm1980_vm7, %v5211_v40 }
 0xc87   : > { %7897 = vmatprep.mubr.msk.f32.mxu0 %vm8224_vm2, %v8223_v41 }
 0xc8a   : > { %7898 = vmatmul.mubr.msk.f32.gmra.mrb[122].mxu0 %vm1980_vm7, %v5212_v17 }
 0xc8b   : > { %7900 = vmatprep.mubr.msk.f32.mxu0 %vm8224_vm2, %v8223_v41 }
 0xc8e   : > { %7901 = vmatmul.mubr.msk.f32.gmra.mrb[124].mxu0 %vm1980_vm7, %v5213_v38 }
 0xc8f   : > { %7903 = vmatprep.mubr.msk.f32.mxu0 %vm8224_vm2, %v8223_v41  ;;  %vm6663_vm2 = vcmask 3072  }
 0xc92   : > { %7904 = vmatmul.mubr.msk.f32.gmra.mrb[126].mxu0 %vm1980_vm7, %v5214_v54 }
 0xd19   : > { %v5375_v42 = vpop.f32.mrb[92].mxu1 }
 0xd1a   : > { %v7823_v23 = vpop.f32.mrb[93].mxu1 }
 0xd1d   : > { %v5380_v60 = vpop.f32.mrb[94].mxu1 }
 0xd1e   : > { %v8133_v61 = vpack.c.bf16 %v5380_v60, %v5375_v42  ;;  %v7826_v46 = vpop.f32.mrb[95].mxu1 }
 0xd1f   : > { %v5218_v46 = vld [vmem:[%s11252_s22] sm:$0xff] }
 0xd20   : > { %8134 = vmatpush1.bf16.msra.mxu1 %v8133_v61 }
 0xd21   : > { %v5385_v63 = vpop.f32.mrb[96].mxu1  ;;  %8135 = vmatprep.subr.bf16.mxu1 %v8225_v10 }
 0xd22   : > { %v7829_v45 = vpop.f32.mrb[97].mxu1 }
 0xd23   : > { %v5223_v45 = vld [vmem:[%s11252_s22 + $0x28] sm:$0xff] }
 0xd25   : > { %v5390_v43 = vpop.f32.mrb[98].mxu1 }
 0xd26   : > { %v8136_v25 = vpack.c.bf16 %v5390_v43, %v5385_v63  ;;  %v7832_v57 = vpop.f32.mrb[99].mxu1  ;;  %v5220_v63 = vld [vmem:[%s11252_s22 + $0x10] sm:$0xff]  ;;  %v5222_v43 = vld [vmem:[%s11252_s22 + $0x20] sm:$0xff] }
 0xd27   : > { %v5224_v57 = vld [vmem:[%s11252_s22 + $0x30] sm:$0xff] }
 0xd28   : > { %8137 = vmatpush1.bf16.msra.mxu1 %v8136_v25  ;;  %v5225_v25 = vld [vmem:[%s11252_s22 + $0x38] sm:$0xff] }
 0xd29   : > { %v5395_v47 = vpop.f32.mrb[100].mxu1  ;;  %8138 = vmatprep.subr.bf16.mxu1 %v8225_v10 }
 0xd2a   : > { %v7835_v6 = vpop.f32.mrb[101].mxu1 }
 0xd2b   : > { %v5226_v6 = vld [vmem:[%s11252_s22 + $0x40] sm:$0xff] }
 0xd2d   : > { %v5400_v26 = vpop.f32.mrb[102].mxu1 }
 0xd2e   : > { %v8139_v0 = vpack.c.bf16 %v5400_v26, %v5395_v47  ;;  %v7838_v9 = vpop.f32.mrb[103].mxu1  ;;  %v5227_v47 = vld [vmem:[%s11252_s22 + $0x48] sm:$0xff]  ;;  %v5229_v26 = vld [vmem:[%s11252_s22 + $0x58] sm:$0xff] }
 0xd2f   : > { %v5231_v9 = vld [vmem:[%s11252_s22 + $0x68] sm:$0xff] }
 0xd30   : > { %8140 = vmatpush1.bf16.msra.mxu1 %v8139_v0  ;;  %v5228_v0 = vld [vmem:[%s11252_s22 + $0x50] sm:$0xff] }
 0xd31   : > { %v5405_v52 = vpop.f32.mrb[104].mxu1  ;;  %8141 = vmatprep.subr.bf16.mxu1 %v8225_v10 }
 0xd32   : > { %v7841_v28 = vpop.f32.mrb[105].mxu1 }
 0xd33   : > { %v5233_v28 = vld [vmem:[%s11252_s22 + $0x78] sm:$0xff] }
 0xd35   : > { %v5410_v2 = vpop.f32.mrb[106].mxu1 }
 0xd36   : > { %v8142_v51 = vpack.c.bf16 %v5410_v2, %v5405_v52  ;;  %v7844_v29 = vpop.f32.mrb[107].mxu1  ;;  %v5230_v52 = vld [vmem:[%s11252_s22 + $0x60] sm:$0xff]  ;;  %v5232_v2 = vld [vmem:[%s11252_s22 + $0x70] sm:$0xff] }
 0xd37   : > { %v5234_v29 = vld [vmem:[%s11252_s22 + $0x80] sm:$0xff] }
 0xd38   : > { %8143 = vmatpush1.bf16.msra.mxu1 %v8142_v51  ;;  %v5235_v51 = vld [vmem:[%s11252_s22 + $0x88] sm:$0xff] }
 0xd39   : > { %v5415_v20 = vpop.f32.mrb[108].mxu1  ;;  %8144 = vmatprep.subr.bf16.mxu1 %v8225_v10 }
 0xd3a   : > { %v7847_v35 = vpop.f32.mrb[109].mxu1 }
 0xd3b   : > { %v5236_v35 = vld [vmem:[%s11252_s22 + $0x90] sm:$0xff] }
 0xd45   : > { %v5617_v32 = vpop.f32.mrb[110].mxu0 }
 0xd46   : > { %v5670_v48 = vrot.slane %v5617_v32, 4  ;;  %v7881_v30 = vpop.f32.mrb[111].mxu0  ;;  %v5239_v32 = vld [vmem:[%s11252_s22 + $0xa8] sm:$0xff] }
 0xd47   : > { %v5241_v30 = vld [vmem:[%s11252_s22 + $0xb8] sm:$0xff] }
 0xd48   : > { %v5696_v50 = vsel %vm988_vm5, %v5415_v20, %v5670_v48  ;;  %v5237_v20 = vld [vmem:[%s11252_s22 + $0x98] sm:$0xff] }
 0xd49   : > { %v5622_v11 = vpop.f32.mrb[112].mxu0 }
 0xd4a   : > { %v5671_v36 = vrot.slane %v5622_v11, 4  ;;  %v7884_v24 = vpop.f32.mrb[113].mxu0  ;;  %v5243_v11 = vld [vmem:[%s11252_s22 + $0xc8] sm:$0xff] }
 0xd4b   : > { %v5245_v24 = vld [vmem:[%s11252_s22 + $0xd8] sm:$0xff] }
 0xd4c   : > { %v5672_v14 = vsel %vm988_vm5, %v5670_v48, %v5671_v36  ;;  %v5238_v48 = vld [vmem:[%s11252_s22 + $0xa0] sm:$0xff] }
 0xd4d   : > { %v8145_v40 = vpack.c.bf16 %v5672_v14, %v5696_v50  ;;  %v5627_v58 = vpop.f32.mrb[114].mxu0  ;;  %v5240_v50 = vld [vmem:[%s11252_s22 + $0xb0] sm:$0xff] }
 0xd4e   : > { %v5673_v59 = vrot.slane %v5627_v58, 4  ;;  %v7887_v49 = vpop.f32.mrb[115].mxu0  ;;  %v5244_v14 = vld [vmem:[%s11252_s22 + $0xd0] sm:$0xff]  ;;  %v5246_v58 = vld [vmem:[%s11252_s22 + $0xe0] sm:$0xff] }
 0xd4f   : > { %8146 = vmatpush1.bf16.msra.mxu1 %v8145_v40  ;;  %v5247_v40 = vld [vmem:[%s11252_s22 + $0xe8] sm:$0xff]  ;;  %v5248_v49 = vld [vmem:[%s11252_s22 + $0xf0] sm:$0xff] }
 0xd50   : > { %v5674_v21 = vsel %vm988_vm5, %v5671_v36, %v5673_v59  ;;  %8147 = vmatprep.subr.bf16.mxu1 %v8225_v10  ;;  %v5242_v36 = vld [vmem:[%s11252_s22 + $0xc0] sm:$0xff] }
 0xd51   : > { %v5632_v15 = vpop.f32.mrb[116].mxu0 }
 0xd52   : > { %v5675_v17 = vrot.slane %v5632_v15, 4  ;;  %v7890_v39 = vpop.f32.mrb[117].mxu0  ;;  %v5250_v15 = vld [vmem:[%s11252_s22 + $0x100] sm:$0xf] }
 0xd53   : > { %v10424_v39 = vrot.slane %v8223_v41, 7 }
 0xd54   : > { %v5676_v22 = vsel %vm988_vm5, %v5673_v59, %v5675_v17  ;;  %v5249_v59 = vld [vmem:[%s11252_s22 + $0xf8] sm:$0xff] }
 0xd55   : > { %v8148_v7 = vpack.c.bf16 %v5676_v22, %v5674_v21  ;;  %v5637_v1 = vpop.f32.mrb[118].mxu0  ;;  %v5251_v21 = vld [vmem:[%s11252_s22 + $0x108] sm:$0xf]  ;;  %11296 = vst [vmem:[#allocation4_spill] sm:$0xff] %v10424_v39 }
 0xd56   : > { %v5677_v27 = vrot.slane %v5637_v1, 4  ;;  %v7893_v34 = vpop.f32.mrb[119].mxu0  ;;  %v6065_v1 = vsel %vm853_vm0, 0.0, %v10424_v39 }
 0xd57   : > { %8149 = vmatpush1.bf16.msra.mxu1 %v8148_v7 }
 0xd58   : > { %v5678_v56 = vsel %vm988_vm5, %v5675_v17, %v5677_v27  ;;  %8150 = vmatprep.subr.bf16.mxu1 %v8225_v10  ;;  %v5921_v17 = vld [vmem:[%s11254_s24] sm:$0xff] }
 0xd59   : > { %v5642_v38 = vpop.f32.mrb[120].mxu0  ;;  %v10428_v22 = vrot.slane %v5921_v17, %v1285_v3  ;;  %v10432_v7 = vrot.slane %v5921_v17, %v1514_v4  ;;  %v10448_v3 = vld [vmem:[%s11253_s23] ss:$0 sm:$0xff] }
 0xd5a   : > { %v5679_v37 = vrot.slane %v5642_v38, 4  ;;  %v7896_v8 = vpop.f32.mrb[121].mxu0  ;;  %v10443_v38 = vrot.slane %v5921_v17, %v1792_v12 }
 0xd5b   : > { %v6127_v34 = vmul.f32 %v10428_v22, %v6065_v1  ;;  %v6128_v4 = vmul.f32 %v10428_v22, %v10424_v39  ;;  %v6291_v8 = vsub.s32 4, %v8472_v62 }
 0xd5c   : > { %v5680_v5 = vsel %vm988_vm5, %v5677_v27, %v5679_v37  ;;  %v10437_v27 = vrot.slane %v8223_v41, 1 }
 0xd5d   : > { %v8151_v19 = vpack.c.bf16 %v5680_v5, %v5678_v56  ;;  %v5647_v16 = vpop.f32.mrb[122].mxu0  ;;  %v6146_v56 = vmul.f32 0.0, %v10432_v7  ;;  %v6465_v5 = vsub.s32 6, %v8472_v62 }
 0xd5e   : > { %v5681_v54 = vrot.slane %v5647_v16, 4  ;;  %v7899_v18 = vpop.f32.mrb[123].mxu0  ;;  %11297 = vst [vmem:[#allocation5_spill] sm:$0xff] %v10437_v27 }
 0xd5f   : > { %8152 = vmatpush1.bf16.msra.mxu1 %v8151_v19  ;;  %v6501_v19 = vsub.s32 7, %v8472_v62  ;;  %v6160_v16 = vadd.f32 %v6146_v56, %v6127_v34 }
 0xd60   : > { %v5682_v31 = vsel %vm988_vm5, %v5679_v37, %v5681_v54  ;;  %8153 = vmatprep.subr.bf16.mxu1 %v8225_v10  ;;  %v5221_v10 = vld [vmem:[%s11252_s22 + $0x18] sm:$0xff] }
 0xd61   : > { %v5652_v13 = vpop.f32.mrb[124].mxu0 }
 0xd62   : > { %v5683_v53 = vrot.slane %v5652_v13, 4  ;;  %v7902_v44 = vpop.f32.mrb[125].mxu0  ;;  %v6329_v13 = vsub.s32 5, %v8472_v62 }
 0xd64   : > { %v5684_v55 = vsel %vm988_vm5, %v5681_v54, %v5683_v53  ;;  %v6179_v54 = vmul.f32 %v10443_v38, %v10437_v27 }
 0xd65   : > { %v8154_v33 = vpack.c.bf16 %v5684_v55, %v5682_v31  ;;  %v5657_v42 = vpop.f32.mrb[126].mxu0  ;;  %v6161_v31 = vadd.f32 %v6146_v56, %v6128_v4  ;;  %v10462_v55 = vrot.slane %v5921_v17, %v6291_v8 }
 0xd66   : > { %v5685_v23 = vrot.slane %v5657_v42, 4  ;;  %v7905_v60 = vpop.f32.mrb[127].mxu0  ;;  %v10464_v42 = vrot.slane %v5921_v17, %v6465_v5 }
 0xd67   : > { %8155 = vmatpush1.bf16.msra.mxu1 %v8154_v33 }
 0xd68   : > { %5786 = vmatprep.subr.mxu1 %v8223_v41  ;;  %v5686_v61 = vsel %vm988_vm5, %v5683_v53, %v5685_v23  ;;  %v6253_v41 = vsub.s32 3, %v8472_v62  ;;  %v10466_v23 = vrot.slane %v5921_v17, %v6501_v19  ;;  %v10471_v62 = vrot.slane %v5921_v17, %v6329_v13 }
 0xd6a   : > { %v10460_v44 = vrot.slane %v5921_v17, %v6253_v41 }
 0xd6b   : > { %5787 = vmatpush1.msra.mxu1 %v5686_v61  ;;  %v6066_v61 = vsel %vm853_vm0, %v10424_v39, 0.0 }
 0xd6c   : > { %5819 = vmatmul.mubr.f32.vlgmr.msra.gmra.mrb[110].mxu1 %v5218_v46  ;;  %v6194_v46 = vadd.f32 %v6179_v54, %v6160_v16 }
 0xd6d   : > { %6877 = vmatprep.mubr.msk.f32.mxu1 %vm1980_vm7, %v5221_v10 }
 0xd70   : > { %5824 = vmatmul.mubr.f32.gmra.mrb[112].mxu1 %v5220_v63 }
 0xd71   : > { %6878 = vmatprep.mubr.msk.f32.mxu1 %vm1980_vm7, %v5223_v45  ;;  %v6195_v45 = vadd.f32 %v6179_v54, %v6161_v31 }
 0xd74   : > { %5829 = vmatmul.mubr.f32.gmra.mrb[114].mxu1 %v5222_v43  ;;  %v10476_v43 = vld [vmem:[%s11254_s24 + $0x8] ss:$0 sm:$0xff] }
 0xd75   : > { %6879 = vmatprep.mubr.msk.f32.mxu1 %vm1980_vm7, %v5225_v25  ;;  %v10480_v25 = vmul.f32 %v10464_v42, %v10424_v39 }
 0xd77   : > { %11298 = vst [vmem:[#allocation6_spill] sm:$0xff] %v10480_v25 }
 0xd78   : > { %5834 = vmatmul.mubr.f32.gmra.mrb[116].mxu1 %v5224_v57  ;;  %v10483_v57 = vmul.f32 0.0, %v10466_v23 }
 0xd79   : > { %6880 = vmatprep.mubr.msk.f32.mxu1 %vm1980_vm7, %v5227_v47 }
 0xd7a   : > { %11299 = vst [vmem:[#allocation7_spill] sm:$0xff] %v10483_v57 }
 0xd7c   : > { %5839 = vmatmul.mubr.f32.gmra.mrb[118].mxu1 %v5226_v6 }
 0xd7d   : > { %6881 = vmatprep.mubr.msk.f32.mxu1 %vm1980_vm7, %v5229_v26 }
 0xd80   : > { %5844 = vmatmul.mubr.f32.gmra.mrb[120].mxu1 %v5228_v0  ;;  %v10488_v0 = vmul.f32 %v10476_v43, %v10437_v27 }
 0xd81   : > { %6882 = vmatprep.mubr.msk.f32.mxu1 %vm1980_vm7, %v5231_v9 }
 0xd82   : > { %11300 = vst [vmem:[#allocation8_spill] sm:$0xff] %v10488_v0 }
 0xd84   : > { %5849 = vmatmul.mubr.f32.gmra.mrb[122].mxu1 %v5230_v52 }
 0xd85   : > { %6883 = vmatprep.mubr.msk.f32.mxu1 %vm1980_vm7, %v5233_v28 }
 0xd88   : > { %5854 = vmatmul.mubr.f32.gmra.mrb[124].mxu1 %v5232_v2 }
 0xd89   : > { %6884 = vmatprep.mubr.msk.f32.mxu1 %vm1980_vm7, %v5235_v51 }
 0xd8c   : > { %5859 = vmatmul.mubr.f32.gmra.mrb[126].mxu1 %v5234_v29 }
 0xd8d   : > { %6885 = vmatprep.mubr.msk.f32.mxu1 %vm1980_vm7, %v5237_v20 }
 0xd90   : > { %5864 = vmatmul.mubr.f32.gmra.mrb[128].mxu1 %v5236_v35 }
 0xd91   : > { %6886 = vmatprep.mubr.msk.f32.mxu1 %vm1980_vm7, %v5239_v32 }
 0xd94   : > { %5869 = vmatmul.mubr.f32.gmra.mrb[130].mxu1 %v5238_v48 }
 0xd95   : > { %6887 = vmatprep.mubr.msk.f32.mxu1 %vm1980_vm7, %v5241_v30 }
 0xd98   : > { %5874 = vmatmul.mubr.f32.gmra.mrb[132].mxu1 %v5240_v50 }
 0xd99   : > { %6888 = vmatprep.mubr.msk.f32.mxu1 %vm1980_vm7, %v5243_v11 }
 0xd9c   : > { %5879 = vmatmul.mubr.f32.gmra.mrb[134].mxu1 %v5242_v36 }
 0xd9d   : > { %6889 = vmatprep.mubr.msk.f32.mxu1 %vm1980_vm7, %v5245_v24 }
 0xda0   : > { %5884 = vmatmul.mubr.f32.gmra.mrb[136].mxu1 %v5244_v14 }
 0xda1   : > { %6890 = vmatprep.mubr.msk.f32.mxu1 %vm1980_vm7, %v5247_v40 }
 0xda4   : > { %5889 = vmatmul.mubr.f32.gmra.mrb[138].mxu1 %v5246_v58 }
 0xda5   : > { %6891 = vmatprep.mubr.msk.f32.mxu1 %vm1980_vm7, %v5249_v59 }
 0xda8   : > { %5894 = vmatmul.mubr.f32.gmra.mrb[140].mxu1 %v5248_v49 }
 0xda9   : > { %6892 = vmatprep.mubr.msk.f32.mxu1 %vm1980_vm7, %v5251_v21 }
 0xdac   : > { %5899 = vmatmul.mubr.f32.gmra.mrb[142].mxu1 %v5250_v15 }
 0xe3f   : > { %v5820_v37 = vpop.f32.mrb[110].mxu1 }
 0xe40   : > { %v5821_v12 = vadd.f32 %v10448_v3, %v5820_v37  ;;  %v5822_v18 = vpop.f32.mrb[111].mxu1 }
 0xe42   : > { %v5904_v53 = vmax.f32 %v5821_v12, 0.0 }
 0xe43   : > { %v5825_v33 = vpop.f32.mrb[112].mxu1 }
 0xe44   : > { %v5937_v60 = vrot.slane %v5904_v53, 7  ;;  %v5826_v10 = vadd.f32 %v10448_v3, %v5825_v33  ;;  %v5827_v63 = vpop.f32.mrb[113].mxu1  ;;  %v6232_v6 = vrot.slane %v5904_v53, 1  ;;  %v6293_v2 = vmul.f32 %v10462_v55, %v5904_v53 }
 0xe46   : > { %v5975_v47 = vsel %vm853_vm0, 0.0, %v5937_v60  ;;  %v5905_v26 = vmax.f32 %v5826_v10, 0.0 }
 0xe47   : > { %v6025_v9 = vrot.slane %v5975_v47, 7  ;;  %v6074_v52 = vrot.slane %v5975_v47, 1  ;;  %v6255_v28 = vmul.f32 %v10460_v44, %v5975_v47  ;;  %v5830_v51 = vpop.f32.mrb[114].mxu1  ;;  %v6147_v29 = vmul.f32 %v10432_v7, %v5975_v47 }
 0xe48   : > { %v5938_v20 = vrot.slane %v5905_v26, 7  ;;  %v6233_v35 = vrot.slane %v5905_v26, 1  ;;  %v5831_v32 = vadd.f32 %v10448_v3, %v5830_v51  ;;  %v5832_v48 = vpop.f32.mrb[115].mxu1  ;;  %v6294_v11 = vmul.f32 %v10462_v55, %v5905_v26 }
 0xe49   : > { %v6067_v30 = vsel %vm984_vm3, %v6066_v61, %v6025_v9  ;;  %v6272_v50 = vadd.f32 %v6255_v28, %v6194_v46  ;;  %v6075_v36 = vsel %vm994_vm1, %v10437_v27, %v6074_v52 }
 0xe4a   : > { %v10499_v24 = vsel %vm853_vm0, %v5937_v60, %v5938_v20  ;;  %v6234_v14 = vsel %vm994_vm1, %v6232_v6, %v6233_v35  ;;  %v5906_v40 = vmax.f32 %v5831_v32, 0.0  ;;  %v6180_v58 = vmul.f32 %v10443_v38, %v6075_v36 }
 0xe4b   : > { %v10503_v59 = vadd.f32 %v6293_v2, %v6272_v50  ;;  %v6026_v49 = vrot.slane %v10499_v24, 7  ;;  %v6078_v21 = vrot.slane %v10499_v24, 1  ;;  %v10509_v15 = vmul.f32 %v10432_v7, %v10499_v24  ;;  %v5835_v17 = vpop.f32.mrb[116].mxu1 }
 0xe4c   : > { %v6256_v1 = vmul.f32 %v10460_v44, %v10499_v24  ;;  %v10514_v34 = vmul.f32 %v10471_v62, %v6234_v14  ;;  %v5940_v56 = vrot.slane %v5906_v40, 7  ;;  %v6235_v4 = vrot.slane %v5906_v40, 1  ;;  %v5837_v37 = vpop.f32.mrb[117].mxu1 }
 0xe4d   : > { %v6295_v41 = vmul.f32 %v10462_v55, %v5906_v40  ;;  %v5836_v8 = vadd.f32 %v10448_v3, %v5835_v17  ;;  %v6196_v5 = vadd.f32 %v6180_v58, %v6161_v31  ;;  %v6079_v19 = vsel %vm994_vm1, %v6074_v52, %v6078_v21 }
 0xe4e   : > { %v6273_v12 = vadd.f32 %v6256_v1, %v6195_v45  ;;  %v10520_v16 = vsel %vm853_vm0, %v5938_v20, %v5940_v56  ;;  %v6236_v54 = vsel %vm994_vm1, %v6233_v35, %v6235_v4  ;;  %v6117_v18 = vsel %vm853_vm0, 0.0, %v6079_v19 }
 0xe4f   : > { %v6028_v13 = vrot.slane %v10520_v16, 7  ;;  %v6080_v53 = vrot.slane %v10520_v16, 1  ;;  %v10528_v33 = vmul.f32 %v10432_v7, %v10520_v16  ;;  %v6257_v31 = vmul.f32 %v10460_v44, %v10520_v16  ;;  %v5840_v60 = vpop.f32.mrb[118].mxu1 }
 0xe50   : > { %v10532_v61 = vadd.f32 %v6294_v11, %v6273_v12  ;;  %v10535_v46 = vmul.f32 %v10471_v62, %v6236_v54  ;;  %v5907_v10 = vmax.f32 %v5836_v8, 0.0  ;;  %v5841_v63 = vadd.f32 %v10448_v3, %v5840_v60  ;;  %v5842_v47 = vpop.f32.mrb[119].mxu1 }
 0xe51   : > { %v6274_v6 = vadd.f32 %v6257_v31, %v6195_v45  ;;  %v6129_v26 = vmul.f32 %v10428_v22, %v6067_v30  ;;  %v6181_v52 = vmul.f32 %v10443_v38, %v6117_v18  ;;  %v6027_v28 = vsel %vm853_vm0, %v6025_v9, %v6026_v49 }
 0xe52   : > { %v5942_v2 = vrot.slane %v5907_v10, 7  ;;  %v6237_v51 = vrot.slane %v5907_v10, 1  ;;  %v6296_v20 = vmul.f32 %v10462_v55, %v5907_v10  ;;  %v5908_v35 = vmax.f32 %v5841_v63, 0.0 }
 0xe53   : > { %v10544_v32 = vadd.f32 %v6295_v41, %v6274_v6  ;;  %v6162_v48 = vadd.f32 %v6147_v29, %v6129_v26  ;;  %v5845_v50 = vpop.f32.mrb[120].mxu1  ;;  %v6081_v11 = vsel %vm994_vm1, %v6078_v21, %v6080_v53  ;;  %v6130_v45 = vmul.f32 %v10428_v22, %v6027_v28 }
 0xe54   : > { %v10549_v30 = vsel %vm853_vm0, %v5940_v56, %v5942_v2  ;;  %v6226_v36 = vsel %vm853_vm0, %v5942_v2, 0.0  ;;  %v6238_v9 = vsel %vm994_vm1, %v6235_v4, %v6237_v51  ;;  %v5944_v14 = vrot.slane %v5908_v35, 7  ;;  %v5847_v40 = vpop.f32.mrb[121].mxu1 }
 0xe55   : > { %v6030_v58 = vrot.slane %v10549_v30, 7  ;;  %v6082_v17 = vrot.slane %v10549_v30, 1  ;;  %v10557_v29 = vmul.f32 %v10432_v7, %v10549_v30  ;;  %v6258_v21 = vmul.f32 %v10460_v44, %v10549_v30 }
 0xe56   : > { %v10562_v1 = vmul.f32 %v10471_v62, %v6238_v9  ;;  %v5945_v56 = vsel %vm853_vm0, %v5942_v2, %v5944_v14  ;;  %v5980_v37 = vrot.slane %v5908_v35, 1  ;;  %v6197_v4 = vadd.f32 %v6181_v52, %v6162_v48 }
 0xe57   : > { %v6275_v41 = vadd.f32 %v6258_v21, %v6196_v5  ;;  %v10565_v8 = vrot.slane %v5945_v56, 7  ;;  %v10567_v19 = vrot.slane %v5945_v56, 1  ;;  %v10570_v12 = vmul.f32 %v10432_v7, %v5945_v56  ;;  %v5850_v54 = vpop.f32.mrb[122].mxu1 }
 0xe58   : > { %v6227_v18 = vsel %vm984_vm3, %v6226_v36, %v5944_v14  ;;  %v6239_v31 = vsel %vm994_vm1, %v6237_v51, %v5980_v37  ;;  %v6297_v60 = vmul.f32 %v10462_v55, %v5908_v35  ;;  %v5846_v10 = vadd.f32 %v10448_v3, %v5845_v50  ;;  %v5852_v63 = vpop.f32.mrb[123].mxu1 }
 0xe59   : > { %v10576_v47 = vadd.f32 %v6296_v20, %v6275_v41  ;;  %v6033_v5 = vsel %vm853_vm0, %v6030_v58, %v10565_v8  ;;  %v6259_v6 = vmul.f32 %v10460_v44, %v6227_v18  ;;  %v10582_v26 = vmul.f32 %v10471_v62, %v6239_v31 }
 0xe5a   : > { %v6068_v52 = vsel %vm984_vm3, %v6033_v5, 0.0  ;;  %v5909_v28 = vmax.f32 %v5846_v10, 0.0  ;;  %v6163_v2 = vadd.f32 %v10509_v15, %v6130_v45  ;;  %v6182_v51 = vmul.f32 %v10443_v38, %v6081_v11 }
 0xe5b   : > { %v6276_v35 = vadd.f32 %v6259_v6, %v6197_v4  ;;  %v5851_v48 = vadd.f32 %v10448_v3, %v5850_v54  ;;  %v6029_v20 = vsel %vm853_vm0, %v6026_v49, %v6028_v13  ;;  %v6083_v50 = vsel %vm994_vm1, %v6080_v53, %v6082_v17  ;;  %v5855_v30 = vpop.f32.mrb[124].mxu1 }
 0xe5c   : > { %v5946_v36 = vrot.slane %v5909_v28, 7  ;;  %v5981_v9 = vrot.slane %v5909_v28, 1  ;;  %v6198_v40 = vadd.f32 %v6182_v51, %v6163_v2  ;;  %v6298_v21 = vmul.f32 %v10462_v55, %v5909_v28  ;;  %v5857_v15 = vpop.f32.mrb[125].mxu1 }
 0xe5d   : > { %v10595_v45 = vadd.f32 %v6297_v60, %v6276_v35  ;;  %v5910_v11 = vmax.f32 %v5851_v48, 0.0  ;;  %v6131_v56 = vmul.f32 %v10428_v22, %v6029_v20  ;;  %v6183_v4 = vmul.f32 %v10443_v38, %v6083_v50 }
 0xe5e   : > { %v10600_v24 = vsel %vm853_vm0, %v5944_v14, %v5946_v36  ;;  %v10603_v49 = vsel %vm994_vm1, %v5980_v37, %v5981_v9  ;;  %v5856_v53 = vadd.f32 %v10448_v3, %v5855_v30  ;;  %v6031_v41 = vsel %vm853_vm0, %v6028_v13, %v6030_v58 }
 0xe5f   : > { %v11266_v54 = vrot.slane %v10600_v24, 7  ;;  %v6091_v18 = vrot.slane %v10600_v24, 1  ;;  %v10613_v31 = vmul.f32 %v10432_v7, %v10600_v24  ;;  %v6260_v14 = vmul.f32 %v10460_v44, %v10600_v24  ;;  %v5860_v60 = vpop.f32.mrb[126].mxu1 }
 0xe60   : > { %v5948_v37 = vrot.slane %v5910_v11, 7  ;;  %v5983_v10 = vrot.slane %v5910_v11, 1  ;;  %v6164_v63 = vadd.f32 %v10528_v33, %v6131_v56  ;;  %v6299_v16 = vmul.f32 %v10462_v55, %v5910_v11  ;;  %v5862_v5 = vpop.f32.mrb[127].mxu1 }
 0xe61   : > { %v6277_v13 = vadd.f32 %v6260_v14, %v6198_v40  ;;  %v5911_v58 = vmax.f32 %v5856_v53, 0.0  ;;  %v6085_v6 = vsel %vm994_vm1, %v6082_v17, %v10567_v19  ;;  %v6132_v28 = vmul.f32 %v10428_v22, %v6031_v41 }
 0xe62   : > { %v10623_v2 = vsel %vm853_vm0, %v5946_v36, %v5948_v37  ;;  %v10626_v51 = vsel %vm994_vm1, %v5981_v9, %v5983_v10  ;;  %v6199_v35 = vadd.f32 %v6183_v4, %v6164_v63  ;;  %v6184_v48 = vmul.f32 %v10443_v38, %v6085_v6 }
 0xe63   : > { %v10629_v33 = vadd.f32 %v6298_v21, %v6277_v13  ;;  %v11268_v50 = vrot.slane %v10623_v2, 1  ;;  %v10635_v17 = vmul.f32 %v10432_v7, %v10623_v2  ;;  %v5865_v30 = vpop.f32.mrb[128].mxu1  ;;  %v6261_v36 = vmul.f32 %v10460_v44, %v10623_v2 }
 0xe64   : > { %v5950_v40 = vrot.slane %v5911_v58, 7  ;;  %v5985_v15 = vrot.slane %v5911_v58, 1  ;;  %v5867_v11 = vpop.f32.mrb[129].mxu1  ;;  %v6165_v21 = vadd.f32 %v10557_v29, %v6132_v28  ;;  %v6300_v56 = vmul.f32 %v10462_v55, %v5911_v58 }
 0xe65   : > { %v5861_v4 = vadd.f32 %v10448_v3, %v5860_v60  ;;  %v6069_v53 = vsel %vm986_vm4, %v6068_v52, %v10565_v8  ;;  %v6278_v41 = vadd.f32 %v6261_v36, %v6199_v35  ;;  %v6092_v5 = vsel %vm994_vm1, %v10567_v19, %v6091_v18 }
 0xe66   : > { %v10646_v14 = vsel %vm853_vm0, %v5948_v37, %v5950_v40  ;;  %v10649_v63 = vsel %vm994_vm1, %v5983_v10, %v5985_v15  ;;  %v6200_v52 = vadd.f32 %v6184_v48, %v6165_v21  ;;  %v6118_v36 = vsel %vm853_vm0, %v10567_v19, 0.0 }
 0xe67   : > { %v11265_v29 = vrot.slane %v10646_v14, 7  ;;  %v10659_v60 = vmul.f32 %v10432_v7, %v10646_v14  ;;  %v5870_v58 = vpop.f32.mrb[130].mxu1  ;;  %v10661_v37 = vadd.f32 %v6299_v16, %v6278_v41  ;;  %v6262_v10 = vmul.f32 %v10460_v44, %v10646_v14 }
 0xe68   : > { %v5912_v28 = vmax.f32 %v5861_v4, 0.0  ;;  %v5872_v35 = vpop.f32.mrb[131].mxu1  ;;  %v6133_v11 = vmul.f32 %v10428_v22, %v6069_v53  ;;  %v5866_v9 = vadd.f32 %v10448_v3, %v5865_v30  ;;  %v6040_v16 = vsel %vm853_vm0, %v10565_v8, %v11266_v54 }
 0xe69   : > { %v6279_v48 = vadd.f32 %v6262_v10, %v6200_v52  ;;  %v6119_v13 = vsel %vm984_vm3, %v6118_v36, %v6092_v5  ;;  %v5871_v54 = vadd.f32 %v10448_v3, %v5870_v58  ;;  %v11302_v39 = vrot.slane %v10623_v2, 7 }
 0xe6a   : > { %v5952_v21 = vrot.slane %v5912_v28, 7  ;;  %v5987_v41 = vrot.slane %v5912_v28, 1  ;;  %v6166_v4 = vadd.f32 %v10570_v12, %v6133_v11  ;;  %v6185_v35 = vmul.f32 %v10443_v38, %v6119_v13 }
 0xe6b   : > { %v6301_v19 = vmul.f32 %v10462_v55, %v5912_v28  ;;  %v10678_v6 = vmax.f32 %v5866_v9, 0.0  ;;  %v5875_v53 = vpop.f32.mrb[132].mxu1  ;;  %v10680_v30 = vadd.f32 %v6300_v56, %v6279_v48  ;;  %v6134_v48 = vmul.f32 %v10428_v22, %v6040_v16 }
 0xe6c   : > { %v5953_v20 = vsel %vm853_vm0, %v5950_v40, %v5952_v21  ;;  %v10684_v8 = vsel %vm994_vm1, %v5985_v15, %v5987_v41  ;;  %v10687_v52 = vsel %vm853_vm0, %v5987_v41, 0.0  ;;  %v5877_v5 = vpop.f32.mrb[133].mxu1  ;;  %v6201_v9 = vadd.f32 %v6185_v35, %v6166_v4 }
 0xe6d   : > { %11301 = vst [vmem:[#allocation9_spill] sm:$0xff] %v10687_v52  ;;  %v10689_v10 = vrot.slane %v5953_v20, 7  ;;  %v10691_v12 = vrot.slane %v5953_v20, 1  ;;  %v10694_v13 = vmul.f32 %v10432_v7, %v5953_v20  ;;  %v6228_v56 = vsel %vm984_vm3, %v5953_v20, 0.0 }
 0xe6e   : > { %v5954_v40 = vrot.slane %v10678_v6, 7  ;;  %v5989_v15 = vrot.slane %v10678_v6, 1  ;;  %v6229_v11 = vsel %vm986_vm4, %v6228_v56, %v5952_v21  ;;  %v6094_v20 = vsel %vm994_vm1, %v6091_v18, %v11268_v50 }
 0xe6f   : > { %v10704_v36 = vsel %vm853_vm0, %v11265_v29, %v10689_v10  ;;  %v10713_v4 = vpop.f32.mrb[134].mxu1  ;;  %v6263_v35 = vmul.f32 %v10460_v44, %v6229_v11  ;;  %v6186_v56 = vmul.f32 %v10443_v38, %v6094_v20  ;;  %v6167_v16 = vadd.f32 %v10613_v31, %v6134_v48 }
 0xe70   : > { %v10717_v5 = vsel %vm853_vm0, %v5952_v21, %v5954_v40  ;;  %v10720_v28 = vsel %vm994_vm1, %v5987_v41, %v5989_v15  ;;  %v5882_v29 = vpop.f32.mrb[135].mxu1  ;;  %v6302_v41 = vmul.f32 %v10462_v55, %v10678_v6  ;;  %v11303_v50 = vrot.slane %v10600_v24, 7 }
 0xe71   : > { %v10727_v18 = vmul.f32 %v10432_v7, %v10717_v5  ;;  %v6280_v11 = vadd.f32 %v6263_v35, %v6201_v9  ;;  %v6264_v21 = vmul.f32 %v10460_v44, %v10717_v5  ;;  %v6202_v29 = vadd.f32 %v6186_v56, %v6167_v16 }
 0xe72   : > { %v6042_v27 = vsel %vm853_vm0, %v11303_v50, %v11302_v39  ;;  %v11304_v31 = vrot.slane %v10646_v14, 1  ;;  %v11305_v9 = vrot.slane %v10623_v2, 1  ;;  %v6348_v16 = vadd.f32 %v10514_v34, %v10503_v59 }
 0xe73   : > { %v10746_v35 = vpop.f32.mrb[136].mxu1  ;;  %v10748_v6 = vadd.f32 %v6301_v19, %v6280_v11  ;;  %v6135_v56 = vmul.f32 %v10428_v22, %v6042_v27  ;;  %v6281_v20 = vadd.f32 %v6264_v21, %v6202_v29  ;;  %v5914_v39 = vmax.f32 %v5871_v54, 0.0 }
 0xe74   : > { %v6096_v48 = vsel %vm994_vm1, %v11305_v9, %v11304_v31  ;;  %v5887_v24 = vpop.f32.mrb[137].mxu1  ;;  %v6365_v50 = vrot.slane %v10603_v49, 7  ;;  %v6415_v0 = vrot.slane %v10603_v49, 1  ;;  %v6416_v9 = vrot.slane %v10626_v51, 1 }
 0xe75   : > { %11306 = vst [vmem:[#allocation10_spill] sm:$0xff] %v10748_v6  ;;  %v6187_v58 = vmul.f32 %v10443_v38, %v6096_v48  ;;  %v6168_v31 = vadd.f32 %v10635_v17, %v6135_v56  ;;  %v6503_v19 = vmul.f32 %v10466_v23, %v10603_v49  ;;  %v5876_v27 = vadd.f32 %v10448_v3, %v5875_v53 }
 0xe76   : > { %v10761_v11 = vadd.f32 %v6302_v41, %v6281_v20  ;;  %v5956_v59 = vrot.slane %v5914_v39, 7  ;;  %v5991_v34 = vrot.slane %v5914_v39, 1  ;;  %v6303_v54 = vmul.f32 %v10462_v55, %v5914_v39 }
 0xe77   : > { %v10764_v21 = vpop.f32.mrb[138].mxu1  ;;  %v6203_v29 = vadd.f32 %v6187_v58, %v6168_v31  ;;  %v6408_v48 = vsel %vm853_vm0, 0.0, %v6365_v50  ;;  %v6417_v17 = vsel %vm994_vm1, %v6415_v0, %v6416_v9  ;;  %v10768_v56 = vmax.f32 %v5876_v27, 0.0 }
 0xe78   : > { %11307 = vst [vmem:[#allocation11_spill] sm:$0xff] %v10761_v11  ;;  %v5892_v24 = vpop.f32.mrb[139].mxu1  ;;  %v10771_v57 = vsel %vm853_vm0, %v5954_v40, %v5956_v59  ;;  %v10774_v53 = vsel %vm994_vm1, %v5989_v15, %v5991_v34  ;;  %v6467_v41 = vmul.f32 %v10464_v42, %v6408_v48  ;;  %v6538_v20 = vmul.f32 %v10476_v43, %v6417_v17 }
 0xe79   : > { %v10782_v0 = vmul.f32 %v10432_v7, %v10771_v57  ;;  %v6265_v31 = vmul.f32 %v10460_v44, %v10771_v57  ;;  %v5958_v15 = vrot.slane %v10768_v56, 7  ;;  %v5993_v48 = vrot.slane %v10768_v56, 1 }
 0xe7a   : > { %v6482_v27 = vadd.f32 %v6467_v41, %v6348_v16  ;;  %v11308_v39 = vrot.slane %v10646_v14, 7  ;;  %v11309_v58 = vrot.slane %v10623_v2, 7  ;;  %v11310_v11 = vrot.slane %v10646_v14, 1 }
 0xe7b   : > { %v10789_v24 = vpop.f32.mrb[140].mxu1  ;;  %v6282_v17 = vadd.f32 %v6265_v31, %v6203_v29  ;;  %v6304_v16 = vmul.f32 %v10462_v55, %v10768_v56  ;;  %v10803_v52 = vsel %vm853_vm0, %v5956_v59, %v5958_v15  ;;  %v10806_v29 = vsel %vm994_vm1, %v5991_v34, %v5993_v48 }
 0xe7c   : > { %v6044_v25 = vsel %vm853_vm0, %v11309_v58, %v11308_v39  ;;  %v6098_v6 = vsel %vm994_vm1, %v11310_v11, %v10691_v12  ;;  %v5897_v41 = vpop.f32.mrb[141].mxu1  ;;  %v6517_v40 = vadd.f32 %v6503_v19, %v6482_v27  ;;  %v6108_v14 = vrot.slane %v10803_v52, 1 }
 0xe7d   : > { %v6136_v2 = vmul.f32 %v10428_v22, %v6044_v25  ;;  %v10809_v31 = vadd.f32 %v6303_v54, %v6282_v17  ;;  %v10815_v11 = vmul.f32 %v10432_v7, %v10803_v52  ;;  %v6188_v59 = vmul.f32 %v10443_v38, %v6098_v6 }
 0xe7e   : > { %v6553_v56 = vadd.f32 %v6538_v20, %v6517_v40  ;;  %v6266_v34 = vmul.f32 %v10460_v44, %v10803_v52  ;;  %v6349_v54 = vadd.f32 %v10535_v46, %v10532_v61  ;;  %v11311_v27 = vrot.slane %v10626_v51, 7 }
 0xe7f   : > { %v6169_v19 = vadd.f32 %v10659_v60, %v6136_v2  ;;  %v10821_v58 = vpop.f32.mrb[142].mxu1  ;;  %v6418_v20 = vrot.slane %v10649_v63, 1  ;;  %v6504_v2 = vmul.f32 %v10466_v23, %v10626_v51  ;;  %v5881_v61 = vadd.f32 %v10448_v3, %v10713_v4 }
 0xe80   : > { %v6367_v17 = vsel %vm853_vm0, %v6365_v50, %v11311_v27  ;;  %v5902_v40 = vpop.f32.mrb[143].mxu1  ;;  %v6571_v60 = vsel %vm6570_vm15, %v6553_v56, 0.0  ;;  %v6070_v46 = vsel %vm986_vm4, %v10704_v36, 0.0  ;;  %v11312_v50 = vrot.slane %v10717_v5, 1 }
 0xe81   : > { %v6204_v6 = vadd.f32 %v6188_v59, %v6169_v19  ;;  %v6468_v41 = vmul.f32 %v10464_v42, %v6367_v17  ;;  %6572 = vadd.xlane.f32.xlu1 %v6571_v60  ;;  %v6419_v25 = vsel %vm994_vm1, %v6416_v9, %v6418_v20  ;;  %v6071_v17 = vsel %vm988_vm5, %v6070_v46, %v10689_v10 }
 0xe82   : > { %v6105_v56 = vsel %vm994_vm1, %v10691_v12, %v11312_v50  ;;  %v6539_v27 = vmul.f32 %v10476_v43, %v6419_v25  ;;  %v5916_v40 = vmax.f32 %v5881_v61, 0.0  ;;  %v6120_v9 = vsel %vm984_vm3, %v10691_v12, 0.0 }
 0xe83   : > { %v6283_v19 = vadd.f32 %v6266_v34, %v6204_v6  ;;  %v6483_v59 = vadd.f32 %v6468_v41, %v6349_v54  ;;  %v6137_v4 = vmul.f32 %v10428_v22, %v6071_v17  ;;  %v6350_v36 = vadd.f32 %v10562_v1, %v10544_v32 }
 0xe84   : > { %v6121_v34 = vsel %vm986_vm4, %v6120_v9, %v6105_v56  ;;  %v11313_v54 = vrot.slane %v10649_v63, 7  ;;  %v11314_v25 = vrot.slane %v10626_v51, 7  ;;  %v5960_v41 = vrot.slane %v5916_v40, 7 }
 0xe85   : > { %v10851_v60 = vadd.f32 %v6304_v16, %v6283_v19  ;;  %v6518_v39 = vadd.f32 %v6504_v2, %v6483_v59  ;;  %v5995_v61 = vrot.slane %v5916_v40, 1  ;;  %v6170_v12 = vadd.f32 %v10694_v13, %v6137_v4 }
 0xe86   : > { %v6369_v6 = vsel %vm853_vm0, %v11314_v25, %v11313_v54  ;;  %v6189_v46 = vmul.f32 %v10443_v38, %v6121_v34  ;;  %v6305_v32 = vmul.f32 %v10462_v55, %v5916_v40  ;;  %v6420_v1 = vrot.slane %v10684_v8, 1 }
 0xe87   : > { %v6554_v50 = vadd.f32 %v6539_v27, %v6518_v39  ;;  %v6469_v16 = vmul.f32 %v10464_v42, %v6369_v6  ;;  %v10865_v2 = vsel %vm853_vm0, %v5958_v15, %v5960_v41  ;;  %v10868_v56 = vsel %vm994_vm1, %v5993_v48, %v5995_v61 }
 0xe88   : > { %v6205_v19 = vadd.f32 %v6189_v46, %v6170_v12  ;;  %v10871_v59 = vsel %vm984_vm3, %v5995_v61, 0.0  ;;  %v6058_v39 = vrot.slane %v10865_v2, 7  ;;  %v6110_v27 = vrot.slane %v10865_v2, 1 }
 0xe89   : > { %v6574_v13 = vsel %vm6570_vm15, %v6554_v50, 0.0  ;;  %v10878_v17 = vmul.f32 %v10432_v7, %v10865_v2  ;;  %v6230_v15 = vsel %vm986_vm4, %v10865_v2, 0.0  ;;  %v6421_v40 = vsel %vm994_vm1, %v6418_v20, %v6420_v1 }
 0xe8a   : > { %6575 = vadd.xlane.f32.xlu0 %v6574_v13  ;;  %v6484_v9 = vadd.f32 %v6469_v16, %v6350_v36  ;;  %v6231_v4 = vsel %vm988_vm5, %v6230_v15, %v5960_v41  ;;  %v6505_v34 = vmul.f32 %v10466_v23, %v10649_v63  ;;  %v6540_v54 = vmul.f32 %v10476_v43, %v6421_v40 }
 0xe8b   : > { %v5886_v7 = vadd.f32 %v10448_v3, %v10746_v35  ;;  %v6267_v25 = vmul.f32 %v10460_v44, %v6231_v4  ;;  %v11315_v6 = vrot.slane %v10717_v5, 7  ;;  %v11316_v20 = vrot.slane %v10771_v57, 1 }
 0xe8c   : > { %v11317_v36 = vrot.slane %v10717_v5, 1  ;;  %v6351_v50 = vadd.f32 %v10582_v26, %v10576_v47  ;;  %v6519_v16 = vadd.f32 %v6505_v34, %v6484_v9  ;;  %v11318_v4 = vrot.slane %v10684_v8, 7 }
 0xe8d   : > { %v6053_v12 = vsel %vm853_vm0, %v10689_v10, %v11315_v6  ;;  %v5917_v13 = vmax.f32 %v5886_v7, 0.0  ;;  %v6284_v40 = vadd.f32 %v6267_v25, %v6205_v19  ;;  %v11319_v10 = vrot.slane %v10649_v63, 7 }
 0xe8e   : > { %v6107_v46 = vsel %vm994_vm1, %v11317_v36, %v11316_v20  ;;  %v6138_v35 = vmul.f32 %v10428_v22, %v6053_v12  ;;  %v6422_v48 = vrot.slane %v10720_v28, 1  ;;  %v6506_v20 = vmul.f32 %v10466_v23, %v10684_v8 }
 0xe8f   : > { %v6190_v15 = vmul.f32 %v10443_v38, %v6107_v46  ;;  %v6371_v6 = vsel %vm853_vm0, %v11319_v10, %v11318_v4  ;;  %v6555_v36 = vadd.f32 %v6540_v54, %v6519_v16  ;;  %v5997_v47 = vrot.slane %v5917_v13, 1 }
 0xe90   : > { %v6171_v26 = vadd.f32 %v10727_v18, %v6138_v35  ;;  %v6213_v9 = vrot.slane %v5917_v13, 7  ;;  %v10913_v34 = vadd.f32 %v6305_v32, %v6284_v40  ;;  %v6306_v19 = vmul.f32 %v10462_v55, %v5917_v13 }
 0xe91   : > { %v6423_v7 = vsel %vm994_vm1, %v6420_v1, %v6422_v48  ;;  %v6470_v25 = vmul.f32 %v10464_v42, %v6371_v6  ;;  %v6577_v12 = vsel %vm6570_vm15, %v6555_v36, 0.0  ;;  %v10920_v46 = vsel %vm994_vm1, %v5995_v61, %v5997_v47 }
 0xe92   : > { %v6206_v4 = vadd.f32 %v6190_v15, %v6171_v26  ;;  %v6214_v54 = vsel %vm853_vm0, %v5960_v41, %v6213_v9  ;;  %6578 = vadd.xlane.f32.xlu0 %v6577_v12  ;;  %v10925_v32 = vrot.slane %v10920_v46, 7  ;;  %v6541_v13 = vmul.f32 %v10476_v43, %v6423_v7 }
 0xe93   : > { %v6268_v18 = vmul.f32 %v10460_v44, %v6214_v54  ;;  %v6485_v16 = vadd.f32 %v6470_v25, %v6351_v50  ;;  %v5891_v1 = vadd.f32 %v10448_v3, %v10764_v21  ;;  %v11320_v35 = vrot.slane %v10771_v57, 7 }
 0xe94   : > { %v11321_v61 = vrot.slane %v10717_v5, 7  ;;  %v11322_v41 = vrot.slane %v10771_v57, 1  ;;  %v6246_v50 = vsel %vm853_vm0, 0.0, %v10603_v49  ;;  %v11323_v7 = vrot.slane %v10684_v8, 7 }
 0xe95   : > { %v6285_v10 = vadd.f32 %v6268_v18, %v6206_v4  ;;  %v6520_v6 = vadd.f32 %v6506_v20, %v6485_v16  ;;  %v5918_v26 = vmax.f32 %v5891_v1, 0.0  ;;  %v6335_v5 = vmul.f32 %v10471_v62, %v6246_v50 }
 0xe96   : > { %v6055_v15 = vsel %vm853_vm0, %v11321_v61, %v11320_v35  ;;  %v6109_v40 = vsel %vm994_vm1, %v11322_v41, %v6108_v14  ;;  %v6409_v25 = vsel %vm853_vm0, %v11323_v7, 0.0  ;;  %v6428_v12 = vrot.slane %v10774_v53, 1 }
 0xe97   : > { %v6139_v36 = vmul.f32 %v10428_v22, %v6055_v15  ;;  %v6191_v21 = vmul.f32 %v10443_v38, %v6109_v40  ;;  %v10949_v54 = vadd.f32 %v6306_v19, %v6285_v10  ;;  %v6556_v35 = vadd.f32 %v6541_v13, %v6520_v6 }
 0xe98   : > { %v11324_v20 = vrot.slane %v10720_v28, 7  ;;  %v5999_v18 = vrot.slane %v5918_v26, 1  ;;  %v6215_v16 = vrot.slane %v5918_v26, 7  ;;  %v6307_v1 = vmul.f32 %v10462_v55, %v5918_v26 }
 0xe99   : > { %v6172_v49 = vadd.f32 %v10782_v0, %v6139_v36  ;;  %v6352_v61 = vadd.f32 %v6335_v5, %v10595_v45  ;;  %v6580_v15 = vsel %vm6570_vm15, %v6556_v35, 0.0  ;;  %v6429_v40 = vsel %vm994_vm1, %v6422_v48, %v6428_v12 }
 0xe9a   : > { %v6410_v4 = vsel %vm984_vm3, %v6409_v25, %v11324_v20  ;;  %6581 = vadd.xlane.f32.xlu1 %v6580_v15  ;;  %v10961_v0 = vsel %vm994_vm1, %v5997_v47, %v5999_v18  ;;  %v6216_v13 = vsel %vm853_vm0, %v6213_v9, %v6215_v16  ;;  %v6457_v50 = vsel %vm853_vm0, 0.0, %v6429_v40 }
 0xe9b   : > { %v6207_v41 = vadd.f32 %v6191_v21, %v6172_v49  ;;  %v6471_v19 = vmul.f32 %v10464_v42, %v6410_v4  ;;  %v6507_v10 = vmul.f32 %v10466_v23, %v10720_v28  ;;  %v6269_v45 = vmul.f32 %v10460_v44, %v6216_v13 }
 0xe9c   : > { %v6392_v6 = vrot.slane %v10961_v0, 7  ;;  %v6542_v48 = vmul.f32 %v10476_v43, %v6457_v50  ;;  %v5896_v21 = vadd.f32 %v10448_v3, %v10789_v24  ;;  %v11325_v47 = vrot.slane %v10803_v52, 7 }
 0xe9d   : > { %v6486_v36 = vadd.f32 %v6471_v19, %v6352_v61  ;;  %v11326_v26 = vrot.slane %v10771_v57, 7  ;;  %v6111_v5 = vsel %vm994_vm1, %v6108_v14, %v6110_v27  ;;  %v6336_v7 = vmul.f32 %v10471_v62, %v10626_v51 }
 0xe9e   : > { %v6286_v25 = vadd.f32 %v6269_v45, %v6207_v41  ;;  %v6192_v24 = vmul.f32 %v10443_v38, %v6111_v5  ;;  %v5919_v20 = vmax.f32 %v5896_v21, 0.0  ;;  %v11327_v4 = vrot.slane %v10774_v53, 7 }
 0xe9f   : > { %v6057_v9 = vsel %vm853_vm0, %v11326_v26, %v11325_v47  ;;  %v6521_v35 = vadd.f32 %v6507_v10, %v6486_v36  ;;  %v6353_v57 = vadd.f32 %v6336_v7, %v10629_v33  ;;  %v11328_v61 = vrot.slane %v10720_v28, 7 }
 0xea0   : > { %v6140_v49 = vmul.f32 %v10428_v22, %v6057_v9  ;;  %v6430_v14 = vrot.slane %v10806_v29, 1  ;;  %v10993_v40 = vadd.f32 %v6307_v1, %v6286_v25  ;;  %v6001_v13 = vrot.slane %v5919_v20, 1 }
 0xea1   : > { %v6379_v15 = vsel %vm853_vm0, %v11328_v61, %v11327_v4  ;;  %v6557_v51 = vadd.f32 %v6542_v48, %v6521_v35  ;;  %v6217_v50 = vrot.slane %v5919_v20, 7  ;;  %v6308_v10 = vmul.f32 %v10462_v55, %v5919_v20 }
 0xea2   : > { %v6173_v41 = vadd.f32 %v10815_v11, %v6140_v49  ;;  %v6472_v19 = vmul.f32 %v10464_v42, %v6379_v15  ;;  %v6431_v33 = vsel %vm994_vm1, %v6428_v12, %v6430_v14  ;;  %v6508_v47 = vmul.f32 %v10466_v23, %v10774_v53 }
 0xea3   : > { %v6583_v45 = vsel %vm6570_vm15, %v6557_v51, 0.0  ;;  %v11003_v1 = vsel %vm994_vm1, %v5999_v18, %v6001_v13  ;;  %v6218_v11 = vsel %vm853_vm0, %v6215_v16, %v6217_v50  ;;  %v6543_v48 = vmul.f32 %v10476_v43, %v6431_v33 }
 0xea4   : > { %v6208_v36 = vadd.f32 %v6192_v24, %v6173_v41  ;;  %v6487_v21 = vadd.f32 %v6472_v19, %v6353_v57  ;;  %6584 = vadd.xlane.f32.xlu0 %v6583_v45  ;;  %v5901_v26 = vadd.f32 %v10448_v3, %v10821_v58  ;;  %v6270_v12 = vmul.f32 %v10460_v44, %v6218_v11 }
 0xea5   : > { %v6394_v9 = vrot.slane %v11003_v1, 7  ;;  %v11329_v7 = vrot.slane %v10803_v52, 7  ;;  %v6122_v16 = vsel %vm986_vm4, %v6110_v27, 0.0  ;;  %v6337_v3 = vmul.f32 %v10471_v62, %v10649_v63 }
 0xea6   : > { %v6522_v5 = vadd.f32 %v6508_v47, %v6487_v21  ;;  %v5920_v18 = vmax.f32 %v5901_v26, 0.0  ;;  %v6287_v58 = vadd.f32 %v6270_v12, %v6208_v36  ;;  %v6193_v24 = vmul.f32 %v10443_v38, %v6122_v16 }
 0xea7   : > { %v6059_v25 = vsel %vm853_vm0, %v11329_v7, %v6058_v39  ;;  %v11330_v20 = vrot.slane %v10806_v29, 7  ;;  %v11331_v52 = vmov %v11327_v4  ;;  %v6354_v61 = vadd.f32 %v6337_v3, %v10661_v37 }
 0xea8   : > { %v6141_v35 = vmul.f32 %v10428_v22, %v6059_v25  ;;  %v6558_v49 = vadd.f32 %v6543_v48, %v6522_v5  ;;  %v6003_v57 = vrot.slane %v5920_v18, 1  ;;  %v6219_v4 = vrot.slane %v5920_v18, 7  ;;  %v11334_v25 = vld [vmem:[#allocation9_spill] sm:$0xff] }
 0xea9   : > { %v6381_v39 = vsel %vm853_vm0, %v11331_v52, %v11330_v20  ;;  %v6309_v27 = vmul.f32 %v10462_v55, %v5920_v18  ;;  %v11030_v22 = vadd.f32 %v6308_v10, %v6287_v58  ;;  %v6432_v38 = vrot.slane %v10868_v56, 1 }
 0xeaa   : > { %v6174_v2 = vadd.f32 %v10878_v17, %v6141_v35  ;;  %v6586_v63 = vsel %vm6570_vm15, %v6558_v49, 0.0  ;;  %v11036_v15 = vsel %vm994_vm1, %v6001_v13, %v6003_v57  ;;  %v11039_v51 = vsel %vm986_vm4, %v6003_v57, 0.0 }
 0xeab   : > { %6587 = vadd.xlane.f32.xlu1 %v6586_v63  ;;  %v6220_v17 = vsel %vm853_vm0, %v6217_v50, %v6219_v4  ;;  %v6347_v19 = vmul.f32 %v10471_v62, %v11039_v51  ;;  %v6396_v10 = vrot.slane %v11036_v15, 7  ;;  %v11047_v37 = vrot.slane %v11039_v51, 7 }
 0xeac   : > { %v6209_v41 = vadd.f32 %v6193_v24, %v6174_v2  ;;  %v6271_v55 = vmul.f32 %v10460_v44, %v6220_v17  ;;  %v6433_v33 = vsel %vm994_vm1, %v6430_v14, %v6432_v38  ;;  %v6473_v13 = vmul.f32 %v10464_v42, %v6381_v39  ;;  %v11336_v2 = vld [vmem:[#allocation10_spill] sm:$0xff] }
 0xead   : > { %v6509_v45 = vmul.f32 %v10466_v23, %v10806_v29  ;;  %v6338_v50 = vmul.f32 %v10471_v62, %v10684_v8  ;;  %v6544_v44 = vmul.f32 %v10476_v43, %v6433_v33  ;;  %v11332_v21 = vrot.slane %v10868_v56, 7 }
 0xeae   : > { %v6288_v36 = vadd.f32 %v6271_v55, %v6209_v41  ;;  %v11333_v47 = vmov %v11330_v20  ;;  %v6434_v48 = vrot.slane %v10920_v46, 1  ;;  %v6488_v14 = vadd.f32 %v6473_v13, %v6354_v61 }
 0xeaf   : > { %v6383_v11 = vsel %vm853_vm0, %v11333_v47, %v11332_v21  ;;  %v6355_v26 = vadd.f32 %v6338_v50, %v10680_v30  ;;  %v6510_v5 = vmul.f32 %v10466_v23, %v10868_v56  ;;  %v6248_v18 = vsel %vm984_vm3, %v11334_v25, %v10720_v28  ;;  %v11337_v50 = vld [vmem:[#allocation11_spill] sm:$0xff] }
 0xeb0   : > { %v6474_v12 = vmul.f32 %v10464_v42, %v6383_v11  ;;  %v6326_v8 = vadd.f32 %v6309_v27, %v6288_v36  ;;  %v6435_v7 = vsel %vm994_vm1, %v6432_v38, %v6434_v48  ;;  %v11335_v16 = vmov %v11332_v21 }
 0xeb1   : > { %v6385_v35 = vsel %vm853_vm0, %v11335_v16, %v10925_v32  ;;  %v6523_v3 = vadd.f32 %v6509_v45, %v6488_v14  ;;  %v6545_v30 = vmul.f32 %v10476_v43, %v6435_v7  ;;  %v6339_v49 = vmul.f32 %v10471_v62, %v6248_v18 }
 0xeb2   : > { %v6489_v58 = vadd.f32 %v6474_v12, %v6355_v26  ;;  %v11076_v24 = vadd.f32 %v6347_v19, %v6326_v8  ;;  %v6411_v20 = vsel %vm984_vm3, %v6385_v35, 0.0  ;;  %v6441_v52 = vrot.slane %v10961_v0, 1 }
 0xeb3   : > { %v6458_v39 = vsel %vm853_vm0, %v6434_v48, 0.0  ;;  %v6559_v28 = vadd.f32 %v6544_v44, %v6523_v3  ;;  %v6356_v4 = vadd.f32 %v6339_v49, %v11336_v2  ;;  %v6412_v27 = vsel %vm986_vm4, %v6411_v20, %v10925_v32  ;;  %v11338_v3 = vld [vmem:[#allocation6_spill] sm:$0xff] }
 0xeb4   : > { %v6524_v57 = vadd.f32 %v6510_v5, %v6489_v58  ;;  %v6442_v63 = vsel %vm994_vm1, %v6434_v48, %v6441_v52  ;;  %v6475_v61 = vmul.f32 %v10464_v42, %v6412_v27  ;;  %v6511_v38 = vmul.f32 %v10466_v23, %v10920_v46 }
 0xeb5   : > { %v6340_v41 = vmul.f32 %v10471_v62, %v10774_v53  ;;  %v6589_v17 = vsel %vm6570_vm15, %v6559_v28, 0.0  ;;  %v6459_v19 = vsel %vm984_vm3, %v6458_v39, %v6442_v63  ;;  %v6393_v33 = vsel %vm853_vm0, %v10925_v32, %v6392_v6  ;;  %v11339_v39 = vld [vmem:[#allocation7_spill] sm:$0xff] }
 0xeb6   : > { %v6560_v55 = vadd.f32 %v6545_v30, %v6524_v57  ;;  %6590 = vadd.xlane.f32.xlu0 %v6589_v17  ;;  %v6490_v13 = vadd.f32 %v6475_v61, %v6356_v4  ;;  %v6546_v45 = vmul.f32 %v10476_v43, %v6459_v19  ;;  %v6443_v44 = vrot.slane %v11003_v1, 1  ;;  %v11341_v19 = vld [vmem:[#allocation5_spill] sm:$0xff] }
 0xeb7   : > { %v6357_v36 = vadd.f32 %v6340_v41, %v11337_v50  ;;  %v6476_v21 = vmul.f32 %v10464_v42, %v6393_v33  ;;  %v6512_v47 = vmul.f32 %v10466_v23, %v10961_v0  ;;  %v6345_v11 = vmul.f32 %v10471_v62, %v11003_v1 }
 0xeb8   : > { %v6592_v53 = vsel %vm6570_vm15, %v6560_v55, 0.0  ;;  %v6525_v32 = vadd.f32 %v6511_v38, %v6490_v13  ;;  %v6444_v48 = vsel %vm994_vm1, %v6441_v52, %v6443_v44  ;;  %v6341_v14 = vmul.f32 %v10471_v62, %v10806_v29 }
 0xeb9   : > { %6593 = vadd.xlane.f32.xlu1 %v6592_v53  ;;  %v6395_v26 = vsel %vm853_vm0, %v6392_v6, %v6394_v9  ;;  %v6491_v12 = vadd.f32 %v6476_v21, %v6357_v36  ;;  %v6547_v5 = vmul.f32 %v10476_v43, %v6444_v48  ;;  %v6362_v8 = vadd.f32 %v6345_v11, %v10993_v40 }
 0xeba   : > { %v6445_v7 = vrot.slane %v11036_v15, 1  ;;  %v6561_v25 = vadd.f32 %v6546_v45, %v6525_v32  ;;  %v6358_v18 = vadd.f32 %v6341_v14, %v10809_v31  ;;  %v6477_v16 = vmul.f32 %v10464_v42, %v6395_v26  ;;  %v8213_v45 = vld [vmem:[%s11254_s24 + $0x8] ss:$0 sm:$0xff]  ;;  %v11342_v32 = vld [vmem:[#allocation4_spill] sm:$0xff] }
 0xebb   : > { %v6513_v29 = vmul.f32 %v10466_v23, %v11003_v1  ;;  %v6526_v35 = vadd.f32 %v6512_v47, %v6491_v12  ;;  %v6496_v58 = vadd.f32 %v11338_v3, %v6362_v8  ;;  %v6342_v30 = vmul.f32 %v10471_v62, %v10868_v56  ;;  %v11340_v1 = vld [vmem:[#allocation8_spill] sm:$0xff] }
 0xebc   : > { %v6446_v6 = vsel %vm994_vm1, %v6443_v44, %v6445_v7  ;;  %v6595_v40 = vsel %vm6570_vm15, %v6561_v25, 0.0  ;;  %v6492_v49 = vadd.f32 %v6477_v16, %v6358_v18  ;;  %v6397_v31 = vsel %vm853_vm0, %v6394_v9, %v6396_v10 }
 0xebd   : > { %v6548_v20 = vmul.f32 %v10476_v43, %v6446_v6  ;;  %6596 = vadd.xlane.f32.xlu0 %v6595_v40  ;;  %v6562_v52 = vadd.f32 %v6547_v5, %v6526_v35  ;;  %v6531_v28 = vadd.f32 %v11339_v39, %v6496_v58  ;;  %v6359_v57 = vadd.f32 %v6342_v30, %v10851_v60 }
 0xebe   : > { %v6447_v2 = vrot.slane %v11039_v51, 1  ;;  %v6527_v56 = vadd.f32 %v6513_v29, %v6492_v49  ;;  %v6478_v4 = vmul.f32 %v10464_v42, %v6397_v31  ;;  %v6250_v43 = vsel %vm986_vm4, %v10871_v59, %v10920_v46 }
 0xebf   : > { %v6598_v27 = vsel %vm6570_vm15, %v6562_v52, 0.0  ;;  %v6567_v63 = vadd.f32 %v11340_v1, %v6531_v28  ;;  %v6343_v61 = vmul.f32 %v10471_v62, %v6250_v43  ;;  %v6514_v41 = vmul.f32 %v10466_v23, %v11036_v15 }
 0xec0   : > { %v6448_v9 = vsel %vm994_vm1, %v6445_v7, %v6447_v2  ;;  %6599 = vadd.xlane.f32.xlu1 %v6598_v27  ;;  %v6563_v38 = vadd.f32 %v6548_v20, %v6527_v56  ;;  %v6493_v60 = vadd.f32 %v6478_v4, %v6359_v57  ;;  %v6399_v17 = vsel %vm853_vm0, %v6396_v10, %v11047_v37 }
 0xec1   : > { %v6613_v59 = vsel %vm6570_vm15, %v6567_v63, 0.0  ;;  %v6360_v46 = vadd.f32 %v6343_v61, %v10913_v34  ;;  %v6413_v55 = vsel %vm986_vm4, %v6399_v17, 0.0  ;;  %v6454_v33 = vsel %vm994_vm1, %v6447_v2, %v11341_v19 }
 0xec2   : > { %6614 = vadd.xlane.f32.xlu0 %v6613_v59  ;;  %v6528_v13 = vadd.f32 %v6514_v41, %v6493_v60  ;;  %v6549_v50 = vmul.f32 %v8213_v45, %v6448_v9  ;;  %v6414_v36 = vsel %vm988_vm5, %v6413_v55, %v11047_v37  ;;  %v6460_v10 = vsel %vm984_vm3, %v6447_v2, 0.0 }
 0xec3   : > { %v6601_v44 = vsel %vm6570_vm15, %v6563_v38, 0.0  ;;  %v6461_v34 = vsel %vm986_vm4, %v6460_v10, %v6454_v33  ;;  %v6479_v53 = vmul.f32 %v10464_v42, %v6414_v36  ;;  %v6344_v21 = vmul.f32 %v10471_v62, %v10961_v0 }
 0xec4   : > { %v6564_v47 = vadd.f32 %v6549_v50, %v6528_v13  ;;  %v6515_v11 = vmul.f32 %v10466_v23, %v11039_v51  ;;  %v6405_v48 = vsel %vm853_vm0, %v11047_v37, %v11342_v32  ;;  %v6462_v14 = vsel %vm986_vm4, %v11341_v19, 0.0 }
 0xec5   : > { %v6494_v26 = vadd.f32 %v6479_v53, %v6360_v46  ;;  %v6361_v12 = vadd.f32 %v6344_v21, %v10949_v54  ;;  %v6480_v5 = vmul.f32 %v10464_v42, %v6405_v48  ;;  %v6498_v8 = vadd.f32 %v11338_v3, %v11076_v24 }
 0xec6   : > { %6602 = vadd.xlane.f32.xlu0 %v6601_v44  ;;  %v6604_v0 = vsel %vm6570_vm15, %v6564_v47, 0.0  ;;  %v6550_v7 = vmul.f32 %v8213_v45, %v6461_v34  ;;  %v6346_v23 = vmul.f32 %v10471_v62, %v11036_v15  ;;  %v6552_v18 = vmul.f32 %v8213_v45, %v6462_v14 }
 0xec7   : > { %6605 = vadd.xlane.f32.xlu1 %v6604_v0  ;;  %v6529_v51 = vadd.f32 %v6515_v11, %v6494_v26  ;;  %v6495_v37 = vadd.f32 %v6480_v5, %v6361_v12  ;;  %v6533_v25 = vadd.f32 %v11339_v39, %v6498_v8  ;;  %vm6619_vm0 = vcmask 27648  }
 0xec8   : > { %v6363_v54 = vadd.f32 %v6346_v23, %v11030_v22  ;;  %vm6646_vm1 = vcmask 7168  }
 0xec9   : > { %v6565_v16 = vadd.f32 %v6550_v7, %v6529_v51  ;;  %v6530_v42 = vadd.f32 %v11339_v39, %v6495_v37  ;;  %v6569_v58 = vadd.f32 %v6552_v18, %v6533_v25 }
 0xeca   : > { %v6497_v24 = vadd.f32 %v11338_v3, %v6363_v54  ;;  %v6894_v3 = vld [vmem:[#allocation3] ss:$0 sm:$0xff] }
 0xecb   : > { %v6607_v29 = vsel %vm6570_vm15, %v6565_v16, 0.0  ;;  %v6566_v35 = vadd.f32 %v11340_v1, %v6530_v42  ;;  %v6620_v6 = vsel %vm6619_vm0, %v6569_v58, 0.0 }
 0xecc   : > { %6608 = vadd.xlane.f32.xlu0 %v6607_v29  ;;  %v6532_v62 = vadd.f32 %v11339_v39, %v6497_v24 }
 0xecd   : > { %v6610_v15 = vsel %vm6570_vm15, %v6566_v35, 0.0 }
 0xece   : > { %6611 = vadd.xlane.f32.xlu1 %v6610_v15  ;;  %v6568_v22 = vadd.f32 %v11340_v1, %v6532_v62 }
 0xed0   : > { %6621 = vadd.xlane.f32.xlu0 %v6620_v6  ;;  %v6616_v30 = vsel %vm6570_vm15, %v6568_v22, 0.0 }
 0xed2   : > { %6617 = vadd.xlane.f32.xlu1 %v6616_v30 }
 0xf0e   : > { %v6573_v40 = vpop.xlane.xlu1 %6572 }
 0xf0f   : > { %v6629_v49 = vadd.f32 %v6894_v3, %v6573_v40 }
 0xf11   : > { %6647 = vst.msk [vmem:[%s11192_s30] sm:$0xff] %vm6646_vm1, %v6629_v49 }
 0xf17   : > { %v6576_v20 = vpop.xlane.xlu0 %6575 }
 0xf18   : > { %v6630_v31 = vadd.f32 %v6894_v3, %v6576_v20 }
 0xf1a   : > { %6648 = vst.msk [vmem:[%s11192_s30 + $0x8] sm:$0xff] %vm6646_vm1, %v6630_v31 }
 0xf1f   : > { %v6579_v52 = vpop.xlane.xlu0 %6578 }
 0xf20   : > { %v6631_v39 = vadd.f32 %v6894_v3, %v6579_v52 }
 0xf22   : > { %6649 = vst.msk [vmem:[%s11192_s30 + $0x10] sm:$0xff] %vm6646_vm1, %v6631_v39 }
 0xf27   : > { %v6582_v28 = vpop.xlane.xlu1 %6581 }
 0xf28   : > { %v6632_v57 = vadd.f32 %v6894_v3, %v6582_v28 }
 0xf2a   : > { %6650 = vst.msk [vmem:[%s11192_s30 + $0x18] sm:$0xff] %vm6646_vm1, %v6632_v57 }
 0xf31   : > { %v6585_v2 = vpop.xlane.xlu0 %6584 }
 0xf32   : > { %v6633_v56 = vadd.f32 %v6894_v3, %v6585_v2 }
 0xf34   : > { %6651 = vst.msk [vmem:[%s11192_s30 + $0x20] sm:$0xff] %vm6646_vm1, %v6633_v56 }
 0xf38   : > { %v6588_v4 = vpop.xlane.xlu1 %6587 }
 0xf39   : > { %v6634_v43 = vadd.f32 %v6894_v3, %v6588_v4 }
 0xf3b   : > { %6652 = vst.msk [vmem:[%s11192_s30 + $0x28] sm:$0xff] %vm6646_vm1, %v6634_v43 }
 0xf43   : > { %v6591_v27 = vpop.xlane.xlu0 %6590 }
 0xf44   : > { %v6635_v1 = vadd.f32 %v6894_v3, %v6591_v27 }
 0xf46   : > { %v6594_v63 = vpop.xlane.xlu1 %6593  ;;  %6653 = vst.msk [vmem:[%s11192_s30 + $0x30] sm:$0xff] %vm6646_vm1, %v6635_v1 }
 0xf47   : > { %v6636_v9 = vadd.f32 %v6894_v3, %v6594_v63 }
 0xf49   : > { %6654 = vst.msk [vmem:[%s11192_s30 + $0x38] sm:$0xff] %vm6646_vm1, %v6636_v9 }
 0xf4a   : > { %v6597_v61 = vpop.xlane.xlu0 %6596 }
 0xf4b   : > { %v6637_v38 = vadd.f32 %v6894_v3, %v6597_v61 }
 0xf4d   : > { %6655 = vst.msk [vmem:[%s11192_s30 + $0x40] sm:$0xff] %vm6646_vm1, %v6637_v38  ;;  %v6600_v60 = vpop.xlane.xlu1 %6599 }
 0xf4e   : > { %v6638_v41 = vadd.f32 %v6894_v3, %v6600_v60 }
 0xf4f   : > { %v6615_v17 = vpop.xlane.xlu0 %6614 }
 0xf50   : > { %6656 = vst.msk [vmem:[%s11192_s30 + $0x48] sm:$0xff] %vm6646_vm1, %v6638_v41  ;;  %v6643_v59 = vadd.f32 %v6894_v3, %v6615_v17 }
 0xf52   : > { %6661 = vst.msk [vmem:[%s11192_s30 + $0x70] sm:$0xff] %vm6646_vm1, %v6643_v59 }
 0xf53   : > { %v6603_v46 = vpop.xlane.xlu0 %6602 }
 0xf54   : > { %v6639_v55 = vadd.f32 %v6894_v3, %v6603_v46  ;;  %v6606_v19 = vpop.xlane.xlu1 %6605 }
 0xf55   : > { %v6640_v33 = vadd.f32 %v6894_v3, %v6606_v19 }
 0xf56   : > { %6657 = vst.msk [vmem:[%s11192_s30 + $0x50] sm:$0xff] %vm6646_vm1, %v6639_v55 }
 0xf57   : > { %6658 = vst.msk [vmem:[%s11192_s30 + $0x58] sm:$0xff] %vm6646_vm1, %v6640_v33 }
 0xf59   : > { %v6609_v13 = vpop.xlane.xlu0 %6608 }
 0xf5a   : > { %v6641_v45 = vadd.f32 %v6894_v3, %v6609_v13 }
 0xf5b   : > { %v6612_v50 = vpop.xlane.xlu1 %6611 }
 0xf5c   : > { %6659 = vst.msk [vmem:[%s11192_s30 + $0x60] sm:$0xff] %vm6646_vm1, %v6641_v45  ;;  %v6642_v36 = vadd.f32 %v6894_v3, %v6612_v50 }
 0xf5d   : > { %v6622_v10 = vpop.xlane.xlu0 %6621 }
 0xf5e   : > { %6660 = vst.msk [vmem:[%s11192_s30 + $0x68] sm:$0xff] %vm6646_vm1, %v6642_v36  ;;  %v6645_v44 = vadd.f32 %v6894_v3, %v6622_v10 }
 0xf5f   : > { %v6618_v34 = vpop.xlane.xlu1 %6617 }
 0xf60   : > { %6664 = vst.msk [vmem:[%s11192_s30 + $0x80] sm:$0xf] %vm6663_vm2, %v6645_v44  ;;  %v6644_v53 = vadd.f32 %v6894_v3, %v6618_v34 }
 0xf62   : > { %6662 = vst.msk [vmem:[%s11192_s30 + $0x78] sm:$0xff] %vm6646_vm1, %v6644_v53 }
 0xf63 PF: > { %s38_s7 = sadd.s32 1, %s8220_s7  }
 0xf64   : > { %p35_p4 = scmp.ge.s32.totalorder %s38_s7, 4  }
 0xf66   :  { %37 = sbr.rel (!%p35_p4) target bundleno = 12 (0xc), region = 200 }

</bundles_post_ra>
